<compile_context>
chip_gen: v7x
topology: tpu7x:2x2x1
jax: 0.10.0
libtpu: 0.0.40
codegen_flags: <defaults>
</compile_context>

<pallas_src>
import math

import jax
import jax.numpy as jnp
from jax.experimental import pallas as pl
from jax.experimental.pallas import tpu as pltpu

GROWTH = 32
BN_SIZE = 4
BLOCK_CONFIG = (6, 12, 24, 16)          # DenseNet-121
NUM_INIT_FEATURES = 64
NUM_CLASSES = 14
BN_EPS = 1e-5
LANE = 128
STEM_K = 256                            # 7*7*3 = 147 padded to a lane multiple
VMEM_LIMIT = 32 * 1024 * 1024           # safe on v5e / v6e / v7x
ROW_BUDGET = 4 * 1024 * 1024            # single-copy row-block budget per step


def _round_up(v, m):
    return (v + m - 1) // m * m


# --------------------------- Pallas kernels ---------------------------

def _stem_conv_kernel(x_ref, w_ref, s_ref, b_ref, o_ref):
    # im2col 7x7/2 conv (bf16 MXU) fused with BN0 affine + ReLU.
    h = jnp.dot(x_ref[...], w_ref[...], preferred_element_type=jnp.float32)
    o_ref[...] = jnp.maximum(h * s_ref[...] + b_ref[...], 0.0)


def _max_taps_kernel(*refs):
    # elementwise max over pooling taps (VPU only; no sublane reductions).
    o_ref = refs[-1]
    m = refs[0][...]
    for r in refs[1:-1]:
        m = jnp.maximum(m, r[...])
    o_ref[...] = m


def _bottleneck_kernel(x_ref, s1_ref, b1_ref, w1_ref, s2_ref, b2_ref, o_ref):
    # fused BN1 + ReLU + 1x1 conv (bf16 MXU) + BN2 + ReLU; emits bf16 activations.
    a = jnp.maximum(x_ref[...] * s1_ref[...] + b1_ref[...], 0.0)
    h = jnp.dot(a.astype(jnp.bfloat16), w1_ref[...],
                preferred_element_type=jnp.float32)
    o_ref[...] = jnp.maximum(h * s2_ref[...] + b2_ref[...], 0.0).astype(o_ref.dtype)


def _matmul_kernel(x_ref, w_ref, o_ref):
    # 3x3 conv as im2col matmul (bf16 operands, f32 accumulation).
    o_ref[...] = jnp.dot(x_ref[...], w_ref[...],
                         preferred_element_type=jnp.float32)


def _transition_kernel(x00_ref, x01_ref, x10_ref, x11_ref, s_ref, b_ref, w_ref,
                       o_ref):
    # fused BN + ReLU + 2x2/2 average pool + 1x1 conv (pool commutes with the
    # linear 1x1 conv, so the matmul runs on the pooled activations: 4x fewer MACs).
    s = s_ref[...]
    b = b_ref[...]
    a = jnp.maximum(x00_ref[...] * s + b, 0.0)
    a = a + jnp.maximum(x01_ref[...] * s + b, 0.0)
    a = a + jnp.maximum(x10_ref[...] * s + b, 0.0)
    a = a + jnp.maximum(x11_ref[...] * s + b, 0.0)
    a = a * 0.25
    o_ref[...] = jnp.dot(a.astype(jnp.bfloat16), w_ref[...],
                         preferred_element_type=jnp.float32)


def _head_kernel(x_ref, s_ref, b_ref, w_ref, cb_ref, o_ref):
    # fused BN5 + ReLU + global average pool + classifier matmul (+ bias).
    a = jnp.maximum(x_ref[...] * s_ref[...] + b_ref[...], 0.0)   # (N, HW, C)
    hw = a.shape[1]
    pooled = a[:, 0, :]
    for k in range(1, hw):
        pooled = pooled + a[:, k, :]
    pooled = pooled * (1.0 / hw)
    o_ref[...] = jnp.dot(pooled.astype(jnp.bfloat16), w_ref[...],
                         preferred_element_type=jnp.float32) + cb_ref[...]


# --------------------------- row-tiled launcher ---------------------------

def _choose_bm(m, bytes_per_row):
    bm = ROW_BUDGET // max(bytes_per_row, 1)
    bm = max(16, min(512, (bm // 16) * 16))
    if m <= bm:
        bm = _round_up(m, 16)
    return bm


def _row_call(kernel, args, row_flags, out_cols, out_dtype):
    """pallas_call with a 1-D grid over rows (axis 0 of the row-tiled operands).

    Row-tiled operands are blocked (bm, ...) and pipelined; the rest (weights,
    scale, bias) are whole resident blocks.  Rows are zero-padded up to a
    multiple of the row tile and sliced back afterwards.
    """
    m = None
    bytes_per_row = out_cols * jnp.dtype(out_dtype).itemsize
    for a, tiled in zip(args, row_flags):
        if tiled:
            m = a.shape[0]
            bytes_per_row += math.prod(a.shape[1:]) * a.dtype.itemsize
    bm = _choose_bm(m, bytes_per_row)
    mp = _round_up(m, bm)

    operands, in_specs = [], []
    for a, tiled in zip(args, row_flags):
        if tiled:
            if mp != m:
                a = jnp.pad(a, ((0, mp - m),) + ((0, 0),) * (a.ndim - 1))
            nd = a.ndim
            in_specs.append(pl.BlockSpec(
                (bm,) + a.shape[1:],
                lambda i, _nd=nd: (i,) + (0,) * (_nd - 1)))
        else:
            nd = a.ndim
            in_specs.append(pl.BlockSpec(a.shape, lambda i, _nd=nd: (0,) * _nd))
        operands.append(a)

    out = pl.pallas_call(
        kernel,
        grid=(mp // bm,),
        in_specs=in_specs,
        out_specs=pl.BlockSpec((bm, out_cols), lambda i: (i, 0)),
        out_shape=jax.ShapeDtypeStruct((mp, out_cols), out_dtype),
        compiler_params=pltpu.CompilerParams(
            dimension_semantics=("parallel",),
            vmem_limit_bytes=VMEM_LIMIT),
    )(*operands)
    return out[:m] if mp != m else out


def _head_call(x, s, b, w, cb):
    n = x.shape[0]
    out_cols = w.shape[1]
    return pl.pallas_call(
        _head_kernel,
        grid=(1,),
        in_specs=[pl.BlockSpec(x.shape, lambda i: (0, 0, 0)),
                  pl.BlockSpec(s.shape, lambda i: (0, 0, 0)),
                  pl.BlockSpec(b.shape, lambda i: (0, 0, 0)),
                  pl.BlockSpec(w.shape, lambda i: (0, 0)),
                  pl.BlockSpec(cb.shape, lambda i: (0, 0))],
        out_specs=pl.BlockSpec((n, out_cols), lambda i: (0, 0)),
        out_shape=jax.ShapeDtypeStruct((n, out_cols), jnp.float32),
        compiler_params=pltpu.CompilerParams(
            dimension_semantics=("arbitrary",),
            vmem_limit_bytes=VMEM_LIMIT),
    )(x, s, b, w, cb)


# --------------------------- glue: im2col / pooling taps ---------------------------

def extract_patches(x, kh, kw, stride, pad):
    """x: (N, H, W, C) -> (N, Ho, Wo, kh*kw, C); tap-major, channel-minor."""
    N, H, W, C = x.shape
    xp = jnp.pad(x, ((0, 0), (pad, pad), (pad, pad), (0, 0)))
    Ho = (H + 2 * pad - kh) // stride + 1
    Wo = (W + 2 * pad - kw) // stride + 1
    taps = []
    for i in range(kh):
        for j in range(kw):
            taps.append(xp[:, i:i + stride * Ho:stride,
                           j:j + stride * Wo:stride, :])
    return jnp.stack(taps, axis=3)


def pool_taps(x, kh, kw, stride, pad, pad_value):
    """Return kh*kw pooling taps as a list of (N, Ho, Wo, C) arrays."""
    N, H, W, C = x.shape
    xp = jnp.pad(x, ((0, 0), (pad, pad), (pad, pad), (0, 0)),
                 constant_values=pad_value)
    Ho = (H + 2 * pad - kh) // stride + 1
    Wo = (W + 2 * pad - kw) // stride + 1
    taps = []
    for i in range(kh):
        for j in range(kw):
            taps.append(xp[:, i:i + stride * Ho:stride,
                           j:j + stride * Wo:stride, :])
    return taps


# --------------------------- deterministic synthetic parameters ---------------------------

def _bn_params(key, c):
    k1, k2, k3, k4 = jax.random.split(key, 4)
    gamma = 1.0 + 0.1 * jax.random.normal(k1, (c,), jnp.float32)
    beta = 0.1 * jax.random.normal(k2, (c,), jnp.float32)
    mean = 0.1 * jax.random.normal(k3, (c,), jnp.float32)
    var = jax.random.uniform(k4, (c,), jnp.float32, 0.5, 1.5)
    scale = gamma / jnp.sqrt(var + BN_EPS)
    bias = beta - mean * scale
    return scale, bias


def _conv_w(key, kh, kw, cin, cout):
    fan_in = kh * kw * cin
    return jax.random.normal(key, (fan_in, cout), jnp.float32) / math.sqrt(fan_in)


def build_params(key):
    n_keys = 4 * sum(BLOCK_CONFIG) + 2 * len(BLOCK_CONFIG) + 16
    keys = iter(jax.random.split(key, n_keys))
    p = {}
    # stem conv (K padded 147->256, Cout padded 64->128; all pads are zeros)
    w0 = _conv_w(next(keys), 7, 7, 3, NUM_INIT_FEATURES)
    p["conv0_w"] = jnp.pad(
        w0, ((0, STEM_K - w0.shape[0]),
             (0, LANE - NUM_INIT_FEATURES))).astype(jnp.bfloat16)
    s0, b0 = _bn_params(next(keys), NUM_INIT_FEATURES)
    p["norm0"] = (jnp.pad(s0, (0, LANE - NUM_INIT_FEATURES)).reshape(1, -1),
                  jnp.pad(b0, (0, LANE - NUM_INIT_FEATURES)).reshape(1, -1))
    c = NUM_INIT_FEATURES
    blocks, transitions = [], []
    for bi, n_layers in enumerate(BLOCK_CONFIG):
        c_blk = _round_up(c + n_layers * GROWTH, LANE)   # per-block buffer width
        layers = []
        for _ in range(n_layers):
            s1, b1 = _bn_params(next(keys), c)
            w1 = _conv_w(next(keys), 1, 1, c, BN_SIZE * GROWTH)
            s2, b2 = _bn_params(next(keys), BN_SIZE * GROWTH)
            w2 = _conv_w(next(keys), 3, 3, BN_SIZE * GROWTH, GROWTH)
            layers.append({
                "s1": jnp.pad(s1, (0, c_blk - c)).reshape(1, -1),
                "b1": jnp.pad(b1, (0, c_blk - c)).reshape(1, -1),
                "w1": jnp.pad(w1, ((0, c_blk - c), (0, 0))).astype(jnp.bfloat16),
                "s2": s2.reshape(1, -1),
                "b2": b2.reshape(1, -1),
                "w2": jnp.pad(w2, ((0, 0), (0, LANE - GROWTH))).astype(jnp.bfloat16),
            })
            c += GROWTH
        blocks.append(layers)
        if bi != len(BLOCK_CONFIG) - 1:
            st, bt = _bn_params(next(keys), c)
            wt = _conv_w(next(keys), 1, 1, c, c // 2)
            transitions.append({"s": st.reshape(1, -1), "b": bt.reshape(1, -1),
                                "w": wt.astype(jnp.bfloat16)})
            c //= 2
    p["blocks"] = blocks
    p["transitions"] = transitions
    s5, b5 = _bn_params(next(keys), c)                   # c == 1024
    p["norm5"] = (s5.reshape(1, 1, -1), b5.reshape(1, 1, -1))
    wc = _conv_w(next(keys), 1, 1, c, NUM_CLASSES)
    p["cls_w"] = jnp.pad(wc, ((0, 0), (0, LANE - NUM_CLASSES))).astype(jnp.bfloat16)
    bc = 0.01 * jax.random.normal(next(keys), (NUM_CLASSES,), jnp.float32)
    p["cls_b"] = jnp.pad(bc, (0, LANE - NUM_CLASSES)).reshape(1, -1)
    return p


# --------------------------- DenseNet-121 forward ---------------------------

def densenet_forward(params, x):
    # x: NCHW float32 (PyTorch convention)
    N = x.shape[0]
    xh = jnp.transpose(x, (0, 2, 3, 1)).astype(jnp.float32)          # -> NHWC

    # ---- stem: conv7x7/2 pad3 + BN0 + ReLU (fused), then maxpool3x3/2 pad1 ----
    p0 = extract_patches(xh, 7, 7, 2, 3)                              # (N,Ho,Wo,49,3)
    H, W = p0.shape[1], p0.shape[2]
    M = N * H * W
    x0 = p0.reshape(M, 49 * 3)
    x0 = jnp.pad(x0, ((0, 0), (0, STEM_K - 49 * 3))).astype(jnp.bfloat16)
    s0, b0 = params["norm0"]
    c0 = _row_call(_stem_conv_kernel, [x0, params["conv0_w"], s0, b0],
                   [True, False, False, False], LANE, jnp.float32)    # (M,128)

    taps = pool_taps(c0.reshape(N, H, W, LANE), 3, 3, 2, 1,
                     pad_value=float(jnp.finfo(jnp.float32).min))
    H, W = taps[0].shape[1], taps[0].shape[2]
    M = N * H * W
    taps = [t.reshape(M, LANE) for t in taps]
    feat = _row_call(_max_taps_kernel, taps, [True] * len(taps),
                     LANE, jnp.float32)                               # (M,128)

    c_in = NUM_INIT_FEATURES          # 64 real channels; cols 64..127 are zero
    buf = feat
    for bi, n_layers in enumerate(BLOCK_CONFIG):
        c_blk = _round_up(c_in + n_layers * GROWTH, LANE)
        # 128-aligned per-block channel buffer; new features written in place.
        buf = jnp.pad(feat, ((0, 0), (0, c_blk - feat.shape[1])))
        for li in range(n_layers):
            lp = params["blocks"][bi][li]
            act = _row_call(
                _bottleneck_kernel,
                [buf, lp["s1"], lp["b1"], lp["w1"], lp["s2"], lp["b2"]],
                [True, False, False, False, False, False],
                BN_SIZE * GROWTH, jnp.bfloat16)                       # (M,128) bf16
            # TODO(synk): replace HBM im2col with halo-blocked in-kernel taps.
            patches = extract_patches(act.reshape(N, H, W, BN_SIZE * GROWTH),
                                      3, 3, 1, 1).reshape(M, 9 * BN_SIZE * GROWTH)
            new = _row_call(_matmul_kernel, [patches, lp["w2"]],
                            [True, False], LANE, jnp.float32)         # (M,128)
            buf = jax.lax.dynamic_update_slice(buf, new[:, :GROWTH], (0, c_in))
            c_in += GROWTH
        if bi != len(BLOCK_CONFIG) - 1:
            tp = params["transitions"][bi]
            xs = buf.reshape(N, H, W, c_in)          # c_in == c_blk here
            Ho, Wo = H // 2, W // 2
            t00 = xs[:, 0:2 * Ho:2, 0:2 * Wo:2, :].reshape(N * Ho * Wo, c_in)
            t01 = xs[:, 0:2 * Ho:2, 1:2 * Wo:2, :].reshape(N * Ho * Wo, c_in)
            t10 = xs[:, 1:2 * Ho:2, 0:2 * Wo:2, :].reshape(N * Ho * Wo, c_in)
            t11 = xs[:, 1:2 * Ho:2, 1:2 * Wo:2, :].reshape(N * Ho * Wo, c_in)
            feat = _row_call(_transition_kernel,
                             [t00, t01, t10, t11, tp["s"], tp["b"], tp["w"]],
                             [True, True, True, True, False, False, False],
                             c_in // 2, jnp.float32)
            c_in //= 2
            H, W = Ho, Wo
            M = N * H * W

    # ---- head: BN5 + ReLU + global average pool + Linear(1024 -> 14), fused ----
    s5, b5 = params["norm5"]
    logits = _head_call(buf.reshape(N, H * W, c_in), s5, b5,
                        params["cls_w"], params["cls_b"])
    return logits[:, :NUM_CLASSES]


if __name__ == "__main__":
    # small shapes consistent with the module: batch=2, 3-channel image, 32x32
    x = jax.random.normal(jax.random.PRNGKey(0), (2, 3, 32, 32), jnp.float32)
    params = build_params(jax.random.PRNGKey(42))

    fwd = jax.jit(densenet_forward)
    logits = fwd(params, x)
    jax.block_until_ready(logits)

    assert logits.shape == (2, NUM_CLASSES), logits.shape
    assert logits.dtype == jnp.float32, logits.dtype
    print("KERNEL_OK")
</pallas_src>

<mosaic_0001>
module attributes {stable_mosaic.version = 11 : i64} {
  func.func @_stem_conv_kernel(%arg0: i32, %arg1: memref<512x256xbf16, #tpu.memory_space<vmem>>, %arg2: memref<256x128xbf16, #tpu.memory_space<vmem>>, %arg3: memref<1x128xf32, #tpu.memory_space<vmem>>, %arg4: memref<1x128xf32, #tpu.memory_space<vmem>>, %arg5: memref<512x128xf32, #tpu.memory_space<vmem>>) attributes {dimension_semantics = [#tpu.dimension_semantics<parallel>], iteration_bounds = array<i64: 1>, scalar_prefetch = 0 : i64, scratch_operands = 0 : i64, tpu.core_type = #tpu.core_type<tc>, window_params = [{transform_indices = @transform_0, window_bounds = array<i64: 512, 256>}, {pipeline_mode = #tpu.pipeline_mode<synchronous>, transform_indices = @transform_1, window_bounds = array<i64: 256, 128>}, {pipeline_mode = #tpu.pipeline_mode<synchronous>, transform_indices = @transform_2, window_bounds = array<i64: 1, 128>}, {pipeline_mode = #tpu.pipeline_mode<synchronous>, transform_indices = @transform_3, window_bounds = array<i64: 1, 128>}, {transform_indices = @transform_4, window_bounds = array<i64: 512, 128>}]} {
    %c0 = arith.constant 0 : index
    %c0_0 = arith.constant 0 : index
    %0 = vector.load %arg1[%c0, %c0_0] : memref<512x256xbf16, #tpu.memory_space<vmem>>, vector<512x256xbf16>
    %c0_1 = arith.constant 0 : index
    %c0_2 = arith.constant 0 : index
    %1 = vector.load %arg2[%c0_1, %c0_2] : memref<256x128xbf16, #tpu.memory_space<vmem>>, vector<256x128xbf16>
    %cst = arith.constant dense<0.000000e+00> : vector<512x128xf32>
    %2 = tpu.matmul %0, %1, %cst {dimension_numbers = #tpu.dot_dimension_numbers<[1], [0], [0], [1], [0, 0, 1, 1], [], []>} : vector<512x256xbf16>, vector<256x128xbf16>, vector<512x128xf32> -> vector<512x128xf32>
    %c0_3 = arith.constant 0 : index
    %c0_4 = arith.constant 0 : index
    %3 = vector.load %arg3[%c0_3, %c0_4] : memref<1x128xf32, #tpu.memory_space<vmem>>, vector<1x128xf32>
    %4 = vector.broadcast %3 : vector<1x128xf32> to vector<512x128xf32>
    %5 = arith.mulf %2, %4 : vector<512x128xf32>
    %c0_5 = arith.constant 0 : index
    %c0_6 = arith.constant 0 : index
    %6 = vector.load %arg4[%c0_5, %c0_6] : memref<1x128xf32, #tpu.memory_space<vmem>>, vector<1x128xf32>
    %7 = vector.broadcast %6 : vector<1x128xf32> to vector<512x128xf32>
    %8 = arith.addf %5, %7 : vector<512x128xf32>
    %cst_7 = arith.constant 0.000000e+00 : f32
    %9 = vector.broadcast %cst_7 : f32 to vector<512x128xf32>
    %10 = arith.maximumf %8, %9 : vector<512x128xf32>
    %c0_8 = arith.constant 0 : index
    %c0_9 = arith.constant 0 : index
    %11 = vector.load %arg5[%c0_8, %c0_9] : memref<512x128xf32, #tpu.memory_space<vmem>>, vector<512x128xf32>
    tpu.vector_store %arg5[%c0_8, %c0_9], %10 {strides = array<i32>} : memref<512x128xf32, #tpu.memory_space<vmem>>, vector<512x128xf32>,
    return
  }
  func.func @transform_0(%arg0: i32) -> (i32, i32) {
    %c0_i32 = arith.constant 0 : i32
    %c0_i32_0 = arith.constant 0 : i32
    return %arg0, %c0_i32 : i32, i32
  }
  func.func @transform_1(%arg0: i32) -> (i32, i32) {
    %c0_i32 = arith.constant 0 : i32
    %c0_i32_0 = arith.constant 0 : i32
    %c0_i32_1 = arith.constant 0 : i32
    return %c0_i32, %c0_i32_0 : i32, i32
  }
  func.func @transform_2(%arg0: i32) -> (i32, i32) {
    %c0_i32 = arith.constant 0 : i32
    %c0_i32_0 = arith.constant 0 : i32
    %c0_i32_1 = arith.constant 0 : i32
    return %c0_i32, %c0_i32_0 : i32, i32
  }
  func.func @transform_3(%arg0: i32) -> (i32, i32) {
    %c0_i32 = arith.constant 0 : i32
    %c0_i32_0 = arith.constant 0 : i32
    %c0_i32_1 = arith.constant 0 : i32
    return %c0_i32, %c0_i32_0 : i32, i32
  }
  func.func @transform_4(%arg0: i32) -> (i32, i32) {
    %c0_i32 = arith.constant 0 : i32
    %c0_i32_0 = arith.constant 0 : i32
    return %arg0, %c0_i32 : i32, i32
  }
}

module attributes {stable_mosaic.version = 11 : i64} {
  func.func @_max_taps_kernel(%arg0: i32, %arg1: memref<128x128xf32, #tpu.memory_space<vmem>>, %arg2: memref<128x128xf32, #tpu.memory_space<vmem>>, %arg3: memref<128x128xf32, #tpu.memory_space<vmem>>, %arg4: memref<128x128xf32, #tpu.memory_space<vmem>>, %arg5: memref<128x128xf32, #tpu.memory_space<vmem>>, %arg6: memref<128x128xf32, #tpu.memory_space<vmem>>, %arg7: memref<128x128xf32, #tpu.memory_space<vmem>>, %arg8: memref<128x128xf32, #tpu.memory_space<vmem>>, %arg9: memref<128x128xf32, #tpu.memory_space<vmem>>, %arg10: memref<128x128xf32, #tpu.memory_space<vmem>>) attributes {dimension_semantics = [#tpu.dimension_semantics<parallel>], iteration_bounds = array<i64: 1>, scalar_prefetch = 0 : i64, scratch_operands = 0 : i64, tpu.core_type = #tpu.core_type<tc>, window_params = [{transform_indices = @transform_0, window_bounds = array<i64: 128, 128>}, {transform_indices = @transform_1, window_bounds = array<i64: 128, 128>}, {transform_indices = @transform_2, window_bounds = array<i64: 128, 128>}, {transform_indices = @transform_3, window_bounds = array<i64: 128, 128>}, {transform_indices = @transform_4, window_bounds = array<i64: 128, 128>}, {transform_indices = @transform_5, window_bounds = array<i64: 128, 128>}, {transform_indices = @transform_6, window_bounds = array<i64: 128, 128>}, {transform_indices = @transform_7, window_bounds = array<i64: 128, 128>}, {transform_indices = @transform_8, window_bounds = array<i64: 128, 128>}, {transform_indices = @transform_9, window_bounds = array<i64: 128, 128>}]} {
    %c0 = arith.constant 0 : index
    %c0_0 = arith.constant 0 : index
    %0 = vector.load %arg1[%c0, %c0_0] : memref<128x128xf32, #tpu.memory_space<vmem>>, vector<128x128xf32>
    %c0_1 = arith.constant 0 : index
    %c0_2 = arith.constant 0 : index
    %1 = vector.load %arg2[%c0_1, %c0_2] : memref<128x128xf32, #tpu.memory_space<vmem>>, vector<128x128xf32>
    %2 = arith.maximumf %0, %1 : vector<128x128xf32>
    %c0_3 = arith.constant 0 : index
    %c0_4 = arith.constant 0 : index
    %3 = vector.load %arg3[%c0_3, %c0_4] : memref<128x128xf32, #tpu.memory_space<vmem>>, vector<128x128xf32>
    %4 = arith.maximumf %2, %3 : vector<128x128xf32>
    %c0_5 = arith.constant 0 : index
    %c0_6 = arith.constant 0 : index
    %5 = vector.load %arg4[%c0_5, %c0_6] : memref<128x128xf32, #tpu.memory_space<vmem>>, vector<128x128xf32>
    %6 = arith.maximumf %4, %5 : vector<128x128xf32>
    %c0_7 = arith.constant 0 : index
    %c0_8 = arith.constant 0 : index
    %7 = vector.load %arg5[%c0_7, %c0_8] : memref<128x128xf32, #tpu.memory_space<vmem>>, vector<128x128xf32>
    %8 = arith.maximumf %6, %7 : vector<128x128xf32>
    %c0_9 = arith.constant 0 : index
    %c0_10 = arith.constant 0 : index
    %9 = vector.load %arg6[%c0_9, %c0_10] : memref<128x128xf32, #tpu.memory_space<vmem>>, vector<128x128xf32>
    %10 = arith.maximumf %8, %9 : vector<128x128xf32>
    %c0_11 = arith.constant 0 : index
    %c0_12 = arith.constant 0 : index
    %11 = vector.load %arg7[%c0_11, %c0_12] : memref<128x128xf32, #tpu.memory_space<vmem>>, vector<128x128xf32>
    %12 = arith.maximumf %10, %11 : vector<128x128xf32>
    %c0_13 = arith.constant 0 : index
    %c0_14 = arith.constant 0 : index
    %13 = vector.load %arg8[%c0_13, %c0_14] : memref<128x128xf32, #tpu.memory_space<vmem>>, vector<128x128xf32>
    %14 = arith.maximumf %12, %13 : vector<128x128xf32>
    %c0_15 = arith.constant 0 : index
    %c0_16 = arith.constant 0 : index
    %15 = vector.load %arg9[%c0_15, %c0_16] : memref<128x128xf32, #tpu.memory_space<vmem>>, vector<128x128xf32>
    %16 = arith.maximumf %14, %15 : vector<128x128xf32>
    %c0_17 = arith.constant 0 : index
    %c0_18 = arith.constant 0 : index
    %17 = vector.load %arg10[%c0_17, %c0_18] : memref<128x128xf32, #tpu.memory_space<vmem>>, vector<128x128xf32>
    tpu.vector_store %arg10[%c0_17, %c0_18], %16 {strides = array<i32>} : memref<128x128xf32, #tpu.memory_space<vmem>>, vector<128x128xf32>,
    return
  }
  func.func @transform_0(%arg0: i32) -> (i32, i32) {
    %c0_i32 = arith.constant 0 : i32
    %c0_i32_0 = arith.constant 0 : i32
    return %arg0, %c0_i32 : i32, i32
  }
  func.func @transform_1(%arg0: i32) -> (i32, i32) {
    %c0_i32 = arith.constant 0 : i32
    %c0_i32_0 = arith.constant 0 : i32
    return %arg0, %c0_i32 : i32, i32
  }
  func.func @transform_2(%arg0: i32) -> (i32, i32) {
    %c0_i32 = arith.constant 0 : i32
    %c0_i32_0 = arith.constant 0 : i32
    return %arg0, %c0_i32 : i32, i32
  }
  func.func @transform_3(%arg0: i32) -> (i32, i32) {
    %c0_i32 = arith.constant 0 : i32
    %c0_i32_0 = arith.constant 0 : i32
    return %arg0, %c0_i32 : i32, i32
  }
  func.func @transform_4(%arg0: i32) -> (i32, i32) {
    %c0_i32 = arith.constant 0 : i32
    %c0_i32_0 = arith.constant 0 : i32
    return %arg0, %c0_i32 : i32, i32
  }
  func.func @transform_5(%arg0: i32) -> (i32, i32) {
    %c0_i32 = arith.constant 0 : i32
    %c0_i32_0 = arith.constant 0 : i32
    return %arg0, %c0_i32 : i32, i32
  }
  func.func @transform_6(%arg0: i32) -> (i32, i32) {
    %c0_i32 = arith.constant 0 : i32
    %c0_i32_0 = arith.constant 0 : i32
    return %arg0, %c0_i32 : i32, i32
  }
  func.func @transform_7(%arg0: i32) -> (i32, i32) {
    %c0_i32 = arith.constant 0 : i32
    %c0_i32_0 = arith.constant 0 : i32
    return %arg0, %c0_i32 : i32, i32
  }
  func.func @transform_8(%arg0: i32) -> (i32, i32) {
    %c0_i32 = arith.constant 0 : i32
    %c0_i32_0 = arith.constant 0 : i32
    return %arg0, %c0_i32 : i32, i32
  }
  func.func @transform_9(%arg0: i32) -> (i32, i32) {
    %c0_i32 = arith.constant 0 : i32
    %c0_i32_0 = arith.constant 0 : i32
    return %arg0, %c0_i32 : i32, i32
  }
}

module attributes {stable_mosaic.version = 11 : i64} {
  func.func @_bottleneck_kernel(%arg0: i32, %arg1: memref<128x256xf32, #tpu.memory_space<vmem>>, %arg2: memref<1x256xf32, #tpu.memory_space<vmem>>, %arg3: memref<1x256xf32, #tpu.memory_space<vmem>>, %arg4: memref<256x128xbf16, #tpu.memory_space<vmem>>, %arg5: memref<1x128xf32, #tpu.memory_space<vmem>>, %arg6: memref<1x128xf32, #tpu.memory_space<vmem>>, %arg7: memref<128x128xbf16, #tpu.memory_space<vmem>>) attributes {dimension_semantics = [#tpu.dimension_semantics<parallel>], iteration_bounds = array<i64: 1>, scalar_prefetch = 0 : i64, scratch_operands = 0 : i64, tpu.core_type = #tpu.core_type<tc>, window_params = [{transform_indices = @transform_0, window_bounds = array<i64: 128, 256>}, {pipeline_mode = #tpu.pipeline_mode<synchronous>, transform_indices = @transform_1, window_bounds = array<i64: 1, 256>}, {pipeline_mode = #tpu.pipeline_mode<synchronous>, transform_indices = @transform_2, window_bounds = array<i64: 1, 256>}, {pipeline_mode = #tpu.pipeline_mode<synchronous>, transform_indices = @transform_3, window_bounds = array<i64: 256, 128>}, {pipeline_mode = #tpu.pipeline_mode<synchronous>, transform_indices = @transform_4, window_bounds = array<i64: 1, 128>}, {pipeline_mode = #tpu.pipeline_mode<synchronous>, transform_indices = @transform_5, window_bounds = array<i64: 1, 128>}, {transform_indices = @transform_6, window_bounds = array<i64: 128, 128>}]} {
    %c0 = arith.constant 0 : index
    %c0_0 = arith.constant 0 : index
    %0 = vector.load %arg1[%c0, %c0_0] : memref<128x256xf32, #tpu.memory_space<vmem>>, vector<128x256xf32>
    %c0_1 = arith.constant 0 : index
    %c0_2 = arith.constant 0 : index
    %1 = vector.load %arg2[%c0_1, %c0_2] : memref<1x256xf32, #tpu.memory_space<vmem>>, vector<1x256xf32>
    %2 = vector.broadcast %1 : vector<1x256xf32> to vector<128x256xf32>
    %3 = arith.mulf %0, %2 : vector<128x256xf32>
    %c0_3 = arith.constant 0 : index
    %c0_4 = arith.constant 0 : index
    %4 = vector.load %arg3[%c0_3, %c0_4] : memref<1x256xf32, #tpu.memory_space<vmem>>, vector<1x256xf32>
    %5 = vector.broadcast %4 : vector<1x256xf32> to vector<128x256xf32>
    %6 = arith.addf %3, %5 : vector<128x256xf32>
    %cst = arith.constant 0.000000e+00 : f32
    %7 = vector.broadcast %cst : f32 to vector<128x256xf32>
    %8 = arith.maximumf %6, %7 : vector<128x256xf32>
    %9 = arith.truncf %8 : vector<128x256xf32> to vector<128x256xbf16>
    %c0_5 = arith.constant 0 : index
    %c0_6 = arith.constant 0 : index
    %10 = vector.load %arg4[%c0_5, %c0_6] : memref<256x128xbf16, #tpu.memory_space<vmem>>, vector<256x128xbf16>
    %cst_7 = arith.constant dense<0.000000e+00> : vector<128x128xf32>
    %11 = tpu.matmul %9, %10, %cst_7 {dimension_numbers = #tpu.dot_dimension_numbers<[1], [0], [0], [1], [0, 0, 1, 1], [], []>} : vector<128x256xbf16>, vector<256x128xbf16>, vector<128x128xf32> -> vector<128x128xf32>
    %c0_8 = arith.constant 0 : index
    %c0_9 = arith.constant 0 : index
    %12 = vector.load %arg5[%c0_8, %c0_9] : memref<1x128xf32, #tpu.memory_space<vmem>>, vector<1x128xf32>
    %13 = vector.broadcast %12 : vector<1x128xf32> to vector<128x128xf32>
    %14 = arith.mulf %11, %13 : vector<128x128xf32>
    %c0_10 = arith.constant 0 : index
    %c0_11 = arith.constant 0 : index
    %15 = vector.load %arg6[%c0_10, %c0_11] : memref<1x128xf32, #tpu.memory_space<vmem>>, vector<1x128xf32>
    %16 = vector.broadcast %15 : vector<1x128xf32> to vector<128x128xf32>
    %17 = arith.addf %14, %16 : vector<128x128xf32>
    %cst_12 = arith.constant 0.000000e+00 : f32
    %18 = vector.broadcast %cst_12 : f32 to vector<128x128xf32>
    %19 = arith.maximumf %17, %18 : vector<128x128xf32>
    %20 = arith.truncf %19 : vector<128x128xf32> to vector<128x128xbf16>
    %c0_13 = arith.constant 0 : index
    %c0_14 = arith.constant 0 : index
    %21 = vector.load %arg7[%c0_13, %c0_14] : memref<128x128xbf16, #tpu.memory_space<vmem>>, vector<128x128xbf16>
    tpu.vector_store %arg7[%c0_13, %c0_14], %20 {strides = array<i32>} : memref<128x128xbf16, #tpu.memory_space<vmem>>, vector<128x128xbf16>,
    return
  }
  func.func @transform_0(%arg0: i32) -> (i32, i32) {
    %c0_i32 = arith.constant 0 : i32
    %c0_i32_0 = arith.constant 0 : i32
    return %arg0, %c0_i32 : i32, i32
  }
  func.func @transform_1(%arg0: i32) -> (i32, i32) {
    %c0_i32 = arith.constant 0 : i32
    %c0_i32_0 = arith.constant 0 : i32
    %c0_i32_1 = arith.constant 0 : i32
    return %c0_i32, %c0_i32_0 : i32, i32
  }
  func.func @transform_2(%arg0: i32) -> (i32, i32) {
    %c0_i32 = arith.constant 0 : i32
    %c0_i32_0 = arith.constant 0 : i32
    %c0_i32_1 = arith.constant 0 : i32
    return %c0_i32, %c0_i32_0 : i32, i32
  }
  func.func @transform_3(%arg0: i32) -> (i32, i32) {
    %c0_i32 = arith.constant 0 : i32
    %c0_i32_0 = arith.constant 0 : i32
    %c0_i32_1 = arith.constant 0 : i32
    return %c0_i32, %c0_i32_0 : i32, i32
  }
  func.func @transform_4(%arg0: i32) -> (i32, i32) {
    %c0_i32 = arith.constant 0 : i32
    %c0_i32_0 = arith.constant 0 : i32
    %c0_i32_1 = arith.constant 0 : i32
    return %c0_i32, %c0_i32_0 : i32, i32
  }
  func.func @transform_5(%arg0: i32) -> (i32, i32) {
    %c0_i32 = arith.constant 0 : i32
    %c0_i32_0 = arith.constant 0 : i32
    %c0_i32_1 = arith.constant 0 : i32
    return %c0_i32, %c0_i32_0 : i32, i32
  }
  func.func @transform_6(%arg0: i32) -> (i32, i32) {
    %c0_i32 = arith.constant 0 : i32
    %c0_i32_0 = arith.constant 0 : i32
    return %arg0, %c0_i32 : i32, i32
  }
}

module attributes {stable_mosaic.version = 11 : i64} {
  func.func @_matmul_kernel(%arg0: i32, %arg1: memref<128x1152xbf16, #tpu.memory_space<vmem>>, %arg2: memref<1152x128xbf16, #tpu.memory_space<vmem>>, %arg3: memref<128x128xf32, #tpu.memory_space<vmem>>) attributes {dimension_semantics = [#tpu.dimension_semantics<parallel>], iteration_bounds = array<i64: 1>, scalar_prefetch = 0 : i64, scratch_operands = 0 : i64, tpu.core_type = #tpu.core_type<tc>, window_params = [{transform_indices = @transform_0, window_bounds = array<i64: 128, 1152>}, {pipeline_mode = #tpu.pipeline_mode<synchronous>, transform_indices = @transform_1, window_bounds = array<i64: 1152, 128>}, {transform_indices = @transform_2, window_bounds = array<i64: 128, 128>}]} {
    %c0 = arith.constant 0 : index
    %c0_0 = arith.constant 0 : index
    %0 = vector.load %arg1[%c0, %c0_0] : memref<128x1152xbf16, #tpu.memory_space<vmem>>, vector<128x1152xbf16>
    %c0_1 = arith.constant 0 : index
    %c0_2 = arith.constant 0 : index
    %1 = vector.load %arg2[%c0_1, %c0_2] : memref<1152x128xbf16, #tpu.memory_space<vmem>>, vector<1152x128xbf16>
    %cst = arith.constant dense<0.000000e+00> : vector<128x128xf32>
    %2 = tpu.matmul %0, %1, %cst {dimension_numbers = #tpu.dot_dimension_numbers<[1], [0], [0], [1], [0, 0, 1, 1], [], []>} : vector<128x1152xbf16>, vector<1152x128xbf16>, vector<128x128xf32> -> vector<128x128xf32>
    %c0_3 = arith.constant 0 : index
    %c0_4 = arith.constant 0 : index
    %3 = vector.load %arg3[%c0_3, %c0_4] : memref<128x128xf32, #tpu.memory_space<vmem>>, vector<128x128xf32>
    tpu.vector_store %arg3[%c0_3, %c0_4], %2 {strides = array<i32>} : memref<128x128xf32, #tpu.memory_space<vmem>>, vector<128x128xf32>,
    return
  }
  func.func @transform_0(%arg0: i32) -> (i32, i32) {
    %c0_i32 = arith.constant 0 : i32
    %c0_i32_0 = arith.constant 0 : i32
    return %arg0, %c0_i32 : i32, i32
  }
  func.func @transform_1(%arg0: i32) -> (i32, i32) {
    %c0_i32 = arith.constant 0 : i32
    %c0_i32_0 = arith.constant 0 : i32
    %c0_i32_1 = arith.constant 0 : i32
    return %c0_i32, %c0_i32_0 : i32, i32
  }
  func.func @transform_2(%arg0: i32) -> (i32, i32) {
    %c0_i32 = arith.constant 0 : i32
    %c0_i32_0 = arith.constant 0 : i32
    return %arg0, %c0_i32 : i32, i32
  }
}

module attributes {stable_mosaic.version = 11 : i64} {
  func.func @_transition_kernel(%arg0: i32, %arg1: memref<32x256xf32, #tpu.memory_space<vmem>>, %arg2: memref<32x256xf32, #tpu.memory_space<vmem>>, %arg3: memref<32x256xf32, #tpu.memory_space<vmem>>, %arg4: memref<32x256xf32, #tpu.memory_space<vmem>>, %arg5: memref<1x256xf32, #tpu.memory_space<vmem>>, %arg6: memref<1x256xf32, #tpu.memory_space<vmem>>, %arg7: memref<256x128xbf16, #tpu.memory_space<vmem>>, %arg8: memref<32x128xf32, #tpu.memory_space<vmem>>) attributes {dimension_semantics = [#tpu.dimension_semantics<parallel>], iteration_bounds = array<i64: 1>, scalar_prefetch = 0 : i64, scratch_operands = 0 : i64, tpu.core_type = #tpu.core_type<tc>, window_params = [{transform_indices = @transform_0, window_bounds = array<i64: 32, 256>}, {transform_indices = @transform_1, window_bounds = array<i64: 32, 256>}, {transform_indices = @transform_2, window_bounds = array<i64: 32, 256>}, {transform_indices = @transform_3, window_bounds = array<i64: 32, 256>}, {pipeline_mode = #tpu.pipeline_mode<synchronous>, transform_indices = @transform_4, window_bounds = array<i64: 1, 256>}, {pipeline_mode = #tpu.pipeline_mode<synchronous>, transform_indices = @transform_5, window_bounds = array<i64: 1, 256>}, {pipeline_mode = #tpu.pipeline_mode<synchronous>, transform_indices = @transform_6, window_bounds = array<i64: 256, 128>}, {transform_indices = @transform_7, window_bounds = array<i64: 32, 128>}]} {
    %c0 = arith.constant 0 : index
    %c0_0 = arith.constant 0 : index
    %0 = vector.load %arg5[%c0, %c0_0] : memref<1x256xf32, #tpu.memory_space<vmem>>, vector<1x256xf32>
    %c0_1 = arith.constant 0 : index
    %c0_2 = arith.constant 0 : index
    %1 = vector.load %arg6[%c0_1, %c0_2] : memref<1x256xf32, #tpu.memory_space<vmem>>, vector<1x256xf32>
    %c0_3 = arith.constant 0 : index
    %c0_4 = arith.constant 0 : index
    %2 = vector.load %arg1[%c0_3, %c0_4] : memref<32x256xf32, #tpu.memory_space<vmem>>, vector<32x256xf32>
    %3 = vector.broadcast %0 : vector<1x256xf32> to vector<32x256xf32>
    %4 = arith.mulf %2, %3 : vector<32x256xf32>
    %5 = vector.broadcast %1 : vector<1x256xf32> to vector<32x256xf32>
    %6 = arith.addf %4, %5 : vector<32x256xf32>
    %cst = arith.constant 0.000000e+00 : f32
    %7 = vector.broadcast %cst : f32 to vector<32x256xf32>
    %8 = arith.maximumf %6, %7 : vector<32x256xf32>
    %c0_5 = arith.constant 0 : index
    %c0_6 = arith.constant 0 : index
    %9 = vector.load %arg2[%c0_5, %c0_6] : memref<32x256xf32, #tpu.memory_space<vmem>>, vector<32x256xf32>
    %10 = vector.broadcast %0 : vector<1x256xf32> to vector<32x256xf32>
    %11 = arith.mulf %9, %10 : vector<32x256xf32>
    %12 = vector.broadcast %1 : vector<1x256xf32> to vector<32x256xf32>
    %13 = arith.addf %11, %12 : vector<32x256xf32>
    %cst_7 = arith.constant 0.000000e+00 : f32
    %14 = vector.broadcast %cst_7 : f32 to vector<32x256xf32>
    %15 = arith.maximumf %13, %14 : vector<32x256xf32>
    %16 = arith.addf %8, %15 : vector<32x256xf32>
    %c0_8 = arith.constant 0 : index
    %c0_9 = arith.constant 0 : index
    %17 = vector.load %arg3[%c0_8, %c0_9] : memref<32x256xf32, #tpu.memory_space<vmem>>, vector<32x256xf32>
    %18 = vector.broadcast %0 : vector<1x256xf32> to vector<32x256xf32>
    %19 = arith.mulf %17, %18 : vector<32x256xf32>
    %20 = vector.broadcast %1 : vector<1x256xf32> to vector<32x256xf32>
    %21 = arith.addf %19, %20 : vector<32x256xf32>
    %cst_10 = arith.constant 0.000000e+00 : f32
    %22 = vector.broadcast %cst_10 : f32 to vector<32x256xf32>
    %23 = arith.maximumf %21, %22 : vector<32x256xf32>
    %24 = arith.addf %16, %23 : vector<32x256xf32>
    %c0_11 = arith.constant 0 : index
    %c0_12 = arith.constant 0 : index
    %25 = vector.load %arg4[%c0_11, %c0_12] : memref<32x256xf32, #tpu.memory_space<vmem>>, vector<32x256xf32>
    %26 = vector.broadcast %0 : vector<1x256xf32> to vector<32x256xf32>
    %27 = arith.mulf %25, %26 : vector<32x256xf32>
    %28 = vector.broadcast %1 : vector<1x256xf32> to vector<32x256xf32>
    %29 = arith.addf %27, %28 : vector<32x256xf32>
    %cst_13 = arith.constant 0.000000e+00 : f32
    %30 = vector.broadcast %cst_13 : f32 to vector<32x256xf32>
    %31 = arith.maximumf %29, %30 : vector<32x256xf32>
    %32 = arith.addf %24, %31 : vector<32x256xf32>
    %cst_14 = arith.constant 2.500000e-01 : f32
    %33 = vector.broadcast %cst_14 : f32 to vector<32x256xf32>
    %34 = arith.mulf %32, %33 : vector<32x256xf32>
    %35 = arith.truncf %34 : vector<32x256xf32> to vector<32x256xbf16>
    %c0_15 = arith.constant 0 : index
    %c0_16 = arith.constant 0 : index
    %36 = vector.load %arg7[%c0_15, %c0_16] : memref<256x128xbf16, #tpu.memory_space<vmem>>, vector<256x128xbf16>
    %cst_17 = arith.constant dense<0.000000e+00> : vector<32x128xf32>
    %37 = tpu.matmul %35, %36, %cst_17 {dimension_numbers = #tpu.dot_dimension_numbers<[1], [0], [0], [1], [0, 0, 1, 1], [], []>} : vector<32x256xbf16>, vector<256x128xbf16>, vector<32x128xf32> -> vector<32x128xf32>
    %c0_18 = arith.constant 0 : index
    %c0_19 = arith.constant 0 : index
    %38 = vector.load %arg8[%c0_18, %c0_19] : memref<32x128xf32, #tpu.memory_space<vmem>>, vector<32x128xf32>
    tpu.vector_store %arg8[%c0_18, %c0_19], %37 {strides = array<i32>} : memref<32x128xf32, #tpu.memory_space<vmem>>, vector<32x128xf32>,
    return
  }
  func.func @transform_0(%arg0: i32) -> (i32, i32) {
    %c0_i32 = arith.constant 0 : i32
    %c0_i32_0 = arith.constant 0 : i32
    return %arg0, %c0_i32 : i32, i32
  }
  func.func @transform_1(%arg0: i32) -> (i32, i32) {
    %c0_i32 = arith.constant 0 : i32
    %c0_i32_0 = arith.constant 0 : i32
    return %arg0, %c0_i32 : i32, i32
  }
  func.func @transform_2(%arg0: i32) -> (i32, i32) {
    %c0_i32 = arith.constant 0 : i32
    %c0_i32_0 = arith.constant 0 : i32
    return %arg0, %c0_i32 : i32, i32
  }
  func.func @transform_3(%arg0: i32) -> (i32, i32) {
    %c0_i32 = arith.constant 0 : i32
    %c0_i32_0 = arith.constant 0 : i32
    return %arg0, %c0_i32 : i32, i32
  }
  func.func @transform_4(%arg0: i32) -> (i32, i32) {
    %c0_i32 = arith.constant 0 : i32
    %c0_i32_0 = arith.constant 0 : i32
    %c0_i32_1 = arith.constant 0 : i32
    return %c0_i32, %c0_i32_0 : i32, i32
  }
  func.func @transform_5(%arg0: i32) -> (i32, i32) {
    %c0_i32 = arith.constant 0 : i32
    %c0_i32_0 = arith.constant 0 : i32
    %c0_i32_1 = arith.constant 0 : i32
    return %c0_i32, %c0_i32_0 : i32, i32
  }
  func.func @transform_6(%arg0: i32) -> (i32, i32) {
    %c0_i32 = arith.constant 0 : i32
    %c0_i32_0 = arith.constant 0 : i32
    %c0_i32_1 = arith.constant 0 : i32
    return %c0_i32, %c0_i32_0 : i32, i32
  }
  func.func @transform_7(%arg0: i32) -> (i32, i32) {
    %c0_i32 = arith.constant 0 : i32
    %c0_i32_0 = arith.constant 0 : i32
    return %arg0, %c0_i32 : i32, i32
  }
}

module attributes {stable_mosaic.version = 11 : i64} {
  func.func @_bottleneck_kernel(%arg0: i32, %arg1: memref<32x512xf32, #tpu.memory_space<vmem>>, %arg2: memref<1x512xf32, #tpu.memory_space<vmem>>, %arg3: memref<1x512xf32, #tpu.memory_space<vmem>>, %arg4: memref<512x128xbf16, #tpu.memory_space<vmem>>, %arg5: memref<1x128xf32, #tpu.memory_space<vmem>>, %arg6: memref<1x128xf32, #tpu.memory_space<vmem>>, %arg7: memref<32x128xbf16, #tpu.memory_space<vmem>>) attributes {dimension_semantics = [#tpu.dimension_semantics<parallel>], iteration_bounds = array<i64: 1>, scalar_prefetch = 0 : i64, scratch_operands = 0 : i64, tpu.core_type = #tpu.core_type<tc>, window_params = [{transform_indices = @transform_0, window_bounds = array<i64: 32, 512>}, {pipeline_mode = #tpu.pipeline_mode<synchronous>, transform_indices = @transform_1, window_bounds = array<i64: 1, 512>}, {pipeline_mode = #tpu.pipeline_mode<synchronous>, transform_indices = @transform_2, window_bounds = array<i64: 1, 512>}, {pipeline_mode = #tpu.pipeline_mode<synchronous>, transform_indices = @transform_3, window_bounds = array<i64: 512, 128>}, {pipeline_mode = #tpu.pipeline_mode<synchronous>, transform_indices = @transform_4, window_bounds = array<i64: 1, 128>}, {pipeline_mode = #tpu.pipeline_mode<synchronous>, transform_indices = @transform_5, window_bounds = array<i64: 1, 128>}, {transform_indices = @transform_6, window_bounds = array<i64: 32, 128>}]} {
    %c0 = arith.constant 0 : index
    %c0_0 = arith.constant 0 : index
    %0 = vector.load %arg1[%c0, %c0_0] : memref<32x512xf32, #tpu.memory_space<vmem>>, vector<32x512xf32>
    %c0_1 = arith.constant 0 : index
    %c0_2 = arith.constant 0 : index
    %1 = vector.load %arg2[%c0_1, %c0_2] : memref<1x512xf32, #tpu.memory_space<vmem>>, vector<1x512xf32>
    %2 = vector.broadcast %1 : vector<1x512xf32> to vector<32x512xf32>
    %3 = arith.mulf %0, %2 : vector<32x512xf32>
    %c0_3 = arith.constant 0 : index
    %c0_4 = arith.constant 0 : index
    %4 = vector.load %arg3[%c0_3, %c0_4] : memref<1x512xf32, #tpu.memory_space<vmem>>, vector<1x512xf32>
    %5 = vector.broadcast %4 : vector<1x512xf32> to vector<32x512xf32>
    %6 = arith.addf %3, %5 : vector<32x512xf32>
    %cst = arith.constant 0.000000e+00 : f32
    %7 = vector.broadcast %cst : f32 to vector<32x512xf32>
    %8 = arith.maximumf %6, %7 : vector<32x512xf32>
    %9 = arith.truncf %8 : vector<32x512xf32> to vector<32x512xbf16>
    %c0_5 = arith.constant 0 : index
    %c0_6 = arith.constant 0 : index
    %10 = vector.load %arg4[%c0_5, %c0_6] : memref<512x128xbf16, #tpu.memory_space<vmem>>, vector<512x128xbf16>
    %cst_7 = arith.constant dense<0.000000e+00> : vector<32x128xf32>
    %11 = tpu.matmul %9, %10, %cst_7 {dimension_numbers = #tpu.dot_dimension_numbers<[1], [0], [0], [1], [0, 0, 1, 1], [], []>} : vector<32x512xbf16>, vector<512x128xbf16>, vector<32x128xf32> -> vector<32x128xf32>
    %c0_8 = arith.constant 0 : index
    %c0_9 = arith.constant 0 : index
    %12 = vector.load %arg5[%c0_8, %c0_9] : memref<1x128xf32, #tpu.memory_space<vmem>>, vector<1x128xf32>
    %13 = vector.broadcast %12 : vector<1x128xf32> to vector<32x128xf32>
    %14 = arith.mulf %11, %13 : vector<32x128xf32>
    %c0_10 = arith.constant 0 : index
    %c0_11 = arith.constant 0 : index
    %15 = vector.load %arg6[%c0_10, %c0_11] : memref<1x128xf32, #tpu.memory_space<vmem>>, vector<1x128xf32>
    %16 = vector.broadcast %15 : vector<1x128xf32> to vector<32x128xf32>
    %17 = arith.addf %14, %16 : vector<32x128xf32>
    %cst_12 = arith.constant 0.000000e+00 : f32
    %18 = vector.broadcast %cst_12 : f32 to vector<32x128xf32>
    %19 = arith.maximumf %17, %18 : vector<32x128xf32>
    %20 = arith.truncf %19 : vector<32x128xf32> to vector<32x128xbf16>
    %c0_13 = arith.constant 0 : index
    %c0_14 = arith.constant 0 : index
    %21 = vector.load %arg7[%c0_13, %c0_14] : memref<32x128xbf16, #tpu.memory_space<vmem>>, vector<32x128xbf16>
    tpu.vector_store %arg7[%c0_13, %c0_14], %20 {strides = array<i32>} : memref<32x128xbf16, #tpu.memory_space<vmem>>, vector<32x128xbf16>,
    return
  }
  func.func @transform_0(%arg0: i32) -> (i32, i32) {
    %c0_i32 = arith.constant 0 : i32
    %c0_i32_0 = arith.constant 0 : i32
    return %arg0, %c0_i32 : i32, i32
  }
  func.func @transform_1(%arg0: i32) -> (i32, i32) {
    %c0_i32 = arith.constant 0 : i32
    %c0_i32_0 = arith.constant 0 : i32
    %c0_i32_1 = arith.constant 0 : i32
    return %c0_i32, %c0_i32_0 : i32, i32
  }
  func.func @transform_2(%arg0: i32) -> (i32, i32) {
    %c0_i32 = arith.constant 0 : i32
    %c0_i32_0 = arith.constant 0 : i32
    %c0_i32_1 = arith.constant 0 : i32
    return %c0_i32, %c0_i32_0 : i32, i32
  }
  func.func @transform_3(%arg0: i32) -> (i32, i32) {
    %c0_i32 = arith.constant 0 : i32
    %c0_i32_0 = arith.constant 0 : i32
    %c0_i32_1 = arith.constant 0 : i32
    return %c0_i32, %c0_i32_0 : i32, i32
  }
  func.func @transform_4(%arg0: i32) -> (i32, i32) {
    %c0_i32 = arith.constant 0 : i32
    %c0_i32_0 = arith.constant 0 : i32
    %c0_i32_1 = arith.constant 0 : i32
    return %c0_i32, %c0_i32_0 : i32, i32
  }
  func.func @transform_5(%arg0: i32) -> (i32, i32) {
    %c0_i32 = arith.constant 0 : i32
    %c0_i32_0 = arith.constant 0 : i32
    %c0_i32_1 = arith.constant 0 : i32
    return %c0_i32, %c0_i32_0 : i32, i32
  }
  func.func @transform_6(%arg0: i32) -> (i32, i32) {
    %c0_i32 = arith.constant 0 : i32
    %c0_i32_0 = arith.constant 0 : i32
    return %arg0, %c0_i32 : i32, i32
  }
}

module attributes {stable_mosaic.version = 11 : i64} {
  func.func @_matmul_kernel(%arg0: i32, %arg1: memref<32x1152xbf16, #tpu.memory_space<vmem>>, %arg2: memref<1152x128xbf16, #tpu.memory_space<vmem>>, %arg3: memref<32x128xf32, #tpu.memory_space<vmem>>) attributes {dimension_semantics = [#tpu.dimension_semantics<parallel>], iteration_bounds = array<i64: 1>, scalar_prefetch = 0 : i64, scratch_operands = 0 : i64, tpu.core_type = #tpu.core_type<tc>, window_params = [{transform_indices = @transform_0, window_bounds = array<i64: 32, 1152>}, {pipeline_mode = #tpu.pipeline_mode<synchronous>, transform_indices = @transform_1, window_bounds = array<i64: 1152, 128>}, {transform_indices = @transform_2, window_bounds = array<i64: 32, 128>}]} {
    %c0 = arith.constant 0 : index
    %c0_0 = arith.constant 0 : index
    %0 = vector.load %arg1[%c0, %c0_0] : memref<32x1152xbf16, #tpu.memory_space<vmem>>, vector<32x1152xbf16>
    %c0_1 = arith.constant 0 : index
    %c0_2 = arith.constant 0 : index
    %1 = vector.load %arg2[%c0_1, %c0_2] : memref<1152x128xbf16, #tpu.memory_space<vmem>>, vector<1152x128xbf16>
    %cst = arith.constant dense<0.000000e+00> : vector<32x128xf32>
    %2 = tpu.matmul %0, %1, %cst {dimension_numbers = #tpu.dot_dimension_numbers<[1], [0], [0], [1], [0, 0, 1, 1], [], []>} : vector<32x1152xbf16>, vector<1152x128xbf16>, vector<32x128xf32> -> vector<32x128xf32>
    %c0_3 = arith.constant 0 : index
    %c0_4 = arith.constant 0 : index
    %3 = vector.load %arg3[%c0_3, %c0_4] : memref<32x128xf32, #tpu.memory_space<vmem>>, vector<32x128xf32>
    tpu.vector_store %arg3[%c0_3, %c0_4], %2 {strides = array<i32>} : memref<32x128xf32, #tpu.memory_space<vmem>>, vector<32x128xf32>,
    return
  }
  func.func @transform_0(%arg0: i32) -> (i32, i32) {
    %c0_i32 = arith.constant 0 : i32
    %c0_i32_0 = arith.constant 0 : i32
    return %arg0, %c0_i32 : i32, i32
  }
  func.func @transform_1(%arg0: i32) -> (i32, i32) {
    %c0_i32 = arith.constant 0 : i32
    %c0_i32_0 = arith.constant 0 : i32
    %c0_i32_1 = arith.constant 0 : i32
    return %c0_i32, %c0_i32_0 : i32, i32
  }
  func.func @transform_2(%arg0: i32) -> (i32, i32) {
    %c0_i32 = arith.constant 0 : i32
    %c0_i32_0 = arith.constant 0 : i32
    return %arg0, %c0_i32 : i32, i32
  }
}

module attributes {stable_mosaic.version = 11 : i64} {
  func.func @_bottleneck_kernel(%arg0: i32, %arg1: memref<16x1024xf32, #tpu.memory_space<vmem>>, %arg2: memref<1x1024xf32, #tpu.memory_space<vmem>>, %arg3: memref<1x1024xf32, #tpu.memory_space<vmem>>, %arg4: memref<1024x128xbf16, #tpu.memory_space<vmem>>, %arg5: memref<1x128xf32, #tpu.memory_space<vmem>>, %arg6: memref<1x128xf32, #tpu.memory_space<vmem>>, %arg7: memref<16x128xbf16, #tpu.memory_space<vmem>>) attributes {dimension_semantics = [#tpu.dimension_semantics<parallel>], iteration_bounds = array<i64: 1>, scalar_prefetch = 0 : i64, scratch_operands = 0 : i64, tpu.core_type = #tpu.core_type<tc>, window_params = [{transform_indices = @transform_0, window_bounds = array<i64: 16, 1024>}, {pipeline_mode = #tpu.pipeline_mode<synchronous>, transform_indices = @transform_1, window_bounds = array<i64: 1, 1024>}, {pipeline_mode = #tpu.pipeline_mode<synchronous>, transform_indices = @transform_2, window_bounds = array<i64: 1, 1024>}, {pipeline_mode = #tpu.pipeline_mode<synchronous>, transform_indices = @transform_3, window_bounds = array<i64: 1024, 128>}, {pipeline_mode = #tpu.pipeline_mode<synchronous>, transform_indices = @transform_4, window_bounds = array<i64: 1, 128>}, {pipeline_mode = #tpu.pipeline_mode<synchronous>, transform_indices = @transform_5, window_bounds = array<i64: 1, 128>}, {transform_indices = @transform_6, window_bounds = array<i64: 16, 128>}]} {
    %c0 = arith.constant 0 : index
    %c0_0 = arith.constant 0 : index
    %0 = vector.load %arg1[%c0, %c0_0] : memref<16x1024xf32, #tpu.memory_space<vmem>>, vector<16x1024xf32>
    %c0_1 = arith.constant 0 : index
    %c0_2 = arith.constant 0 : index
    %1 = vector.load %arg2[%c0_1, %c0_2] : memref<1x1024xf32, #tpu.memory_space<vmem>>, vector<1x1024xf32>
    %2 = vector.broadcast %1 : vector<1x1024xf32> to vector<16x1024xf32>
    %3 = arith.mulf %0, %2 : vector<16x1024xf32>
    %c0_3 = arith.constant 0 : index
    %c0_4 = arith.constant 0 : index
    %4 = vector.load %arg3[%c0_3, %c0_4] : memref<1x1024xf32, #tpu.memory_space<vmem>>, vector<1x1024xf32>
    %5 = vector.broadcast %4 : vector<1x1024xf32> to vector<16x1024xf32>
    %6 = arith.addf %3, %5 : vector<16x1024xf32>
    %cst = arith.constant 0.000000e+00 : f32
    %7 = vector.broadcast %cst : f32 to vector<16x1024xf32>
    %8 = arith.maximumf %6, %7 : vector<16x1024xf32>
    %9 = arith.truncf %8 : vector<16x1024xf32> to vector<16x1024xbf16>
    %c0_5 = arith.constant 0 : index
    %c0_6 = arith.constant 0 : index
    %10 = vector.load %arg4[%c0_5, %c0_6] : memref<1024x128xbf16, #tpu.memory_space<vmem>>, vector<1024x128xbf16>
    %cst_7 = arith.constant dense<0.000000e+00> : vector<16x128xf32>
    %11 = tpu.matmul %9, %10, %cst_7 {dimension_numbers = #tpu.dot_dimension_numbers<[1], [0], [0], [1], [0, 0, 1, 1], [], []>} : vector<16x1024xbf16>, vector<1024x128xbf16>, vector<16x128xf32> -> vector<16x128xf32>
    %c0_8 = arith.constant 0 : index
    %c0_9 = arith.constant 0 : index
    %12 = vector.load %arg5[%c0_8, %c0_9] : memref<1x128xf32, #tpu.memory_space<vmem>>, vector<1x128xf32>
    %13 = vector.broadcast %12 : vector<1x128xf32> to vector<16x128xf32>
    %14 = arith.mulf %11, %13 : vector<16x128xf32>
    %c0_10 = arith.constant 0 : index
    %c0_11 = arith.constant 0 : index
    %15 = vector.load %arg6[%c0_10, %c0_11] : memref<1x128xf32, #tpu.memory_space<vmem>>, vector<1x128xf32>
    %16 = vector.broadcast %15 : vector<1x128xf32> to vector<16x128xf32>
    %17 = arith.addf %14, %16 : vector<16x128xf32>
    %cst_12 = arith.constant 0.000000e+00 : f32
    %18 = vector.broadcast %cst_12 : f32 to vector<16x128xf32>
    %19 = arith.maximumf %17, %18 : vector<16x128xf32>
    %20 = arith.truncf %19 : vector<16x128xf32> to vector<16x128xbf16>
    %c0_13 = arith.constant 0 : index
    %c0_14 = arith.constant 0 : index
    %21 = vector.load %arg7[%c0_13, %c0_14] : memref<16x128xbf16, #tpu.memory_space<vmem>>, vector<16x128xbf16>
    tpu.vector_store %arg7[%c0_13, %c0_14], %20 {strides = array<i32>} : memref<16x128xbf16, #tpu.memory_space<vmem>>, vector<16x128xbf16>,
    return
  }
  func.func @transform_0(%arg0: i32) -> (i32, i32) {
    %c0_i32 = arith.constant 0 : i32
    %c0_i32_0 = arith.constant 0 : i32
    return %arg0, %c0_i32 : i32, i32
  }
  func.func @transform_1(%arg0: i32) -> (i32, i32) {
    %c0_i32 = arith.constant 0 : i32
    %c0_i32_0 = arith.constant 0 : i32
    %c0_i32_1 = arith.constant 0 : i32
    return %c0_i32, %c0_i32_0 : i32, i32
  }
  func.func @transform_2(%arg0: i32) -> (i32, i32) {
    %c0_i32 = arith.constant 0 : i32
    %c0_i32_0 = arith.constant 0 : i32
    %c0_i32_1 = arith.constant 0 : i32
    return %c0_i32, %c0_i32_0 : i32, i32
  }
  func.func @transform_3(%arg0: i32) -> (i32, i32) {
    %c0_i32 = arith.constant 0 : i32
    %c0_i32_0 = arith.constant 0 : i32
    %c0_i32_1 = arith.constant 0 : i32
    return %c0_i32, %c0_i32_0 : i32, i32
  }
  func.func @transform_4(%arg0: i32) -> (i32, i32) {
    %c0_i32 = arith.constant 0 : i32
    %c0_i32_0 = arith.constant 0 : i32
    %c0_i32_1 = arith.constant 0 : i32
    return %c0_i32, %c0_i32_0 : i32, i32
  }
  func.func @transform_5(%arg0: i32) -> (i32, i32) {
    %c0_i32 = arith.constant 0 : i32
    %c0_i32_0 = arith.constant 0 : i32
    %c0_i32_1 = arith.constant 0 : i32
    return %c0_i32, %c0_i32_0 : i32, i32
  }
  func.func @transform_6(%arg0: i32) -> (i32, i32) {
    %c0_i32 = arith.constant 0 : i32
    %c0_i32_0 = arith.constant 0 : i32
    return %arg0, %c0_i32 : i32, i32
  }
}

module attributes {stable_mosaic.version = 11 : i64} {
  func.func @_transition_kernel(%arg0: i32, %arg1: memref<16x512xf32, #tpu.memory_space<vmem>>, %arg2: memref<16x512xf32, #tpu.memory_space<vmem>>, %arg3: memref<16x512xf32, #tpu.memory_space<vmem>>, %arg4: memref<16x512xf32, #tpu.memory_space<vmem>>, %arg5: memref<1x512xf32, #tpu.memory_space<vmem>>, %arg6: memref<1x512xf32, #tpu.memory_space<vmem>>, %arg7: memref<512x256xbf16, #tpu.memory_space<vmem>>, %arg8: memref<16x256xf32, #tpu.memory_space<vmem>>) attributes {dimension_semantics = [#tpu.dimension_semantics<parallel>], iteration_bounds = array<i64: 1>, scalar_prefetch = 0 : i64, scratch_operands = 0 : i64, tpu.core_type = #tpu.core_type<tc>, window_params = [{transform_indices = @transform_0, window_bounds = array<i64: 16, 512>}, {transform_indices = @transform_1, window_bounds = array<i64: 16, 512>}, {transform_indices = @transform_2, window_bounds = array<i64: 16, 512>}, {transform_indices = @transform_3, window_bounds = array<i64: 16, 512>}, {pipeline_mode = #tpu.pipeline_mode<synchronous>, transform_indices = @transform_4, window_bounds = array<i64: 1, 512>}, {pipeline_mode = #tpu.pipeline_mode<synchronous>, transform_indices = @transform_5, window_bounds = array<i64: 1, 512>}, {pipeline_mode = #tpu.pipeline_mode<synchronous>, transform_indices = @transform_6, window_bounds = array<i64: 512, 256>}, {transform_indices = @transform_7, window_bounds = array<i64: 16, 256>}]} {
    %c0 = arith.constant 0 : index
    %c0_0 = arith.constant 0 : index
    %0 = vector.load %arg5[%c0, %c0_0] : memref<1x512xf32, #tpu.memory_space<vmem>>, vector<1x512xf32>
    %c0_1 = arith.constant 0 : index
    %c0_2 = arith.constant 0 : index
    %1 = vector.load %arg6[%c0_1, %c0_2] : memref<1x512xf32, #tpu.memory_space<vmem>>, vector<1x512xf32>
    %c0_3 = arith.constant 0 : index
    %c0_4 = arith.constant 0 : index
    %2 = vector.load %arg1[%c0_3, %c0_4] : memref<16x512xf32, #tpu.memory_space<vmem>>, vector<16x512xf32>
    %3 = vector.broadcast %0 : vector<1x512xf32> to vector<16x512xf32>
    %4 = arith.mulf %2, %3 : vector<16x512xf32>
    %5 = vector.broadcast %1 : vector<1x512xf32> to vector<16x512xf32>
    %6 = arith.addf %4, %5 : vector<16x512xf32>
    %cst = arith.constant 0.000000e+00 : f32
    %7 = vector.broadcast %cst : f32 to vector<16x512xf32>
    %8 = arith.maximumf %6, %7 : vector<16x512xf32>
    %c0_5 = arith.constant 0 : index
    %c0_6 = arith.constant 0 : index
    %9 = vector.load %arg2[%c0_5, %c0_6] : memref<16x512xf32, #tpu.memory_space<vmem>>, vector<16x512xf32>
    %10 = vector.broadcast %0 : vector<1x512xf32> to vector<16x512xf32>
    %11 = arith.mulf %9, %10 : vector<16x512xf32>
    %12 = vector.broadcast %1 : vector<1x512xf32> to vector<16x512xf32>
    %13 = arith.addf %11, %12 : vector<16x512xf32>
    %cst_7 = arith.constant 0.000000e+00 : f32
    %14 = vector.broadcast %cst_7 : f32 to vector<16x512xf32>
    %15 = arith.maximumf %13, %14 : vector<16x512xf32>
    %16 = arith.addf %8, %15 : vector<16x512xf32>
    %c0_8 = arith.constant 0 : index
    %c0_9 = arith.constant 0 : index
    %17 = vector.load %arg3[%c0_8, %c0_9] : memref<16x512xf32, #tpu.memory_space<vmem>>, vector<16x512xf32>
    %18 = vector.broadcast %0 : vector<1x512xf32> to vector<16x512xf32>
    %19 = arith.mulf %17, %18 : vector<16x512xf32>
    %20 = vector.broadcast %1 : vector<1x512xf32> to vector<16x512xf32>
    %21 = arith.addf %19, %20 : vector<16x512xf32>
    %cst_10 = arith.constant 0.000000e+00 : f32
    %22 = vector.broadcast %cst_10 : f32 to vector<16x512xf32>
    %23 = arith.maximumf %21, %22 : vector<16x512xf32>
    %24 = arith.addf %16, %23 : vector<16x512xf32>
    %c0_11 = arith.constant 0 : index
    %c0_12 = arith.constant 0 : index
    %25 = vector.load %arg4[%c0_11, %c0_12] : memref<16x512xf32, #tpu.memory_space<vmem>>, vector<16x512xf32>
    %26 = vector.broadcast %0 : vector<1x512xf32> to vector<16x512xf32>
    %27 = arith.mulf %25, %26 : vector<16x512xf32>
    %28 = vector.broadcast %1 : vector<1x512xf32> to vector<16x512xf32>
    %29 = arith.addf %27, %28 : vector<16x512xf32>
    %cst_13 = arith.constant 0.000000e+00 : f32
    %30 = vector.broadcast %cst_13 : f32 to vector<16x512xf32>
    %31 = arith.maximumf %29, %30 : vector<16x512xf32>
    %32 = arith.addf %24, %31 : vector<16x512xf32>
    %cst_14 = arith.constant 2.500000e-01 : f32
    %33 = vector.broadcast %cst_14 : f32 to vector<16x512xf32>
    %34 = arith.mulf %32, %33 : vector<16x512xf32>
    %35 = arith.truncf %34 : vector<16x512xf32> to vector<16x512xbf16>
    %c0_15 = arith.constant 0 : index
    %c0_16 = arith.constant 0 : index
    %36 = vector.load %arg7[%c0_15, %c0_16] : memref<512x256xbf16, #tpu.memory_space<vmem>>, vector<512x256xbf16>
    %cst_17 = arith.constant dense<0.000000e+00> : vector<16x256xf32>
    %37 = tpu.matmul %35, %36, %cst_17 {dimension_numbers = #tpu.dot_dimension_numbers<[1], [0], [0], [1], [0, 0, 1, 1], [], []>} : vector<16x512xbf16>, vector<512x256xbf16>, vector<16x256xf32> -> vector<16x256xf32>
    %c0_18 = arith.constant 0 : index
    %c0_19 = arith.constant 0 : index
    %38 = vector.load %arg8[%c0_18, %c0_19] : memref<16x256xf32, #tpu.memory_space<vmem>>, vector<16x256xf32>
    tpu.vector_store %arg8[%c0_18, %c0_19], %37 {strides = array<i32>} : memref<16x256xf32, #tpu.memory_space<vmem>>, vector<16x256xf32>,
    return
  }
  func.func @transform_0(%arg0: i32) -> (i32, i32) {
    %c0_i32 = arith.constant 0 : i32
    %c0_i32_0 = arith.constant 0 : i32
    return %arg0, %c0_i32 : i32, i32
  }
  func.func @transform_1(%arg0: i32) -> (i32, i32) {
    %c0_i32 = arith.constant 0 : i32
    %c0_i32_0 = arith.constant 0 : i32
    return %arg0, %c0_i32 : i32, i32
  }
  func.func @transform_2(%arg0: i32) -> (i32, i32) {
    %c0_i32 = arith.constant 0 : i32
    %c0_i32_0 = arith.constant 0 : i32
    return %arg0, %c0_i32 : i32, i32
  }
  func.func @transform_3(%arg0: i32) -> (i32, i32) {
    %c0_i32 = arith.constant 0 : i32
    %c0_i32_0 = arith.constant 0 : i32
    return %arg0, %c0_i32 : i32, i32
  }
  func.func @transform_4(%arg0: i32) -> (i32, i32) {
    %c0_i32 = arith.constant 0 : i32
    %c0_i32_0 = arith.constant 0 : i32
    %c0_i32_1 = arith.constant 0 : i32
    return %c0_i32, %c0_i32_0 : i32, i32
  }
  func.func @transform_5(%arg0: i32) -> (i32, i32) {
    %c0_i32 = arith.constant 0 : i32
    %c0_i32_0 = arith.constant 0 : i32
    %c0_i32_1 = arith.constant 0 : i32
    return %c0_i32, %c0_i32_0 : i32, i32
  }
  func.func @transform_6(%arg0: i32) -> (i32, i32) {
    %c0_i32 = arith.constant 0 : i32
    %c0_i32_0 = arith.constant 0 : i32
    %c0_i32_1 = arith.constant 0 : i32
    return %c0_i32, %c0_i32_0 : i32, i32
  }
  func.func @transform_7(%arg0: i32) -> (i32, i32) {
    %c0_i32 = arith.constant 0 : i32
    %c0_i32_0 = arith.constant 0 : i32
    return %arg0, %c0_i32 : i32, i32
  }
}

module attributes {stable_mosaic.version = 11 : i64} {
  func.func @_matmul_kernel(%arg0: i32, %arg1: memref<16x1152xbf16, #tpu.memory_space<vmem>>, %arg2: memref<1152x128xbf16, #tpu.memory_space<vmem>>, %arg3: memref<16x128xf32, #tpu.memory_space<vmem>>) attributes {dimension_semantics = [#tpu.dimension_semantics<parallel>], iteration_bounds = array<i64: 1>, scalar_prefetch = 0 : i64, scratch_operands = 0 : i64, tpu.core_type = #tpu.core_type<tc>, window_params = [{transform_indices = @transform_0, window_bounds = array<i64: 16, 1152>}, {pipeline_mode = #tpu.pipeline_mode<synchronous>, transform_indices = @transform_1, window_bounds = array<i64: 1152, 128>}, {transform_indices = @transform_2, window_bounds = array<i64: 16, 128>}]} {
    %c0 = arith.constant 0 : index
    %c0_0 = arith.constant 0 : index
    %0 = vector.load %arg1[%c0, %c0_0] : memref<16x1152xbf16, #tpu.memory_space<vmem>>, vector<16x1152xbf16>
    %c0_1 = arith.constant 0 : index
    %c0_2 = arith.constant 0 : index
    %1 = vector.load %arg2[%c0_1, %c0_2] : memref<1152x128xbf16, #tpu.memory_space<vmem>>, vector<1152x128xbf16>
    %cst = arith.constant dense<0.000000e+00> : vector<16x128xf32>
    %2 = tpu.matmul %0, %1, %cst {dimension_numbers = #tpu.dot_dimension_numbers<[1], [0], [0], [1], [0, 0, 1, 1], [], []>} : vector<16x1152xbf16>, vector<1152x128xbf16>, vector<16x128xf32> -> vector<16x128xf32>
    %c0_3 = arith.constant 0 : index
    %c0_4 = arith.constant 0 : index
    %3 = vector.load %arg3[%c0_3, %c0_4] : memref<16x128xf32, #tpu.memory_space<vmem>>, vector<16x128xf32>
    tpu.vector_store %arg3[%c0_3, %c0_4], %2 {strides = array<i32>} : memref<16x128xf32, #tpu.memory_space<vmem>>, vector<16x128xf32>,
    return
  }
  func.func @transform_0(%arg0: i32) -> (i32, i32) {
    %c0_i32 = arith.constant 0 : i32
    %c0_i32_0 = arith.constant 0 : i32
    return %arg0, %c0_i32 : i32, i32
  }
  func.func @transform_1(%arg0: i32) -> (i32, i32) {
    %c0_i32 = arith.constant 0 : i32
    %c0_i32_0 = arith.constant 0 : i32
    %c0_i32_1 = arith.constant 0 : i32
    return %c0_i32, %c0_i32_0 : i32, i32
  }
  func.func @transform_2(%arg0: i32) -> (i32, i32) {
    %c0_i32 = arith.constant 0 : i32
    %c0_i32_0 = arith.constant 0 : i32
    return %arg0, %c0_i32 : i32, i32
  }
}

module attributes {stable_mosaic.version = 11 : i64} {
  func.func @_transition_kernel(%arg0: i32, %arg1: memref<16x1024xf32, #tpu.memory_space<vmem>>, %arg2: memref<16x1024xf32, #tpu.memory_space<vmem>>, %arg3: memref<16x1024xf32, #tpu.memory_space<vmem>>, %arg4: memref<16x1024xf32, #tpu.memory_space<vmem>>, %arg5: memref<1x1024xf32, #tpu.memory_space<vmem>>, %arg6: memref<1x1024xf32, #tpu.memory_space<vmem>>, %arg7: memref<1024x512xbf16, #tpu.memory_space<vmem>>, %arg8: memref<16x512xf32, #tpu.memory_space<vmem>>) attributes {dimension_semantics = [#tpu.dimension_semantics<parallel>], iteration_bounds = array<i64: 1>, scalar_prefetch = 0 : i64, scratch_operands = 0 : i64, tpu.core_type = #tpu.core_type<tc>, window_params = [{transform_indices = @transform_0, window_bounds = array<i64: 16, 1024>}, {transform_indices = @transform_1, window_bounds = array<i64: 16, 1024>}, {transform_indices = @transform_2, window_bounds = array<i64: 16, 1024>}, {transform_indices = @transform_3, window_bounds = array<i64: 16, 1024>}, {pipeline_mode = #tpu.pipeline_mode<synchronous>, transform_indices = @transform_4, window_bounds = array<i64: 1, 1024>}, {pipeline_mode = #tpu.pipeline_mode<synchronous>, transform_indices = @transform_5, window_bounds = array<i64: 1, 1024>}, {pipeline_mode = #tpu.pipeline_mode<synchronous>, transform_indices = @transform_6, window_bounds = array<i64: 1024, 512>}, {transform_indices = @transform_7, window_bounds = array<i64: 16, 512>}]} {
    %c0 = arith.constant 0 : index
    %c0_0 = arith.constant 0 : index
    %0 = vector.load %arg5[%c0, %c0_0] : memref<1x1024xf32, #tpu.memory_space<vmem>>, vector<1x1024xf32>
    %c0_1 = arith.constant 0 : index
    %c0_2 = arith.constant 0 : index
    %1 = vector.load %arg6[%c0_1, %c0_2] : memref<1x1024xf32, #tpu.memory_space<vmem>>, vector<1x1024xf32>
    %c0_3 = arith.constant 0 : index
    %c0_4 = arith.constant 0 : index
    %2 = vector.load %arg1[%c0_3, %c0_4] : memref<16x1024xf32, #tpu.memory_space<vmem>>, vector<16x1024xf32>
    %3 = vector.broadcast %0 : vector<1x1024xf32> to vector<16x1024xf32>
    %4 = arith.mulf %2, %3 : vector<16x1024xf32>
    %5 = vector.broadcast %1 : vector<1x1024xf32> to vector<16x1024xf32>
    %6 = arith.addf %4, %5 : vector<16x1024xf32>
    %cst = arith.constant 0.000000e+00 : f32
    %7 = vector.broadcast %cst : f32 to vector<16x1024xf32>
    %8 = arith.maximumf %6, %7 : vector<16x1024xf32>
    %c0_5 = arith.constant 0 : index
    %c0_6 = arith.constant 0 : index
    %9 = vector.load %arg2[%c0_5, %c0_6] : memref<16x1024xf32, #tpu.memory_space<vmem>>, vector<16x1024xf32>
    %10 = vector.broadcast %0 : vector<1x1024xf32> to vector<16x1024xf32>
    %11 = arith.mulf %9, %10 : vector<16x1024xf32>
    %12 = vector.broadcast %1 : vector<1x1024xf32> to vector<16x1024xf32>
    %13 = arith.addf %11, %12 : vector<16x1024xf32>
    %cst_7 = arith.constant 0.000000e+00 : f32
    %14 = vector.broadcast %cst_7 : f32 to vector<16x1024xf32>
    %15 = arith.maximumf %13, %14 : vector<16x1024xf32>
    %16 = arith.addf %8, %15 : vector<16x1024xf32>
    %c0_8 = arith.constant 0 : index
    %c0_9 = arith.constant 0 : index
    %17 = vector.load %arg3[%c0_8, %c0_9] : memref<16x1024xf32, #tpu.memory_space<vmem>>, vector<16x1024xf32>
    %18 = vector.broadcast %0 : vector<1x1024xf32> to vector<16x1024xf32>
    %19 = arith.mulf %17, %18 : vector<16x1024xf32>
    %20 = vector.broadcast %1 : vector<1x1024xf32> to vector<16x1024xf32>
    %21 = arith.addf %19, %20 : vector<16x1024xf32>
    %cst_10 = arith.constant 0.000000e+00 : f32
    %22 = vector.broadcast %cst_10 : f32 to vector<16x1024xf32>
    %23 = arith.maximumf %21, %22 : vector<16x1024xf32>
    %24 = arith.addf %16, %23 : vector<16x1024xf32>
    %c0_11 = arith.constant 0 : index
    %c0_12 = arith.constant 0 : index
    %25 = vector.load %arg4[%c0_11, %c0_12] : memref<16x1024xf32, #tpu.memory_space<vmem>>, vector<16x1024xf32>
    %26 = vector.broadcast %0 : vector<1x1024xf32> to vector<16x1024xf32>
    %27 = arith.mulf %25, %26 : vector<16x1024xf32>
    %28 = vector.broadcast %1 : vector<1x1024xf32> to vector<16x1024xf32>
    %29 = arith.addf %27, %28 : vector<16x1024xf32>
    %cst_13 = arith.constant 0.000000e+00 : f32
    %30 = vector.broadcast %cst_13 : f32 to vector<16x1024xf32>
    %31 = arith.maximumf %29, %30 : vector<16x1024xf32>
    %32 = arith.addf %24, %31 : vector<16x1024xf32>
    %cst_14 = arith.constant 2.500000e-01 : f32
    %33 = vector.broadcast %cst_14 : f32 to vector<16x1024xf32>
    %34 = arith.mulf %32, %33 : vector<16x1024xf32>
    %35 = arith.truncf %34 : vector<16x1024xf32> to vector<16x1024xbf16>
    %c0_15 = arith.constant 0 : index
    %c0_16 = arith.constant 0 : index
    %36 = vector.load %arg7[%c0_15, %c0_16] : memref<1024x512xbf16, #tpu.memory_space<vmem>>, vector<1024x512xbf16>
    %cst_17 = arith.constant dense<0.000000e+00> : vector<16x512xf32>
    %37 = tpu.matmul %35, %36, %cst_17 {dimension_numbers = #tpu.dot_dimension_numbers<[1], [0], [0], [1], [0, 0, 1, 1], [], []>} : vector<16x1024xbf16>, vector<1024x512xbf16>, vector<16x512xf32> -> vector<16x512xf32>
    %c0_18 = arith.constant 0 : index
    %c0_19 = arith.constant 0 : index
    %38 = vector.load %arg8[%c0_18, %c0_19] : memref<16x512xf32, #tpu.memory_space<vmem>>, vector<16x512xf32>
    tpu.vector_store %arg8[%c0_18, %c0_19], %37 {strides = array<i32>} : memref<16x512xf32, #tpu.memory_space<vmem>>, vector<16x512xf32>,
    return
  }
  func.func @transform_0(%arg0: i32) -> (i32, i32) {
    %c0_i32 = arith.constant 0 : i32
    %c0_i32_0 = arith.constant 0 : i32
    return %arg0, %c0_i32 : i32, i32
  }
  func.func @transform_1(%arg0: i32) -> (i32, i32) {
    %c0_i32 = arith.constant 0 : i32
    %c0_i32_0 = arith.constant 0 : i32
    return %arg0, %c0_i32 : i32, i32
  }
  func.func @transform_2(%arg0: i32) -> (i32, i32) {
    %c0_i32 = arith.constant 0 : i32
    %c0_i32_0 = arith.constant 0 : i32
    return %arg0, %c0_i32 : i32, i32
  }
  func.func @transform_3(%arg0: i32) -> (i32, i32) {
    %c0_i32 = arith.constant 0 : i32
    %c0_i32_0 = arith.constant 0 : i32
    return %arg0, %c0_i32 : i32, i32
  }
  func.func @transform_4(%arg0: i32) -> (i32, i32) {
    %c0_i32 = arith.constant 0 : i32
    %c0_i32_0 = arith.constant 0 : i32
    %c0_i32_1 = arith.constant 0 : i32
    return %c0_i32, %c0_i32_0 : i32, i32
  }
  func.func @transform_5(%arg0: i32) -> (i32, i32) {
    %c0_i32 = arith.constant 0 : i32
    %c0_i32_0 = arith.constant 0 : i32
    %c0_i32_1 = arith.constant 0 : i32
    return %c0_i32, %c0_i32_0 : i32, i32
  }
  func.func @transform_6(%arg0: i32) -> (i32, i32) {
    %c0_i32 = arith.constant 0 : i32
    %c0_i32_0 = arith.constant 0 : i32
    %c0_i32_1 = arith.constant 0 : i32
    return %c0_i32, %c0_i32_0 : i32, i32
  }
  func.func @transform_7(%arg0: i32) -> (i32, i32) {
    %c0_i32 = arith.constant 0 : i32
    %c0_i32_0 = arith.constant 0 : i32
    return %arg0, %c0_i32 : i32, i32
  }
}

module attributes {stable_mosaic.version = 11 : i64} {
  func.func @_head_kernel(%arg0: i32, %arg1: memref<2x1x1024xf32, #tpu.memory_space<vmem>>, %arg2: memref<1x1x1024xf32, #tpu.memory_space<vmem>>, %arg3: memref<1x1x1024xf32, #tpu.memory_space<vmem>>, %arg4: memref<1024x128xbf16, #tpu.memory_space<vmem>>, %arg5: memref<1x128xf32, #tpu.memory_space<vmem>>, %arg6: memref<2x128xf32, #tpu.memory_space<vmem>>) attributes {dimension_semantics = [#tpu.dimension_semantics<arbitrary>], iteration_bounds = array<i64: 1>, scalar_prefetch = 0 : i64, scratch_operands = 0 : i64, tpu.core_type = #tpu.core_type<tc>, window_params = [{pipeline_mode = #tpu.pipeline_mode<synchronous>, transform_indices = @transform_0, window_bounds = array<i64: 2, 1, 1024>}, {pipeline_mode = #tpu.pipeline_mode<synchronous>, transform_indices = @transform_1, window_bounds = array<i64: 1, 1, 1024>}, {pipeline_mode = #tpu.pipeline_mode<synchronous>, transform_indices = @transform_2, window_bounds = array<i64: 1, 1, 1024>}, {pipeline_mode = #tpu.pipeline_mode<synchronous>, transform_indices = @transform_3, window_bounds = array<i64: 1024, 128>}, {pipeline_mode = #tpu.pipeline_mode<synchronous>, transform_indices = @transform_4, window_bounds = array<i64: 1, 128>}, {pipeline_mode = #tpu.pipeline_mode<synchronous>, transform_indices = @transform_5, window_bounds = array<i64: 2, 128>}]} {
    %c0 = arith.constant 0 : index
    %c0_0 = arith.constant 0 : index
    %c0_1 = arith.constant 0 : index
    %0 = vector.load %arg1[%c0, %c0_0, %c0_1] : memref<2x1x1024xf32, #tpu.memory_space<vmem>>, vector<2x1x1024xf32>
    %c0_2 = arith.constant 0 : index
    %c0_3 = arith.constant 0 : index
    %c0_4 = arith.constant 0 : index
    %1 = vector.load %arg2[%c0_2, %c0_3, %c0_4] : memref<1x1x1024xf32, #tpu.memory_space<vmem>>, vector<1x1x1024xf32>
    %2 = vector.broadcast %1 : vector<1x1x1024xf32> to vector<2x1x1024xf32>
    %3 = arith.mulf %0, %2 : vector<2x1x1024xf32>
    %c0_5 = arith.constant 0 : index
    %c0_6 = arith.constant 0 : index
    %c0_7 = arith.constant 0 : index
    %4 = vector.load %arg3[%c0_5, %c0_6, %c0_7] : memref<1x1x1024xf32, #tpu.memory_space<vmem>>, vector<1x1x1024xf32>
    %5 = vector.broadcast %4 : vector<1x1x1024xf32> to vector<2x1x1024xf32>
    %6 = arith.addf %3, %5 : vector<2x1x1024xf32>
    %cst = arith.constant 0.000000e+00 : f32
    %7 = vector.broadcast %cst : f32 to vector<2x1x1024xf32>
    %8 = arith.maximumf %6, %7 : vector<2x1x1024xf32>
    %9 = vector.shape_cast %8 : vector<2x1x1024xf32> to vector<2x1024xf32>
    %cst_8 = arith.constant 1.000000e+00 : f32
    %10 = vector.broadcast %cst_8 : f32 to vector<2x1024xf32>
    %11 = arith.mulf %9, %10 : vector<2x1024xf32>
    %12 = arith.truncf %11 : vector<2x1024xf32> to vector<2x1024xbf16>
    %c0_9 = arith.constant 0 : index
    %c0_10 = arith.constant 0 : index
    %13 = vector.load %arg4[%c0_9, %c0_10] : memref<1024x128xbf16, #tpu.memory_space<vmem>>, vector<1024x128xbf16>
    %cst_11 = arith.constant dense<0.000000e+00> : vector<2x128xf32>
    %14 = tpu.matmul %12, %13, %cst_11 {dimension_numbers = #tpu.dot_dimension_numbers<[1], [0], [0], [1], [0, 0, 1, 1], [], []>} : vector<2x1024xbf16>, vector<1024x128xbf16>, vector<2x128xf32> -> vector<2x128xf32>
    %c0_12 = arith.constant 0 : index
    %c0_13 = arith.constant 0 : index
    %15 = vector.load %arg5[%c0_12, %c0_13] : memref<1x128xf32, #tpu.memory_space<vmem>>, vector<1x128xf32>
    %16 = vector.broadcast %15 : vector<1x128xf32> to vector<2x128xf32>
    %17 = arith.addf %14, %16 : vector<2x128xf32>
    %c0_14 = arith.constant 0 : index
    %c0_15 = arith.constant 0 : index
    %18 = vector.load %arg6[%c0_14, %c0_15] : memref<2x128xf32, #tpu.memory_space<vmem>>, vector<2x128xf32>
    tpu.vector_store %arg6[%c0_14, %c0_15], %17 {strides = array<i32>} : memref<2x128xf32, #tpu.memory_space<vmem>>, vector<2x128xf32>,
    return
  }
  func.func @transform_0(%arg0: i32) -> (i32, i32, i32) {
    %c0_i32 = arith.constant 0 : i32
    %c0_i32_0 = arith.constant 0 : i32
    %c0_i32_1 = arith.constant 0 : i32
    %c0_i32_2 = arith.constant 0 : i32
    return %c0_i32, %c0_i32_0, %c0_i32_1 : i32, i32, i32
  }
  func.func @transform_1(%arg0: i32) -> (i32, i32, i32) {
    %c0_i32 = arith.constant 0 : i32
    %c0_i32_0 = arith.constant 0 : i32
    %c0_i32_1 = arith.constant 0 : i32
    %c0_i32_2 = arith.constant 0 : i32
    return %c0_i32, %c0_i32_0, %c0_i32_1 : i32, i32, i32
  }
  func.func @transform_2(%arg0: i32) -> (i32, i32, i32) {
    %c0_i32 = arith.constant 0 : i32
    %c0_i32_0 = arith.constant 0 : i32
    %c0_i32_1 = arith.constant 0 : i32
    %c0_i32_2 = arith.constant 0 : i32
    return %c0_i32, %c0_i32_0, %c0_i32_1 : i32, i32, i32
  }
  func.func @transform_3(%arg0: i32) -> (i32, i32) {
    %c0_i32 = arith.constant 0 : i32
    %c0_i32_0 = arith.constant 0 : i32
    %c0_i32_1 = arith.constant 0 : i32
    return %c0_i32, %c0_i32_0 : i32, i32
  }
  func.func @transform_4(%arg0: i32) -> (i32, i32) {
    %c0_i32 = arith.constant 0 : i32
    %c0_i32_0 = arith.constant 0 : i32
    %c0_i32_1 = arith.constant 0 : i32
    return %c0_i32, %c0_i32_0 : i32, i32
  }
  func.func @transform_5(%arg0: i32) -> (i32, i32) {
    %c0_i32 = arith.constant 0 : i32
    %c0_i32_0 = arith.constant 0 : i32
    %c0_i32_1 = arith.constant 0 : i32
    return %c0_i32, %c0_i32_0 : i32, i32
  }
}

</mosaic_0001>

<bundles_post_ra>
// kernel: densenet_forward.122
= control target key start
LH: loop header
LB: loop body
LE: loop exit
PB: predicated region body
PF: predicated region fallthrough
CT: control target
= control target key end

     0   :  { %v1320_v0 = vmov 0   ;;  %s1948_s1 = inlined_call_operand.vmem [shape: bf16[256,128], index: 1, kind: input, shape index: {}]   ;;  %s1949_s0 = inlined_call_operand.vmem [shape: bf16[512,256], index: 0, kind: input, shape index: {}]   ;;  %s1950_s2 = inlined_call_operand.vmem [shape: f32[1,128], index: 2, kind: input, shape index: {}]   ;;  %s1951_s3 = inlined_call_operand.vmem [shape: f32[1,128], index: 3, kind: input, shape index: {}]   ;;  %s1952_s4 = inlined_call_operand.vmem [shape: f32[512,128], index: 4, kind: output, shape index: {}]  }
   0x1   :  { %530 = vmatprep.subr.bf16.mxu0 %v1320_v0  ;;  %1175 = vmatprep.subr.bf16.mxu1 %v1320_v0  ;;  %v1208_v1 = vld [vmem:[%s1948_s1] sm:$0xff]   ;;  %v1209_v2 = vld [vmem:[%s1948_s1 + $0x8] sm:$0xff]   ;;  %v1210_v3 = vld [vmem:[%s1948_s1 + $0x10] sm:$0xff]  }
   0x2   :  { %531 = vmatpush1.bf16.msra.mxu0 %v1208_v1  ;;  %1191 = vmatpush1.bf16.msra.mxu1 %v1208_v1  ;;  %v1211_v4 = vld [vmem:[%s1948_s1 + $0x18] sm:$0xff]   ;;  %v1212_v5 = vld [vmem:[%s1948_s1 + $0x20] sm:$0xff]   ;;  %v1213_v7 = vld [vmem:[%s1948_s1 + $0x28] sm:$0xff]  }
   0x3   :  { %532 = vmatprep.subr.bf16.mxu0 %v1320_v0  ;;  %1176 = vmatprep.subr.bf16.mxu1 %v1320_v0  ;;  %v1226_v6 = vld [vmem:[%s1949_s0 + $0x4] ss:$8 sps:$4 sm:$0xff]   ;;  %v1214_v9 = vld [vmem:[%s1948_s1 + $0x30] sm:$0xff]   ;;  %v1215_v10 = vld [vmem:[%s1948_s1 + $0x38] sm:$0xff]  }
   0x4   :  { %v1229_v8 = vld [vmem:[%s1949_s0 + $0x104] ss:$8 sps:$4 sm:$0xff]   ;;  %562 = vmatprep.mubr.bf16.mxu0 %v1226_v6  ;;  %v1218_v13 = vld [vmem:[%s1948_s1 + $0x50] sm:$0xff]   ;;  %v1219_v14 = vld [vmem:[%s1948_s1 + $0x58] sm:$0xff]  }
   0x5   :  { %690 = vmatprep.mubr.bf16.mxu1 %v1229_v8  ;;  %v1216_v11 = vld [vmem:[%s1948_s1 + $0x40] sm:$0xff]   ;;  %v1217_v12 = vld [vmem:[%s1948_s1 + $0x48] sm:$0xff]   ;;  %v1222_v17 = vld [vmem:[%s1948_s1 + $0x70] sm:$0xff]  }
   0x6   :  { %533 = vmatpush1.bf16.msra.mxu0 %v1209_v2  ;;  %1192 = vmatpush1.bf16.msra.mxu1 %v1209_v2  ;;  %v1220_v15 = vld [vmem:[%s1948_s1 + $0x60] sm:$0xff]   ;;  %v1221_v16 = vld [vmem:[%s1948_s1 + $0x68] sm:$0xff]   ;;  %v1223_v18 = vld [vmem:[%s1948_s1 + $0x78] sm:$0xff]  }
   0x7   :  { %534 = vmatprep.subr.bf16.mxu0 %v1320_v0  ;;  %1177 = vmatprep.subr.bf16.mxu1 %v1320_v0  ;;  %v1224_v19 = vld [vmem:[%s1949_s0] ss:$8 sps:$4 sm:$0xff]   ;;  %v1230_v21 = vld [vmem:[%s1949_s0 + $0x14] ss:$8 sps:$4 sm:$0xff]   ;;  %v1234_v23 = vld [vmem:[%s1949_s0 + $0x10] ss:$8 sps:$4 sm:$0xff]  }
   0x8   :  { %v1227_v20 = vld [vmem:[%s1949_s0 + $0x100] ss:$8 sps:$4 sm:$0xff]   ;;  %v1232_v22 = vld [vmem:[%s1949_s0 + $0x114] ss:$8 sps:$4 sm:$0xff]   ;;  %v1235_v24 = vld [vmem:[%s1949_s0 + $0x110] ss:$8 sps:$4 sm:$0xff]  }
   0x9   :  { %v1236_v25 = vld [vmem:[%s1949_s0 + $0x24] ss:$8 sps:$4 sm:$0xff]   ;;  %v1240_v27 = vld [vmem:[%s1949_s0 + $0x20] ss:$8 sps:$4 sm:$0xff]   ;;  %v1242_v29 = vld [vmem:[%s1949_s0 + $0x34] ss:$8 sps:$4 sm:$0xff]  }
   0xa   :  { %535 = vmatpush1.bf16.msra.mxu0 %v1210_v3  ;;  %1193 = vmatpush1.bf16.msra.mxu1 %v1210_v3  ;;  %v1238_v26 = vld [vmem:[%s1949_s0 + $0x124] ss:$8 sps:$4 sm:$0xff]   ;;  %v1241_v28 = vld [vmem:[%s1949_s0 + $0x120] ss:$8 sps:$4 sm:$0xff]   ;;  %v1244_v30 = vld [vmem:[%s1949_s0 + $0x134] ss:$8 sps:$4 sm:$0xff]  }
   0xb   :  { %536 = vmatprep.subr.bf16.mxu0 %v1320_v0  ;;  %1178 = vmatprep.subr.bf16.mxu1 %v1320_v0  ;;  %v1246_v31 = vld [vmem:[%s1949_s0 + $0x30] ss:$8 sps:$4 sm:$0xff]   ;;  %v1248_v33 = vld [vmem:[%s1949_s0 + $0x44] ss:$8 sps:$4 sm:$0xff]   ;;  %v1252_v35 = vld [vmem:[%s1949_s0 + $0x40] ss:$8 sps:$4 sm:$0xff]  }
   0xc   :  { %v1247_v32 = vld [vmem:[%s1949_s0 + $0x130] ss:$8 sps:$4 sm:$0xff]   ;;  %v1250_v34 = vld [vmem:[%s1949_s0 + $0x144] ss:$8 sps:$4 sm:$0xff]   ;;  %v1253_v36 = vld [vmem:[%s1949_s0 + $0x140] ss:$8 sps:$4 sm:$0xff]  }
   0xd   :  { %v1254_v37 = vld [vmem:[%s1949_s0 + $0x54] ss:$8 sps:$4 sm:$0xff]   ;;  %v1258_v39 = vld [vmem:[%s1949_s0 + $0x50] ss:$8 sps:$4 sm:$0xff]   ;;  %v1260_v41 = vld [vmem:[%s1949_s0 + $0x64] ss:$8 sps:$4 sm:$0xff]  }
   0xe   :  { %537 = vmatpush1.bf16.msra.mxu0 %v1211_v4  ;;  %1194 = vmatpush1.bf16.msra.mxu1 %v1211_v4  ;;  %v1256_v38 = vld [vmem:[%s1949_s0 + $0x154] ss:$8 sps:$4 sm:$0xff]   ;;  %v1259_v40 = vld [vmem:[%s1949_s0 + $0x150] ss:$8 sps:$4 sm:$0xff]   ;;  %v1262_v42 = vld [vmem:[%s1949_s0 + $0x164] ss:$8 sps:$4 sm:$0xff]  }
   0xf   :  { %538 = vmatprep.subr.bf16.mxu0 %v1320_v0  ;;  %1179 = vmatprep.subr.bf16.mxu1 %v1320_v0  ;;  %v1264_v43 = vld [vmem:[%s1949_s0 + $0x60] ss:$8 sps:$4 sm:$0xff]   ;;  %v1266_v45 = vld [vmem:[%s1949_s0 + $0x74] ss:$8 sps:$4 sm:$0xff]   ;;  %v1270_v47 = vld [vmem:[%s1949_s0 + $0x70] ss:$8 sps:$4 sm:$0xff]  }
  0x10   :  { %v1265_v44 = vld [vmem:[%s1949_s0 + $0x160] ss:$8 sps:$4 sm:$0xff]   ;;  %v1268_v46 = vld [vmem:[%s1949_s0 + $0x174] ss:$8 sps:$4 sm:$0xff]   ;;  %v1271_v48 = vld [vmem:[%s1949_s0 + $0x170] ss:$8 sps:$4 sm:$0xff]  }
  0x11   :  { %v1272_v49 = vld [vmem:[%s1949_s0 + $0x84] ss:$8 sps:$4 sm:$0xff]   ;;  %v1276_v51 = vld [vmem:[%s1949_s0 + $0x80] ss:$8 sps:$4 sm:$0xff]   ;;  %v1278_v53 = vld [vmem:[%s1949_s0 + $0x94] ss:$8 sps:$4 sm:$0xff]  }
  0x12   :  { %539 = vmatpush1.bf16.msra.mxu0 %v1212_v5  ;;  %1195 = vmatpush1.bf16.msra.mxu1 %v1212_v5  ;;  %v1274_v50 = vld [vmem:[%s1949_s0 + $0x184] ss:$8 sps:$4 sm:$0xff]   ;;  %v1277_v52 = vld [vmem:[%s1949_s0 + $0x180] ss:$8 sps:$4 sm:$0xff]   ;;  %v1280_v54 = vld [vmem:[%s1949_s0 + $0x194] ss:$8 sps:$4 sm:$0xff]  }
  0x13   :  { %540 = vmatprep.subr.bf16.mxu0 %v1320_v0  ;;  %1180 = vmatprep.subr.bf16.mxu1 %v1320_v0  ;;  %v1282_v55 = vld [vmem:[%s1949_s0 + $0x90] ss:$8 sps:$4 sm:$0xff]   ;;  %v1284_v57 = vld [vmem:[%s1949_s0 + $0xa4] ss:$8 sps:$4 sm:$0xff]   ;;  %v1288_v59 = vld [vmem:[%s1949_s0 + $0xa0] ss:$8 sps:$4 sm:$0xff]  }
  0x14   :  { %v1283_v56 = vld [vmem:[%s1949_s0 + $0x190] ss:$8 sps:$4 sm:$0xff]   ;;  %v1286_v58 = vld [vmem:[%s1949_s0 + $0x1a4] ss:$8 sps:$4 sm:$0xff]   ;;  %v1289_v60 = vld [vmem:[%s1949_s0 + $0x1a0] ss:$8 sps:$4 sm:$0xff]  }
  0x15   :  { %v1290_v61 = vld [vmem:[%s1949_s0 + $0xb4] ss:$8 sps:$4 sm:$0xff]   ;;  %v1294_v63 = vld [vmem:[%s1949_s0 + $0xb0] ss:$8 sps:$4 sm:$0xff]   ;;  %v1296_v1 = vld [vmem:[%s1949_s0 + $0xc4] ss:$8 sps:$4 sm:$0xff]  }
  0x16   :  { %541 = vmatpush1.bf16.msra.mxu0 %v1213_v7  ;;  %1196 = vmatpush1.bf16.msra.mxu1 %v1213_v7  ;;  %v1292_v62 = vld [vmem:[%s1949_s0 + $0x1b4] ss:$8 sps:$4 sm:$0xff]   ;;  %v1298_v2 = vld [vmem:[%s1949_s0 + $0x1c4] ss:$8 sps:$4 sm:$0xff]   ;;  %v1300_v3 = vld [vmem:[%s1949_s0 + $0xc0] ss:$8 sps:$4 sm:$0xff]  }
  0x17   :  { %542 = vmatprep.subr.bf16.mxu0 %v1320_v0  ;;  %1181 = vmatprep.subr.bf16.mxu1 %v1320_v0  ;;  %v1301_v4 = vld [vmem:[%s1949_s0 + $0x1c0] ss:$8 sps:$4 sm:$0xff]   ;;  %v1302_v5 = vld [vmem:[%s1949_s0 + $0xd4] ss:$8 sps:$4 sm:$0xff]   ;;  %v1306_v7 = vld [vmem:[%s1949_s0 + $0xd0] ss:$8 sps:$4 sm:$0xff]  }
  0x18   :  { %v1304_v6 = vld [vmem:[%s1949_s0 + $0x1d4] ss:$8 sps:$4 sm:$0xff]   ;;  %v1307_v8 = vld [vmem:[%s1949_s0 + $0x1d0] ss:$8 sps:$4 sm:$0xff]  }
  0x1a   :  { %543 = vmatpush1.bf16.msra.mxu0 %v1214_v9  ;;  %1197 = vmatpush1.bf16.msra.mxu1 %v1214_v9  ;;  %v1308_v9 = vld [vmem:[%s1949_s0 + $0xe4] ss:$8 sps:$4 sm:$0xff]  }
  0x1b   :  { %544 = vmatprep.subr.bf16.mxu0 %v1320_v0  ;;  %1182 = vmatprep.subr.bf16.mxu1 %v1320_v0 }
  0x1e   :  { %545 = vmatpush1.bf16.msra.mxu0 %v1215_v10  ;;  %1198 = vmatpush1.bf16.msra.mxu1 %v1215_v10  ;;  %v1310_v10 = vld [vmem:[%s1949_s0 + $0x1e4] ss:$8 sps:$4 sm:$0xff]  }
  0x1f   :  { %546 = vmatprep.subr.bf16.mxu0 %v1320_v0  ;;  %1183 = vmatprep.subr.bf16.mxu1 %v1320_v0 }
  0x22   :  { %547 = vmatpush1.bf16.msra.mxu0 %v1216_v11  ;;  %1199 = vmatpush1.bf16.msra.mxu1 %v1216_v11  ;;  %v1312_v11 = vld [vmem:[%s1949_s0 + $0xe0] ss:$8 sps:$4 sm:$0xff]  }
  0x23   :  { %548 = vmatprep.subr.bf16.mxu0 %v1320_v0  ;;  %1184 = vmatprep.subr.bf16.mxu1 %v1320_v0 }
  0x26   :  { %549 = vmatpush1.bf16.msra.mxu0 %v1217_v12  ;;  %1200 = vmatpush1.bf16.msra.mxu1 %v1217_v12  ;;  %v1313_v12 = vld [vmem:[%s1949_s0 + $0x1e0] ss:$8 sps:$4 sm:$0xff]  }
  0x27   :  { %550 = vmatprep.subr.bf16.mxu0 %v1320_v0  ;;  %1185 = vmatprep.subr.bf16.mxu1 %v1320_v0 }
  0x2a   :  { %551 = vmatpush1.bf16.msra.mxu0 %v1218_v13  ;;  %1201 = vmatpush1.bf16.msra.mxu1 %v1218_v13  ;;  %v1314_v13 = vld [vmem:[%s1949_s0 + $0xf4] ss:$8 sps:$4 sm:$0xff]  }
  0x2b   :  { %552 = vmatprep.subr.bf16.mxu0 %v1320_v0  ;;  %1186 = vmatprep.subr.bf16.mxu1 %v1320_v0 }
  0x2e   :  { %553 = vmatpush1.bf16.msra.mxu0 %v1219_v14  ;;  %1202 = vmatpush1.bf16.msra.mxu1 %v1219_v14  ;;  %v1316_v14 = vld [vmem:[%s1949_s0 + $0x1f4] ss:$8 sps:$4 sm:$0xff]  }
  0x2f   :  { %554 = vmatprep.subr.bf16.mxu0 %v1320_v0  ;;  %1187 = vmatprep.subr.bf16.mxu1 %v1320_v0 }
  0x32   :  { %555 = vmatpush1.bf16.msra.mxu0 %v1220_v15  ;;  %1203 = vmatpush1.bf16.msra.mxu1 %v1220_v15  ;;  %v1318_v15 = vld [vmem:[%s1949_s0 + $0xf0] ss:$8 sps:$4 sm:$0xff]  }
  0x33   :  { %556 = vmatprep.subr.bf16.mxu0 %v1320_v0  ;;  %1188 = vmatprep.subr.bf16.mxu1 %v1320_v0 }
  0x36   :  { %557 = vmatpush1.bf16.msra.mxu0 %v1221_v16  ;;  %1204 = vmatpush1.bf16.msra.mxu1 %v1221_v16  ;;  %v1319_v16 = vld [vmem:[%s1949_s0 + $0x1f0] ss:$8 sps:$4 sm:$0xff]  }
  0x37   :  { %558 = vmatprep.subr.bf16.mxu0 %v1320_v0  ;;  %1189 = vmatprep.subr.bf16.mxu1 %v1320_v0 }
  0x3a   :  { %559 = vmatpush1.bf16.msra.mxu0 %v1222_v17  ;;  %1205 = vmatpush1.bf16.msra.mxu1 %v1222_v17  ;;  %v1621_v17 = vld [vmem:[%s1950_s2] ss:$0 sm:$0xff] }
  0x3b   :  { %560 = vmatprep.subr.bf16.mxu0 %v1320_v0  ;;  %1190 = vmatprep.subr.bf16.mxu1 %v1320_v0  ;;  %v1295_v0 = vld [vmem:[%s1949_s0 + $0x1b0] ss:$8 sps:$4 sm:$0xff]  }
  0x3e   :  { %561 = vmatpush1.bf16.msra.mxu0 %v1223_v18  ;;  %1206 = vmatpush1.bf16.msra.mxu1 %v1223_v18 }
  0x41   :  { %563 = vmatmul.mubr.bf16.vlgmr.msra.gmra.mrb[0].mxu0 %v1224_v19  ;;  %691 = vmatmul.mubr.bf16.vlgmr.msra.gmra.mrb[0].mxu1 %v1227_v20  ;;  %v1626_v19 = vld [vmem:[%s1951_s3] ss:$0 sm:$0xff] }
  0x42   :  { %570 = vmatprep.mubr.bf16.mxu0 %v1230_v21  ;;  %698 = vmatprep.mubr.bf16.mxu1 %v1232_v22 }
  0x49   :  { %571 = vmatmul.mubr.bf16.gmra.mrb[4].mxu0 %v1234_v23  ;;  %699 = vmatmul.mubr.bf16.gmra.mrb[4].mxu1 %v1235_v24 }
  0x4a   :  { %578 = vmatprep.mubr.bf16.mxu0 %v1236_v25  ;;  %706 = vmatprep.mubr.bf16.mxu1 %v1238_v26 }
  0x51   :  { %579 = vmatmul.mubr.bf16.gmra.mrb[8].mxu0 %v1240_v27  ;;  %707 = vmatmul.mubr.bf16.gmra.mrb[8].mxu1 %v1241_v28 }
  0x52   :  { %586 = vmatprep.mubr.bf16.mxu0 %v1242_v29  ;;  %714 = vmatprep.mubr.bf16.mxu1 %v1244_v30 }
  0x59   :  { %587 = vmatmul.mubr.bf16.gmra.mrb[12].mxu0 %v1246_v31  ;;  %715 = vmatmul.mubr.bf16.gmra.mrb[12].mxu1 %v1247_v32 }
  0x5a   :  { %594 = vmatprep.mubr.bf16.mxu0 %v1248_v33  ;;  %722 = vmatprep.mubr.bf16.mxu1 %v1250_v34 }
  0x61   :  { %595 = vmatmul.mubr.bf16.gmra.mrb[16].mxu0 %v1252_v35  ;;  %723 = vmatmul.mubr.bf16.gmra.mrb[16].mxu1 %v1253_v36 }
  0x62   :  { %602 = vmatprep.mubr.bf16.mxu0 %v1254_v37  ;;  %730 = vmatprep.mubr.bf16.mxu1 %v1256_v38 }
  0x69   :  { %603 = vmatmul.mubr.bf16.gmra.mrb[20].mxu0 %v1258_v39  ;;  %731 = vmatmul.mubr.bf16.gmra.mrb[20].mxu1 %v1259_v40 }
  0x6a   :  { %610 = vmatprep.mubr.bf16.mxu0 %v1260_v41  ;;  %738 = vmatprep.mubr.bf16.mxu1 %v1262_v42 }
  0x71   :  { %611 = vmatmul.mubr.bf16.gmra.mrb[24].mxu0 %v1264_v43  ;;  %739 = vmatmul.mubr.bf16.gmra.mrb[24].mxu1 %v1265_v44 }
  0x72   :  { %618 = vmatprep.mubr.bf16.mxu0 %v1266_v45  ;;  %746 = vmatprep.mubr.bf16.mxu1 %v1268_v46 }
  0x79   :  { %619 = vmatmul.mubr.bf16.gmra.mrb[28].mxu0 %v1270_v47  ;;  %747 = vmatmul.mubr.bf16.gmra.mrb[28].mxu1 %v1271_v48 }
  0x7a   :  { %626 = vmatprep.mubr.bf16.mxu0 %v1272_v49  ;;  %754 = vmatprep.mubr.bf16.mxu1 %v1274_v50 }
  0x81   :  { %627 = vmatmul.mubr.bf16.gmra.mrb[32].mxu0 %v1276_v51  ;;  %755 = vmatmul.mubr.bf16.gmra.mrb[32].mxu1 %v1277_v52 }
  0x82   :  { %634 = vmatprep.mubr.bf16.mxu0 %v1278_v53  ;;  %762 = vmatprep.mubr.bf16.mxu1 %v1280_v54 }
  0x89   :  { %635 = vmatmul.mubr.bf16.gmra.mrb[36].mxu0 %v1282_v55  ;;  %763 = vmatmul.mubr.bf16.gmra.mrb[36].mxu1 %v1283_v56 }
  0x8a   :  { %642 = vmatprep.mubr.bf16.mxu0 %v1284_v57  ;;  %770 = vmatprep.mubr.bf16.mxu1 %v1286_v58 }
  0x91   :  { %643 = vmatmul.mubr.bf16.gmra.mrb[40].mxu0 %v1288_v59  ;;  %771 = vmatmul.mubr.bf16.gmra.mrb[40].mxu1 %v1289_v60 }
  0x92   :  { %650 = vmatprep.mubr.bf16.mxu0 %v1290_v61  ;;  %778 = vmatprep.mubr.bf16.mxu1 %v1292_v62 }
  0x99   :  { %651 = vmatmul.mubr.bf16.gmra.mrb[44].mxu0 %v1294_v63  ;;  %779 = vmatmul.mubr.bf16.gmra.mrb[44].mxu1 %v1295_v0 }
  0x9a   :  { %658 = vmatprep.mubr.bf16.mxu0 %v1296_v1  ;;  %786 = vmatprep.mubr.bf16.mxu1 %v1298_v2 }
  0xa1   :  { %659 = vmatmul.mubr.bf16.gmra.mrb[48].mxu0 %v1300_v3  ;;  %787 = vmatmul.mubr.bf16.gmra.mrb[48].mxu1 %v1301_v4 }
  0xa2   :  { %666 = vmatprep.mubr.bf16.mxu0 %v1302_v5  ;;  %794 = vmatprep.mubr.bf16.mxu1 %v1304_v6 }
  0xa9   :  { %667 = vmatmul.mubr.bf16.gmra.mrb[52].mxu0 %v1306_v7  ;;  %795 = vmatmul.mubr.bf16.gmra.mrb[52].mxu1 %v1307_v8 }
  0xaa   :  { %674 = vmatprep.mubr.bf16.mxu0 %v1308_v9  ;;  %802 = vmatprep.mubr.bf16.mxu1 %v1310_v10 }
  0xb1   :  { %675 = vmatmul.mubr.bf16.gmra.mrb[56].mxu0 %v1312_v11  ;;  %803 = vmatmul.mubr.bf16.gmra.mrb[56].mxu1 %v1313_v12 }
  0xb2   :  { %682 = vmatprep.mubr.bf16.mxu0 %v1314_v13  ;;  %810 = vmatprep.mubr.bf16.mxu1 %v1316_v14 }
  0xb9   :  { %683 = vmatmul.mubr.bf16.gmra.mrb[60].mxu0 %v1318_v15  ;;  %811 = vmatmul.mubr.bf16.gmra.mrb[60].mxu1 %v1319_v16 }
 0x114   :  { %v564_v18 = vpop.f32.mrb[0].mxu0  ;;  %v692_v20 = vpop.f32.mrb[0].mxu1 }
 0x115   :  { %v826_v21 = vmul.f32 %v1621_v17, %v564_v18  ;;  %v858_v22 = vmul.f32 %v1621_v17, %v692_v20  ;;  %v566_v23 = vpop.f32.mrb[1].mxu0  ;;  %v694_v24 = vpop.f32.mrb[1].mxu1 }
 0x116   :  { %v567_v25 = vpop.f32.mrb[2].mxu0  ;;  %v695_v26 = vpop.f32.mrb[2].mxu1 }
 0x117   :  { %v897_v27 = vadd.f32 %v1626_v19, %v826_v21  ;;  %v929_v28 = vadd.f32 %v1626_v19, %v858_v22  ;;  %v827_v29 = vmul.f32 %v1621_v17, %v567_v25  ;;  %v859_v30 = vmul.f32 %v1621_v17, %v695_v26  ;;  %v569_v31 = vpop.f32.mrb[3].mxu0  ;;  %v697_v32 = vpop.f32.mrb[3].mxu1 }
 0x119   :  { %v961_v33 = vmax.f32 %v897_v27, 0.0  ;;  %v993_v34 = vmax.f32 %v929_v28, 0.0  ;;  %v898_v35 = vadd.f32 %v1626_v19, %v827_v29  ;;  %v930_v36 = vadd.f32 %v1626_v19, %v859_v30 }
 0x11b   :  { %1025 = vst [vmem:[%s1952_s4] sm:$0xff] %v961_v33  ;;  %1057 = vst [vmem:[%s1952_s4 + $0x100] sm:$0xff] %v993_v34  ;;  %v962_v37 = vmax.f32 %v898_v35, 0.0  ;;  %v994_v38 = vmax.f32 %v930_v36, 0.0 }
 0x11c   :  { %v572_v39 = vpop.f32.mrb[4].mxu0  ;;  %v700_v40 = vpop.f32.mrb[4].mxu1 }
 0x11d   :  { %1026 = vst [vmem:[%s1952_s4 + $0x8] sm:$0xff] %v962_v37  ;;  %1058 = vst [vmem:[%s1952_s4 + $0x108] sm:$0xff] %v994_v38  ;;  %v828_v41 = vmul.f32 %v1621_v17, %v572_v39  ;;  %v860_v42 = vmul.f32 %v1621_v17, %v700_v40  ;;  %v574_v43 = vpop.f32.mrb[5].mxu0  ;;  %v702_v44 = vpop.f32.mrb[5].mxu1 }
 0x11e   :  { %v575_v45 = vpop.f32.mrb[6].mxu0  ;;  %v703_v46 = vpop.f32.mrb[6].mxu1 }
 0x11f   :  { %v899_v47 = vadd.f32 %v1626_v19, %v828_v41  ;;  %v931_v48 = vadd.f32 %v1626_v19, %v860_v42  ;;  %v829_v49 = vmul.f32 %v1621_v17, %v575_v45  ;;  %v861_v50 = vmul.f32 %v1621_v17, %v703_v46  ;;  %v577_v51 = vpop.f32.mrb[7].mxu0  ;;  %v705_v52 = vpop.f32.mrb[7].mxu1 }
 0x121   :  { %v963_v53 = vmax.f32 %v899_v47, 0.0  ;;  %v995_v54 = vmax.f32 %v931_v48, 0.0  ;;  %v900_v55 = vadd.f32 %v1626_v19, %v829_v49  ;;  %v932_v56 = vadd.f32 %v1626_v19, %v861_v50 }
 0x123   :  { %1027 = vst [vmem:[%s1952_s4 + $0x10] sm:$0xff] %v963_v53  ;;  %1059 = vst [vmem:[%s1952_s4 + $0x110] sm:$0xff] %v995_v54  ;;  %v964_v57 = vmax.f32 %v900_v55, 0.0  ;;  %v996_v58 = vmax.f32 %v932_v56, 0.0 }
 0x124   :  { %v580_v59 = vpop.f32.mrb[8].mxu0  ;;  %v708_v60 = vpop.f32.mrb[8].mxu1 }
 0x125   :  { %1028 = vst [vmem:[%s1952_s4 + $0x18] sm:$0xff] %v964_v57  ;;  %1060 = vst [vmem:[%s1952_s4 + $0x118] sm:$0xff] %v996_v58  ;;  %v830_v61 = vmul.f32 %v1621_v17, %v580_v59  ;;  %v862_v62 = vmul.f32 %v1621_v17, %v708_v60  ;;  %v582_v63 = vpop.f32.mrb[9].mxu0  ;;  %v710_v0 = vpop.f32.mrb[9].mxu1 }
 0x126   :  { %v583_v1 = vpop.f32.mrb[10].mxu0  ;;  %v711_v2 = vpop.f32.mrb[10].mxu1 }
 0x127   :  { %v901_v3 = vadd.f32 %v1626_v19, %v830_v61  ;;  %v933_v4 = vadd.f32 %v1626_v19, %v862_v62  ;;  %v831_v5 = vmul.f32 %v1621_v17, %v583_v1  ;;  %v863_v6 = vmul.f32 %v1621_v17, %v711_v2  ;;  %v585_v7 = vpop.f32.mrb[11].mxu0  ;;  %v713_v8 = vpop.f32.mrb[11].mxu1 }
 0x129   :  { %v965_v9 = vmax.f32 %v901_v3, 0.0  ;;  %v997_v10 = vmax.f32 %v933_v4, 0.0  ;;  %v902_v11 = vadd.f32 %v1626_v19, %v831_v5  ;;  %v934_v12 = vadd.f32 %v1626_v19, %v863_v6 }
 0x12b   :  { %1029 = vst [vmem:[%s1952_s4 + $0x20] sm:$0xff] %v965_v9  ;;  %1061 = vst [vmem:[%s1952_s4 + $0x120] sm:$0xff] %v997_v10  ;;  %v966_v13 = vmax.f32 %v902_v11, 0.0  ;;  %v998_v14 = vmax.f32 %v934_v12, 0.0 }
 0x12c   :  { %v588_v15 = vpop.f32.mrb[12].mxu0  ;;  %v716_v16 = vpop.f32.mrb[12].mxu1 }
 0x12d   :  { %1030 = vst [vmem:[%s1952_s4 + $0x28] sm:$0xff] %v966_v13  ;;  %1062 = vst [vmem:[%s1952_s4 + $0x128] sm:$0xff] %v998_v14  ;;  %v832_v18 = vmul.f32 %v1621_v17, %v588_v15  ;;  %v864_v20 = vmul.f32 %v1621_v17, %v716_v16  ;;  %v590_v21 = vpop.f32.mrb[13].mxu0  ;;  %v718_v22 = vpop.f32.mrb[13].mxu1 }
 0x12e   :  { %v591_v23 = vpop.f32.mrb[14].mxu0  ;;  %v719_v24 = vpop.f32.mrb[14].mxu1 }
 0x12f   :  { %v903_v25 = vadd.f32 %v1626_v19, %v832_v18  ;;  %v935_v26 = vadd.f32 %v1626_v19, %v864_v20  ;;  %v833_v27 = vmul.f32 %v1621_v17, %v591_v23  ;;  %v865_v28 = vmul.f32 %v1621_v17, %v719_v24  ;;  %v593_v29 = vpop.f32.mrb[15].mxu0  ;;  %v721_v30 = vpop.f32.mrb[15].mxu1 }
 0x131   :  { %v967_v31 = vmax.f32 %v903_v25, 0.0  ;;  %v999_v32 = vmax.f32 %v935_v26, 0.0  ;;  %v904_v33 = vadd.f32 %v1626_v19, %v833_v27  ;;  %v936_v34 = vadd.f32 %v1626_v19, %v865_v28 }
 0x133   :  { %1031 = vst [vmem:[%s1952_s4 + $0x30] sm:$0xff] %v967_v31  ;;  %1063 = vst [vmem:[%s1952_s4 + $0x130] sm:$0xff] %v999_v32  ;;  %v968_v35 = vmax.f32 %v904_v33, 0.0  ;;  %v1000_v36 = vmax.f32 %v936_v34, 0.0 }
 0x134   :  { %v596_v37 = vpop.f32.mrb[16].mxu0  ;;  %v724_v38 = vpop.f32.mrb[16].mxu1 }
 0x135   :  { %1032 = vst [vmem:[%s1952_s4 + $0x38] sm:$0xff] %v968_v35  ;;  %1064 = vst [vmem:[%s1952_s4 + $0x138] sm:$0xff] %v1000_v36  ;;  %v834_v39 = vmul.f32 %v1621_v17, %v596_v37  ;;  %v866_v40 = vmul.f32 %v1621_v17, %v724_v38  ;;  %v598_v41 = vpop.f32.mrb[17].mxu0  ;;  %v726_v42 = vpop.f32.mrb[17].mxu1 }
 0x136   :  { %v599_v43 = vpop.f32.mrb[18].mxu0  ;;  %v727_v44 = vpop.f32.mrb[18].mxu1 }
 0x137   :  { %v905_v45 = vadd.f32 %v1626_v19, %v834_v39  ;;  %v937_v46 = vadd.f32 %v1626_v19, %v866_v40  ;;  %v835_v47 = vmul.f32 %v1621_v17, %v599_v43  ;;  %v867_v48 = vmul.f32 %v1621_v17, %v727_v44  ;;  %v601_v49 = vpop.f32.mrb[19].mxu0  ;;  %v729_v50 = vpop.f32.mrb[19].mxu1 }
 0x139   :  { %v969_v51 = vmax.f32 %v905_v45, 0.0  ;;  %v1001_v52 = vmax.f32 %v937_v46, 0.0  ;;  %v906_v53 = vadd.f32 %v1626_v19, %v835_v47  ;;  %v938_v54 = vadd.f32 %v1626_v19, %v867_v48 }
 0x13b   :  { %1033 = vst [vmem:[%s1952_s4 + $0x40] sm:$0xff] %v969_v51  ;;  %1065 = vst [vmem:[%s1952_s4 + $0x140] sm:$0xff] %v1001_v52  ;;  %v970_v55 = vmax.f32 %v906_v53, 0.0  ;;  %v1002_v56 = vmax.f32 %v938_v54, 0.0 }
 0x13c   :  { %v604_v57 = vpop.f32.mrb[20].mxu0  ;;  %v732_v58 = vpop.f32.mrb[20].mxu1 }
 0x13d   :  { %1034 = vst [vmem:[%s1952_s4 + $0x48] sm:$0xff] %v970_v55  ;;  %1066 = vst [vmem:[%s1952_s4 + $0x148] sm:$0xff] %v1002_v56  ;;  %v836_v59 = vmul.f32 %v1621_v17, %v604_v57  ;;  %v868_v60 = vmul.f32 %v1621_v17, %v732_v58  ;;  %v606_v61 = vpop.f32.mrb[21].mxu0  ;;  %v734_v62 = vpop.f32.mrb[21].mxu1 }
 0x13e   :  { %v607_v63 = vpop.f32.mrb[22].mxu0  ;;  %v735_v0 = vpop.f32.mrb[22].mxu1 }
 0x13f   :  { %v907_v1 = vadd.f32 %v1626_v19, %v836_v59  ;;  %v939_v2 = vadd.f32 %v1626_v19, %v868_v60  ;;  %v837_v3 = vmul.f32 %v1621_v17, %v607_v63  ;;  %v869_v4 = vmul.f32 %v1621_v17, %v735_v0  ;;  %v609_v5 = vpop.f32.mrb[23].mxu0  ;;  %v737_v6 = vpop.f32.mrb[23].mxu1 }
 0x141   :  { %v971_v7 = vmax.f32 %v907_v1, 0.0  ;;  %v1003_v8 = vmax.f32 %v939_v2, 0.0  ;;  %v908_v9 = vadd.f32 %v1626_v19, %v837_v3  ;;  %v940_v10 = vadd.f32 %v1626_v19, %v869_v4 }
 0x143   :  { %1035 = vst [vmem:[%s1952_s4 + $0x50] sm:$0xff] %v971_v7  ;;  %1067 = vst [vmem:[%s1952_s4 + $0x150] sm:$0xff] %v1003_v8  ;;  %v972_v11 = vmax.f32 %v908_v9, 0.0  ;;  %v1004_v12 = vmax.f32 %v940_v10, 0.0 }
 0x144   :  { %v612_v13 = vpop.f32.mrb[24].mxu0  ;;  %v740_v14 = vpop.f32.mrb[24].mxu1 }
 0x145   :  { %1036 = vst [vmem:[%s1952_s4 + $0x58] sm:$0xff] %v972_v11  ;;  %1068 = vst [vmem:[%s1952_s4 + $0x158] sm:$0xff] %v1004_v12  ;;  %v838_v15 = vmul.f32 %v1621_v17, %v612_v13  ;;  %v870_v16 = vmul.f32 %v1621_v17, %v740_v14  ;;  %v614_v18 = vpop.f32.mrb[25].mxu0  ;;  %v742_v20 = vpop.f32.mrb[25].mxu1 }
 0x146   :  { %v615_v21 = vpop.f32.mrb[26].mxu0  ;;  %v743_v22 = vpop.f32.mrb[26].mxu1 }
 0x147   :  { %v909_v23 = vadd.f32 %v1626_v19, %v838_v15  ;;  %v941_v24 = vadd.f32 %v1626_v19, %v870_v16  ;;  %v839_v25 = vmul.f32 %v1621_v17, %v615_v21  ;;  %v871_v26 = vmul.f32 %v1621_v17, %v743_v22  ;;  %v617_v27 = vpop.f32.mrb[27].mxu0  ;;  %v745_v28 = vpop.f32.mrb[27].mxu1 }
 0x149   :  { %v973_v29 = vmax.f32 %v909_v23, 0.0  ;;  %v1005_v30 = vmax.f32 %v941_v24, 0.0  ;;  %v910_v31 = vadd.f32 %v1626_v19, %v839_v25  ;;  %v942_v32 = vadd.f32 %v1626_v19, %v871_v26 }
 0x14b   :  { %1037 = vst [vmem:[%s1952_s4 + $0x60] sm:$0xff] %v973_v29  ;;  %1069 = vst [vmem:[%s1952_s4 + $0x160] sm:$0xff] %v1005_v30  ;;  %v974_v33 = vmax.f32 %v910_v31, 0.0  ;;  %v1006_v34 = vmax.f32 %v942_v32, 0.0 }
 0x14c   :  { %v620_v35 = vpop.f32.mrb[28].mxu0  ;;  %v748_v36 = vpop.f32.mrb[28].mxu1 }
 0x14d   :  { %1038 = vst [vmem:[%s1952_s4 + $0x68] sm:$0xff] %v974_v33  ;;  %1070 = vst [vmem:[%s1952_s4 + $0x168] sm:$0xff] %v1006_v34  ;;  %v840_v37 = vmul.f32 %v1621_v17, %v620_v35  ;;  %v872_v38 = vmul.f32 %v1621_v17, %v748_v36  ;;  %v622_v39 = vpop.f32.mrb[29].mxu0  ;;  %v750_v40 = vpop.f32.mrb[29].mxu1 }
 0x14e   :  { %v623_v41 = vpop.f32.mrb[30].mxu0  ;;  %v751_v42 = vpop.f32.mrb[30].mxu1 }
 0x14f   :  { %v911_v43 = vadd.f32 %v1626_v19, %v840_v37  ;;  %v943_v44 = vadd.f32 %v1626_v19, %v872_v38  ;;  %v841_v45 = vmul.f32 %v1621_v17, %v623_v41  ;;  %v873_v46 = vmul.f32 %v1621_v17, %v751_v42  ;;  %v625_v47 = vpop.f32.mrb[31].mxu0  ;;  %v753_v48 = vpop.f32.mrb[31].mxu1 }
 0x151   :  { %v975_v49 = vmax.f32 %v911_v43, 0.0  ;;  %v1007_v50 = vmax.f32 %v943_v44, 0.0  ;;  %v912_v51 = vadd.f32 %v1626_v19, %v841_v45  ;;  %v944_v52 = vadd.f32 %v1626_v19, %v873_v46 }
 0x153   :  { %1039 = vst [vmem:[%s1952_s4 + $0x70] sm:$0xff] %v975_v49  ;;  %1071 = vst [vmem:[%s1952_s4 + $0x170] sm:$0xff] %v1007_v50  ;;  %v976_v53 = vmax.f32 %v912_v51, 0.0  ;;  %v1008_v54 = vmax.f32 %v944_v52, 0.0 }
 0x154   :  { %v628_v55 = vpop.f32.mrb[32].mxu0  ;;  %v756_v56 = vpop.f32.mrb[32].mxu1 }
 0x155   :  { %1040 = vst [vmem:[%s1952_s4 + $0x78] sm:$0xff] %v976_v53  ;;  %1072 = vst [vmem:[%s1952_s4 + $0x178] sm:$0xff] %v1008_v54  ;;  %v842_v57 = vmul.f32 %v1621_v17, %v628_v55  ;;  %v874_v58 = vmul.f32 %v1621_v17, %v756_v56  ;;  %v630_v59 = vpop.f32.mrb[33].mxu0  ;;  %v758_v60 = vpop.f32.mrb[33].mxu1 }
 0x156   :  { %v631_v61 = vpop.f32.mrb[34].mxu0  ;;  %v759_v62 = vpop.f32.mrb[34].mxu1 }
 0x157   :  { %v913_v63 = vadd.f32 %v1626_v19, %v842_v57  ;;  %v945_v0 = vadd.f32 %v1626_v19, %v874_v58  ;;  %v843_v1 = vmul.f32 %v1621_v17, %v631_v61  ;;  %v875_v2 = vmul.f32 %v1621_v17, %v759_v62  ;;  %v633_v3 = vpop.f32.mrb[35].mxu0  ;;  %v761_v4 = vpop.f32.mrb[35].mxu1 }
 0x159   :  { %v977_v5 = vmax.f32 %v913_v63, 0.0  ;;  %v1009_v6 = vmax.f32 %v945_v0, 0.0  ;;  %v914_v7 = vadd.f32 %v1626_v19, %v843_v1  ;;  %v946_v8 = vadd.f32 %v1626_v19, %v875_v2 }
 0x15b   :  { %1041 = vst [vmem:[%s1952_s4 + $0x80] sm:$0xff] %v977_v5  ;;  %1073 = vst [vmem:[%s1952_s4 + $0x180] sm:$0xff] %v1009_v6  ;;  %v978_v9 = vmax.f32 %v914_v7, 0.0  ;;  %v1010_v10 = vmax.f32 %v946_v8, 0.0 }
 0x15c   :  { %v636_v11 = vpop.f32.mrb[36].mxu0  ;;  %v764_v12 = vpop.f32.mrb[36].mxu1 }
 0x15d   :  { %1042 = vst [vmem:[%s1952_s4 + $0x88] sm:$0xff] %v978_v9  ;;  %1074 = vst [vmem:[%s1952_s4 + $0x188] sm:$0xff] %v1010_v10  ;;  %v844_v13 = vmul.f32 %v1621_v17, %v636_v11  ;;  %v876_v14 = vmul.f32 %v1621_v17, %v764_v12  ;;  %v638_v15 = vpop.f32.mrb[37].mxu0  ;;  %v766_v16 = vpop.f32.mrb[37].mxu1 }
 0x15e   :  { %v639_v18 = vpop.f32.mrb[38].mxu0  ;;  %v767_v20 = vpop.f32.mrb[38].mxu1 }
 0x15f   :  { %v915_v21 = vadd.f32 %v1626_v19, %v844_v13  ;;  %v947_v22 = vadd.f32 %v1626_v19, %v876_v14  ;;  %v845_v23 = vmul.f32 %v1621_v17, %v639_v18  ;;  %v877_v24 = vmul.f32 %v1621_v17, %v767_v20  ;;  %v641_v25 = vpop.f32.mrb[39].mxu0  ;;  %v769_v26 = vpop.f32.mrb[39].mxu1 }
 0x161   :  { %v979_v27 = vmax.f32 %v915_v21, 0.0  ;;  %v1011_v28 = vmax.f32 %v947_v22, 0.0  ;;  %v916_v29 = vadd.f32 %v1626_v19, %v845_v23  ;;  %v948_v30 = vadd.f32 %v1626_v19, %v877_v24 }
 0x163   :  { %1043 = vst [vmem:[%s1952_s4 + $0x90] sm:$0xff] %v979_v27  ;;  %1075 = vst [vmem:[%s1952_s4 + $0x190] sm:$0xff] %v1011_v28  ;;  %v980_v31 = vmax.f32 %v916_v29, 0.0  ;;  %v1012_v32 = vmax.f32 %v948_v30, 0.0 }
 0x164   :  { %v644_v33 = vpop.f32.mrb[40].mxu0  ;;  %v772_v34 = vpop.f32.mrb[40].mxu1 }
 0x165   :  { %1044 = vst [vmem:[%s1952_s4 + $0x98] sm:$0xff] %v980_v31  ;;  %1076 = vst [vmem:[%s1952_s4 + $0x198] sm:$0xff] %v1012_v32  ;;  %v846_v35 = vmul.f32 %v1621_v17, %v644_v33  ;;  %v878_v36 = vmul.f32 %v1621_v17, %v772_v34  ;;  %v646_v37 = vpop.f32.mrb[41].mxu0  ;;  %v774_v38 = vpop.f32.mrb[41].mxu1 }
 0x166   :  { %v647_v39 = vpop.f32.mrb[42].mxu0  ;;  %v775_v40 = vpop.f32.mrb[42].mxu1 }
 0x167   :  { %v917_v41 = vadd.f32 %v1626_v19, %v846_v35  ;;  %v949_v42 = vadd.f32 %v1626_v19, %v878_v36  ;;  %v847_v43 = vmul.f32 %v1621_v17, %v647_v39  ;;  %v879_v44 = vmul.f32 %v1621_v17, %v775_v40  ;;  %v649_v45 = vpop.f32.mrb[43].mxu0  ;;  %v777_v46 = vpop.f32.mrb[43].mxu1 }
 0x169   :  { %v981_v47 = vmax.f32 %v917_v41, 0.0  ;;  %v1013_v48 = vmax.f32 %v949_v42, 0.0  ;;  %v918_v49 = vadd.f32 %v1626_v19, %v847_v43  ;;  %v950_v50 = vadd.f32 %v1626_v19, %v879_v44 }
 0x16b   :  { %1045 = vst [vmem:[%s1952_s4 + $0xa0] sm:$0xff] %v981_v47  ;;  %1077 = vst [vmem:[%s1952_s4 + $0x1a0] sm:$0xff] %v1013_v48  ;;  %v982_v51 = vmax.f32 %v918_v49, 0.0  ;;  %v1014_v52 = vmax.f32 %v950_v50, 0.0 }
 0x16c   :  { %v652_v53 = vpop.f32.mrb[44].mxu0  ;;  %v780_v54 = vpop.f32.mrb[44].mxu1 }
 0x16d   :  { %1046 = vst [vmem:[%s1952_s4 + $0xa8] sm:$0xff] %v982_v51  ;;  %1078 = vst [vmem:[%s1952_s4 + $0x1a8] sm:$0xff] %v1014_v52  ;;  %v848_v55 = vmul.f32 %v1621_v17, %v652_v53  ;;  %v880_v56 = vmul.f32 %v1621_v17, %v780_v54  ;;  %v654_v57 = vpop.f32.mrb[45].mxu0  ;;  %v782_v58 = vpop.f32.mrb[45].mxu1 }
 0x16e   :  { %v655_v59 = vpop.f32.mrb[46].mxu0  ;;  %v783_v60 = vpop.f32.mrb[46].mxu1 }
 0x16f   :  { %v919_v61 = vadd.f32 %v1626_v19, %v848_v55  ;;  %v951_v62 = vadd.f32 %v1626_v19, %v880_v56  ;;  %v849_v63 = vmul.f32 %v1621_v17, %v655_v59  ;;  %v881_v0 = vmul.f32 %v1621_v17, %v783_v60  ;;  %v657_v1 = vpop.f32.mrb[47].mxu0  ;;  %v785_v2 = vpop.f32.mrb[47].mxu1 }
 0x171   :  { %v983_v3 = vmax.f32 %v919_v61, 0.0  ;;  %v1015_v4 = vmax.f32 %v951_v62, 0.0  ;;  %v920_v5 = vadd.f32 %v1626_v19, %v849_v63  ;;  %v952_v6 = vadd.f32 %v1626_v19, %v881_v0 }
 0x173   :  { %1047 = vst [vmem:[%s1952_s4 + $0xb0] sm:$0xff] %v983_v3  ;;  %1079 = vst [vmem:[%s1952_s4 + $0x1b0] sm:$0xff] %v1015_v4  ;;  %v984_v7 = vmax.f32 %v920_v5, 0.0  ;;  %v1016_v8 = vmax.f32 %v952_v6, 0.0 }
 0x174   :  { %v660_v9 = vpop.f32.mrb[48].mxu0  ;;  %v788_v10 = vpop.f32.mrb[48].mxu1 }
 0x175   :  { %1048 = vst [vmem:[%s1952_s4 + $0xb8] sm:$0xff] %v984_v7  ;;  %1080 = vst [vmem:[%s1952_s4 + $0x1b8] sm:$0xff] %v1016_v8  ;;  %v850_v11 = vmul.f32 %v1621_v17, %v660_v9  ;;  %v882_v12 = vmul.f32 %v1621_v17, %v788_v10  ;;  %v662_v13 = vpop.f32.mrb[49].mxu0  ;;  %v790_v14 = vpop.f32.mrb[49].mxu1 }
 0x176   :  { %v663_v15 = vpop.f32.mrb[50].mxu0  ;;  %v791_v16 = vpop.f32.mrb[50].mxu1 }
 0x177   :  { %v921_v18 = vadd.f32 %v1626_v19, %v850_v11  ;;  %v953_v20 = vadd.f32 %v1626_v19, %v882_v12  ;;  %v851_v21 = vmul.f32 %v1621_v17, %v663_v15  ;;  %v883_v22 = vmul.f32 %v1621_v17, %v791_v16  ;;  %v665_v23 = vpop.f32.mrb[51].mxu0  ;;  %v793_v24 = vpop.f32.mrb[51].mxu1 }
 0x179   :  { %v985_v25 = vmax.f32 %v921_v18, 0.0  ;;  %v1017_v26 = vmax.f32 %v953_v20, 0.0  ;;  %v922_v27 = vadd.f32 %v1626_v19, %v851_v21  ;;  %v954_v28 = vadd.f32 %v1626_v19, %v883_v22 }
 0x17b   :  { %1049 = vst [vmem:[%s1952_s4 + $0xc0] sm:$0xff] %v985_v25  ;;  %1081 = vst [vmem:[%s1952_s4 + $0x1c0] sm:$0xff] %v1017_v26  ;;  %v986_v29 = vmax.f32 %v922_v27, 0.0  ;;  %v1018_v30 = vmax.f32 %v954_v28, 0.0 }
 0x17c   :  { %v668_v31 = vpop.f32.mrb[52].mxu0  ;;  %v796_v32 = vpop.f32.mrb[52].mxu1 }
 0x17d   :  { %1050 = vst [vmem:[%s1952_s4 + $0xc8] sm:$0xff] %v986_v29  ;;  %1082 = vst [vmem:[%s1952_s4 + $0x1c8] sm:$0xff] %v1018_v30  ;;  %v852_v33 = vmul.f32 %v1621_v17, %v668_v31  ;;  %v884_v34 = vmul.f32 %v1621_v17, %v796_v32  ;;  %v670_v35 = vpop.f32.mrb[53].mxu0  ;;  %v798_v36 = vpop.f32.mrb[53].mxu1 }
 0x17e   :  { %v671_v37 = vpop.f32.mrb[54].mxu0  ;;  %v799_v38 = vpop.f32.mrb[54].mxu1 }
 0x17f   :  { %v923_v39 = vadd.f32 %v1626_v19, %v852_v33  ;;  %v955_v40 = vadd.f32 %v1626_v19, %v884_v34  ;;  %v853_v41 = vmul.f32 %v1621_v17, %v671_v37  ;;  %v885_v42 = vmul.f32 %v1621_v17, %v799_v38  ;;  %v673_v43 = vpop.f32.mrb[55].mxu0  ;;  %v801_v44 = vpop.f32.mrb[55].mxu1 }
 0x181   :  { %v987_v45 = vmax.f32 %v923_v39, 0.0  ;;  %v1019_v46 = vmax.f32 %v955_v40, 0.0  ;;  %v924_v47 = vadd.f32 %v1626_v19, %v853_v41  ;;  %v956_v48 = vadd.f32 %v1626_v19, %v885_v42 }
 0x183   :  { %1051 = vst [vmem:[%s1952_s4 + $0xd0] sm:$0xff] %v987_v45  ;;  %1083 = vst [vmem:[%s1952_s4 + $0x1d0] sm:$0xff] %v1019_v46  ;;  %v988_v49 = vmax.f32 %v924_v47, 0.0  ;;  %v1020_v50 = vmax.f32 %v956_v48, 0.0 }
 0x184   :  { %v676_v51 = vpop.f32.mrb[56].mxu0  ;;  %v804_v52 = vpop.f32.mrb[56].mxu1 }
 0x185   :  { %1052 = vst [vmem:[%s1952_s4 + $0xd8] sm:$0xff] %v988_v49  ;;  %1084 = vst [vmem:[%s1952_s4 + $0x1d8] sm:$0xff] %v1020_v50  ;;  %v854_v53 = vmul.f32 %v1621_v17, %v676_v51  ;;  %v886_v54 = vmul.f32 %v1621_v17, %v804_v52  ;;  %v678_v55 = vpop.f32.mrb[57].mxu0  ;;  %v806_v56 = vpop.f32.mrb[57].mxu1 }
 0x186   :  { %v679_v57 = vpop.f32.mrb[58].mxu0  ;;  %v807_v58 = vpop.f32.mrb[58].mxu1 }
 0x187   :  { %v925_v59 = vadd.f32 %v1626_v19, %v854_v53  ;;  %v957_v60 = vadd.f32 %v1626_v19, %v886_v54  ;;  %v855_v61 = vmul.f32 %v1621_v17, %v679_v57  ;;  %v887_v62 = vmul.f32 %v1621_v17, %v807_v58  ;;  %v681_v63 = vpop.f32.mrb[59].mxu0  ;;  %v809_v0 = vpop.f32.mrb[59].mxu1 }
 0x189   :  { %v989_v1 = vmax.f32 %v925_v59, 0.0  ;;  %v1021_v2 = vmax.f32 %v957_v60, 0.0  ;;  %v926_v3 = vadd.f32 %v1626_v19, %v855_v61  ;;  %v958_v4 = vadd.f32 %v1626_v19, %v887_v62 }
 0x18b   :  { %1053 = vst [vmem:[%s1952_s4 + $0xe0] sm:$0xff] %v989_v1  ;;  %1085 = vst [vmem:[%s1952_s4 + $0x1e0] sm:$0xff] %v1021_v2  ;;  %v990_v5 = vmax.f32 %v926_v3, 0.0  ;;  %v1022_v6 = vmax.f32 %v958_v4, 0.0 }
 0x18c   :  { %v684_v7 = vpop.f32.mrb[60].mxu0  ;;  %v812_v8 = vpop.f32.mrb[60].mxu1 }
 0x18d   :  { %1054 = vst [vmem:[%s1952_s4 + $0xe8] sm:$0xff] %v990_v5  ;;  %1086 = vst [vmem:[%s1952_s4 + $0x1e8] sm:$0xff] %v1022_v6  ;;  %v856_v9 = vmul.f32 %v1621_v17, %v684_v7  ;;  %v888_v10 = vmul.f32 %v1621_v17, %v812_v8  ;;  %v686_v11 = vpop.f32.mrb[61].mxu0  ;;  %v814_v12 = vpop.f32.mrb[61].mxu1 }
 0x18e   :  { %v687_v13 = vpop.f32.mrb[62].mxu0  ;;  %v815_v14 = vpop.f32.mrb[62].mxu1 }
 0x18f   :  { %v927_v15 = vadd.f32 %v1626_v19, %v856_v9  ;;  %v959_v16 = vadd.f32 %v1626_v19, %v888_v10  ;;  %v857_v18 = vmul.f32 %v1621_v17, %v687_v13  ;;  %v889_v20 = vmul.f32 %v1621_v17, %v815_v14  ;;  %v689_v21 = vpop.f32.mrb[63].mxu0  ;;  %v817_v22 = vpop.f32.mrb[63].mxu1 }
 0x191   :  { %v991_v23 = vmax.f32 %v927_v15, 0.0  ;;  %v1023_v24 = vmax.f32 %v959_v16, 0.0  ;;  %v928_v25 = vadd.f32 %v1626_v19, %v857_v18  ;;  %v960_v26 = vadd.f32 %v1626_v19, %v889_v20 }
 0x193   :  { %1055 = vst [vmem:[%s1952_s4 + $0xf0] sm:$0xff] %v991_v23  ;;  %1087 = vst [vmem:[%s1952_s4 + $0x1f0] sm:$0xff] %v1023_v24  ;;  %v992_v27 = vmax.f32 %v928_v25, 0.0  ;;  %v1024_v28 = vmax.f32 %v960_v26, 0.0 }
 0x195   :  { %1056 = vst [vmem:[%s1952_s4 + $0xf8] sm:$0xff] %v992_v27  ;;  %1088 = vst [vmem:[%s1952_s4 + $0x1f8] sm:$0xff] %v1024_v28 }

// kernel: densenet_forward.123
= control target key start
LH: loop header
LB: loop body
LE: loop exit
PB: predicated region body
PF: predicated region fallthrough
CT: control target
= control target key end

     0   :  { %s854_s0 = inlined_call_operand.vmem [shape: f32[128,128], index: 0, kind: input, shape index: {}]   ;;  %s855_s1 = inlined_call_operand.vmem [shape: f32[128,128], index: 1, kind: input, shape index: {}]   ;;  %s856_s2 = inlined_call_operand.vmem [shape: f32[128,128], index: 2, kind: input, shape index: {}]   ;;  %s857_s3 = inlined_call_operand.vmem [shape: f32[128,128], index: 3, kind: input, shape index: {}]   ;;  %s858_s4 = inlined_call_operand.vmem [shape: f32[128,128], index: 4, kind: input, shape index: {}]   ;;  %s859_s5 = inlined_call_operand.vmem [shape: f32[128,128], index: 5, kind: input, shape index: {}]   ;;  %s860_s6 = inlined_call_operand.vmem [shape: f32[128,128], index: 6, kind: input, shape index: {}]   ;;  %s861_s7 = inlined_call_operand.vmem [shape: f32[128,128], index: 7, kind: input, shape index: {}]   ;;  %s862_s8 = inlined_call_operand.vmem [shape: f32[128,128], index: 8, kind: input, shape index: {}]   ;;  %s863_s9 = inlined_call_operand.vmem [shape: f32[128,128], index: 9, kind: output, shape index: {}]  }
   0x1   :  { %v32_v0 = vld [vmem:[%s854_s0] sm:$0xff]  ;;  %v33_v6 = vld [vmem:[%s854_s0 + $0x8] sm:$0xff]  ;;  %v34_v15 = vld [vmem:[%s854_s0 + $0x10] sm:$0xff] }
   0x2   :  { %v48_v1 = vld [vmem:[%s855_s1] sm:$0xff]  ;;  %v49_v7 = vld [vmem:[%s855_s1 + $0x8] sm:$0xff]  ;;  %v50_v16 = vld [vmem:[%s855_s1 + $0x10] sm:$0xff] }
   0x3   :  { %v80_v2 = vld [vmem:[%s856_s2] sm:$0xff]  ;;  %v64_v3 = vmax.f32 %v32_v0, %v48_v1  ;;  %v81_v8 = vld [vmem:[%s856_s2 + $0x8] sm:$0xff]  ;;  %v65_v10 = vmax.f32 %v33_v6, %v49_v7  ;;  %v82_v17 = vld [vmem:[%s856_s2 + $0x10] sm:$0xff]  ;;  %v66_v20 = vmax.f32 %v34_v15, %v50_v16 }
   0x4   :  { %v112_v4 = vld [vmem:[%s857_s3] sm:$0xff]  ;;  %v113_v13 = vld [vmem:[%s857_s3 + $0x8] sm:$0xff]  ;;  %v114_v24 = vld [vmem:[%s857_s3 + $0x10] sm:$0xff] }
   0x5   :  { %v96_v5 = vmax.f32 %v64_v3, %v80_v2  ;;  %v144_v9 = vld [vmem:[%s858_s4] sm:$0xff]  ;;  %v97_v14 = vmax.f32 %v65_v10, %v81_v8  ;;  %v145_v19 = vld [vmem:[%s858_s4 + $0x8] sm:$0xff]  ;;  %v98_v26 = vmax.f32 %v66_v20, %v82_v17  ;;  %v35_v27 = vld [vmem:[%s854_s0 + $0x18] sm:$0xff] }
   0x6   :  { %v176_v12 = vld [vmem:[%s859_s5] sm:$0xff]  ;;  %v177_v23 = vld [vmem:[%s859_s5 + $0x8] sm:$0xff]  ;;  %v51_v28 = vld [vmem:[%s855_s1 + $0x18] sm:$0xff] }
   0x7   :  { %v128_v11 = vmax.f32 %v96_v5, %v112_v4  ;;  %v208_v21 = vld [vmem:[%s860_s6] sm:$0xff]  ;;  %v129_v22 = vmax.f32 %v97_v14, %v113_v13  ;;  %v83_v29 = vld [vmem:[%s856_s2 + $0x18] sm:$0xff]  ;;  %v146_v33 = vld [vmem:[%s858_s4 + $0x10] sm:$0xff]  ;;  %v67_v34 = vmax.f32 %v35_v27, %v51_v28  ;;  %v130_v37 = vmax.f32 %v98_v26, %v114_v24 }
   0x8   :  { %v240_v30 = vld [vmem:[%s861_s7] sm:$0xff]  ;;  %v209_v36 = vld [vmem:[%s860_s6 + $0x8] sm:$0xff]  ;;  %v178_v38 = vld [vmem:[%s859_s5 + $0x10] sm:$0xff] }
   0x9   :  { %v160_v18 = vmax.f32 %v128_v11, %v144_v9  ;;  %v272_v31 = vld [vmem:[%s862_s8] sm:$0xff]  ;;  %v161_v32 = vmax.f32 %v129_v22, %v145_v19  ;;  %v115_v39 = vld [vmem:[%s857_s3 + $0x18] sm:$0xff]  ;;  %v99_v41 = vmax.f32 %v67_v34, %v83_v29  ;;  %v241_v46 = vld [vmem:[%s861_s7 + $0x8] sm:$0xff]  ;;  %v162_v48 = vmax.f32 %v130_v37, %v146_v33 }
   0xa   :  { %v36_v42 = vld [vmem:[%s854_s0 + $0x20] sm:$0xff]  ;;  %v273_v47 = vld [vmem:[%s862_s8 + $0x8] sm:$0xff]  ;;  %v147_v49 = vld [vmem:[%s858_s4 + $0x18] sm:$0xff] }
   0xb   :  { %v192_v25 = vmax.f32 %v160_v18, %v176_v12  ;;  %v193_v40 = vmax.f32 %v161_v32, %v177_v23  ;;  %v52_v43 = vld [vmem:[%s855_s1 + $0x20] sm:$0xff]  ;;  %v210_v52 = vld [vmem:[%s860_s6 + $0x10] sm:$0xff]  ;;  %v131_v53 = vmax.f32 %v99_v41, %v115_v39  ;;  %v179_v54 = vld [vmem:[%s859_s5 + $0x18] sm:$0xff]  ;;  %v194_v57 = vmax.f32 %v162_v48, %v178_v38 }
   0xc   :  { %v84_v44 = vld [vmem:[%s856_s2 + $0x20] sm:$0xff]  ;;  %v68_v50 = vmax.f32 %v36_v42, %v52_v43  ;;  %v37_v59 = vld [vmem:[%s854_s0 + $0x28] sm:$0xff]  ;;  %v242_v63 = vld [vmem:[%s861_s7 + $0x10] sm:$0xff] }
   0xd   :  { %v224_v35 = vmax.f32 %v192_v25, %v208_v21  ;;  %v225_v51 = vmax.f32 %v193_v40, %v209_v36  ;;  %v116_v55 = vld [vmem:[%s857_s3 + $0x20] sm:$0xff]  ;;  %v53_v60 = vld [vmem:[%s855_s1 + $0x28] sm:$0xff]  ;;  %v274_v0 = vld [vmem:[%s862_s8 + $0x10] sm:$0xff]  ;;  %v163_v1 = vmax.f32 %v131_v53, %v147_v49  ;;  %v226_v4 = vmax.f32 %v194_v57, %v210_v52 }
   0xe   :  { %v100_v58 = vmax.f32 %v68_v50, %v84_v44  ;;  %v85_v61 = vld [vmem:[%s856_s2 + $0x28] sm:$0xff]  ;;  %v148_v2 = vld [vmem:[%s858_s4 + $0x20] sm:$0xff]  ;;  %v69_v3 = vmax.f32 %v37_v59, %v53_v60  ;;  %v211_v5 = vld [vmem:[%s860_s6 + $0x18] sm:$0xff] }
   0xf   :  { %v256_v45 = vmax.f32 %v224_v35, %v240_v30  ;;  %v257_v62 = vmax.f32 %v225_v51, %v241_v46  ;;  %v180_v7 = vld [vmem:[%s859_s5 + $0x20] sm:$0xff]  ;;  %v117_v8 = vld [vmem:[%s857_s3 + $0x28] sm:$0xff]  ;;  %v195_v10 = vmax.f32 %v163_v1, %v179_v54  ;;  %v38_v12 = vld [vmem:[%s854_s0 + $0x30] sm:$0xff]  ;;  %v258_v15 = vmax.f32 %v226_v4, %v242_v63 }
  0x10   :  { %v132_v6 = vmax.f32 %v100_v58, %v116_v55  ;;  %v101_v11 = vmax.f32 %v69_v3, %v85_v61  ;;  %v54_v13 = vld [vmem:[%s855_s1 + $0x30] sm:$0xff]  ;;  %v243_v16 = vld [vmem:[%s861_s7 + $0x18] sm:$0xff]  ;;  %v149_v19 = vld [vmem:[%s858_s4 + $0x28] sm:$0xff] }
  0x11   :  { %v288_v56 = vmax.f32 %v256_v45, %v272_v31  ;;  %v289_v9 = vmax.f32 %v257_v62, %v273_v47  ;;  %v86_v14 = vld [vmem:[%s856_s2 + $0x30] sm:$0xff]  ;;  %v275_v17 = vld [vmem:[%s862_s8 + $0x18] sm:$0xff]  ;;  %v70_v20 = vmax.f32 %v38_v12, %v54_v13  ;;  %v227_v21 = vmax.f32 %v195_v10, %v211_v5  ;;  %v212_v22 = vld [vmem:[%s860_s6 + $0x20] sm:$0xff] }
  0x12   :  { %v164_v18 = vmax.f32 %v132_v6, %v148_v2  ;;  %v133_v23 = vmax.f32 %v101_v11, %v117_v8  ;;  %v181_v24 = vld [vmem:[%s859_s5 + $0x28] sm:$0xff]  ;;  %v118_v25 = vld [vmem:[%s857_s3 + $0x30] sm:$0xff]  ;;  %v290_v26 = vmax.f32 %v258_v15, %v274_v0  ;;  %v39_v29 = vld [vmem:[%s854_s0 + $0x38] sm:$0xff] }
  0x13   :  { %304 = vst [vmem:[%s863_s9] sm:$0xff] %v288_v56  ;;  %305 = vst [vmem:[%s863_s9 + $0x8] sm:$0xff] %v289_v9  ;;  %v102_v28 = vmax.f32 %v70_v20, %v86_v14  ;;  %v55_v30 = vld [vmem:[%s855_s1 + $0x38] sm:$0xff]  ;;  %v259_v32 = vmax.f32 %v227_v21, %v243_v16  ;;  %v244_v33 = vld [vmem:[%s861_s7 + $0x20] sm:$0xff] }
  0x14   :  { %v196_v27 = vmax.f32 %v164_v18, %v180_v7  ;;  %v87_v31 = vld [vmem:[%s856_s2 + $0x38] sm:$0xff]  ;;  %v276_v34 = vld [vmem:[%s862_s8 + $0x20] sm:$0xff]  ;;  %v165_v35 = vmax.f32 %v133_v23, %v149_v19  ;;  %v150_v36 = vld [vmem:[%s858_s4 + $0x30] sm:$0xff]  ;;  %v71_v37 = vmax.f32 %v39_v29, %v55_v30  ;;  %306 = vst [vmem:[%s863_s9 + $0x10] sm:$0xff] %v290_v26 }
  0x15   :  { %v213_v39 = vld [vmem:[%s860_s6 + $0x28] sm:$0xff]  ;;  %v134_v40 = vmax.f32 %v102_v28, %v118_v25  ;;  %v182_v41 = vld [vmem:[%s859_s5 + $0x30] sm:$0xff]  ;;  %v119_v42 = vld [vmem:[%s857_s3 + $0x38] sm:$0xff]  ;;  %v291_v43 = vmax.f32 %v259_v32, %v275_v17 }
  0x16   :  { %v228_v38 = vmax.f32 %v196_v27, %v212_v22  ;;  %v197_v44 = vmax.f32 %v165_v35, %v181_v24  ;;  %v103_v45 = vmax.f32 %v71_v37, %v87_v31  ;;  %v40_v46 = vld [vmem:[%s854_s0 + $0x40] sm:$0xff]  ;;  %v245_v50 = vld [vmem:[%s861_s7 + $0x28] sm:$0xff]  ;;  %v151_v53 = vld [vmem:[%s858_s4 + $0x38] sm:$0xff] }
  0x17   :  { %v56_v47 = vld [vmem:[%s855_s1 + $0x40] sm:$0xff]  ;;  %v277_v51 = vld [vmem:[%s862_s8 + $0x28] sm:$0xff]  ;;  %v166_v52 = vmax.f32 %v134_v40, %v150_v36  ;;  %307 = vst [vmem:[%s863_s9 + $0x18] sm:$0xff] %v291_v43  ;;  %v214_v56 = vld [vmem:[%s860_s6 + $0x30] sm:$0xff] }
  0x18   :  { %v88_v48 = vld [vmem:[%s856_s2 + $0x40] sm:$0xff]  ;;  %v260_v49 = vmax.f32 %v228_v38, %v244_v33  ;;  %v72_v54 = vmax.f32 %v40_v46, %v56_v47  ;;  %v229_v55 = vmax.f32 %v197_v44, %v213_v39  ;;  %v135_v57 = vmax.f32 %v103_v45, %v119_v42  ;;  %v183_v58 = vld [vmem:[%s859_s5 + $0x38] sm:$0xff]  ;;  %v41_v63 = vld [vmem:[%s854_s0 + $0x48] sm:$0xff] }
  0x19   :  { %v120_v59 = vld [vmem:[%s857_s3 + $0x40] sm:$0xff]  ;;  %v198_v61 = vmax.f32 %v166_v52, %v182_v41  ;;  %v57_v0 = vld [vmem:[%s855_s1 + $0x48] sm:$0xff]  ;;  %v246_v3 = vld [vmem:[%s861_s7 + $0x30] sm:$0xff] }
  0x1a   :  { %v292_v60 = vmax.f32 %v260_v49, %v276_v34  ;;  %v104_v62 = vmax.f32 %v72_v54, %v88_v48  ;;  %v89_v1 = vld [vmem:[%s856_s2 + $0x48] sm:$0xff]  ;;  %v261_v2 = vmax.f32 %v229_v55, %v245_v50  ;;  %v278_v4 = vld [vmem:[%s862_s8 + $0x30] sm:$0xff]  ;;  %v167_v5 = vmax.f32 %v135_v57, %v151_v53  ;;  %v152_v6 = vld [vmem:[%s858_s4 + $0x40] sm:$0xff] }
  0x1b   :  { %v73_v7 = vmax.f32 %v41_v63, %v57_v0  ;;  %v230_v8 = vmax.f32 %v198_v61, %v214_v56  ;;  %v215_v9 = vld [vmem:[%s860_s6 + $0x38] sm:$0xff]  ;;  %v184_v11 = vld [vmem:[%s859_s5 + $0x40] sm:$0xff]  ;;  %v121_v12 = vld [vmem:[%s857_s3 + $0x48] sm:$0xff] }
  0x1c   :  { %308 = vst [vmem:[%s863_s9 + $0x20] sm:$0xff] %v292_v60  ;;  %v136_v10 = vmax.f32 %v104_v62, %v120_v59  ;;  %v293_v13 = vmax.f32 %v261_v2, %v277_v51  ;;  %v199_v14 = vmax.f32 %v167_v5, %v183_v58  ;;  %v42_v16 = vld [vmem:[%s854_s0 + $0x50] sm:$0xff]  ;;  %v247_v20 = vld [vmem:[%s861_s7 + $0x38] sm:$0xff]  ;;  %v153_v23 = vld [vmem:[%s858_s4 + $0x48] sm:$0xff] }
  0x1d   :  { %v105_v15 = vmax.f32 %v73_v7, %v89_v1  ;;  %v58_v17 = vld [vmem:[%s855_s1 + $0x50] sm:$0xff]  ;;  %v262_v19 = vmax.f32 %v230_v8, %v246_v3  ;;  %v279_v21 = vld [vmem:[%s862_s8 + $0x38] sm:$0xff]  ;;  %v216_v26 = vld [vmem:[%s860_s6 + $0x40] sm:$0xff] }
  0x1e   :  { %v90_v18 = vld [vmem:[%s856_s2 + $0x50] sm:$0xff]  ;;  %v168_v22 = vmax.f32 %v136_v10, %v152_v6  ;;  %v74_v24 = vmax.f32 %v42_v16, %v58_v17  ;;  %309 = vst [vmem:[%s863_s9 + $0x28] sm:$0xff] %v293_v13  ;;  %v231_v25 = vmax.f32 %v199_v14, %v215_v9  ;;  %v185_v28 = vld [vmem:[%s859_s5 + $0x48] sm:$0xff]  ;;  %v43_v33 = vld [vmem:[%s854_s0 + $0x58] sm:$0xff] }
  0x1f   :  { %v137_v27 = vmax.f32 %v105_v15, %v121_v12  ;;  %v122_v29 = vld [vmem:[%s857_s3 + $0x50] sm:$0xff]  ;;  %v294_v30 = vmax.f32 %v262_v19, %v278_v4  ;;  %v59_v34 = vld [vmem:[%s855_s1 + $0x58] sm:$0xff]  ;;  %v248_v37 = vld [vmem:[%s861_s7 + $0x40] sm:$0xff] }
  0x20   :  { %v200_v31 = vmax.f32 %v168_v22, %v184_v11  ;;  %v106_v32 = vmax.f32 %v74_v24, %v90_v18  ;;  %v91_v35 = vld [vmem:[%s856_s2 + $0x58] sm:$0xff]  ;;  %v263_v36 = vmax.f32 %v231_v25, %v247_v20  ;;  %v280_v38 = vld [vmem:[%s862_s8 + $0x40] sm:$0xff]  ;;  %v154_v40 = vld [vmem:[%s858_s4 + $0x50] sm:$0xff]  ;;  %v75_v41 = vmax.f32 %v43_v33, %v59_v34 }
  0x21   :  { %v169_v39 = vmax.f32 %v137_v27, %v153_v23  ;;  %310 = vst [vmem:[%s863_s9 + $0x30] sm:$0xff] %v294_v30  ;;  %v217_v43 = vld [vmem:[%s860_s6 + $0x48] sm:$0xff]  ;;  %v186_v45 = vld [vmem:[%s859_s5 + $0x50] sm:$0xff]  ;;  %v123_v46 = vld [vmem:[%s857_s3 + $0x58] sm:$0xff] }
  0x22   :  { %v232_v42 = vmax.f32 %v200_v31, %v216_v26  ;;  %v138_v44 = vmax.f32 %v106_v32, %v122_v29  ;;  %v295_v47 = vmax.f32 %v263_v36, %v279_v21  ;;  %v107_v49 = vmax.f32 %v75_v41, %v91_v35  ;;  %v44_v50 = vld [vmem:[%s854_s0 + $0x60] sm:$0xff]  ;;  %v249_v54 = vld [vmem:[%s861_s7 + $0x48] sm:$0xff]  ;;  %v155_v57 = vld [vmem:[%s858_s4 + $0x58] sm:$0xff] }
  0x23   :  { %v201_v48 = vmax.f32 %v169_v39, %v185_v28  ;;  %v60_v51 = vld [vmem:[%s855_s1 + $0x60] sm:$0xff]  ;;  %v281_v55 = vld [vmem:[%s862_s8 + $0x48] sm:$0xff]  ;;  %v218_v60 = vld [vmem:[%s860_s6 + $0x50] sm:$0xff] }
  0x24   :  { %v92_v52 = vld [vmem:[%s856_s2 + $0x60] sm:$0xff]  ;;  %v264_v53 = vmax.f32 %v232_v42, %v248_v37  ;;  %v170_v56 = vmax.f32 %v138_v44, %v154_v40  ;;  %v76_v58 = vmax.f32 %v44_v50, %v60_v51  ;;  %311 = vst [vmem:[%s863_s9 + $0x38] sm:$0xff] %v295_v47  ;;  %v139_v61 = vmax.f32 %v107_v49, %v123_v46  ;;  %v187_v62 = vld [vmem:[%s859_s5 + $0x58] sm:$0xff]  ;;  %v45_v3 = vld [vmem:[%s854_s0 + $0x68] sm:$0xff] }
  0x25   :  { %v233_v59 = vmax.f32 %v201_v48, %v217_v43  ;;  %v124_v63 = vld [vmem:[%s857_s3 + $0x60] sm:$0xff]  ;;  %v61_v4 = vld [vmem:[%s855_s1 + $0x68] sm:$0xff]  ;;  %v250_v7 = vld [vmem:[%s861_s7 + $0x50] sm:$0xff] }
  0x26   :  { %v296_v0 = vmax.f32 %v264_v53, %v280_v38  ;;  %v202_v1 = vmax.f32 %v170_v56, %v186_v45  ;;  %v108_v2 = vmax.f32 %v76_v58, %v92_v52  ;;  %v93_v5 = vld [vmem:[%s856_s2 + $0x68] sm:$0xff]  ;;  %v282_v8 = vld [vmem:[%s862_s8 + $0x50] sm:$0xff]  ;;  %v171_v9 = vmax.f32 %v139_v61, %v155_v57  ;;  %v156_v10 = vld [vmem:[%s858_s4 + $0x60] sm:$0xff] }
  0x27   :  { %v265_v6 = vmax.f32 %v233_v59, %v249_v54  ;;  %v77_v11 = vmax.f32 %v45_v3, %v61_v4  ;;  %v219_v13 = vld [vmem:[%s860_s6 + $0x58] sm:$0xff]  ;;  %v188_v15 = vld [vmem:[%s859_s5 + $0x60] sm:$0xff]  ;;  %v125_v16 = vld [vmem:[%s857_s3 + $0x68] sm:$0xff] }
  0x28   :  { %312 = vst [vmem:[%s863_s9 + $0x40] sm:$0xff] %v296_v0  ;;  %v234_v12 = vmax.f32 %v202_v1, %v218_v60  ;;  %v140_v14 = vmax.f32 %v108_v2, %v124_v63  ;;  %v203_v18 = vmax.f32 %v171_v9, %v187_v62  ;;  %v46_v20 = vld [vmem:[%s854_s0 + $0x70] sm:$0xff]  ;;  %v251_v24 = vld [vmem:[%s861_s7 + $0x58] sm:$0xff]  ;;  %v157_v27 = vld [vmem:[%s858_s4 + $0x68] sm:$0xff] }
  0x29   :  { %v297_v17 = vmax.f32 %v265_v6, %v281_v55  ;;  %v109_v19 = vmax.f32 %v77_v11, %v93_v5  ;;  %v62_v21 = vld [vmem:[%s855_s1 + $0x70] sm:$0xff]  ;;  %v283_v25 = vld [vmem:[%s862_s8 + $0x58] sm:$0xff]  ;;  %v220_v30 = vld [vmem:[%s860_s6 + $0x60] sm:$0xff] }
  0x2a   :  { %v94_v22 = vld [vmem:[%s856_s2 + $0x70] sm:$0xff]  ;;  %v266_v23 = vmax.f32 %v234_v12, %v250_v7  ;;  %v172_v26 = vmax.f32 %v140_v14, %v156_v10  ;;  %v78_v28 = vmax.f32 %v46_v20, %v62_v21  ;;  %v235_v29 = vmax.f32 %v203_v18, %v219_v13  ;;  %v189_v32 = vld [vmem:[%s859_s5 + $0x68] sm:$0xff]  ;;  %v47_v37 = vld [vmem:[%s854_s0 + $0x78] sm:$0xff] }
  0x2b   :  { %313 = vst [vmem:[%s863_s9 + $0x48] sm:$0xff] %v297_v17  ;;  %v141_v31 = vmax.f32 %v109_v19, %v125_v16  ;;  %v126_v33 = vld [vmem:[%s857_s3 + $0x70] sm:$0xff]  ;;  %v63_v38 = vld [vmem:[%s855_s1 + $0x78] sm:$0xff]  ;;  %v252_v41 = vld [vmem:[%s861_s7 + $0x60] sm:$0xff] }
  0x2c   :  { %v298_v34 = vmax.f32 %v266_v23, %v282_v8  ;;  %v204_v35 = vmax.f32 %v172_v26, %v188_v15  ;;  %v110_v36 = vmax.f32 %v78_v28, %v94_v22  ;;  %v95_v39 = vld [vmem:[%s856_s2 + $0x78] sm:$0xff]  ;;  %v267_v40 = vmax.f32 %v235_v29, %v251_v24  ;;  %v158_v43 = vld [vmem:[%s858_s4 + $0x70] sm:$0xff]  ;;  %v221_v46 = vld [vmem:[%s860_s6 + $0x68] sm:$0xff] }
  0x2d   :  { %v173_v42 = vmax.f32 %v141_v31, %v157_v27  ;;  %v79_v44 = vmax.f32 %v47_v37, %v63_v38  ;;  %v127_v48 = vld [vmem:[%s857_s3 + $0x78] sm:$0xff]  ;;  %v284_v50 = vld [vmem:[%s862_s8 + $0x60] sm:$0xff]  ;;  %v190_v52 = vld [vmem:[%s859_s5 + $0x70] sm:$0xff] }
  0x2e   :  { %314 = vst [vmem:[%s863_s9 + $0x50] sm:$0xff] %v298_v34  ;;  %v236_v45 = vmax.f32 %v204_v35, %v220_v30  ;;  %v142_v47 = vmax.f32 %v110_v36, %v126_v33  ;;  %v299_v49 = vmax.f32 %v267_v40, %v283_v25  ;;  %v253_v55 = vld [vmem:[%s861_s7 + $0x68] sm:$0xff]  ;;  %v159_v57 = vld [vmem:[%s858_s4 + $0x78] sm:$0xff]  ;;  %v222_v59 = vld [vmem:[%s860_s6 + $0x70] sm:$0xff] }
  0x2f   :  { %v205_v51 = vmax.f32 %v173_v42, %v189_v32  ;;  %v111_v53 = vmax.f32 %v79_v44, %v95_v39  ;;  %v285_v62 = vld [vmem:[%s862_s8 + $0x68] sm:$0xff]  ;;  %v191_v0 = vld [vmem:[%s859_s5 + $0x78] sm:$0xff]  ;;  %v254_v2 = vld [vmem:[%s861_s7 + $0x70] sm:$0xff] }
  0x30   :  { %v268_v54 = vmax.f32 %v236_v45, %v252_v41  ;;  %v174_v56 = vmax.f32 %v142_v47, %v158_v43  ;;  %315 = vst [vmem:[%s863_s9 + $0x58] sm:$0xff] %v299_v49  ;;  %v223_v5 = vld [vmem:[%s860_s6 + $0x78] sm:$0xff]  ;;  %v286_v7 = vld [vmem:[%s862_s8 + $0x70] sm:$0xff] }
  0x31   :  { %v237_v58 = vmax.f32 %v205_v51, %v221_v46  ;;  %v143_v60 = vmax.f32 %v111_v53, %v127_v48  ;;  %v255_v10 = vld [vmem:[%s861_s7 + $0x78] sm:$0xff] }
  0x32   :  { %v300_v61 = vmax.f32 %v268_v54, %v284_v50  ;;  %v206_v63 = vmax.f32 %v174_v56, %v190_v52  ;;  %v287_v13 = vld [vmem:[%s862_s8 + $0x78] sm:$0xff] }
  0x33   :  { %v269_v1 = vmax.f32 %v237_v58, %v253_v55  ;;  %v175_v3 = vmax.f32 %v143_v60, %v159_v57 }
  0x34   :  { %316 = vst [vmem:[%s863_s9 + $0x60] sm:$0xff] %v300_v61  ;;  %v238_v4 = vmax.f32 %v206_v63, %v222_v59 }
  0x35   :  { %v301_v6 = vmax.f32 %v269_v1, %v285_v62  ;;  %v207_v8 = vmax.f32 %v175_v3, %v191_v0 }
  0x36   :  { %v270_v9 = vmax.f32 %v238_v4, %v254_v2 }
  0x37   :  { %317 = vst [vmem:[%s863_s9 + $0x68] sm:$0xff] %v301_v6  ;;  %v239_v11 = vmax.f32 %v207_v8, %v223_v5 }
  0x38   :  { %v302_v12 = vmax.f32 %v270_v9, %v286_v7 }
  0x39   :  { %v271_v14 = vmax.f32 %v239_v11, %v255_v10 }
  0x3a   :  { %318 = vst [vmem:[%s863_s9 + $0x70] sm:$0xff] %v302_v12 }
  0x3b   :  { %v303_v15 = vmax.f32 %v271_v14, %v287_v13 }
  0x3d   :  { %319 = vst [vmem:[%s863_s9 + $0x78] sm:$0xff] %v303_v15 }

// kernel: densenet_forward.124
= control target key start
LH: loop header
LB: loop body
LE: loop exit
PB: predicated region body
PF: predicated region fallthrough
CT: control target
= control target key end

     0   :  { %v58_v5 = vlaneseq  ;;  %s1079_s3 = inlined_call_operand.vmem [shape: bf16[256,128], index: 3, kind: input, shape index: {}]   ;;  %s1080_s0 = inlined_call_operand.vmem [shape: f32[128,256], index: 0, kind: input, shape index: {}]   ;;  %s1081_s1 = inlined_call_operand.vmem [shape: f32[1,256], index: 1, kind: input, shape index: {}]   ;;  %s1082_s2 = inlined_call_operand.vmem [shape: f32[1,256], index: 2, kind: input, shape index: {}]   ;;  %s1083_s4 = inlined_call_operand.vmem [shape: f32[1,128], index: 4, kind: input, shape index: {}]   ;;  %s1084_s5 = inlined_call_operand.vmem [shape: f32[1,128], index: 5, kind: input, shape index: {}]   ;;  %s1085_s6 = inlined_call_operand.vmem [shape: bf16[128,128], index: 6, kind: output, shape index: {}]  }
   0x1   :  { %v740_v0 = vld [vmem:[%s1079_s3 + $0x40] sm:$0xff]   ;;  %v742_v2 = vld [vmem:[%s1079_s3 + $0x48] sm:$0xff]   ;;  %v744_v4 = vld [vmem:[%s1079_s3 + $0x50] sm:$0xff]  }
   0x2   :  { %v741_v1 = vld [vmem:[%s1079_s3] sm:$0xff]   ;;  %660 = vmatprep.subr.bf16.mxu0 %v740_v0  ;;  %724 = vmatprep.subr.bf16.mxu1 %v740_v0  ;;  %v743_v3 = vld [vmem:[%s1079_s3 + $0x8] sm:$0xff]   ;;  %v745_v6 = vld [vmem:[%s1079_s3 + $0x10] sm:$0xff]   ;;  %v59_v8 = vshrl.u32 %v58_v5, 7 }
   0x3   :  { %661 = vmatpush3.bf16.msra.mxu0 %v741_v1  ;;  %732 = vmatpush3.bf16.msra.mxu1 %v741_v1  ;;  %v746_v7 = vld [vmem:[%s1079_s3 + $0x58] sm:$0xff]   ;;  %v748_v10 = vld [vmem:[%s1079_s3 + $0x60] sm:$0xff]   ;;  %v750_v14 = vld [vmem:[%s1079_s3 + $0x68] sm:$0xff]  }
   0x4   :  { %662 = vmatprep.subr.bf16.mxu0 %v742_v2  ;;  %725 = vmatprep.subr.bf16.mxu1 %v742_v2  ;;  %v747_v9 = vld [vmem:[%s1079_s3 + $0x18] sm:$0xff]   ;;  %v60_v11 = vsub.s32 0, %v59_v8  ;;  %v64_v12 = vsub.s32 1, %v59_v8  ;;  %v749_v13 = vld [vmem:[%s1079_s3 + $0x20] sm:$0xff]   ;;  %v25_v15 = vld [vmem:[%s1080_s0 + $0x8] sm:$0xff] }
   0x5   :  { %v27_v16 = vld [vmem:[%s1080_s0 + $0x18] sm:$0xff]  ;;  %v56_v17 = vld [vmem:[%s1081_s1] sm:$0x3]  ;;  %v41_v21 = vld [vmem:[%s1080_s0 + $0x88] sm:$0xff] }
   0x6   :  { %v833_v18 = vrot.slane %v56_v17, %v60_v11  ;;  %v835_v19 = vrot.slane %v56_v17, %v64_v12  ;;  %v100_v20 = vld [vmem:[%s1082_s2] sm:$0x3]  ;;  %v43_v22 = vld [vmem:[%s1080_s0 + $0x98] sm:$0xff]  ;;  %v26_v26 = vld [vmem:[%s1080_s0 + $0x10] sm:$0xff] }
   0x7   :  { %663 = vmatpush3.bf16.msra.mxu0 %v743_v3  ;;  %733 = vmatpush3.bf16.msra.mxu1 %v743_v3  ;;  %v846_v23 = vrot.slane %v100_v20, %v60_v11  ;;  %v848_v24 = vrot.slane %v100_v20, %v64_v12  ;;  %v24_v25 = vld [vmem:[%s1080_s0] sm:$0xff]  ;;  %v751_v28 = vld [vmem:[%s1079_s3 + $0x28] sm:$0xff]   ;;  %v42_v32 = vld [vmem:[%s1080_s0 + $0x90] sm:$0xff] }
   0x8   :  { %664 = vmatprep.subr.bf16.mxu0 %v744_v4  ;;  %726 = vmatprep.subr.bf16.mxu1 %v744_v4  ;;  %v40_v27 = vld [vmem:[%s1080_s0 + $0x80] sm:$0xff]  ;;  %v69_v29 = vmul.f32 %v835_v19, %v25_v15  ;;  %v71_v30 = vmul.f32 %v835_v19, %v27_v16  ;;  %v85_v31 = vmul.f32 %v835_v19, %v41_v21  ;;  %v752_v33 = vld [vmem:[%s1079_s3 + $0x70] sm:$0xff]   ;;  %v29_v45 = vld [vmem:[%s1080_s0 + $0x28] sm:$0xff] }
   0x9   :  { %v87_v34 = vmul.f32 %v835_v19, %v43_v22  ;;  %v68_v35 = vmul.f32 %v833_v18, %v24_v25  ;;  %v70_v36 = vmul.f32 %v833_v18, %v26_v26  ;;  %v84_v40 = vmul.f32 %v833_v18, %v40_v27  ;;  %v31_v46 = vld [vmem:[%s1080_s0 + $0x38] sm:$0xff]  ;;  %v753_v47 = vld [vmem:[%s1079_s3 + $0x30] sm:$0xff]   ;;  %v45_v52 = vld [vmem:[%s1080_s0 + $0xa8] sm:$0xff] }
   0xa   :  { %v113_v37 = vadd.f32 %v848_v24, %v69_v29  ;;  %v115_v38 = vadd.f32 %v848_v24, %v71_v30  ;;  %v129_v39 = vadd.f32 %v848_v24, %v85_v31  ;;  %v86_v44 = vmul.f32 %v833_v18, %v42_v32  ;;  %v754_v53 = vld [vmem:[%s1079_s3 + $0x78] sm:$0xff]   ;;  %v28_v63 = vld [vmem:[%s1080_s0 + $0x20] sm:$0xff]  ;;  %v30_v4 = vld [vmem:[%s1080_s0 + $0x30] sm:$0xff] }
   0xb   :  { %665 = vmatpush3.bf16.msra.mxu0 %v745_v6  ;;  %734 = vmatpush3.bf16.msra.mxu1 %v745_v6  ;;  %v131_v41 = vadd.f32 %v848_v24, %v87_v34  ;;  %v112_v42 = vadd.f32 %v846_v23, %v68_v35  ;;  %v114_v43 = vadd.f32 %v846_v23, %v70_v36  ;;  %v47_v58 = vld [vmem:[%s1080_s0 + $0xb8] sm:$0xff] }
   0xc   :  { %666 = vmatprep.subr.bf16.mxu0 %v746_v7  ;;  %727 = vmatprep.subr.bf16.mxu1 %v746_v7  ;;  %v145_v48 = vmax.f32 %v113_v37, 0.0  ;;  %v147_v49 = vmax.f32 %v115_v38, 0.0  ;;  %v161_v50 = vmax.f32 %v129_v39, 0.0  ;;  %v128_v51 = vadd.f32 %v846_v23, %v84_v40  ;;  %v755_v5 = vld [vmem:[%s1079_s3 + $0x38] sm:$0xff]   ;;  %v32_v38 = vld [vmem:[%s1080_s0 + $0x40] sm:$0xff] }
   0xd   :  { %v163_v54 = vmax.f32 %v131_v41, 0.0  ;;  %v144_v55 = vmax.f32 %v112_v42, 0.0  ;;  %v146_v56 = vmax.f32 %v114_v43, 0.0  ;;  %v130_v57 = vadd.f32 %v846_v23, %v86_v44  ;;  %v35_v21 = vld [vmem:[%s1080_s0 + $0x58] sm:$0xff]  ;;  %v34_v43 = vld [vmem:[%s1080_s0 + $0x50] sm:$0xff] }
   0xe   :  { %v177_v59 = vpack.c.bf16 %v147_v49, %v145_v48  ;;  %v160_v60 = vmax.f32 %v128_v51, 0.0  ;;  %v73_v61 = vmul.f32 %v835_v19, %v29_v45  ;;  %v75_v62 = vmul.f32 %v835_v19, %v31_v46  ;;  %v48_v48 = vld [vmem:[%s1080_s0 + $0xc0] sm:$0xff]  ;;  %v50_v49 = vld [vmem:[%s1080_s0 + $0xd0] sm:$0xff] }
   0xf   :  { %667 = vmatpush3.bf16.msra.mxu0 %v747_v9  ;;  %735 = vmatpush3.bf16.msra.mxu1 %v747_v9  ;;  %v185_v0 = vpack.c.bf16 %v163_v54, %v161_v50  ;;  %v176_v1 = vpack.c.bf16 %v146_v56, %v144_v55  ;;  %v162_v2 = vmax.f32 %v130_v57, 0.0  ;;  %v89_v3 = vmul.f32 %v835_v19, %v45_v52  ;;  %v44_v9 = vld [vmem:[%s1080_s0 + $0xa0] sm:$0xff]  ;;  %v37_v54 = vld [vmem:[%s1080_s0 + $0x68] sm:$0xff] }
  0x10   :  { %668 = vmatprep.subr.bf16.mxu0 %v748_v10  ;;  %728 = vmatprep.subr.bf16.mxu1 %v748_v10  ;;  %v117_v6 = vadd.f32 %v848_v24, %v73_v61  ;;  %v119_v7 = vadd.f32 %v848_v24, %v75_v62  ;;  %v91_v8 = vmul.f32 %v835_v19, %v47_v58  ;;  %v46_v10 = vld [vmem:[%s1080_s0 + $0xb0] sm:$0xff] }
  0x11   :  { %v184_v11 = vpack.c.bf16 %v162_v2, %v160_v60  ;;  %v133_v12 = vadd.f32 %v848_v24, %v89_v3  ;;  %352 = vmatprep.mubr.bf16.mxu0 %v177_v59  ;;  %384 = vmatprep.mubr.bf16.mxu1 %v185_v0  ;;  %v74_v20 = vmul.f32 %v833_v18, %v30_v4  ;;  %v39_v59 = vld [vmem:[%s1080_s0 + $0x78] sm:$0xff]  ;;  %v53_v0 = vld [vmem:[%s1080_s0 + $0xe8] sm:$0xff] }
  0x12   :  { %v149_v15 = vmax.f32 %v117_v6, 0.0  ;;  %v151_v16 = vmax.f32 %v119_v7, 0.0  ;;  %v135_v17 = vadd.f32 %v848_v24, %v91_v8  ;;  %v88_v26 = vmul.f32 %v833_v18, %v44_v9 }
  0x13   :  { %669 = vmatpush3.bf16.msra.mxu0 %v749_v13  ;;  %736 = vmatpush3.bf16.msra.mxu1 %v749_v13  ;;  %v72_v13 = vmul.f32 %v833_v18, %v28_v63  ;;  %v165_v22 = vmax.f32 %v133_v12, 0.0  ;;  %v90_v27 = vmul.f32 %v833_v18, %v46_v10  ;;  %v118_v31 = vadd.f32 %v846_v23, %v74_v20  ;;  %v36_v10 = vld [vmem:[%s1080_s0 + $0x60] sm:$0xff] }
  0x14   :  { %670 = vmatprep.subr.bf16.mxu0 %v750_v14  ;;  %729 = vmatprep.subr.bf16.mxu1 %v750_v14  ;;  %v33_v14 = vld [vmem:[%s1080_s0 + $0x48] sm:$0xff]  ;;  %v179_v29 = vpack.c.bf16 %v151_v16, %v149_v15  ;;  %v167_v30 = vmax.f32 %v135_v17, 0.0  ;;  %v132_v35 = vadd.f32 %v846_v23, %v88_v26  ;;  %v79_v37 = vmul.f32 %v835_v19, %v35_v21  ;;  %v38_v15 = vld [vmem:[%s1080_s0 + $0x70] sm:$0xff] }
  0x15   :  { %v116_v25 = vadd.f32 %v846_v23, %v72_v13  ;;  %v77_v32 = vmul.f32 %v835_v19, %v33_v14  ;;  %v134_v36 = vadd.f32 %v846_v23, %v90_v27  ;;  %v150_v40 = vmax.f32 %v118_v31, 0.0 }
  0x16   :  { %v187_v39 = vpack.c.bf16 %v167_v30, %v165_v22  ;;  %v164_v44 = vmax.f32 %v132_v35, 0.0  ;;  %v123_v46 = vadd.f32 %v848_v24, %v79_v37  ;;  %v78_v58 = vmul.f32 %v833_v18, %v34_v43  ;;  %v52_v22 = vld [vmem:[%s1080_s0 + $0xe0] sm:$0xff] }
  0x17   :  { %671 = vmatpush3.bf16.msra.mxu0 %v751_v28  ;;  %737 = vmatpush3.bf16.msra.mxu1 %v751_v28  ;;  %v49_v28 = vld [vmem:[%s1080_s0 + $0xc8] sm:$0xff]  ;;  %v148_v34 = vmax.f32 %v116_v25, 0.0  ;;  %v121_v41 = vadd.f32 %v848_v24, %v77_v32  ;;  %v166_v45 = vmax.f32 %v134_v36, 0.0  ;;  %v92_v62 = vmul.f32 %v833_v18, %v48_v48  ;;  %v54_v25 = vld [vmem:[%s1080_s0 + $0xf0] sm:$0xff] }
  0x18   :  { %672 = vmatprep.subr.bf16.mxu0 %v752_v33  ;;  %730 = vmatprep.subr.bf16.mxu1 %v752_v33  ;;  %v51_v33 = vld [vmem:[%s1080_s0 + $0xd8] sm:$0xff]  ;;  %v93_v42 = vmul.f32 %v835_v19, %v49_v28  ;;  %v155_v56 = vmax.f32 %v123_v46, 0.0  ;;  %v94_v63 = vmul.f32 %v833_v18, %v50_v49  ;;  %v122_v3 = vadd.f32 %v846_v23, %v78_v58 }
  0x19   :  { %v178_v50 = vpack.c.bf16 %v150_v40, %v148_v34  ;;  %v153_v51 = vmax.f32 %v121_v41, 0.0  ;;  %v186_v55 = vpack.c.bf16 %v166_v45, %v164_v44  ;;  %v81_v4 = vmul.f32 %v835_v19, %v37_v54 }
  0x1a   :  { %v137_v52 = vadd.f32 %v848_v24, %v93_v42  ;;  %v136_v7 = vadd.f32 %v846_v23, %v92_v62  ;;  %v138_v8 = vadd.f32 %v846_v23, %v94_v63  ;;  %v83_v9 = vmul.f32 %v835_v19, %v39_v59 }
  0x1b   :  { %673 = vmatpush3.bf16.msra.mxu0 %v753_v47  ;;  %738 = vmatpush3.bf16.msra.mxu1 %v753_v47  ;;  %v95_v47 = vmul.f32 %v835_v19, %v51_v33  ;;  %v154_v12 = vmax.f32 %v122_v3, 0.0  ;;  %v125_v13 = vadd.f32 %v848_v24, %v81_v4  ;;  %v97_v14 = vmul.f32 %v835_v19, %v53_v0 }
  0x1c   :  { %674 = vmatprep.subr.bf16.mxu0 %v754_v53  ;;  %731 = vmatprep.subr.bf16.mxu1 %v754_v53  ;;  %v76_v53 = vmul.f32 %v833_v18, %v32_v38  ;;  %v169_v60 = vmax.f32 %v137_v52, 0.0  ;;  %v168_v16 = vmax.f32 %v136_v7, 0.0  ;;  %v170_v17 = vmax.f32 %v138_v8, 0.0 }
  0x1d   :  { %v139_v57 = vadd.f32 %v848_v24, %v95_v47  ;;  %v127_v20 = vadd.f32 %v848_v24, %v83_v9  ;;  %v141_v26 = vadd.f32 %v848_v24, %v97_v14  ;;  %v80_v27 = vmul.f32 %v833_v18, %v36_v10 }
  0x1e   :  { %v120_v61 = vadd.f32 %v846_v23, %v76_v53  ;;  %v157_v28 = vmax.f32 %v125_v13, 0.0  ;;  %v82_v30 = vmul.f32 %v833_v18, %v38_v15  ;;  %v96_v32 = vmul.f32 %v833_v18, %v52_v22 }
  0x1f   :  { %675 = vmatpush3.bf16.msra.mxu0 %v755_v5  ;;  %739 = vmatpush3.bf16.msra.mxu1 %v755_v5  ;;  %v171_v2 = vmax.f32 %v139_v57, 0.0  ;;  %v55_v5 = vld [vmem:[%s1080_s0 + $0xf8] sm:$0xff]  ;;  %v173_v31 = vmax.f32 %v141_v26, 0.0  ;;  %v98_v33 = vmul.f32 %v833_v18, %v54_v25  ;;  %v188_v35 = vpack.c.bf16 %v170_v17, %v168_v16 }
  0x20   :  { %v152_v6 = vmax.f32 %v120_v61, 0.0  ;;  %v99_v21 = vmul.f32 %v835_v19, %v55_v5  ;;  %v124_v37 = vadd.f32 %v846_v23, %v80_v27  ;;  %v126_v38 = vadd.f32 %v846_v23, %v82_v30 }
  0x21   :  { %v142_v40 = vadd.f32 %v846_v23, %v98_v33 }
  0x22   :  { %353 = vmatmul.mubr.bf16.vlgmr.msra.gmra.mrb[0].mxu0 %v176_v1  ;;  %385 = vmatmul.mubr.bf16.vlgmr.msra.gmra.mrb[0].mxu1 %v184_v11  ;;  %v181_v1 = vpack.c.bf16 %v155_v56, %v153_v51  ;;  %v189_v11 = vpack.c.bf16 %v171_v2, %v169_v60  ;;  %v143_v19 = vadd.f32 %v848_v24, %v99_v21  ;;  %v156_v42 = vmax.f32 %v124_v37, 0.0 }
  0x23   :  { %360 = vmatprep.mubr.bf16.mxu0 %v179_v29  ;;  %392 = vmatprep.mubr.bf16.mxu1 %v187_v39  ;;  %v159_v29 = vmax.f32 %v127_v20, 0.0  ;;  %v180_v34 = vpack.c.bf16 %v154_v12, %v152_v6  ;;  %v140_v39 = vadd.f32 %v846_v23, %v96_v32  ;;  %v158_v43 = vmax.f32 %v126_v38, 0.0  ;;  %v1016_v23 = vld [vmem:[%s1083_s4] ss:$0 sm:$0xff] }
  0x24   :  { %v175_v36 = vmax.f32 %v143_v19, 0.0  ;;  %v174_v45 = vmax.f32 %v142_v40, 0.0 }
  0x25   :  { %v183_v41 = vpack.c.bf16 %v159_v29, %v157_v28  ;;  %v172_v44 = vmax.f32 %v140_v39, 0.0  ;;  %v182_v18 = vpack.c.bf16 %v158_v43, %v156_v42 }
  0x26   :  { %v191_v24 = vpack.c.bf16 %v175_v36, %v173_v31 }
  0x27   :  { %v190_v46 = vpack.c.bf16 %v174_v45, %v172_v44 }
  0x2a   :  { %361 = vmatmul.mubr.bf16.gmra.mrb[4].mxu0 %v178_v50  ;;  %393 = vmatmul.mubr.bf16.gmra.mrb[4].mxu1 %v186_v55  ;;  %v1021_v55 = vld [vmem:[%s1084_s5] ss:$0 sm:$0xff] }
  0x2b   :  { %368 = vmatprep.mubr.bf16.mxu0 %v181_v1  ;;  %400 = vmatprep.mubr.bf16.mxu1 %v189_v11 }
  0x32   :  { %369 = vmatmul.mubr.bf16.gmra.mrb[8].mxu0 %v180_v34  ;;  %401 = vmatmul.mubr.bf16.gmra.mrb[8].mxu1 %v188_v35 }
  0x33   :  { %376 = vmatprep.mubr.bf16.mxu0 %v183_v41  ;;  %408 = vmatprep.mubr.bf16.mxu1 %v191_v24 }
  0x3a   :  { %377 = vmatmul.mubr.bf16.gmra.mrb[12].mxu0 %v182_v18  ;;  %409 = vmatmul.mubr.bf16.gmra.mrb[12].mxu1 %v190_v46 }
  0xf5   :  { %v676_v47 = vpop.f32.mrb[0].mxu0  ;;  %v700_v48 = vpop.f32.mrb[0].mxu1 }
  0xf6   :  { %v677_v49 = vpop.f32.mrb[1].mxu0  ;;  %v701_v50 = vpop.f32.mrb[1].mxu1 }
  0xf7   :  { %v678_v51 = vadd.f32 %v677_v49, %v676_v47  ;;  %v702_v52 = vadd.f32 %v701_v50, %v700_v48  ;;  %v679_v53 = vpop.f32.mrb[2].mxu0  ;;  %v703_v54 = vpop.f32.mrb[2].mxu1 }
  0xf8   :  { %v680_v56 = vpop.f32.mrb[3].mxu0  ;;  %v704_v57 = vpop.f32.mrb[3].mxu1 }
  0xf9   :  { %v424_v58 = vmul.f32 %v678_v51, %v1016_v23  ;;  %v432_v59 = vmul.f32 %v702_v52, %v1016_v23  ;;  %v681_v60 = vadd.f32 %v680_v56, %v679_v53  ;;  %v705_v61 = vadd.f32 %v704_v57, %v703_v54 }
  0xfb   :  { %v447_v62 = vadd.f32 %v1021_v55, %v424_v58  ;;  %v455_v63 = vadd.f32 %v1021_v55, %v432_v59  ;;  %v425_v0 = vmul.f32 %v681_v60, %v1016_v23  ;;  %v433_v1 = vmul.f32 %v705_v61, %v1016_v23 }
  0xfd   :  { %v448_v2 = vadd.f32 %v1021_v55, %v425_v0  ;;  %v456_v3 = vadd.f32 %v1021_v55, %v433_v1  ;;  %v682_v4 = vpop.f32.mrb[4].mxu0  ;;  %v706_v5 = vpop.f32.mrb[4].mxu1  ;;  %v463_v6 = vmax.f32 %v447_v62, 0.0  ;;  %v471_v7 = vmax.f32 %v455_v63, 0.0 }
  0xfe   :  { %v683_v8 = vpop.f32.mrb[5].mxu0  ;;  %v707_v9 = vpop.f32.mrb[5].mxu1 }
  0xff   :  { %v464_v10 = vmax.f32 %v448_v2, 0.0  ;;  %v472_v11 = vmax.f32 %v456_v3, 0.0  ;;  %v684_v12 = vadd.f32 %v683_v8, %v682_v4  ;;  %v708_v13 = vadd.f32 %v707_v9, %v706_v5  ;;  %v685_v14 = vpop.f32.mrb[6].mxu0  ;;  %v709_v15 = vpop.f32.mrb[6].mxu1 }
 0x100   :  { %v686_v16 = vpop.f32.mrb[7].mxu0  ;;  %v710_v17 = vpop.f32.mrb[7].mxu1 }
 0x101   :  { %v616_v20 = vpack.c.bf16 %v464_v10, %v463_v6  ;;  %v636_v21 = vpack.c.bf16 %v472_v11, %v471_v7  ;;  %v426_v22 = vmul.f32 %v684_v12, %v1016_v23  ;;  %v434_v25 = vmul.f32 %v708_v13, %v1016_v23 }
 0x102   :  { %v687_v26 = vadd.f32 %v686_v16, %v685_v14  ;;  %v711_v27 = vadd.f32 %v710_v17, %v709_v15 }
 0x103   :  { %617 = vst [vmem:[%s1085_s6] sm:$0xff] %v616_v20   ;;  %656 = vst [vmem:[%s1085_s6 + $0x20] sm:$0xff] %v636_v21   ;;  %v449_v28 = vadd.f32 %v1021_v55, %v426_v22  ;;  %v457_v29 = vadd.f32 %v1021_v55, %v434_v25 }
 0x104   :  { %v427_v19 = vmul.f32 %v687_v26, %v1016_v23  ;;  %v435_v30 = vmul.f32 %v711_v27, %v1016_v23 }
 0x105   :  { %v688_v31 = vpop.f32.mrb[8].mxu0  ;;  %v712_v32 = vpop.f32.mrb[8].mxu1  ;;  %v465_v41 = vmax.f32 %v449_v28, 0.0  ;;  %v473_v24 = vmax.f32 %v457_v29, 0.0 }
 0x106   :  { %v450_v33 = vadd.f32 %v1021_v55, %v427_v19  ;;  %v458_v34 = vadd.f32 %v1021_v55, %v435_v30  ;;  %v689_v35 = vpop.f32.mrb[9].mxu0  ;;  %v713_v36 = vpop.f32.mrb[9].mxu1 }
 0x107   :  { %v690_v37 = vadd.f32 %v689_v35, %v688_v31  ;;  %v714_v38 = vadd.f32 %v713_v36, %v712_v32  ;;  %v691_v39 = vpop.f32.mrb[10].mxu0  ;;  %v715_v40 = vpop.f32.mrb[10].mxu1 }
 0x108   :  { %v466_v42 = vmax.f32 %v450_v33, 0.0  ;;  %v474_v43 = vmax.f32 %v458_v34, 0.0  ;;  %v692_v44 = vpop.f32.mrb[11].mxu0  ;;  %v716_v45 = vpop.f32.mrb[11].mxu1 }
 0x109   :  { %v428_v18 = vmul.f32 %v690_v37, %v1016_v23  ;;  %v436_v46 = vmul.f32 %v714_v38, %v1016_v23  ;;  %v693_v47 = vadd.f32 %v692_v44, %v691_v39  ;;  %v717_v48 = vadd.f32 %v716_v45, %v715_v40 }
 0x10a   :  { %v621_v49 = vpack.c.bf16 %v466_v42, %v465_v41  ;;  %v641_v50 = vpack.c.bf16 %v474_v43, %v473_v24 }
 0x10b   :  { %v451_v51 = vadd.f32 %v1021_v55, %v428_v18  ;;  %v459_v52 = vadd.f32 %v1021_v55, %v436_v46  ;;  %v429_v53 = vmul.f32 %v693_v47, %v1016_v23  ;;  %v437_v54 = vmul.f32 %v717_v48, %v1016_v23 }
 0x10c   :  { %653 = vst [vmem:[%s1085_s6 + $0x8] sm:$0xff] %v621_v49   ;;  %657 = vst [vmem:[%s1085_s6 + $0x28] sm:$0xff] %v641_v50  }
 0x10d   :  { %v452_v56 = vadd.f32 %v1021_v55, %v429_v53  ;;  %v460_v57 = vadd.f32 %v1021_v55, %v437_v54  ;;  %v694_v58 = vpop.f32.mrb[12].mxu0  ;;  %v718_v59 = vpop.f32.mrb[12].mxu1  ;;  %v467_v60 = vmax.f32 %v451_v51, 0.0  ;;  %v475_v61 = vmax.f32 %v459_v52, 0.0 }
 0x10e   :  { %v695_v62 = vpop.f32.mrb[13].mxu0  ;;  %v719_v63 = vpop.f32.mrb[13].mxu1 }
 0x10f   :  { %v468_v0 = vmax.f32 %v452_v56, 0.0  ;;  %v476_v1 = vmax.f32 %v460_v57, 0.0  ;;  %v696_v2 = vadd.f32 %v695_v62, %v694_v58  ;;  %v720_v3 = vadd.f32 %v719_v63, %v718_v59  ;;  %v697_v4 = vpop.f32.mrb[14].mxu0  ;;  %v721_v5 = vpop.f32.mrb[14].mxu1 }
 0x110   :  { %v698_v6 = vpop.f32.mrb[15].mxu0  ;;  %v722_v7 = vpop.f32.mrb[15].mxu1 }
 0x111   :  { %v626_v8 = vpack.c.bf16 %v468_v0, %v467_v60  ;;  %v646_v9 = vpack.c.bf16 %v476_v1, %v475_v61  ;;  %v430_v10 = vmul.f32 %v696_v2, %v1016_v23  ;;  %v438_v11 = vmul.f32 %v720_v3, %v1016_v23 }
 0x112   :  { %v699_v12 = vadd.f32 %v698_v6, %v697_v4  ;;  %v723_v13 = vadd.f32 %v722_v7, %v721_v5 }
 0x113   :  { %654 = vst [vmem:[%s1085_s6 + $0x10] sm:$0xff] %v626_v8   ;;  %658 = vst [vmem:[%s1085_s6 + $0x30] sm:$0xff] %v646_v9   ;;  %v453_v14 = vadd.f32 %v1021_v55, %v430_v10  ;;  %v461_v15 = vadd.f32 %v1021_v55, %v438_v11 }
 0x114   :  { %v431_v16 = vmul.f32 %v699_v12, %v1016_v23  ;;  %v439_v17 = vmul.f32 %v723_v13, %v1016_v23 }
 0x115   :  { %v469_v22 = vmax.f32 %v453_v14, 0.0  ;;  %v477_v25 = vmax.f32 %v461_v15, 0.0 }
 0x116   :  { %v454_v20 = vadd.f32 %v1021_v55, %v431_v16  ;;  %v462_v21 = vadd.f32 %v1021_v55, %v439_v17 }
 0x118   :  { %v470_v26 = vmax.f32 %v454_v20, 0.0  ;;  %v478_v27 = vmax.f32 %v462_v21, 0.0 }
 0x11a   :  { %v631_v28 = vpack.c.bf16 %v470_v26, %v469_v22  ;;  %v651_v29 = vpack.c.bf16 %v478_v27, %v477_v25 }
 0x11c   :  { %655 = vst [vmem:[%s1085_s6 + $0x18] sm:$0xff] %v631_v28   ;;  %659 = vst [vmem:[%s1085_s6 + $0x38] sm:$0xff] %v651_v29  }

// kernel: densenet_forward.125
= control target key start
LH: loop header
LB: loop body
LE: loop exit
PB: predicated region body
PF: predicated region fallthrough
CT: control target
= control target key end

     0   :  { %7 = vsyncpa [#allocation3], 0  ;;  %s2223_s9 = smov [#allocation2]   ;;  %s2592_s0 = inlined_call_operand.hbm [shape: bf16[128,1152], index: 0, kind: input, shape index: {}]   ;;  %s2593_s1 = inlined_call_operand.vmem [shape: bf16[1152,128], index: 1, kind: input, shape index: {}]   ;;  %s2594_s2 = inlined_call_operand.vmem [shape: f32[128,128], index: 2, kind: output, shape index: {}]  }
   0x1   :  { %s13_s10 = sshll.u32 %s2223_s9, 4  ;;  %s2199_s13 = scalar_lea.hbm %s2592_s0, 9216  ;;  %s14_s10 = int_to_ptr.vmem [resolvable:$true] %s13_s10 }
   0x2   :  { %p2200_p0 = scmp.ne.s32.totalorder %s2592_s0, %s2199_s13  ;;  %p2203_p1 = scmp.lt.u32.totalorder %s2199_s13, %s2592_s0 }
   0x4   :  { %p2205_p2 = pnand %p2203_p1, %p2200_p0 }
   0x6   :  { %2208 = shalt.err (!%p2205_p2)
}
   0x7   :  { %s2209_s18 = scalar_lea.vmem %s14_s10, 9216  ;;  %p2214_p4 = scmp.lt.s32.totalorder %s14_s10, %s14_s10 }
   0x8   :  { %p2210_p3 = scmp.ne.s32.totalorder %s14_s10, %s2209_s18  ;;  %p2215_p5 = scmp.lt.s32.totalorder %s2209_s18, %s2209_s18 }
   0xa   :  { %p2216_p6 = por %p2215_p5, %p2214_p4 }
   0xc   :  { %p2217_p7 = pnand %p2216_p6, %p2210_p3 }
   0xe   :  { %2220 = shalt.err (!%p2217_p7)
}
   0xf   :  { %s2224_s19 = smov 576   ;;  %s2225_s20 = smov 36  }
  0x10   :  { %19 = dma.hbm_to_vmem [thread:$0]  %s2592_s0, 9216, %s14_s10, [#allocation3], %s2224_s19, %s2224_s19, %s2225_s20  }
  0x11   :  { %2221 = dma.done.wait [#allocation3], 9216  }
  0x12   :  { %2222 = vsyncadd [#allocation3], 4294958080  ;;  %v2023_v0 = vld [vmem:[%s2593_s1 + $0x40] sm:$0xff]   ;;  %v2027_v4 = vld [vmem:[%s2593_s1 + $0x48] sm:$0xff]  }
  0x13   :  { %v2024_v1 = vld [vmem:[%s2593_s1 + $0xc0] sm:$0xff]   ;;  %1700 = vmatprep.subr.bf16.mxu0 %v2023_v0  ;;  %v2028_v5 = vld [vmem:[%s2593_s1 + $0xc8] sm:$0xff]   ;;  %v2031_v8 = vld [vmem:[%s2593_s1 + $0x50] sm:$0xff]  }
  0x14   :  { %v2025_v2 = vld [vmem:[%s2593_s1] sm:$0xff]   ;;  %1764 = vmatprep.subr.bf16.mxu1 %v2024_v1  ;;  %v2029_v6 = vld [vmem:[%s2593_s1 + $0x8] sm:$0xff]   ;;  %v2032_v9 = vld [vmem:[%s2593_s1 + $0xd0] sm:$0xff]  }
  0x15   :  { %v2026_v3 = vld [vmem:[%s2593_s1 + $0x80] sm:$0xff]   ;;  %1701 = vmatpush3.bf16.msra.mxu0 %v2025_v2  ;;  %v2030_v7 = vld [vmem:[%s2593_s1 + $0x88] sm:$0xff]   ;;  %v2033_v10 = vld [vmem:[%s2593_s1 + $0x10] sm:$0xff]  }
  0x16   :  { %1765 = vmatpush3.bf16.msra.mxu1 %v2026_v3  ;;  %1702 = vmatprep.subr.bf16.mxu0 %v2027_v4  ;;  %v2034_v11 = vld [vmem:[%s2593_s1 + $0x90] sm:$0xff]   ;;  %v2035_v12 = vld [vmem:[%s2593_s1 + $0x58] sm:$0xff]   ;;  %v2039_v16 = vld [vmem:[%s2593_s1 + $0x60] sm:$0xff]  }
  0x17   :  { %1766 = vmatprep.subr.bf16.mxu1 %v2028_v5  ;;  %v2036_v13 = vld [vmem:[%s2593_s1 + $0xd8] sm:$0xff]   ;;  %v2040_v17 = vld [vmem:[%s2593_s1 + $0xe0] sm:$0xff]   ;;  %v2043_v20 = vld [vmem:[%s2593_s1 + $0x68] sm:$0xff]  }
  0x18   :  { %v2037_v14 = vld [vmem:[%s2593_s1 + $0x18] sm:$0xff]   ;;  %v2041_v18 = vld [vmem:[%s2593_s1 + $0x20] sm:$0xff]   ;;  %v2044_v21 = vld [vmem:[%s2593_s1 + $0xe8] sm:$0xff]  }
  0x19   :  { %1703 = vmatpush3.bf16.msra.mxu0 %v2029_v6  ;;  %v2038_v15 = vld [vmem:[%s2593_s1 + $0x98] sm:$0xff]   ;;  %v2042_v19 = vld [vmem:[%s2593_s1 + $0xa0] sm:$0xff]   ;;  %v2045_v22 = vld [vmem:[%s2593_s1 + $0x28] sm:$0xff]  }
  0x1a   :  { %1767 = vmatpush3.bf16.msra.mxu1 %v2030_v7  ;;  %1704 = vmatprep.subr.bf16.mxu0 %v2031_v8  ;;  %v2046_v23 = vld [vmem:[%s2593_s1 + $0xa8] sm:$0xff]   ;;  %v2047_v24 = vld [vmem:[%s2593_s1 + $0x70] sm:$0xff]   ;;  %v2051_v28 = vld [vmem:[%s2593_s1 + $0x78] sm:$0xff]  }
  0x1b   :  { %1768 = vmatprep.subr.bf16.mxu1 %v2032_v9  ;;  %v2048_v25 = vld [vmem:[%s2593_s1 + $0xf0] sm:$0xff]   ;;  %v2052_v29 = vld [vmem:[%s2593_s1 + $0xf8] sm:$0xff]   ;;  %v2055_v32 = vld [vmem:[#allocation2] ss:$36 sps:$4 sm:$0xff]  }
  0x1c   :  { %v2049_v26 = vld [vmem:[%s2593_s1 + $0x30] sm:$0xff]   ;;  %v2053_v30 = vld [vmem:[%s2593_s1 + $0x38] sm:$0xff]   ;;  %v2057_v33 = vld [vmem:[#allocation2 + $0x4] ss:$36 sps:$4 sm:$0xff]  }
  0x1d   :  { %1705 = vmatpush3.bf16.msra.mxu0 %v2033_v10  ;;  %v2050_v27 = vld [vmem:[%s2593_s1 + $0xb0] sm:$0xff]   ;;  %v2054_v31 = vld [vmem:[%s2593_s1 + $0xb8] sm:$0xff]   ;;  %v2058_v34 = vld [vmem:[#allocation2 + $0x8] ss:$36 sps:$4 sm:$0xff]   ;;  %1082 = vmatprep.mubr.bf16.mxu0 %v2057_v33 }
  0x1e   :  { %1769 = vmatpush3.bf16.msra.mxu1 %v2034_v11  ;;  %1706 = vmatprep.subr.bf16.mxu0 %v2035_v12  ;;  %v2060_v35 = vld [vmem:[#allocation2 + $0xc] ss:$36 sps:$4 sm:$0xff]   ;;  %v2061_v36 = vld [vmem:[%s2593_s1 + $0x140] sm:$0xff]   ;;  %v2067_v41 = vld [vmem:[#allocation2 + $0x54] ss:$36 sps:$4 sm:$0xff]  }
  0x1f   :  { %1770 = vmatprep.subr.bf16.mxu1 %v2036_v13  ;;  %1179 = vmatprep.mubr.bf16.mxu1 %v2060_v35  ;;  %v2062_v37 = vld [vmem:[%s2593_s1 + $0x1c0] sm:$0xff]   ;;  %v2065_v40 = vld [vmem:[#allocation2 + $0x4c] ss:$36 sps:$4 sm:$0xff]   ;;  %v2075_v48 = vld [vmem:[#allocation2 + $0x94] ss:$36 sps:$4 sm:$0xff]  }
  0x20   :  { %v2063_v38 = vld [vmem:[%s2593_s1 + $0x100] sm:$0xff]   ;;  %v2069_v42 = vld [vmem:[#allocation2 + $0x48] ss:$36 sps:$4 sm:$0xff]   ;;  %v2070_v43 = vld [vmem:[#allocation2 + $0x50] ss:$36 sps:$4 sm:$0xff]  }
  0x21   :  { %1707 = vmatpush3.bf16.msra.mxu0 %v2037_v14  ;;  %v2064_v39 = vld [vmem:[%s2593_s1 + $0x180] sm:$0xff]   ;;  %v2071_v44 = vld [vmem:[%s2593_s1 + $0x148] sm:$0xff]   ;;  %v2079_v50 = vld [vmem:[#allocation2 + $0x90] ss:$36 sps:$4 sm:$0xff]  }
  0x22   :  { %1771 = vmatpush3.bf16.msra.mxu1 %v2038_v15  ;;  %1708 = vmatprep.subr.bf16.mxu0 %v2039_v16  ;;  %v2072_v45 = vld [vmem:[%s2593_s1 + $0x1c8] sm:$0xff]   ;;  %v2077_v49 = vld [vmem:[#allocation2 + $0x9c] ss:$36 sps:$4 sm:$0xff]   ;;  %v2081_v52 = vld [vmem:[%s2593_s1 + $0x150] sm:$0xff]  }
  0x23   :  { %1772 = vmatprep.subr.bf16.mxu1 %v2040_v17  ;;  %v2073_v46 = vld [vmem:[%s2593_s1 + $0x108] sm:$0xff]   ;;  %v2080_v51 = vld [vmem:[#allocation2 + $0x98] ss:$36 sps:$4 sm:$0xff]   ;;  %v2082_v53 = vld [vmem:[%s2593_s1 + $0x1d0] sm:$0xff]  }
  0x24   :  { %v2074_v47 = vld [vmem:[%s2593_s1 + $0x188] sm:$0xff]   ;;  %v2083_v54 = vld [vmem:[%s2593_s1 + $0x110] sm:$0xff]   ;;  %v2085_v56 = vld [vmem:[#allocation2 + $0xdc] ss:$36 sps:$4 sm:$0xff]  }
  0x25   :  { %1709 = vmatpush3.bf16.msra.mxu0 %v2041_v18  ;;  %v2084_v55 = vld [vmem:[%s2593_s1 + $0x190] sm:$0xff]   ;;  %v2087_v57 = vld [vmem:[#allocation2 + $0xe4] ss:$36 sps:$4 sm:$0xff]   ;;  %v2089_v58 = vld [vmem:[#allocation2 + $0xd8] ss:$36 sps:$4 sm:$0xff]  }
  0x26   :  { %1773 = vmatpush3.bf16.msra.mxu1 %v2042_v19  ;;  %1710 = vmatprep.subr.bf16.mxu0 %v2043_v20  ;;  %v2090_v59 = vld [vmem:[#allocation2 + $0xe0] ss:$36 sps:$4 sm:$0xff]   ;;  %v2091_v60 = vld [vmem:[%s2593_s1 + $0x158] sm:$0xff]   ;;  %v2097_v1 = vld [vmem:[#allocation2 + $0x12c] ss:$36 sps:$4 sm:$0xff]  }
  0x27   :  { %1774 = vmatprep.subr.bf16.mxu1 %v2044_v21  ;;  %v2092_v61 = vld [vmem:[%s2593_s1 + $0x1d8] sm:$0xff]   ;;  %v2095_v0 = vld [vmem:[#allocation2 + $0x124] ss:$36 sps:$4 sm:$0xff]   ;;  %v2105_v8 = vld [vmem:[#allocation2 + $0x16c] ss:$36 sps:$4 sm:$0xff]  }
  0x28   :  { %v2093_v62 = vld [vmem:[%s2593_s1 + $0x118] sm:$0xff]   ;;  %v2099_v2 = vld [vmem:[#allocation2 + $0x120] ss:$36 sps:$4 sm:$0xff]   ;;  %v2100_v4 = vld [vmem:[#allocation2 + $0x128] ss:$36 sps:$4 sm:$0xff]  }
  0x29   :  { %1711 = vmatpush3.bf16.msra.mxu0 %v2045_v22  ;;  %v2094_v63 = vld [vmem:[%s2593_s1 + $0x198] sm:$0xff]   ;;  %v2101_v3 = vld [vmem:[%s2593_s1 + $0x160] sm:$0xff]   ;;  %v2111_v10 = vld [vmem:[%s2593_s1 + $0x168] sm:$0xff]  }
  0x2a   :  { %1775 = vmatpush3.bf16.msra.mxu1 %v2046_v23  ;;  %1712 = vmatprep.subr.bf16.mxu0 %v2047_v24  ;;  %v2102_v5 = vld [vmem:[%s2593_s1 + $0x1e0] sm:$0xff]   ;;  %v2107_v9 = vld [vmem:[#allocation2 + $0x174] ss:$36 sps:$4 sm:$0xff]   ;;  %v2112_v11 = vld [vmem:[%s2593_s1 + $0x1e8] sm:$0xff]  }
  0x2b   :  { %1776 = vmatprep.subr.bf16.mxu1 %v2048_v25  ;;  %v2103_v6 = vld [vmem:[%s2593_s1 + $0x120] sm:$0xff]   ;;  %v2109_v12 = vld [vmem:[#allocation2 + $0x168] ss:$36 sps:$4 sm:$0xff]   ;;  %v2110_v15 = vld [vmem:[#allocation2 + $0x170] ss:$36 sps:$4 sm:$0xff]  }
  0x2c   :  { %v2104_v7 = vld [vmem:[%s2593_s1 + $0x1a0] sm:$0xff]   ;;  %v2113_v13 = vld [vmem:[%s2593_s1 + $0x128] sm:$0xff]   ;;  %v2115_v16 = vld [vmem:[#allocation2 + $0x1b4] ss:$36 sps:$4 sm:$0xff]  }
  0x2d   :  { %1713 = vmatpush3.bf16.msra.mxu0 %v2049_v26  ;;  %v2114_v14 = vld [vmem:[%s2593_s1 + $0x1a8] sm:$0xff]   ;;  %v2117_v17 = vld [vmem:[#allocation2 + $0x1bc] ss:$36 sps:$4 sm:$0xff]   ;;  %v2121_v18 = vld [vmem:[%s2593_s1 + $0x170] sm:$0xff]  }
  0x2e   :  { %1777 = vmatpush3.bf16.msra.mxu1 %v2050_v27  ;;  %1714 = vmatprep.subr.bf16.mxu0 %v2051_v28  ;;  %v2122_v19 = vld [vmem:[%s2593_s1 + $0x1f0] sm:$0xff]   ;;  %v2120_v23 = vld [vmem:[#allocation2 + $0x1b8] ss:$36 sps:$4 sm:$0xff]   ;;  %v2127_v25 = vld [vmem:[#allocation2 + $0x204] ss:$36 sps:$4 sm:$0xff]  }
  0x2f   :  { %1778 = vmatprep.subr.bf16.mxu1 %v2052_v29  ;;  %v2123_v20 = vld [vmem:[%s2593_s1 + $0x130] sm:$0xff]   ;;  %v2125_v24 = vld [vmem:[#allocation2 + $0x1fc] ss:$36 sps:$4 sm:$0xff]  }
  0x30   :  { %v2124_v21 = vld [vmem:[%s2593_s1 + $0x1b0] sm:$0xff]   ;;  %v2131_v26 = vld [vmem:[%s2593_s1 + $0x178] sm:$0xff]  }
  0x31   :  { %1715 = vmatpush3.bf16.msra.mxu0 %v2053_v30  ;;  %v2119_v22 = vld [vmem:[#allocation2 + $0x1b0] ss:$36 sps:$4 sm:$0xff]   ;;  %v2132_v27 = vld [vmem:[%s2593_s1 + $0x1f8] sm:$0xff]  }
  0x32   :  { %1779 = vmatpush3.bf16.msra.mxu1 %v2054_v31  ;;  %1828 = vmatprep.subr.bf16.mxu0 %v2061_v36  ;;  %v2133_v28 = vld [vmem:[%s2593_s1 + $0x138] sm:$0xff]   ;;  %v2130_v31 = vld [vmem:[#allocation2 + $0x200] ss:$36 sps:$4 sm:$0xff]   ;;  %v2135_v35 = vld [vmem:[#allocation2 + $0x10] ss:$36 sps:$4 sm:$0xff]  }
  0x33   :  { %1892 = vmatprep.subr.bf16.mxu1 %v2062_v37  ;;  %v2134_v29 = vld [vmem:[%s2593_s1 + $0x1b8] sm:$0xff]  }
  0x34   :  { %1083 = vmatmul.mubr.bf16.vlgmr.msra.gmra.mrb[0].mxu0 %v2055_v32  ;;  %v2129_v30 = vld [vmem:[#allocation2 + $0x1f8] ss:$36 sps:$4 sm:$0xff]   ;;  %v2141_v32 = vld [vmem:[%s2593_s1 + $0x200] sm:$0xff]  }
  0x35   :  { %1180 = vmatmul.mubr.bf16.vlgmr.msra.gmra.mrb[0].mxu1 %v2058_v34  ;;  %1829 = vmatpush3.bf16.msra.mxu0 %v2063_v38  ;;  %v2137_v33 = vld [vmem:[#allocation2 + $0x14] ss:$36 sps:$4 sm:$0xff]   ;;  %v2140_v34 = vld [vmem:[#allocation2 + $0x1c] ss:$36 sps:$4 sm:$0xff]   ;;  %v2144_v38 = vld [vmem:[#allocation2 + $0x64] ss:$36 sps:$4 sm:$0xff]  }
  0x36   :  { %1893 = vmatpush3.bf16.msra.mxu1 %v2064_v39  ;;  %1090 = vmatprep.mubr.bf16.mxu0 %v2065_v40  ;;  %v2138_v36 = vld [vmem:[#allocation2 + $0x18] ss:$36 sps:$4 sm:$0xff]   ;;  %v2148_v39 = vld [vmem:[%s2593_s1 + $0x208] sm:$0xff]   ;;  %v2155_v40 = vld [vmem:[%s2593_s1 + $0x210] sm:$0xff]  }
  0x37   :  { %1187 = vmatprep.mubr.bf16.mxu1 %v2067_v41  ;;  %1830 = vmatprep.subr.bf16.mxu0 %v2071_v44  ;;  %v2142_v37 = vld [vmem:[#allocation2 + $0x5c] ss:$36 sps:$4 sm:$0xff]   ;;  %v2151_v44 = vld [vmem:[#allocation2 + $0xac] ss:$36 sps:$4 sm:$0xff]  }
  0x38   :  { %1894 = vmatprep.subr.bf16.mxu1 %v2072_v45  ;;  %v2146_v41 = vld [vmem:[#allocation2 + $0x58] ss:$36 sps:$4 sm:$0xff]  }
  0x39   :  { %1831 = vmatpush3.bf16.msra.mxu0 %v2073_v46  ;;  %v2162_v45 = vld [vmem:[%s2593_s1 + $0x218] sm:$0xff]   ;;  %v2169_v46 = vld [vmem:[%s2593_s1 + $0x220] sm:$0xff]  }
  0x3a   :  { %1895 = vmatpush3.bf16.msra.mxu1 %v2074_v47  ;;  %1832 = vmatprep.subr.bf16.mxu0 %v2081_v52  ;;  %v2153_v47 = vld [vmem:[#allocation2 + $0xa0] ss:$36 sps:$4 sm:$0xff]   ;;  %v2160_v52 = vld [vmem:[#allocation2 + $0xe8] ss:$36 sps:$4 sm:$0xff]  }
  0x3b   :  { %1896 = vmatprep.subr.bf16.mxu1 %v2082_v53  ;;  %v2183_v53 = vld [vmem:[%s2593_s1 + $0x230] sm:$0xff]  }
  0x3c   :  { %1091 = vmatmul.mubr.bf16.gmra.mrb[4].mxu0 %v2069_v42  ;;  %v2147_v42 = vld [vmem:[#allocation2 + $0x60] ss:$36 sps:$4 sm:$0xff]  }
  0x3d   :  { %1188 = vmatmul.mubr.bf16.gmra.mrb[4].mxu1 %v2070_v43  ;;  %1098 = vmatprep.mubr.bf16.mxu0 %v2075_v48  ;;  %v2149_v43 = vld [vmem:[#allocation2 + $0xa4] ss:$36 sps:$4 sm:$0xff]  }
  0x3e   :  { %1195 = vmatprep.mubr.bf16.mxu1 %v2077_v49  ;;  %1833 = vmatpush3.bf16.msra.mxu0 %v2083_v54  ;;  %v2154_v48 = vld [vmem:[#allocation2 + $0xa8] ss:$36 sps:$4 sm:$0xff]   ;;  %v2161_v54 = vld [vmem:[#allocation2 + $0xf0] ss:$36 sps:$4 sm:$0xff]  }
  0x3f   :  { %1897 = vmatpush3.bf16.msra.mxu1 %v2084_v55  ;;  %1834 = vmatprep.subr.bf16.mxu0 %v2091_v60  ;;  %v2156_v49 = vld [vmem:[#allocation2 + $0xec] ss:$36 sps:$4 sm:$0xff]   ;;  %v2163_v55 = vld [vmem:[#allocation2 + $0x134] ss:$36 sps:$4 sm:$0xff]   ;;  %v2170_v60 = vld [vmem:[#allocation2 + $0x17c] ss:$36 sps:$4 sm:$0xff]  }
  0x40   :  { %1898 = vmatprep.subr.bf16.mxu1 %v2092_v61  ;;  %v2172_v61 = vld [vmem:[#allocation2 + $0x184] ss:$36 sps:$4 sm:$0xff]  }
  0x42   :  { %1835 = vmatpush3.bf16.msra.mxu0 %v2093_v62  ;;  %v2174_v62 = vld [vmem:[#allocation2 + $0x178] ss:$36 sps:$4 sm:$0xff]  }
  0x43   :  { %1899 = vmatpush3.bf16.msra.mxu1 %v2094_v63  ;;  %1836 = vmatprep.subr.bf16.mxu0 %v2101_v3  ;;  %v2175_v63 = vld [vmem:[#allocation2 + $0x180] ss:$36 sps:$4 sm:$0xff]   ;;  %v2182_v3 = vld [vmem:[#allocation2 + $0x1c8] ss:$36 sps:$4 sm:$0xff]  }
  0x44   :  { %1099 = vmatmul.mubr.bf16.gmra.mrb[8].mxu0 %v2079_v50  ;;  %1900 = vmatprep.subr.bf16.mxu1 %v2102_v5  ;;  %v2158_v50 = vld [vmem:[#allocation2 + $0xf4] ss:$36 sps:$4 sm:$0xff]  }
  0x45   :  { %1196 = vmatmul.mubr.bf16.gmra.mrb[8].mxu1 %v2080_v51  ;;  %1106 = vmatprep.mubr.bf16.mxu0 %v2085_v56  ;;  %v2176_v51 = vld [vmem:[%s2593_s1 + $0x228] sm:$0xff]   ;;  %v2165_v56 = vld [vmem:[#allocation2 + $0x13c] ss:$36 sps:$4 sm:$0xff]   ;;  %v2186_v5 = vld [vmem:[#allocation2 + $0x214] ss:$36 sps:$4 sm:$0xff]  }
  0x46   :  { %1203 = vmatprep.mubr.bf16.mxu1 %v2087_v57  ;;  %1837 = vmatpush3.bf16.msra.mxu0 %v2103_v6  ;;  %v2190_v57 = vld [vmem:[%s2593_s1 + $0x238] sm:$0xff]   ;;  %v2188_v6 = vld [vmem:[#allocation2 + $0x208] ss:$36 sps:$4 sm:$0xff]  }
  0x47   :  { %1901 = vmatpush3.bf16.msra.mxu1 %v2104_v7  ;;  %1838 = vmatprep.subr.bf16.mxu0 %v2111_v10  ;;  %v2189_v7 = vld [vmem:[#allocation2 + $0x210] ss:$36 sps:$4 sm:$0xff]   ;;  %v2193_v10 = vld [vmem:[#allocation2 + $0x68] ss:$36 sps:$4 sm:$0xff]  }
  0x48   :  { %1902 = vmatprep.subr.bf16.mxu1 %v2112_v11  ;;  %v2194_v11 = vld [vmem:[#allocation2 + $0x188] ss:$36 sps:$4 sm:$0xff]  }
  0x4a   :  { %1839 = vmatpush3.bf16.msra.mxu0 %v2113_v13  ;;  %v2196_v13 = vld [vmem:[#allocation2 + $0x1d0] ss:$36 sps:$4 sm:$0xff]  }
  0x4b   :  { %1903 = vmatpush3.bf16.msra.mxu1 %v2114_v14  ;;  %1840 = vmatprep.subr.bf16.mxu0 %v2121_v18  ;;  %v2197_v14 = vld [vmem:[#allocation2 + $0xf8] ss:$36 sps:$4 sm:$0xff]  }
  0x4c   :  { %1107 = vmatmul.mubr.bf16.gmra.mrb[12].mxu0 %v2089_v58  ;;  %1904 = vmatprep.subr.bf16.mxu1 %v2122_v19  ;;  %v2167_v58 = vld [vmem:[#allocation2 + $0x130] ss:$36 sps:$4 sm:$0xff]  }
  0x4d   :  { %1204 = vmatmul.mubr.bf16.gmra.mrb[12].mxu1 %v2090_v59  ;;  %1114 = vmatprep.mubr.bf16.mxu0 %v2095_v0  ;;  %v2168_v59 = vld [vmem:[#allocation2 + $0x138] ss:$36 sps:$4 sm:$0xff]   ;;  %v2177_v0 = vld [vmem:[#allocation2 + $0x1c4] ss:$36 sps:$4 sm:$0xff]  }
  0x4e   :  { %1211 = vmatprep.mubr.bf16.mxu1 %v2097_v1  ;;  %1841 = vmatpush3.bf16.msra.mxu0 %v2123_v20  ;;  %v2179_v1 = vld [vmem:[#allocation2 + $0x1cc] ss:$36 sps:$4 sm:$0xff]  }
  0x4f   :  { %1905 = vmatpush3.bf16.msra.mxu1 %v2124_v21  ;;  %1842 = vmatprep.subr.bf16.mxu0 %v2131_v26 }
  0x50   :  { %1906 = vmatprep.subr.bf16.mxu1 %v2132_v27 }
  0x52   :  { %1843 = vmatpush3.bf16.msra.mxu0 %v2133_v28 }
  0x53   :  { %1907 = vmatpush3.bf16.msra.mxu1 %v2134_v29  ;;  %1972 = vmatprep.subr.bf16.mxu0 %v2141_v32 }
  0x54   :  { %1115 = vmatmul.mubr.bf16.gmra.mrb[16].mxu0 %v2099_v2  ;;  %2004 = vmatprep.subr.bf16.mxu1 %v2141_v32  ;;  %v2181_v2 = vld [vmem:[#allocation2 + $0x1c0] ss:$36 sps:$4 sm:$0xff]  }
  0x55   :  { %1212 = vmatmul.mubr.bf16.gmra.mrb[16].mxu1 %v2100_v4  ;;  %1122 = vmatprep.mubr.bf16.mxu0 %v2105_v8  ;;  %v2184_v4 = vld [vmem:[#allocation2 + $0x20c] ss:$36 sps:$4 sm:$0xff]   ;;  %v2191_v8 = vld [vmem:[#allocation2 + $0x20] ss:$36 sps:$4 sm:$0xff]  }
  0x56   :  { %1219 = vmatprep.mubr.bf16.mxu1 %v2107_v9  ;;  %v2192_v9 = vld [vmem:[#allocation2 + $0x140] ss:$36 sps:$4 sm:$0xff]  }
  0x5c   :  { %1123 = vmatmul.mubr.bf16.gmra.mrb[20].mxu0 %v2109_v12  ;;  %v2195_v12 = vld [vmem:[#allocation2 + $0xb0] ss:$36 sps:$4 sm:$0xff]  }
  0x5d   :  { %1220 = vmatmul.mubr.bf16.gmra.mrb[20].mxu1 %v2110_v15  ;;  %1130 = vmatprep.mubr.bf16.mxu0 %v2115_v16  ;;  %v2198_v15 = vld [vmem:[#allocation2 + $0x218] ss:$36 sps:$4 sm:$0xff]  }
  0x5e   :  { %1227 = vmatprep.mubr.bf16.mxu1 %v2117_v17 }
  0x64   :  { %1131 = vmatmul.mubr.bf16.gmra.mrb[24].mxu0 %v2119_v22 }
  0x65   :  { %1228 = vmatmul.mubr.bf16.gmra.mrb[24].mxu1 %v2120_v23  ;;  %1138 = vmatprep.mubr.bf16.mxu0 %v2125_v24 }
  0x66   :  { %1235 = vmatprep.mubr.bf16.mxu1 %v2127_v25 }
  0x6c   :  { %1139 = vmatmul.mubr.bf16.gmra.mrb[28].mxu0 %v2129_v30 }
  0x6d   :  { %1236 = vmatmul.mubr.bf16.gmra.mrb[28].mxu1 %v2130_v31  ;;  %1276 = vmatprep.mubr.bf16.mxu0 %v2137_v33 }
  0x6e   :  { %1373 = vmatprep.mubr.bf16.mxu1 %v2140_v34 }
  0x74   :  { %1277 = vmatmul.mubr.bf16.vlgmr.msra.gmra.mrb[32].mxu0 %v2135_v35 }
  0x75   :  { %1374 = vmatmul.mubr.bf16.vlgmr.msra.gmra.mrb[32].mxu1 %v2138_v36  ;;  %1973 = vmatpush3.bf16.msra.mxu0 %v2141_v32 }
  0x76   :  { %2012 = vmatpush3.bf16.msra.mxu1 %v2141_v32  ;;  %1284 = vmatprep.mubr.bf16.mxu0 %v2142_v37 }
  0x77   :  { %1381 = vmatprep.mubr.bf16.mxu1 %v2144_v38  ;;  %1974 = vmatprep.subr.bf16.mxu0 %v2148_v39 }
  0x78   :  { %2005 = vmatprep.subr.bf16.mxu1 %v2148_v39 }
  0x79   :  { %1975 = vmatpush3.bf16.msra.mxu0 %v2148_v39 }
  0x7a   :  { %2013 = vmatpush3.bf16.msra.mxu1 %v2148_v39  ;;  %1976 = vmatprep.subr.bf16.mxu0 %v2155_v40 }
  0x7b   :  { %2006 = vmatprep.subr.bf16.mxu1 %v2155_v40 }
  0x7c   :  { %1285 = vmatmul.mubr.bf16.gmra.mrb[36].mxu0 %v2146_v41 }
  0x7d   :  { %1382 = vmatmul.mubr.bf16.gmra.mrb[36].mxu1 %v2147_v42  ;;  %1292 = vmatprep.mubr.bf16.mxu0 %v2149_v43 }
  0x7e   :  { %1389 = vmatprep.mubr.bf16.mxu1 %v2151_v44  ;;  %1977 = vmatpush3.bf16.msra.mxu0 %v2155_v40 }
  0x7f   :  { %2014 = vmatpush3.bf16.msra.mxu1 %v2155_v40  ;;  %1978 = vmatprep.subr.bf16.mxu0 %v2162_v45 }
  0x80   :  { %2007 = vmatprep.subr.bf16.mxu1 %v2162_v45 }
  0x82   :  { %1979 = vmatpush3.bf16.msra.mxu0 %v2162_v45 }
  0x83   :  { %2015 = vmatpush3.bf16.msra.mxu1 %v2162_v45  ;;  %1980 = vmatprep.subr.bf16.mxu0 %v2169_v46 }
  0x84   :  { %1293 = vmatmul.mubr.bf16.gmra.mrb[40].mxu0 %v2153_v47  ;;  %2008 = vmatprep.subr.bf16.mxu1 %v2169_v46 }
  0x85   :  { %1390 = vmatmul.mubr.bf16.gmra.mrb[40].mxu1 %v2154_v48  ;;  %1300 = vmatprep.mubr.bf16.mxu0 %v2156_v49 }
  0x86   :  { %1397 = vmatprep.mubr.bf16.mxu1 %v2158_v50  ;;  %1981 = vmatpush3.bf16.msra.mxu0 %v2169_v46 }
  0x87   :  { %2016 = vmatpush3.bf16.msra.mxu1 %v2169_v46  ;;  %1982 = vmatprep.subr.bf16.mxu0 %v2176_v51 }
  0x88   :  { %2009 = vmatprep.subr.bf16.mxu1 %v2176_v51 }
  0x8a   :  { %1983 = vmatpush3.bf16.msra.mxu0 %v2176_v51 }
  0x8b   :  { %2017 = vmatpush3.bf16.msra.mxu1 %v2176_v51  ;;  %1984 = vmatprep.subr.bf16.mxu0 %v2183_v53 }
  0x8c   :  { %1301 = vmatmul.mubr.bf16.gmra.mrb[44].mxu0 %v2160_v52  ;;  %2010 = vmatprep.subr.bf16.mxu1 %v2183_v53 }
  0x8d   :  { %1398 = vmatmul.mubr.bf16.gmra.mrb[44].mxu1 %v2161_v54  ;;  %1308 = vmatprep.mubr.bf16.mxu0 %v2163_v55 }
  0x8e   :  { %1405 = vmatprep.mubr.bf16.mxu1 %v2165_v56  ;;  %1985 = vmatpush3.bf16.msra.mxu0 %v2183_v53 }
  0x8f   :  { %2018 = vmatpush3.bf16.msra.mxu1 %v2183_v53  ;;  %1986 = vmatprep.subr.bf16.mxu0 %v2190_v57 }
  0x90   :  { %2011 = vmatprep.subr.bf16.mxu1 %v2190_v57 }
  0x92   :  { %1987 = vmatpush3.bf16.msra.mxu0 %v2190_v57 }
  0x93   :  { %2019 = vmatpush3.bf16.msra.mxu1 %v2190_v57 }
  0x94   :  { %1309 = vmatmul.mubr.bf16.gmra.mrb[48].mxu0 %v2167_v58 }
  0x95   :  { %1406 = vmatmul.mubr.bf16.gmra.mrb[48].mxu1 %v2168_v59  ;;  %1316 = vmatprep.mubr.bf16.mxu0 %v2170_v60 }
  0x96   :  { %1413 = vmatprep.mubr.bf16.mxu1 %v2172_v61 }
  0x9c   :  { %1317 = vmatmul.mubr.bf16.gmra.mrb[52].mxu0 %v2174_v62 }
  0x9d   :  { %1414 = vmatmul.mubr.bf16.gmra.mrb[52].mxu1 %v2175_v63  ;;  %1324 = vmatprep.mubr.bf16.mxu0 %v2177_v0 }
  0x9e   :  { %1421 = vmatprep.mubr.bf16.mxu1 %v2179_v1 }
  0xa4   :  { %1325 = vmatmul.mubr.bf16.gmra.mrb[56].mxu0 %v2181_v2 }
  0xa5   :  { %1422 = vmatmul.mubr.bf16.gmra.mrb[56].mxu1 %v2182_v3  ;;  %1332 = vmatprep.mubr.bf16.mxu0 %v2184_v4 }
  0xa6   :  { %1429 = vmatprep.mubr.bf16.mxu1 %v2186_v5 }
  0xac   :  { %1333 = vmatmul.mubr.bf16.gmra.mrb[60].mxu0 %v2188_v6 }
  0xad   :  { %1430 = vmatmul.mubr.bf16.gmra.mrb[60].mxu1 %v2189_v7  ;;  %1988 = vmatprep.mubr.bf16.mxu0 %v2191_v8 }
  0xae   :  { %1996 = vmatprep.mubr.bf16.mxu1 %v2192_v9 }
  0xb4   :  { %1989 = vmatmul.mubr.bf16.vlgmr.msra.gmra.mrb[64].mxu0 %v2193_v10 }
  0xb5   :  { %1997 = vmatmul.mubr.bf16.vlgmr.msra.gmra.mrb[64].mxu1 %v2194_v11  ;;  %1992 = vmatprep.mubr.bf16.mxu0 %v2195_v12 }
  0xb6   :  { %2000 = vmatprep.mubr.bf16.mxu1 %v2196_v13 }
  0xbc   :  { %1993 = vmatmul.mubr.bf16.gmra.mrb[68].mxu0 %v2197_v14 }
  0xbd   :  { %2001 = vmatmul.mubr.bf16.gmra.mrb[68].mxu1 %v2198_v15 }
 0x107   :  { %v1716_v16 = vpop.f32.mrb[0].mxu0 }
 0x108   :  { %v1780_v17 = vpop.f32.mrb[0].mxu1  ;;  %v1717_v18 = vpop.f32.mrb[1].mxu0 }
 0x109   :  { %v1718_v19 = vadd.f32 %v1717_v18, %v1716_v16  ;;  %v1781_v20 = vpop.f32.mrb[1].mxu1  ;;  %v1719_v21 = vpop.f32.mrb[2].mxu0 }
 0x10a   :  { %v1782_v22 = vadd.f32 %v1781_v20, %v1780_v17  ;;  %v1783_v23 = vpop.f32.mrb[2].mxu1  ;;  %v1720_v24 = vpop.f32.mrb[3].mxu0 }
 0x10b   :  { %v1721_v25 = vadd.f32 %v1720_v24, %v1719_v21  ;;  %v1784_v26 = vpop.f32.mrb[3].mxu1 }
 0x10c   :  { %v2469_v27 = vadd.f32 %v1782_v22, %v1718_v19  ;;  %v1785_v28 = vadd.f32 %v1784_v26, %v1783_v23 }
 0x10e   :  { %v2471_v29 = vadd.f32 %v1785_v28, %v1721_v25 }
 0x10f   :  { %v1722_v30 = vpop.f32.mrb[4].mxu0 }
 0x110   :  { %v1786_v31 = vpop.f32.mrb[4].mxu1  ;;  %v1723_v32 = vpop.f32.mrb[5].mxu0 }
 0x111   :  { %v1724_v33 = vadd.f32 %v1723_v32, %v1722_v30  ;;  %v1787_v34 = vpop.f32.mrb[5].mxu1  ;;  %v1725_v35 = vpop.f32.mrb[6].mxu0 }
 0x112   :  { %v1788_v36 = vadd.f32 %v1787_v34, %v1786_v31  ;;  %v1789_v37 = vpop.f32.mrb[6].mxu1  ;;  %v1726_v38 = vpop.f32.mrb[7].mxu0 }
 0x113   :  { %v1727_v39 = vadd.f32 %v1726_v38, %v1725_v35  ;;  %v1790_v40 = vpop.f32.mrb[7].mxu1 }
 0x114   :  { %v2473_v41 = vadd.f32 %v1788_v36, %v1724_v33  ;;  %v1791_v42 = vadd.f32 %v1790_v40, %v1789_v37 }
 0x116   :  { %v2475_v43 = vadd.f32 %v1791_v42, %v1727_v39 }
 0x117   :  { %v1728_v44 = vpop.f32.mrb[8].mxu0 }
 0x118   :  { %v1792_v45 = vpop.f32.mrb[8].mxu1  ;;  %v1729_v46 = vpop.f32.mrb[9].mxu0 }
 0x119   :  { %v1730_v47 = vadd.f32 %v1729_v46, %v1728_v44  ;;  %v1793_v48 = vpop.f32.mrb[9].mxu1  ;;  %v1731_v49 = vpop.f32.mrb[10].mxu0 }
 0x11a   :  { %v1794_v50 = vadd.f32 %v1793_v48, %v1792_v45  ;;  %v1795_v51 = vpop.f32.mrb[10].mxu1  ;;  %v1732_v52 = vpop.f32.mrb[11].mxu0 }
 0x11b   :  { %v1733_v53 = vadd.f32 %v1732_v52, %v1731_v49  ;;  %v1796_v54 = vpop.f32.mrb[11].mxu1 }
 0x11c   :  { %v2477_v55 = vadd.f32 %v1794_v50, %v1730_v47  ;;  %v1797_v56 = vadd.f32 %v1796_v54, %v1795_v51 }
 0x11e   :  { %v2479_v57 = vadd.f32 %v1797_v56, %v1733_v53 }
 0x11f   :  { %v1734_v58 = vpop.f32.mrb[12].mxu0 }
 0x120   :  { %v1798_v59 = vpop.f32.mrb[12].mxu1  ;;  %v1735_v60 = vpop.f32.mrb[13].mxu0 }
 0x121   :  { %v1736_v61 = vadd.f32 %v1735_v60, %v1734_v58  ;;  %v1799_v62 = vpop.f32.mrb[13].mxu1  ;;  %v1737_v63 = vpop.f32.mrb[14].mxu0 }
 0x122   :  { %v1800_v0 = vadd.f32 %v1799_v62, %v1798_v59  ;;  %v1801_v1 = vpop.f32.mrb[14].mxu1  ;;  %v1738_v2 = vpop.f32.mrb[15].mxu0 }
 0x123   :  { %v1739_v3 = vadd.f32 %v1738_v2, %v1737_v63  ;;  %v1802_v4 = vpop.f32.mrb[15].mxu1 }
 0x124   :  { %v2481_v5 = vadd.f32 %v1800_v0, %v1736_v61  ;;  %v1803_v6 = vadd.f32 %v1802_v4, %v1801_v1 }
 0x126   :  { %v2483_v7 = vadd.f32 %v1803_v6, %v1739_v3 }
 0x127   :  { %v1740_v8 = vpop.f32.mrb[16].mxu0 }
 0x128   :  { %v1804_v9 = vpop.f32.mrb[16].mxu1  ;;  %v1741_v10 = vpop.f32.mrb[17].mxu0 }
 0x129   :  { %v1742_v11 = vadd.f32 %v1741_v10, %v1740_v8  ;;  %v1805_v12 = vpop.f32.mrb[17].mxu1  ;;  %v1743_v13 = vpop.f32.mrb[18].mxu0 }
 0x12a   :  { %v1806_v14 = vadd.f32 %v1805_v12, %v1804_v9  ;;  %v1807_v15 = vpop.f32.mrb[18].mxu1  ;;  %v1744_v16 = vpop.f32.mrb[19].mxu0 }
 0x12b   :  { %v1745_v17 = vadd.f32 %v1744_v16, %v1743_v13  ;;  %v1808_v18 = vpop.f32.mrb[19].mxu1 }
 0x12c   :  { %v2485_v19 = vadd.f32 %v1806_v14, %v1742_v11  ;;  %v1809_v20 = vadd.f32 %v1808_v18, %v1807_v15 }
 0x12e   :  { %v2487_v21 = vadd.f32 %v1809_v20, %v1745_v17 }
 0x12f   :  { %v1746_v22 = vpop.f32.mrb[20].mxu0 }
 0x130   :  { %v1810_v23 = vpop.f32.mrb[20].mxu1  ;;  %v1747_v24 = vpop.f32.mrb[21].mxu0 }
 0x131   :  { %v1748_v25 = vadd.f32 %v1747_v24, %v1746_v22  ;;  %v1811_v26 = vpop.f32.mrb[21].mxu1  ;;  %v1749_v28 = vpop.f32.mrb[22].mxu0 }
 0x132   :  { %v1812_v30 = vadd.f32 %v1811_v26, %v1810_v23  ;;  %v1813_v31 = vpop.f32.mrb[22].mxu1  ;;  %v1750_v32 = vpop.f32.mrb[23].mxu0 }
 0x133   :  { %v1751_v33 = vadd.f32 %v1750_v32, %v1749_v28  ;;  %v1814_v34 = vpop.f32.mrb[23].mxu1 }
 0x134   :  { %v2489_v35 = vadd.f32 %v1812_v30, %v1748_v25  ;;  %v1815_v36 = vadd.f32 %v1814_v34, %v1813_v31 }
 0x136   :  { %v2491_v37 = vadd.f32 %v1815_v36, %v1751_v33 }
 0x137   :  { %v1752_v38 = vpop.f32.mrb[24].mxu0 }
 0x138   :  { %v1816_v39 = vpop.f32.mrb[24].mxu1  ;;  %v1753_v40 = vpop.f32.mrb[25].mxu0 }
 0x139   :  { %v1754_v42 = vadd.f32 %v1753_v40, %v1752_v38  ;;  %v1817_v44 = vpop.f32.mrb[25].mxu1  ;;  %v1755_v45 = vpop.f32.mrb[26].mxu0 }
 0x13a   :  { %v1818_v46 = vadd.f32 %v1817_v44, %v1816_v39  ;;  %v1819_v47 = vpop.f32.mrb[26].mxu1  ;;  %v1756_v48 = vpop.f32.mrb[27].mxu0 }
 0x13b   :  { %v1757_v49 = vadd.f32 %v1756_v48, %v1755_v45  ;;  %v1820_v50 = vpop.f32.mrb[27].mxu1 }
 0x13c   :  { %v2493_v51 = vadd.f32 %v1818_v46, %v1754_v42  ;;  %v1821_v52 = vadd.f32 %v1820_v50, %v1819_v47 }
 0x13e   :  { %v2495_v53 = vadd.f32 %v1821_v52, %v1757_v49 }
 0x13f   :  { %v1758_v54 = vpop.f32.mrb[28].mxu0 }
 0x140   :  { %v1822_v56 = vpop.f32.mrb[28].mxu1  ;;  %v1759_v58 = vpop.f32.mrb[29].mxu0 }
 0x141   :  { %v1760_v59 = vadd.f32 %v1759_v58, %v1758_v54  ;;  %v1823_v60 = vpop.f32.mrb[29].mxu1  ;;  %v1761_v61 = vpop.f32.mrb[30].mxu0 }
 0x142   :  { %v1824_v62 = vadd.f32 %v1823_v60, %v1822_v56  ;;  %v1825_v63 = vpop.f32.mrb[30].mxu1  ;;  %v1762_v0 = vpop.f32.mrb[31].mxu0 }
 0x143   :  { %v1763_v1 = vadd.f32 %v1762_v0, %v1761_v61  ;;  %v1826_v2 = vpop.f32.mrb[31].mxu1 }
 0x144   :  { %v2497_v3 = vadd.f32 %v1824_v62, %v1760_v59  ;;  %v1827_v4 = vadd.f32 %v1826_v2, %v1825_v63 }
 0x146   :  { %v2499_v6 = vadd.f32 %v1827_v4, %v1763_v1 }
 0x147   :  { %v1844_v8 = vpop.f32.mrb[32].mxu0 }
 0x148   :  { %v1908_v9 = vpop.f32.mrb[32].mxu1  ;;  %v1845_v10 = vpop.f32.mrb[33].mxu0 }
 0x149   :  { %v1846_v11 = vadd.f32 %v1845_v10, %v1844_v8  ;;  %v1909_v12 = vpop.f32.mrb[33].mxu1  ;;  %v1847_v13 = vpop.f32.mrb[34].mxu0 }
 0x14a   :  { %v1910_v14 = vadd.f32 %v1909_v12, %v1908_v9  ;;  %v1911_v15 = vpop.f32.mrb[34].mxu1  ;;  %v1848_v16 = vpop.f32.mrb[35].mxu0 }
 0x14b   :  { %v1279_v17 = vadd.f32 %v1846_v11, %v2469_v27  ;;  %v1849_v18 = vadd.f32 %v1848_v16, %v1847_v13  ;;  %v1912_v20 = vpop.f32.mrb[35].mxu1 }
 0x14c   :  { %v1913_v22 = vadd.f32 %v1912_v20, %v1911_v15 }
 0x14d   :  { %v1282_v23 = vadd.f32 %v1849_v18, %v2471_v29  ;;  %v2503_v24 = vadd.f32 %v1910_v14, %v1279_v17 }
 0x14f   :  { %v1850_v25 = vpop.f32.mrb[36].mxu0  ;;  %v2505_v26 = vadd.f32 %v1913_v22, %v1282_v23 }
 0x150   :  { %v1914_v28 = vpop.f32.mrb[36].mxu1  ;;  %v1851_v30 = vpop.f32.mrb[37].mxu0 }
 0x151   :  { %v1852_v31 = vadd.f32 %v1851_v30, %v1850_v25  ;;  %v1915_v32 = vpop.f32.mrb[37].mxu1  ;;  %v1853_v33 = vpop.f32.mrb[38].mxu0 }
 0x152   :  { %v1916_v34 = vadd.f32 %v1915_v32, %v1914_v28  ;;  %v1917_v36 = vpop.f32.mrb[38].mxu1  ;;  %v1854_v38 = vpop.f32.mrb[39].mxu0 }
 0x153   :  { %v1287_v27 = vadd.f32 %v1852_v31, %v2473_v41  ;;  %v1855_v39 = vadd.f32 %v1854_v38, %v1853_v33  ;;  %v1918_v40 = vpop.f32.mrb[39].mxu1 }
 0x154   :  { %v1919_v42 = vadd.f32 %v1918_v40, %v1917_v36 }
 0x155   :  { %v1290_v29 = vadd.f32 %v1855_v39, %v2475_v43  ;;  %v2509_v44 = vadd.f32 %v1916_v34, %v1287_v27 }
 0x157   :  { %v1856_v45 = vpop.f32.mrb[40].mxu0  ;;  %v2511_v46 = vadd.f32 %v1919_v42, %v1290_v29 }
 0x158   :  { %v1920_v47 = vpop.f32.mrb[40].mxu1  ;;  %v1857_v48 = vpop.f32.mrb[41].mxu0 }
 0x159   :  { %v1858_v49 = vadd.f32 %v1857_v48, %v1856_v45  ;;  %v1921_v50 = vpop.f32.mrb[41].mxu1  ;;  %v1859_v52 = vpop.f32.mrb[42].mxu0 }
 0x15a   :  { %v1922_v54 = vadd.f32 %v1921_v50, %v1920_v47  ;;  %v1923_v56 = vpop.f32.mrb[42].mxu1  ;;  %v1860_v58 = vpop.f32.mrb[43].mxu0 }
 0x15b   :  { %v1295_v41 = vadd.f32 %v1858_v49, %v2477_v55  ;;  %v1861_v59 = vadd.f32 %v1860_v58, %v1859_v52  ;;  %v1924_v60 = vpop.f32.mrb[43].mxu1 }
 0x15c   :  { %v1925_v61 = vadd.f32 %v1924_v60, %v1923_v56 }
 0x15d   :  { %v1298_v43 = vadd.f32 %v1861_v59, %v2479_v57  ;;  %v2515_v62 = vadd.f32 %v1922_v54, %v1295_v41 }
 0x15f   :  { %v1862_v63 = vpop.f32.mrb[44].mxu0  ;;  %v2517_v0 = vadd.f32 %v1925_v61, %v1298_v43 }
 0x160   :  { %v1926_v1 = vpop.f32.mrb[44].mxu1  ;;  %v1863_v2 = vpop.f32.mrb[45].mxu0 }
 0x161   :  { %v1864_v4 = vadd.f32 %v1863_v2, %v1862_v63  ;;  %v1927_v8 = vpop.f32.mrb[45].mxu1  ;;  %v1865_v9 = vpop.f32.mrb[46].mxu0 }
 0x162   :  { %v1928_v10 = vadd.f32 %v1927_v8, %v1926_v1  ;;  %v1929_v11 = vpop.f32.mrb[46].mxu1  ;;  %v1866_v12 = vpop.f32.mrb[47].mxu0 }
 0x163   :  { %v1303_v55 = vadd.f32 %v1864_v4, %v2481_v5  ;;  %v1867_v13 = vadd.f32 %v1866_v12, %v1865_v9  ;;  %v1930_v14 = vpop.f32.mrb[47].mxu1 }
 0x164   :  { %v1931_v15 = vadd.f32 %v1930_v14, %v1929_v11 }
 0x165   :  { %v1306_v57 = vadd.f32 %v1867_v13, %v2483_v7  ;;  %v2521_v16 = vadd.f32 %v1928_v10, %v1303_v55 }
 0x167   :  { %v1868_v17 = vpop.f32.mrb[48].mxu0  ;;  %v2523_v18 = vadd.f32 %v1931_v15, %v1306_v57 }
 0x168   :  { %v1932_v20 = vpop.f32.mrb[48].mxu1  ;;  %v1869_v22 = vpop.f32.mrb[49].mxu0 }
 0x169   :  { %v1870_v23 = vadd.f32 %v1869_v22, %v1868_v17  ;;  %v1933_v25 = vpop.f32.mrb[49].mxu1  ;;  %v1871_v28 = vpop.f32.mrb[50].mxu0 }
 0x16a   :  { %v1934_v30 = vadd.f32 %v1933_v25, %v1932_v20  ;;  %v1935_v31 = vpop.f32.mrb[50].mxu1  ;;  %v1872_v32 = vpop.f32.mrb[51].mxu0 }
 0x16b   :  { %v1311_v5 = vadd.f32 %v1870_v23, %v2485_v19  ;;  %v1873_v33 = vadd.f32 %v1872_v32, %v1871_v28  ;;  %v1936_v34 = vpop.f32.mrb[51].mxu1 }
 0x16c   :  { %v1937_v36 = vadd.f32 %v1936_v34, %v1935_v31 }
 0x16d   :  { %v1314_v7 = vadd.f32 %v1873_v33, %v2487_v21  ;;  %v1408_v38 = vadd.f32 %v1934_v30, %v1311_v5 }
 0x16f   :  { %v1874_v27 = vpop.f32.mrb[52].mxu0  ;;  %v2527_v39 = vadd.f32 %v1937_v36, %v1314_v7 }
 0x170   :  { %v1938_v40 = vpop.f32.mrb[52].mxu1  ;;  %v1875_v42 = vpop.f32.mrb[53].mxu0 }
 0x171   :  { %v1876_v29 = vadd.f32 %v1875_v42, %v1874_v27  ;;  %v1939_v45 = vpop.f32.mrb[53].mxu1  ;;  %v1877_v47 = vpop.f32.mrb[54].mxu0 }
 0x172   :  { %v1940_v48 = vadd.f32 %v1939_v45, %v1938_v40  ;;  %v1941_v49 = vpop.f32.mrb[54].mxu1  ;;  %v1878_v50 = vpop.f32.mrb[55].mxu0 }
 0x173   :  { %v1319_v52 = vadd.f32 %v1876_v29, %v2489_v35  ;;  %v1879_v19 = vadd.f32 %v1878_v50, %v1877_v47  ;;  %v1942_v54 = vpop.f32.mrb[55].mxu1 }
 0x174   :  { %v1943_v56 = vadd.f32 %v1942_v54, %v1941_v49 }
 0x175   :  { %v1322_v58 = vadd.f32 %v1879_v19, %v2491_v37  ;;  %v1416_v21 = vadd.f32 %v1940_v48, %v1319_v52 }
 0x177   :  { %v1880_v41 = vpop.f32.mrb[56].mxu0  ;;  %v1419_v59 = vadd.f32 %v1943_v56, %v1322_v58 }
 0x178   :  { %v1944_v60 = vpop.f32.mrb[56].mxu1  ;;  %v1881_v61 = vpop.f32.mrb[57].mxu0 }
 0x179   :  { %v1882_v43 = vadd.f32 %v1881_v61, %v1880_v41  ;;  %v1945_v63 = vpop.f32.mrb[57].mxu1  ;;  %v1883_v1 = vpop.f32.mrb[58].mxu0 }
 0x17a   :  { %v1946_v2 = vadd.f32 %v1945_v63, %v1944_v60  ;;  %v1947_v4 = vpop.f32.mrb[58].mxu1  ;;  %v1884_v8 = vpop.f32.mrb[59].mxu0 }
 0x17b   :  { %v1327_v9 = vadd.f32 %v1882_v43, %v2493_v51  ;;  %v1885_v10 = vadd.f32 %v1884_v8, %v1883_v1  ;;  %v1948_v35 = vpop.f32.mrb[59].mxu1 }
 0x17c   :  { %v1949_v11 = vadd.f32 %v1948_v35, %v1947_v4 }
 0x17d   :  { %v1330_v12 = vadd.f32 %v1885_v10, %v2495_v53  ;;  %v1424_v55 = vadd.f32 %v1946_v2, %v1327_v9 }
 0x17f   :  { %v1886_v37 = vpop.f32.mrb[60].mxu0  ;;  %v1427_v13 = vadd.f32 %v1949_v11, %v1330_v12 }
 0x180   :  { %v1950_v14 = vpop.f32.mrb[60].mxu1  ;;  %v1887_v15 = vpop.f32.mrb[61].mxu0 }
 0x181   :  { %v1888_v57 = vadd.f32 %v1887_v15, %v1886_v37  ;;  %v1951_v17 = vpop.f32.mrb[61].mxu1  ;;  %v1889_v20 = vpop.f32.mrb[62].mxu0 }
 0x182   :  { %v1952_v22 = vadd.f32 %v1951_v17, %v1950_v14  ;;  %v1953_v23 = vpop.f32.mrb[62].mxu1  ;;  %v1890_v25 = vpop.f32.mrb[63].mxu0 }
 0x183   :  { %v1335_v28 = vadd.f32 %v1888_v57, %v2497_v3  ;;  %v1891_v30 = vadd.f32 %v1890_v25, %v1889_v20  ;;  %v1954_v51 = vpop.f32.mrb[63].mxu1 }
 0x184   :  { %v1955_v31 = vadd.f32 %v1954_v51, %v1953_v23 }
 0x185   :  { %v1338_v32 = vadd.f32 %v1891_v30, %v2499_v6  ;;  %v1432_v5 = vadd.f32 %v1952_v22, %v1335_v28 }
 0x187   :  { %v1990_v53 = vpop.f32.mrb[64].mxu0  ;;  %v1435_v33 = vadd.f32 %v1955_v31, %v1338_v32 }
 0x188   :  { %v1481_v34 = vadd.f32 %v1990_v53, %v2509_v44  ;;  %v1998_v36 = vpop.f32.mrb[64].mxu1  ;;  %v1472_v7 = vpop.f32.mrb[65].mxu0 }
 0x189   :  { %v1513_v27 = vadd.f32 %v1998_v36, %v1416_v21  ;;  %v1473_v40 = vadd.f32 %v1472_v7, %v2503_v24  ;;  %v1504_v42 = vpop.f32.mrb[65].mxu1  ;;  %v1991_v29 = vpop.f32.mrb[66].mxu0 }
 0x18a   :  { %1537 = vst [vmem:[%s2594_s2 + $0x10] sm:$0xff] %v1481_v34  ;;  %v1505_v3 = vadd.f32 %v1504_v42, %v1408_v38  ;;  %v1484_v45 = vadd.f32 %v1991_v29, %v2511_v46  ;;  %v1999_v6 = vpop.f32.mrb[66].mxu1  ;;  %v1475_v47 = vpop.f32.mrb[67].mxu0 }
 0x18b   :  { %1545 = vst [vmem:[%s2594_s2 + $0x50] sm:$0xff] %v1513_v27  ;;  %1535 = vst [vmem:[%s2594_s2] sm:$0xff] %v1473_v40  ;;  %v1516_v24 = vadd.f32 %v1999_v6, %v1419_v59  ;;  %v1476_v44 = vadd.f32 %v1475_v47, %v2505_v26  ;;  %v1507_v48 = vpop.f32.mrb[67].mxu1 }
 0x18c   :  { %1543 = vst [vmem:[%s2594_s2 + $0x40] sm:$0xff] %v1505_v3  ;;  %1538 = vst [vmem:[%s2594_s2 + $0x18] sm:$0xff] %v1484_v45  ;;  %v1508_v46 = vadd.f32 %v1507_v48, %v2527_v39 }
 0x18d   :  { %1546 = vst [vmem:[%s2594_s2 + $0x58] sm:$0xff] %v1516_v24  ;;  %1536 = vst [vmem:[%s2594_s2 + $0x8] sm:$0xff] %v1476_v44 }
 0x18e   :  { %1544 = vst [vmem:[%s2594_s2 + $0x48] sm:$0xff] %v1508_v46 }
 0x18f   :  { %v1994_v26 = vpop.f32.mrb[68].mxu0 }
 0x190   :  { %v1497_v38 = vadd.f32 %v1994_v26, %v2521_v16  ;;  %v2002_v49 = vpop.f32.mrb[68].mxu1  ;;  %v1488_v50 = vpop.f32.mrb[69].mxu0 }
 0x191   :  { %v1529_v52 = vadd.f32 %v2002_v49, %v1432_v5  ;;  %v1489_v39 = vadd.f32 %v1488_v50, %v2515_v62  ;;  %v1520_v19 = vpop.f32.mrb[69].mxu1  ;;  %v1995_v54 = vpop.f32.mrb[70].mxu0 }
 0x192   :  { %1541 = vst [vmem:[%s2594_s2 + $0x30] sm:$0xff] %v1497_v38  ;;  %v1521_v56 = vadd.f32 %v1520_v19, %v1424_v55  ;;  %v1500_v58 = vadd.f32 %v1995_v54, %v2523_v18  ;;  %v2003_v21 = vpop.f32.mrb[70].mxu1  ;;  %v1491_v41 = vpop.f32.mrb[71].mxu0 }
 0x193   :  { %1549 = vst [vmem:[%s2594_s2 + $0x70] sm:$0xff] %v1529_v52  ;;  %1539 = vst [vmem:[%s2594_s2 + $0x20] sm:$0xff] %v1489_v39  ;;  %v1532_v62 = vadd.f32 %v2003_v21, %v1435_v33  ;;  %v1492_v16 = vadd.f32 %v1491_v41, %v2517_v0  ;;  %v1523_v59 = vpop.f32.mrb[71].mxu1 }
 0x194   :  { %1547 = vst [vmem:[%s2594_s2 + $0x60] sm:$0xff] %v1521_v56  ;;  %1542 = vst [vmem:[%s2594_s2 + $0x38] sm:$0xff] %v1500_v58  ;;  %v1524_v18 = vadd.f32 %v1523_v59, %v1427_v13 }
 0x195   :  { %1550 = vst [vmem:[%s2594_s2 + $0x78] sm:$0xff] %v1532_v62  ;;  %1540 = vst [vmem:[%s2594_s2 + $0x28] sm:$0xff] %v1492_v16 }
 0x196   :  { %1548 = vst [vmem:[%s2594_s2 + $0x68] sm:$0xff] %v1524_v18 }
 0x197   :  { %1555 = vsyncpa [#allocation3], 1 }

// kernel: densenet_forward.136
= control target key start
LH: loop header
LB: loop body
LE: loop exit
PB: predicated region body
PF: predicated region fallthrough
CT: control target
= control target key end

     0   :  { %v38_v5 = vlaneseq  ;;  %s750_s6 = inlined_call_operand.vmem [shape: bf16[256,128], index: 6, kind: input, shape index: {}]   ;;  %s751_s0 = inlined_call_operand.vmem [shape: f32[32,256], index: 0, kind: input, shape index: {}]   ;;  %s752_s4 = inlined_call_operand.vmem [shape: f32[1,256], index: 4, kind: input, shape index: {}]   ;;  %s753_s5 = inlined_call_operand.vmem [shape: f32[1,256], index: 5, kind: input, shape index: {}]   ;;  %s754_s1 = inlined_call_operand.vmem [shape: f32[32,256], index: 1, kind: input, shape index: {}]   ;;  %s755_s2 = inlined_call_operand.vmem [shape: f32[32,256], index: 2, kind: input, shape index: {}]   ;;  %s756_s3 = inlined_call_operand.vmem [shape: f32[32,256], index: 3, kind: input, shape index: {}]   ;;  %s757_s7 = inlined_call_operand.vmem [shape: f32[32,128], index: 7, kind: output, shape index: {}]  }
   0x1   :  { %v460_v0 = vld [vmem:[%s750_s6 + $0x40] sm:$0xff]   ;;  %v462_v2 = vld [vmem:[%s750_s6 + $0x48] sm:$0xff]   ;;  %v464_v4 = vld [vmem:[%s750_s6 + $0x50] sm:$0xff]  }
   0x2   :  { %v461_v1 = vld [vmem:[%s750_s6] sm:$0xff]   ;;  %416 = vmatprep.subr.bf16.mxu0 %v460_v0  ;;  %444 = vmatprep.subr.bf16.mxu1 %v460_v0  ;;  %v463_v3 = vld [vmem:[%s750_s6 + $0x8] sm:$0xff]   ;;  %v465_v6 = vld [vmem:[%s750_s6 + $0x10] sm:$0xff]   ;;  %v39_v8 = vshrl.u32 %v38_v5, 7 }
   0x3   :  { %417 = vmatpush3.bf16.msra.mxu0 %v461_v1  ;;  %452 = vmatpush3.bf16.msra.mxu1 %v461_v1  ;;  %v466_v7 = vld [vmem:[%s750_s6 + $0x58] sm:$0xff]   ;;  %v468_v10 = vld [vmem:[%s750_s6 + $0x60] sm:$0xff]   ;;  %v470_v14 = vld [vmem:[%s750_s6 + $0x68] sm:$0xff]  }
   0x4   :  { %418 = vmatprep.subr.bf16.mxu0 %v462_v2  ;;  %445 = vmatprep.subr.bf16.mxu1 %v462_v2  ;;  %v467_v9 = vld [vmem:[%s750_s6 + $0x18] sm:$0xff]   ;;  %v44_v11 = vsub.s32 1, %v39_v8  ;;  %v469_v12 = vld [vmem:[%s750_s6 + $0x20] sm:$0xff]   ;;  %v40_v13 = vsub.s32 0, %v39_v8  ;;  %v30_v17 = vld [vmem:[%s751_s0 + $0x8] sm:$0xff] }
   0x5   :  { %v27_v15 = vld [vmem:[%s752_s4] sm:$0x3]  ;;  %v32_v18 = vld [vmem:[%s751_s0 + $0x18] sm:$0xff]  ;;  %v84_v21 = vld [vmem:[%s754_s1 + $0x8] sm:$0xff] }
   0x6   :  { %v28_v16 = vld [vmem:[%s753_s5] sm:$0x3]  ;;  %v561_v19 = vrot.slane %v27_v15, %v44_v11  ;;  %v86_v22 = vld [vmem:[%s754_s1 + $0x18] sm:$0xff]  ;;  %v571_v23 = vrot.slane %v27_v15, %v40_v13  ;;  %v124_v25 = vld [vmem:[%s755_s2 + $0x8] sm:$0xff] }
   0x7   :  { %419 = vmatpush3.bf16.msra.mxu0 %v463_v3  ;;  %453 = vmatpush3.bf16.msra.mxu1 %v463_v3  ;;  %v563_v20 = vrot.slane %v28_v16, %v44_v11  ;;  %v573_v24 = vrot.slane %v28_v16, %v40_v13  ;;  %v126_v26 = vld [vmem:[%s755_s2 + $0x18] sm:$0xff]  ;;  %v164_v27 = vld [vmem:[%s756_s3 + $0x8] sm:$0xff]  ;;  %v472_v33 = vld [vmem:[%s750_s6 + $0x70] sm:$0xff]  }
   0x8   :  { %420 = vmatprep.subr.bf16.mxu0 %v464_v4  ;;  %446 = vmatprep.subr.bf16.mxu1 %v464_v4  ;;  %v471_v28 = vld [vmem:[%s750_s6 + $0x28] sm:$0xff]   ;;  %v49_v29 = vmul.f32 %v561_v19, %v30_v17  ;;  %v51_v30 = vmul.f32 %v561_v19, %v32_v18  ;;  %v92_v31 = vmul.f32 %v84_v21, %v561_v19  ;;  %v166_v32 = vld [vmem:[%s756_s3 + $0x18] sm:$0xff]  ;;  %v473_v47 = vld [vmem:[%s750_s6 + $0x30] sm:$0xff]  }
   0x9   :  { %v94_v34 = vmul.f32 %v86_v22, %v561_v19  ;;  %v132_v35 = vmul.f32 %v124_v25, %v561_v19  ;;  %v134_v36 = vmul.f32 %v126_v26, %v561_v19  ;;  %v172_v40 = vmul.f32 %v164_v27, %v561_v19  ;;  %v34_v45 = vld [vmem:[%s751_s0 + $0x28] sm:$0xff]  ;;  %v36_v46 = vld [vmem:[%s751_s0 + $0x38] sm:$0xff]  ;;  %v29_v26 = vld [vmem:[%s751_s0] sm:$0xff] }
   0xa   :  { %v68_v37 = vadd.f32 %v563_v20, %v49_v29  ;;  %v70_v38 = vadd.f32 %v563_v20, %v51_v30  ;;  %v100_v39 = vadd.f32 %v92_v31, %v563_v20  ;;  %v174_v44 = vmul.f32 %v166_v32, %v561_v19  ;;  %v88_v52 = vld [vmem:[%s754_s1 + $0x28] sm:$0xff]  ;;  %v90_v53 = vld [vmem:[%s754_s1 + $0x38] sm:$0xff]  ;;  %v31_v31 = vld [vmem:[%s751_s0 + $0x10] sm:$0xff] }
   0xb   :  { %421 = vmatpush3.bf16.msra.mxu0 %v465_v6  ;;  %454 = vmatpush3.bf16.msra.mxu1 %v465_v6  ;;  %v102_v41 = vadd.f32 %v94_v34, %v563_v20  ;;  %v140_v42 = vadd.f32 %v132_v35, %v563_v20  ;;  %v142_v43 = vadd.f32 %v134_v36, %v563_v20  ;;  %v474_v54 = vld [vmem:[%s750_s6 + $0x78] sm:$0xff]   ;;  %v128_v3 = vld [vmem:[%s755_s2 + $0x28] sm:$0xff]  ;;  %v83_v32 = vld [vmem:[%s754_s1] sm:$0xff] }
   0xc   :  { %422 = vmatprep.subr.bf16.mxu0 %v466_v7  ;;  %447 = vmatprep.subr.bf16.mxu1 %v466_v7  ;;  %v76_v48 = vmax.f32 %v68_v37, 0.0  ;;  %v78_v49 = vmax.f32 %v70_v38, 0.0  ;;  %v108_v50 = vmax.f32 %v100_v39, 0.0  ;;  %v180_v51 = vadd.f32 %v172_v40, %v563_v20  ;;  %v475_v4 = vld [vmem:[%s750_s6 + $0x38] sm:$0xff]   ;;  %v85_v40 = vld [vmem:[%s754_s1 + $0x10] sm:$0xff] }
   0xd   :  { %v110_v55 = vmax.f32 %v102_v41, 0.0  ;;  %v148_v56 = vmax.f32 %v140_v42, 0.0  ;;  %v150_v57 = vmax.f32 %v142_v43, 0.0  ;;  %v182_v58 = vadd.f32 %v174_v44, %v563_v20  ;;  %v130_v8 = vld [vmem:[%s755_s2 + $0x38] sm:$0xff] }
   0xe   :  { %v116_v59 = vadd.f32 %v108_v50, %v76_v48  ;;  %v188_v60 = vmax.f32 %v180_v51, 0.0  ;;  %v53_v61 = vmul.f32 %v561_v19, %v34_v45  ;;  %v55_v62 = vmul.f32 %v561_v19, %v36_v46  ;;  %v170_v13 = vld [vmem:[%s756_s3 + $0x38] sm:$0xff]  ;;  %v123_v45 = vld [vmem:[%s755_s2] sm:$0xff] }
   0xf   :  { %423 = vmatpush3.bf16.msra.mxu0 %v467_v9  ;;  %455 = vmatpush3.bf16.msra.mxu1 %v467_v9  ;;  %v118_v63 = vadd.f32 %v110_v55, %v78_v49  ;;  %v190_v0 = vmax.f32 %v182_v58, 0.0  ;;  %v96_v1 = vmul.f32 %v88_v52, %v561_v19  ;;  %v98_v2 = vmul.f32 %v90_v53, %v561_v19 }
  0x10   :  { %424 = vmatprep.subr.bf16.mxu0 %v468_v10  ;;  %448 = vmatprep.subr.bf16.mxu1 %v468_v10  ;;  %v156_v5 = vadd.f32 %v148_v56, %v116_v59  ;;  %v72_v6 = vadd.f32 %v563_v20, %v53_v61  ;;  %v74_v7 = vadd.f32 %v563_v20, %v55_v62  ;;  %v165_v59 = vld [vmem:[%s756_s3 + $0x10] sm:$0xff] }
  0x11   :  { %v158_v9 = vadd.f32 %v150_v57, %v118_v63  ;;  %v104_v10 = vadd.f32 %v96_v1, %v563_v20  ;;  %v106_v11 = vadd.f32 %v98_v2, %v563_v20  ;;  %v136_v17 = vmul.f32 %v128_v3, %v561_v19 }
  0x12   :  { %v80_v15 = vmax.f32 %v72_v6, 0.0  ;;  %v82_v16 = vmax.f32 %v74_v7, 0.0  ;;  %v138_v25 = vmul.f32 %v130_v8, %v561_v19  ;;  %v178_v30 = vmul.f32 %v170_v13, %v561_v19 }
  0x13   :  { %425 = vmatpush3.bf16.msra.mxu0 %v469_v12  ;;  %456 = vmatpush3.bf16.msra.mxu1 %v469_v12  ;;  %v168_v12 = vld [vmem:[%s756_s3 + $0x28] sm:$0xff]  ;;  %v198_v18 = vadd.f32 %v190_v0, %v158_v9  ;;  %v112_v21 = vmax.f32 %v104_v10, 0.0  ;;  %v114_v22 = vmax.f32 %v106_v11, 0.0  ;;  %v50_v43 = vmul.f32 %v571_v23, %v31_v31  ;;  %v33_v0 = vld [vmem:[%s751_s0 + $0x20] sm:$0xff] }
  0x14   :  { %426 = vmatprep.subr.bf16.mxu0 %v470_v14  ;;  %449 = vmatprep.subr.bf16.mxu1 %v470_v14  ;;  %v196_v14 = vadd.f32 %v188_v60, %v156_v5  ;;  %v176_v29 = vmul.f32 %v168_v12, %v561_v19  ;;  %v146_v36 = vadd.f32 %v138_v25, %v563_v20  ;;  %v35_v5 = vld [vmem:[%s751_s0 + $0x30] sm:$0xff]  ;;  %v87_v10 = vld [vmem:[%s754_s1 + $0x20] sm:$0xff] }
  0x15   :  { %v120_v34 = vadd.f32 %v112_v21, %v80_v15  ;;  %v122_v35 = vadd.f32 %v114_v22, %v82_v16  ;;  %v186_v39 = vadd.f32 %v178_v30, %v563_v20  ;;  %v48_v19 = vmul.f32 %v571_v23, %v29_v26  ;;  %v89_v15 = vld [vmem:[%s754_s1 + $0x30] sm:$0xff]  ;;  %v127_v22 = vld [vmem:[%s755_s2 + $0x20] sm:$0xff] }
  0x16   :  { %v204_v27 = vmul.f32 0.25, %v196_v14  ;;  %v184_v38 = vadd.f32 %v176_v29, %v563_v20  ;;  %v154_v42 = vmax.f32 %v146_v36, 0.0  ;;  %v91_v44 = vmul.f32 %v83_v32, %v571_v23  ;;  %v129_v29 = vld [vmem:[%s755_s2 + $0x30] sm:$0xff] }
  0x17   :  { %427 = vmatpush3.bf16.msra.mxu0 %v471_v28  ;;  %457 = vmatpush3.bf16.msra.mxu1 %v471_v28  ;;  %v144_v28 = vadd.f32 %v136_v17, %v563_v20  ;;  %v125_v20 = vld [vmem:[%s755_s2 + $0x10] sm:$0xff]  ;;  %v194_v48 = vmax.f32 %v186_v39, 0.0  ;;  %v67_v49 = vadd.f32 %v573_v24, %v48_v19  ;;  %v69_v51 = vadd.f32 %v573_v24, %v50_v43 }
  0x18   :  { %428 = vmatprep.subr.bf16.mxu0 %v472_v33  ;;  %450 = vmatprep.subr.bf16.mxu1 %v472_v33  ;;  %v206_v33 = vmul.f32 0.25, %v198_v18  ;;  %v162_v50 = vadd.f32 %v154_v42, %v122_v35  ;;  %v93_v52 = vmul.f32 %v85_v40, %v571_v23  ;;  %v99_v53 = vadd.f32 %v91_v44, %v573_v24  ;;  %v169_v39 = vld [vmem:[%s756_s3 + $0x30] sm:$0xff] }
  0x19   :  { %v152_v37 = vmax.f32 %v144_v28, 0.0  ;;  %v75_v56 = vmax.f32 %v67_v49, 0.0  ;;  %v131_v57 = vmul.f32 %v123_v45, %v571_v23  ;;  %v133_v58 = vmul.f32 %v125_v20, %v571_v23 }
  0x1a   :  { %v212_v41 = vpack.c.bf16 %v206_v33, %v204_v27  ;;  %v202_v60 = vadd.f32 %v194_v48, %v162_v50  ;;  %v77_v61 = vmax.f32 %v69_v51, 0.0  ;;  %v101_v62 = vadd.f32 %v93_v52, %v573_v24 }
  0x1b   :  { %429 = vmatpush3.bf16.msra.mxu0 %v473_v47  ;;  %458 = vmatpush3.bf16.msra.mxu1 %v473_v47  ;;  %v160_v46 = vadd.f32 %v152_v37, %v120_v34  ;;  %v192_v47 = vmax.f32 %v184_v38, 0.0  ;;  %v107_v63 = vmax.f32 %v99_v53, 0.0  ;;  %v139_v2 = vadd.f32 %v131_v57, %v573_v24  ;;  %v167_v34 = vld [vmem:[%s756_s3 + $0x20] sm:$0xff] }
  0x1c   :  { %430 = vmatprep.subr.bf16.mxu0 %v474_v54  ;;  %451 = vmatprep.subr.bf16.mxu1 %v474_v54  ;;  %v163_v54 = vld [vmem:[%s756_s3] sm:$0xff]  ;;  %v141_v3 = vadd.f32 %v133_v58, %v573_v24  ;;  %v210_v6 = vmul.f32 0.25, %v202_v60  ;;  %v109_v7 = vmax.f32 %v101_v62, 0.0  ;;  %v173_v9 = vmul.f32 %v165_v59, %v571_v23 }
  0x1d   :  { %375 = vmatprep.mubr.bf16.mxu0 %v212_v41  ;;  %v200_v55 = vadd.f32 %v192_v47, %v160_v46  ;;  %v115_v8 = vadd.f32 %v107_v63, %v75_v56  ;;  %v147_v11 = vmax.f32 %v139_v2, 0.0  ;;  %v52_v14 = vmul.f32 %v571_v23, %v33_v0 }
  0x1e   :  { %v149_v12 = vmax.f32 %v141_v3, 0.0  ;;  %v117_v17 = vadd.f32 %v109_v7, %v77_v61  ;;  %v181_v18 = vadd.f32 %v173_v9, %v573_v24  ;;  %v54_v21 = vmul.f32 %v571_v23, %v35_v5 }
  0x1f   :  { %431 = vmatpush3.bf16.msra.mxu0 %v475_v4  ;;  %459 = vmatpush3.bf16.msra.mxu1 %v475_v4  ;;  %v208_v1 = vmul.f32 0.25, %v200_v55  ;;  %v171_v4 = vmul.f32 %v163_v54, %v571_v23  ;;  %v155_v25 = vadd.f32 %v147_v11, %v115_v8  ;;  %v71_v27 = vadd.f32 %v573_v24, %v52_v14 }
  0x20   :  { %v95_v28 = vmul.f32 %v87_v10, %v571_v23  ;;  %v157_v30 = vadd.f32 %v149_v12, %v117_v17  ;;  %v189_v31 = vmax.f32 %v181_v18, 0.0  ;;  %v73_v32 = vadd.f32 %v573_v24, %v54_v21 }
  0x21   :  { %v179_v13 = vadd.f32 %v171_v4, %v573_v24  ;;  %v214_v16 = vpack.c.bf16 %v210_v6, %v208_v1  ;;  %v97_v33 = vmul.f32 %v89_v15, %v571_v23  ;;  %v79_v36 = vmax.f32 %v71_v27, 0.0 }
  0x22   :  { %v103_v37 = vadd.f32 %v95_v28, %v573_v24  ;;  %v135_v38 = vmul.f32 %v127_v22, %v571_v23  ;;  %v197_v19 = vadd.f32 %v189_v31, %v157_v30  ;;  %v81_v40 = vmax.f32 %v73_v32, 0.0 }
  0x23   :  { %v187_v26 = vmax.f32 %v179_v13, 0.0  ;;  %383 = vmatprep.mubr.bf16.mxu1 %v214_v16  ;;  %v105_v41 = vadd.f32 %v97_v33, %v573_v24  ;;  %v137_v42 = vmul.f32 %v129_v29, %v571_v23  ;;  %v175_v20 = vmul.f32 %v167_v34, %v571_v23 }
  0x24   :  { %v111_v44 = vmax.f32 %v103_v37, 0.0  ;;  %v143_v45 = vadd.f32 %v135_v38, %v573_v24  ;;  %v205_v46 = vmul.f32 0.25, %v197_v19  ;;  %v177_v49 = vmul.f32 %v169_v39, %v571_v23 }
  0x25   :  { %v195_v35 = vadd.f32 %v187_v26, %v155_v25  ;;  %v113_v47 = vmax.f32 %v105_v41, 0.0  ;;  %v145_v48 = vadd.f32 %v137_v42, %v573_v24  ;;  %v183_v52 = vadd.f32 %v175_v20, %v573_v24 }
  0x26   :  { %v119_v50 = vadd.f32 %v111_v44, %v79_v36  ;;  %v151_v51 = vmax.f32 %v143_v45, 0.0  ;;  %v185_v56 = vadd.f32 %v177_v49, %v573_v24 }
  0x27   :  { %v203_v43 = vmul.f32 0.25, %v195_v35  ;;  %v121_v54 = vadd.f32 %v113_v47, %v81_v40  ;;  %v153_v55 = vmax.f32 %v145_v48, 0.0  ;;  %v191_v58 = vmax.f32 %v183_v52, 0.0 }
  0x28   :  { %v159_v57 = vadd.f32 %v151_v51, %v119_v50  ;;  %v193_v60 = vmax.f32 %v185_v56, 0.0 }
  0x29   :  { %v211_v53 = vpack.c.bf16 %v205_v46, %v203_v43  ;;  %v161_v59 = vadd.f32 %v153_v55, %v121_v54 }
  0x2a   :  { %v199_v61 = vadd.f32 %v191_v58, %v159_v57 }
  0x2b   :  { %376 = vmatmul.mubr.bf16.vlgmr.msra.gmra.mrb[0].mxu0 %v211_v53  ;;  %v201_v62 = vadd.f32 %v193_v60, %v161_v59 }
  0x2c   :  { %v207_v63 = vmul.f32 0.25, %v199_v61 }
  0x2d   :  { %v209_v0 = vmul.f32 0.25, %v201_v62 }
  0x2f   :  { %v213_v1 = vpack.c.bf16 %v209_v0, %v207_v63 }
  0x31   :  { %384 = vmatmul.mubr.bf16.vlgmr.msra.gmra.mrb[0].mxu1 %v213_v1 }
  0xfe   :  { %v432_v23 = vpop.f32.mrb[0].mxu0 }
  0xff   :  { %v433_v2 = vpop.f32.mrb[1].mxu0 }
 0x100   :  { %v434_v3 = vadd.f32 %v433_v2, %v432_v23  ;;  %v435_v4 = vpop.f32.mrb[2].mxu0 }
 0x101   :  { %v436_v5 = vpop.f32.mrb[3].mxu0 }
 0x102   :  { %392 = vst [vmem:[%s757_s7] sm:$0xff] %v434_v3  ;;  %v437_v24 = vadd.f32 %v436_v5, %v435_v4 }
 0x104   :  { %393 = vst [vmem:[%s757_s7 + $0x8] sm:$0xff] %v437_v24  ;;  %v438_v6 = vpop.f32.mrb[0].mxu1 }
 0x105   :  { %v439_v7 = vpop.f32.mrb[1].mxu1 }
 0x106   :  { %v440_v8 = vadd.f32 %v439_v7, %v438_v6  ;;  %v441_v9 = vpop.f32.mrb[2].mxu1 }
 0x107   :  { %v442_v10 = vpop.f32.mrb[3].mxu1 }
 0x108   :  { %394 = vst [vmem:[%s757_s7 + $0x10] sm:$0xff] %v440_v8  ;;  %v443_v11 = vadd.f32 %v442_v10, %v441_v9 }
 0x10a   :  { %395 = vst [vmem:[%s757_s7 + $0x18] sm:$0xff] %v443_v11 }

// kernel: densenet_forward.137
= control target key start
LH: loop header
LB: loop body
LE: loop exit
PB: predicated region body
PF: predicated region fallthrough
CT: control target
= control target key end

     0   :  { %v42_v19 = vlaneseq  ;;  %s894_s3 = inlined_call_operand.vmem [shape: bf16[512,128], index: 3, kind: input, shape index: {}]   ;;  %s895_s0 = inlined_call_operand.vmem [shape: f32[32,512], index: 0, kind: input, shape index: {}]   ;;  %s896_s1 = inlined_call_operand.vmem [shape: f32[1,512], index: 1, kind: input, shape index: {}]   ;;  %s897_s2 = inlined_call_operand.vmem [shape: f32[1,512], index: 2, kind: input, shape index: {}]   ;;  %s898_s4 = inlined_call_operand.vmem [shape: f32[1,128], index: 4, kind: input, shape index: {}]   ;;  %s899_s5 = inlined_call_operand.vmem [shape: f32[1,128], index: 5, kind: input, shape index: {}]   ;;  %s900_s6 = inlined_call_operand.vmem [shape: bf16[32,128], index: 6, kind: output, shape index: {}]  }
   0x1   :  { %v653_v0 = vld [vmem:[%s894_s3 + $0x40] sm:$0xff]   ;;  %v657_v4 = vld [vmem:[%s894_s3 + $0x48] sm:$0xff]   ;;  %v661_v8 = vld [vmem:[%s894_s3 + $0x50] sm:$0xff]  }
   0x2   :  { %v654_v1 = vld [vmem:[%s894_s3 + $0xc0] sm:$0xff]   ;;  %597 = vmatprep.subr.bf16.mxu0 %v653_v0  ;;  %v658_v5 = vld [vmem:[%s894_s3 + $0xc8] sm:$0xff]   ;;  %v662_v9 = vld [vmem:[%s894_s3 + $0xd0] sm:$0xff]   ;;  %v43_v24 = vshrl.u32 %v42_v19, 7 }
   0x3   :  { %v655_v2 = vld [vmem:[%s894_s3] sm:$0xff]   ;;  %625 = vmatprep.subr.bf16.mxu1 %v654_v1  ;;  %v659_v6 = vld [vmem:[%s894_s3 + $0x8] sm:$0xff]   ;;  %v663_v10 = vld [vmem:[%s894_s3 + $0x10] sm:$0xff]  }
   0x4   :  { %v656_v3 = vld [vmem:[%s894_s3 + $0x80] sm:$0xff]   ;;  %598 = vmatpush3.bf16.msra.mxu0 %v655_v2  ;;  %v660_v7 = vld [vmem:[%s894_s3 + $0x88] sm:$0xff]   ;;  %v664_v11 = vld [vmem:[%s894_s3 + $0x90] sm:$0xff]   ;;  %v48_v29 = vsub.s32 1, %v43_v24  ;;  %v56_v31 = vsub.s32 3, %v43_v24  ;;  %v44_v33 = vsub.s32 0, %v43_v24 }
   0x5   :  { %626 = vmatpush3.bf16.msra.mxu1 %v656_v3  ;;  %599 = vmatprep.subr.bf16.mxu0 %v657_v4  ;;  %v665_v12 = vld [vmem:[%s894_s3 + $0x58] sm:$0xff]   ;;  %v669_v16 = vld [vmem:[%s894_s3 + $0x60] sm:$0xff]   ;;  %v673_v21 = vld [vmem:[%s894_s3 + $0x68] sm:$0xff]   ;;  %v52_v35 = vsub.s32 2, %v43_v24 }
   0x6   :  { %627 = vmatprep.subr.bf16.mxu1 %v658_v5  ;;  %v666_v13 = vld [vmem:[%s894_s3 + $0xd8] sm:$0xff]   ;;  %v670_v17 = vld [vmem:[%s894_s3 + $0xe0] sm:$0xff]   ;;  %v674_v22 = vld [vmem:[%s894_s3 + $0xe8] sm:$0xff]  }
   0x7   :  { %v667_v14 = vld [vmem:[%s894_s3 + $0x18] sm:$0xff]   ;;  %v671_v18 = vld [vmem:[%s894_s3 + $0x20] sm:$0xff]   ;;  %v675_v23 = vld [vmem:[%s894_s3 + $0x28] sm:$0xff]  }
   0x8   :  { %600 = vmatpush3.bf16.msra.mxu0 %v659_v6  ;;  %v668_v15 = vld [vmem:[%s894_s3 + $0x98] sm:$0xff]   ;;  %v672_v20 = vld [vmem:[%s894_s3 + $0xa0] sm:$0xff]   ;;  %v676_v25 = vld [vmem:[%s894_s3 + $0xa8] sm:$0xff]  }
   0x9   :  { %628 = vmatpush3.bf16.msra.mxu1 %v660_v7  ;;  %601 = vmatprep.subr.bf16.mxu0 %v661_v8  ;;  %v677_v26 = vld [vmem:[%s894_s3 + $0x70] sm:$0xff]   ;;  %v681_v32 = vld [vmem:[%s894_s3 + $0x78] sm:$0xff]   ;;  %v25_v38 = vld [vmem:[%s895_s0 + $0x8] sm:$0xff] }
   0xa   :  { %629 = vmatprep.subr.bf16.mxu1 %v662_v9  ;;  %v678_v27 = vld [vmem:[%s894_s3 + $0xf0] sm:$0xff]   ;;  %v682_v34 = vld [vmem:[%s894_s3 + $0xf8] sm:$0xff]   ;;  %v29_v39 = vld [vmem:[%s895_s0 + $0x28] sm:$0xff] }
   0xb   :  { %v679_v28 = vld [vmem:[%s894_s3 + $0x30] sm:$0xff]   ;;  %v683_v36 = vld [vmem:[%s894_s3 + $0x38] sm:$0xff]   ;;  %v40_v40 = vld [vmem:[%s896_s1] sm:$0xf] }
   0xc   :  { %602 = vmatpush3.bf16.msra.mxu0 %v663_v10  ;;  %v680_v30 = vld [vmem:[%s894_s3 + $0xb0] sm:$0xff]   ;;  %v684_v37 = vld [vmem:[%s894_s3 + $0xb8] sm:$0xff]   ;;  %v49_v41 = vrot.slane %v40_v40, %v48_v29  ;;  %v78_v42 = vld [vmem:[%s897_s2] sm:$0xf]  ;;  %v57_v45 = vrot.slane %v40_v40, %v56_v31  ;;  %v45_v46 = vrot.slane %v40_v40, %v44_v33  ;;  %v834_v47 = vrot.slane %v40_v40, %v52_v35 }
   0xd   :  { %630 = vmatpush3.bf16.msra.mxu1 %v664_v11  ;;  %603 = vmatprep.subr.bf16.mxu0 %v665_v12  ;;  %v27_v43 = vld [vmem:[%s895_s0 + $0x18] sm:$0xff]  ;;  %v87_v48 = vrot.slane %v78_v42, %v48_v29  ;;  %v95_v49 = vrot.slane %v78_v42, %v56_v31  ;;  %v24_v50 = vld [vmem:[%s895_s0] sm:$0xff]  ;;  %v83_v52 = vrot.slane %v78_v42, %v44_v33  ;;  %v26_v53 = vld [vmem:[%s895_s0 + $0x10] sm:$0xff] }
   0xe   :  { %631 = vmatprep.subr.bf16.mxu1 %v666_v13  ;;  %v31_v44 = vld [vmem:[%s895_s0 + $0x38] sm:$0xff]  ;;  %v28_v51 = vld [vmem:[%s895_s0 + $0x20] sm:$0xff]  ;;  %v845_v54 = vrot.slane %v78_v42, %v52_v35  ;;  %v63_v55 = vmul.f32 %v49_v41, %v25_v38  ;;  %v67_v56 = vmul.f32 %v49_v41, %v29_v39  ;;  %v65_v57 = vmul.f32 %v57_v45, %v27_v43  ;;  %v30_v59 = vld [vmem:[%s895_s0 + $0x30] sm:$0xff] }
   0xf   :  { %v69_v58 = vmul.f32 %v57_v45, %v31_v44  ;;  %v62_v60 = vmul.f32 %v45_v46, %v24_v50  ;;  %v66_v61 = vmul.f32 %v45_v46, %v28_v51  ;;  %v64_v62 = vmul.f32 %v834_v47, %v26_v53  ;;  %v33_v8 = vld [vmem:[%s895_s0 + $0x48] sm:$0xff] }
  0x10   :  { %604 = vmatpush3.bf16.msra.mxu0 %v667_v14  ;;  %v68_v63 = vmul.f32 %v834_v47, %v30_v59  ;;  %v101_v0 = vadd.f32 %v87_v48, %v63_v55  ;;  %v105_v1 = vadd.f32 %v87_v48, %v67_v56  ;;  %v103_v2 = vadd.f32 %v95_v49, %v65_v57  ;;  %v37_v9 = vld [vmem:[%s895_s0 + $0x68] sm:$0xff]  ;;  %v35_v14 = vld [vmem:[%s895_s0 + $0x58] sm:$0xff] }
  0x11   :  { %632 = vmatpush3.bf16.msra.mxu1 %v668_v15  ;;  %605 = vmatprep.subr.bf16.mxu0 %v669_v16  ;;  %v107_v3 = vadd.f32 %v95_v49, %v69_v58  ;;  %v100_v4 = vadd.f32 %v83_v52, %v62_v60  ;;  %v104_v5 = vadd.f32 %v83_v52, %v66_v61  ;;  %v39_v15 = vld [vmem:[%s895_s0 + $0x78] sm:$0xff] }
  0x12   :  { %633 = vmatprep.subr.bf16.mxu1 %v670_v17  ;;  %v102_v6 = vadd.f32 %v845_v54, %v64_v62  ;;  %v106_v7 = vadd.f32 %v845_v54, %v68_v63  ;;  %v117_v10 = vmax.f32 %v101_v0, 0.0  ;;  %v121_v11 = vmax.f32 %v105_v1, 0.0 }
  0x13   :  { %v119_v12 = vmax.f32 %v103_v2, 0.0  ;;  %v123_v13 = vmax.f32 %v107_v3, 0.0  ;;  %v116_v16 = vmax.f32 %v100_v4, 0.0  ;;  %v120_v17 = vmax.f32 %v104_v5, 0.0 }
  0x14   :  { %606 = vmatpush3.bf16.msra.mxu0 %v671_v18  ;;  %v118_v18 = vmax.f32 %v102_v6, 0.0  ;;  %v122_v19 = vmax.f32 %v106_v7, 0.0  ;;  %v75_v24 = vmul.f32 %v49_v41, %v37_v9  ;;  %v77_v29 = vmul.f32 %v57_v45, %v39_v15  ;;  %v577_v6 = vld [vmem:[%s899_s5] ss:$0 sm:$0xff] }
  0x15   :  { %634 = vmatpush3.bf16.msra.mxu1 %v672_v20  ;;  %607 = vmatprep.subr.bf16.mxu0 %v673_v21  ;;  %v32_v20 = vld [vmem:[%s895_s0 + $0x40] sm:$0xff]  ;;  %v133_v21 = vpack.c.bf16 %v121_v11, %v117_v10 }
  0x16   :  { %635 = vmatprep.subr.bf16.mxu1 %v674_v22  ;;  %v135_v22 = vpack.c.bf16 %v123_v13, %v119_v12  ;;  %v70_v33 = vmul.f32 %v45_v46, %v32_v20 }
  0x17   :  { %428 = vmatprep.mubr.bf16.mxu0 %v133_v21 }
  0x18   :  { %608 = vmatpush3.bf16.msra.mxu0 %v675_v23  ;;  %v71_v23 = vmul.f32 %v49_v41, %v33_v8  ;;  %477 = vmatprep.mubr.bf16.mxu1 %v135_v22  ;;  %v108_v40 = vadd.f32 %v83_v52, %v70_v33 }
  0x19   :  { %636 = vmatpush3.bf16.msra.mxu1 %v676_v25  ;;  %609 = vmatprep.subr.bf16.mxu0 %v677_v26  ;;  %v36_v25 = vld [vmem:[%s895_s0 + $0x60] sm:$0xff]  ;;  %v132_v26 = vpack.c.bf16 %v120_v17, %v116_v16 }
  0x1a   :  { %637 = vmatprep.subr.bf16.mxu1 %v678_v27  ;;  %v134_v27 = vpack.c.bf16 %v122_v19, %v118_v18  ;;  %v109_v31 = vadd.f32 %v87_v48, %v71_v23  ;;  %v124_v50 = vmax.f32 %v108_v40, 0.0 }
  0x1c   :  { %610 = vmatpush3.bf16.msra.mxu0 %v679_v28  ;;  %v73_v28 = vmul.f32 %v57_v45, %v35_v14  ;;  %v125_v38 = vmax.f32 %v109_v31, 0.0 }
  0x1d   :  { %638 = vmatpush3.bf16.msra.mxu1 %v680_v30  ;;  %611 = vmatprep.subr.bf16.mxu0 %v681_v32  ;;  %v34_v30 = vld [vmem:[%s895_s0 + $0x50] sm:$0xff]  ;;  %v113_v32 = vadd.f32 %v87_v48, %v75_v24 }
  0x1e   :  { %639 = vmatprep.subr.bf16.mxu1 %v682_v34  ;;  %v38_v34 = vld [vmem:[%s895_s0 + $0x70] sm:$0xff]  ;;  %v111_v35 = vadd.f32 %v95_v49, %v73_v28  ;;  %v72_v41 = vmul.f32 %v834_v47, %v34_v30 }
  0x1f   :  { %v129_v39 = vmax.f32 %v113_v32, 0.0  ;;  %v76_v45 = vmul.f32 %v834_v47, %v38_v34 }
  0x20   :  { %612 = vmatpush3.bf16.msra.mxu0 %v683_v36  ;;  %v115_v36 = vadd.f32 %v95_v49, %v77_v29  ;;  %v127_v42 = vmax.f32 %v111_v35, 0.0  ;;  %v110_v51 = vadd.f32 %v845_v54, %v72_v41 }
  0x21   :  { %640 = vmatpush3.bf16.msra.mxu1 %v684_v37  ;;  %v74_v37 = vmul.f32 %v45_v46, %v36_v25  ;;  %v137_v48 = vpack.c.bf16 %v129_v39, %v125_v38  ;;  %v114_v56 = vadd.f32 %v845_v54, %v76_v45  ;;  %v576_v54 = vld [vmem:[%s898_s4] ss:$0 sm:$0xff] }
  0x22   :  { %v131_v43 = vmax.f32 %v115_v36, 0.0  ;;  %v126_v46 = vmax.f32 %v110_v51, 0.0 }
  0x23   :  { %429 = vmatmul.mubr.bf16.vlgmr.msra.gmra.mrb[0].mxu0 %v132_v26  ;;  %v112_v44 = vadd.f32 %v83_v52, %v74_v37  ;;  %v130_v57 = vmax.f32 %v114_v56, 0.0 }
  0x24   :  { %478 = vmatmul.mubr.bf16.vlgmr.msra.gmra.mrb[0].mxu1 %v134_v27  ;;  %v139_v53 = vpack.c.bf16 %v131_v43, %v127_v42  ;;  %436 = vmatprep.mubr.bf16.mxu0 %v137_v48 }
  0x25   :  { %v128_v55 = vmax.f32 %v112_v44, 0.0  ;;  %v138_v58 = vpack.c.bf16 %v130_v57, %v126_v46 }
  0x26   :  { %485 = vmatprep.mubr.bf16.mxu1 %v139_v53 }
  0x27   :  { %v136_v49 = vpack.c.bf16 %v128_v55, %v124_v50 }
  0x2b   :  { %437 = vmatmul.mubr.bf16.gmra.mrb[4].mxu0 %v136_v49 }
  0x2c   :  { %486 = vmatmul.mubr.bf16.gmra.mrb[4].mxu1 %v138_v58 }
  0xf6   :  { %v613_v59 = vpop.f32.mrb[0].mxu0 }
  0xf7   :  { %v641_v52 = vpop.f32.mrb[0].mxu1  ;;  %v614_v60 = vpop.f32.mrb[1].mxu0 }
  0xf8   :  { %v642_v47 = vpop.f32.mrb[1].mxu1  ;;  %v615_v61 = vadd.f32 %v614_v60, %v613_v59  ;;  %v616_v63 = vpop.f32.mrb[2].mxu0 }
  0xf9   :  { %v643_v62 = vadd.f32 %v642_v47, %v641_v52  ;;  %v644_v0 = vpop.f32.mrb[2].mxu1  ;;  %v617_v1 = vpop.f32.mrb[3].mxu0 }
  0xfa   :  { %v645_v2 = vpop.f32.mrb[3].mxu1  ;;  %v618_v4 = vadd.f32 %v617_v1, %v616_v63 }
  0xfb   :  { %v480_v3 = vadd.f32 %v643_v62, %v615_v61  ;;  %v646_v5 = vadd.f32 %v645_v2, %v644_v0 }
  0xfd   :  { %v501_v7 = vmul.f32 %v576_v54, %v480_v3  ;;  %v483_v8 = vadd.f32 %v646_v5, %v618_v4 }
  0xfe   :  { %v619_v11 = vpop.f32.mrb[4].mxu0 }
  0xff   :  { %v512_v9 = vadd.f32 %v577_v6, %v501_v7  ;;  %v502_v10 = vmul.f32 %v576_v54, %v483_v8  ;;  %v620_v12 = vpop.f32.mrb[5].mxu0  ;;  %v647_v14 = vpop.f32.mrb[4].mxu1 }
 0x100   :  { %v621_v15 = vadd.f32 %v620_v12, %v619_v11  ;;  %v622_v16 = vpop.f32.mrb[6].mxu0  ;;  %v648_v17 = vpop.f32.mrb[5].mxu1 }
 0x101   :  { %v513_v13 = vadd.f32 %v577_v6, %v502_v10  ;;  %v623_v18 = vpop.f32.mrb[7].mxu0  ;;  %v516_v19 = vmax.f32 %v512_v9, 0.0  ;;  %v649_v21 = vadd.f32 %v648_v17, %v647_v14  ;;  %v650_v22 = vpop.f32.mrb[6].mxu1 }
 0x102   :  { %v624_v23 = vadd.f32 %v623_v18, %v622_v16  ;;  %v651_v24 = vpop.f32.mrb[7].mxu1 }
 0x103   :  { %v517_v20 = vmax.f32 %v513_v13, 0.0  ;;  %v488_v26 = vadd.f32 %v649_v21, %v621_v15  ;;  %v652_v27 = vadd.f32 %v651_v24, %v650_v22 }
 0x105   :  { %v589_v25 = vpack.c.bf16 %v517_v20, %v516_v19  ;;  %v503_v28 = vmul.f32 %v576_v54, %v488_v26  ;;  %v491_v29 = vadd.f32 %v652_v27, %v624_v23 }
 0x107   :  { %590 = vst [vmem:[%s900_s6] sm:$0xff] %v589_v25   ;;  %v514_v30 = vadd.f32 %v577_v6, %v503_v28  ;;  %v504_v31 = vmul.f32 %v576_v54, %v491_v29 }
 0x109   :  { %v515_v32 = vadd.f32 %v577_v6, %v504_v31  ;;  %v518_v33 = vmax.f32 %v514_v30, 0.0 }
 0x10b   :  { %v519_v34 = vmax.f32 %v515_v32, 0.0 }
 0x10d   :  { %v594_v35 = vpack.c.bf16 %v519_v34, %v518_v33 }
 0x10f   :  { %596 = vst [vmem:[%s900_s6 + $0x8] sm:$0xff] %v594_v35  }

// kernel: densenet_forward.138
= control target key start
LH: loop header
LB: loop body
LE: loop exit
PB: predicated region body
PF: predicated region fallthrough
CT: control target
= control target key end

     0   :  { %s1580_s1 = inlined_call_operand.vmem [shape: bf16[1152,128], index: 1, kind: input, shape index: {}]   ;;  %s1581_s0 = inlined_call_operand.vmem [shape: bf16[32,1152], index: 0, kind: input, shape index: {}]   ;;  %s1582_s2 = inlined_call_operand.vmem [shape: f32[32,128], index: 2, kind: output, shape index: {}]  }
   0x1   :  { %v1185_v0 = vld [vmem:[%s1580_s1 + $0x40] sm:$0xff]   ;;  %v1189_v4 = vld [vmem:[%s1580_s1 + $0x48] sm:$0xff]   ;;  %v1193_v8 = vld [vmem:[%s1580_s1 + $0x50] sm:$0xff]  }
   0x2   :  { %v1186_v1 = vld [vmem:[%s1580_s1 + $0xc0] sm:$0xff]   ;;  %1043 = vmatprep.subr.bf16.mxu0 %v1185_v0  ;;  %v1190_v5 = vld [vmem:[%s1580_s1 + $0xc8] sm:$0xff]   ;;  %v1194_v9 = vld [vmem:[%s1580_s1 + $0xd0] sm:$0xff]  }
   0x3   :  { %v1187_v2 = vld [vmem:[%s1580_s1] sm:$0xff]   ;;  %1071 = vmatprep.subr.bf16.mxu1 %v1186_v1  ;;  %v1191_v6 = vld [vmem:[%s1580_s1 + $0x8] sm:$0xff]   ;;  %v1195_v10 = vld [vmem:[%s1580_s1 + $0x10] sm:$0xff]  }
   0x4   :  { %v1188_v3 = vld [vmem:[%s1580_s1 + $0x80] sm:$0xff]   ;;  %1044 = vmatpush3.bf16.msra.mxu0 %v1187_v2  ;;  %v1192_v7 = vld [vmem:[%s1580_s1 + $0x88] sm:$0xff]   ;;  %v1196_v11 = vld [vmem:[%s1580_s1 + $0x90] sm:$0xff]  }
   0x5   :  { %1072 = vmatpush3.bf16.msra.mxu1 %v1188_v3  ;;  %1045 = vmatprep.subr.bf16.mxu0 %v1189_v4  ;;  %v1197_v12 = vld [vmem:[%s1580_s1 + $0x58] sm:$0xff]   ;;  %v1201_v16 = vld [vmem:[%s1580_s1 + $0x60] sm:$0xff]   ;;  %v1205_v20 = vld [vmem:[%s1580_s1 + $0x68] sm:$0xff]  }
   0x6   :  { %1073 = vmatprep.subr.bf16.mxu1 %v1190_v5  ;;  %v1198_v13 = vld [vmem:[%s1580_s1 + $0xd8] sm:$0xff]   ;;  %v1202_v17 = vld [vmem:[%s1580_s1 + $0xe0] sm:$0xff]   ;;  %v1206_v21 = vld [vmem:[%s1580_s1 + $0xe8] sm:$0xff]  }
   0x7   :  { %v1199_v14 = vld [vmem:[%s1580_s1 + $0x18] sm:$0xff]   ;;  %v1203_v18 = vld [vmem:[%s1580_s1 + $0x20] sm:$0xff]   ;;  %v1207_v22 = vld [vmem:[%s1580_s1 + $0x28] sm:$0xff]  }
   0x8   :  { %1046 = vmatpush3.bf16.msra.mxu0 %v1191_v6  ;;  %v1200_v15 = vld [vmem:[%s1580_s1 + $0x98] sm:$0xff]   ;;  %v1204_v19 = vld [vmem:[%s1580_s1 + $0xa0] sm:$0xff]   ;;  %v1208_v23 = vld [vmem:[%s1580_s1 + $0xa8] sm:$0xff]  }
   0x9   :  { %1074 = vmatpush3.bf16.msra.mxu1 %v1192_v7  ;;  %1047 = vmatprep.subr.bf16.mxu0 %v1193_v8  ;;  %v1209_v24 = vld [vmem:[%s1580_s1 + $0x70] sm:$0xff]   ;;  %v1213_v28 = vld [vmem:[%s1580_s1 + $0x78] sm:$0xff]   ;;  %v1217_v32 = vld [vmem:[%s1581_s0] ss:$36 sps:$4 sm:$0xff]  }
   0xa   :  { %1075 = vmatprep.subr.bf16.mxu1 %v1194_v9  ;;  %v1210_v25 = vld [vmem:[%s1580_s1 + $0xf0] sm:$0xff]   ;;  %v1214_v29 = vld [vmem:[%s1580_s1 + $0xf8] sm:$0xff]   ;;  %v1219_v33 = vld [vmem:[%s1581_s0 + $0x4] ss:$36 sps:$4 sm:$0xff]  }
   0xb   :  { %v1211_v26 = vld [vmem:[%s1580_s1 + $0x30] sm:$0xff]   ;;  %v1215_v30 = vld [vmem:[%s1580_s1 + $0x38] sm:$0xff]   ;;  %v1220_v34 = vld [vmem:[%s1581_s0 + $0x8] ss:$36 sps:$4 sm:$0xff]   ;;  %732 = vmatprep.mubr.bf16.mxu0 %v1219_v33 }
   0xc   :  { %1048 = vmatpush3.bf16.msra.mxu0 %v1195_v10  ;;  %v1212_v27 = vld [vmem:[%s1580_s1 + $0xb0] sm:$0xff]   ;;  %v1216_v31 = vld [vmem:[%s1580_s1 + $0xb8] sm:$0xff]   ;;  %v1223_v36 = vld [vmem:[%s1580_s1 + $0x140] sm:$0xff]  }
   0xd   :  { %1076 = vmatpush3.bf16.msra.mxu1 %v1196_v11  ;;  %1049 = vmatprep.subr.bf16.mxu0 %v1197_v12  ;;  %v1222_v35 = vld [vmem:[%s1581_s0 + $0xc] ss:$36 sps:$4 sm:$0xff]   ;;  %v1224_v37 = vld [vmem:[%s1580_s1 + $0x100] sm:$0xff]   ;;  %v1235_v48 = vld [vmem:[%s1580_s1 + $0x158] sm:$0xff]  }
   0xe   :  { %1077 = vmatprep.subr.bf16.mxu1 %v1198_v13  ;;  %781 = vmatprep.mubr.bf16.mxu1 %v1222_v35  ;;  %v1225_v38 = vld [vmem:[%s1580_s1 + $0x1c0] sm:$0xff]   ;;  %v1227_v40 = vld [vmem:[%s1580_s1 + $0x148] sm:$0xff]   ;;  %v1231_v44 = vld [vmem:[%s1580_s1 + $0x150] sm:$0xff]  }
   0xf   :  { %v1226_v39 = vld [vmem:[%s1580_s1 + $0x180] sm:$0xff]   ;;  %v1228_v41 = vld [vmem:[%s1580_s1 + $0x108] sm:$0xff]   ;;  %v1232_v45 = vld [vmem:[%s1580_s1 + $0x110] sm:$0xff]  }
  0x10   :  { %1050 = vmatpush3.bf16.msra.mxu0 %v1199_v14  ;;  %v1229_v42 = vld [vmem:[%s1580_s1 + $0x1c8] sm:$0xff]   ;;  %v1233_v46 = vld [vmem:[%s1580_s1 + $0x1d0] sm:$0xff]   ;;  %v1236_v49 = vld [vmem:[%s1580_s1 + $0x118] sm:$0xff]  }
  0x11   :  { %1078 = vmatpush3.bf16.msra.mxu1 %v1200_v15  ;;  %1051 = vmatprep.subr.bf16.mxu0 %v1201_v16  ;;  %v1230_v43 = vld [vmem:[%s1580_s1 + $0x188] sm:$0xff]   ;;  %v1234_v47 = vld [vmem:[%s1580_s1 + $0x190] sm:$0xff]   ;;  %v1237_v50 = vld [vmem:[%s1580_s1 + $0x1d8] sm:$0xff]  }
  0x12   :  { %1079 = vmatprep.subr.bf16.mxu1 %v1202_v17  ;;  %v1238_v51 = vld [vmem:[%s1580_s1 + $0x198] sm:$0xff]   ;;  %v1239_v52 = vld [vmem:[%s1580_s1 + $0x160] sm:$0xff]   ;;  %v1243_v56 = vld [vmem:[%s1580_s1 + $0x168] sm:$0xff]  }
  0x13   :  { %v1240_v53 = vld [vmem:[%s1580_s1 + $0x120] sm:$0xff]   ;;  %v1244_v57 = vld [vmem:[%s1581_s0 + $0x4c] ss:$36 sps:$4 sm:$0xff]   ;;  %v1246_v58 = vld [vmem:[%s1581_s0 + $0x54] ss:$36 sps:$4 sm:$0xff]  }
  0x14   :  { %1052 = vmatpush3.bf16.msra.mxu0 %v1203_v18  ;;  %v1241_v54 = vld [vmem:[%s1580_s1 + $0x1e0] sm:$0xff]   ;;  %v1248_v59 = vld [vmem:[%s1580_s1 + $0x128] sm:$0xff]   ;;  %v1250_v61 = vld [vmem:[%s1581_s0 + $0x50] ss:$36 sps:$4 sm:$0xff]  }
  0x15   :  { %1080 = vmatpush3.bf16.msra.mxu1 %v1204_v19  ;;  %1053 = vmatprep.subr.bf16.mxu0 %v1205_v20  ;;  %v1242_v55 = vld [vmem:[%s1580_s1 + $0x1a0] sm:$0xff]   ;;  %v1249_v60 = vld [vmem:[%s1581_s0 + $0x48] ss:$36 sps:$4 sm:$0xff]   ;;  %v1253_v0 = vld [vmem:[%s1580_s1 + $0x170] sm:$0xff]  }
  0x16   :  { %1081 = vmatprep.subr.bf16.mxu1 %v1206_v21  ;;  %v1251_v62 = vld [vmem:[%s1580_s1 + $0x1e8] sm:$0xff]   ;;  %v1254_v1 = vld [vmem:[%s1580_s1 + $0x130] sm:$0xff]   ;;  %v1257_v4 = vld [vmem:[%s1580_s1 + $0x178] sm:$0xff]  }
  0x17   :  { %v1252_v63 = vld [vmem:[%s1580_s1 + $0x1a8] sm:$0xff]   ;;  %v1255_v2 = vld [vmem:[%s1580_s1 + $0x1f0] sm:$0xff]   ;;  %v1258_v5 = vld [vmem:[%s1580_s1 + $0x138] sm:$0xff]  }
  0x18   :  { %1054 = vmatpush3.bf16.msra.mxu0 %v1207_v22  ;;  %v1256_v3 = vld [vmem:[%s1580_s1 + $0x1b0] sm:$0xff]   ;;  %v1259_v6 = vld [vmem:[%s1580_s1 + $0x1f8] sm:$0xff]   ;;  %v1264_v10 = vld [vmem:[%s1580_s1 + $0x200] sm:$0xff]  }
  0x19   :  { %1082 = vmatpush3.bf16.msra.mxu1 %v1208_v23  ;;  %1055 = vmatprep.subr.bf16.mxu0 %v1209_v24  ;;  %v1260_v7 = vld [vmem:[%s1581_s0 + $0x10] ss:$36 sps:$4 sm:$0xff]   ;;  %v1263_v9 = vld [vmem:[%s1580_s1 + $0x1b8] sm:$0xff]   ;;  %v1268_v13 = vld [vmem:[%s1580_s1 + $0x208] sm:$0xff]  }
  0x1a   :  { %1083 = vmatprep.subr.bf16.mxu1 %v1210_v25  ;;  %v1262_v8 = vld [vmem:[%s1581_s0 + $0x14] ss:$36 sps:$4 sm:$0xff]   ;;  %v1267_v12 = vld [vmem:[%s1581_s0 + $0x1c] ss:$36 sps:$4 sm:$0xff]   ;;  %v1273_v17 = vld [vmem:[%s1581_s0 + $0x64] ss:$36 sps:$4 sm:$0xff]  }
  0x1b   :  { %v1265_v11 = vld [vmem:[%s1581_s0 + $0x18] ss:$36 sps:$4 sm:$0xff]   ;;  %v1272_v16 = vld [vmem:[%s1580_s1 + $0x210] sm:$0xff]   ;;  %v1275_v18 = vld [vmem:[%s1581_s0 + $0x60] ss:$36 sps:$4 sm:$0xff]  }
  0x1c   :  { %1056 = vmatpush3.bf16.msra.mxu0 %v1211_v26  ;;  %v1269_v14 = vld [vmem:[%s1581_s0 + $0x5c] ss:$36 sps:$4 sm:$0xff]   ;;  %v1278_v22 = vld [vmem:[%s1580_s1 + $0x228] sm:$0xff]   ;;  %v1279_v23 = vld [vmem:[%s1580_s1 + $0x230] sm:$0xff]  }
  0x1d   :  { %1084 = vmatpush3.bf16.msra.mxu1 %v1212_v27  ;;  %1057 = vmatprep.subr.bf16.mxu0 %v1213_v28  ;;  %v1271_v15 = vld [vmem:[%s1581_s0 + $0x58] ss:$36 sps:$4 sm:$0xff]   ;;  %v1277_v20 = vld [vmem:[%s1580_s1 + $0x220] sm:$0xff]   ;;  %v1282_v25 = vld [vmem:[%s1581_s0 + $0x68] ss:$36 sps:$4 sm:$0xff]  }
  0x1e   :  { %1085 = vmatprep.subr.bf16.mxu1 %v1214_v29  ;;  %v1276_v19 = vld [vmem:[%s1580_s1 + $0x218] sm:$0xff]   ;;  %v1281_v21 = vld [vmem:[%s1581_s0 + $0x20] ss:$36 sps:$4 sm:$0xff]  }
  0x1f   :  { %v1280_v24 = vld [vmem:[%s1580_s1 + $0x238] sm:$0xff]  }
  0x20   :  { %1058 = vmatpush3.bf16.msra.mxu0 %v1215_v30 }
  0x21   :  { %1086 = vmatpush3.bf16.msra.mxu1 %v1216_v31  ;;  %1099 = vmatprep.subr.bf16.mxu0 %v1223_v36 }
  0x22   :  { %1127 = vmatprep.subr.bf16.mxu1 %v1225_v38 }
  0x23   :  { %733 = vmatmul.mubr.bf16.vlgmr.msra.gmra.mrb[0].mxu0 %v1217_v32 }
  0x24   :  { %782 = vmatmul.mubr.bf16.vlgmr.msra.gmra.mrb[0].mxu1 %v1220_v34  ;;  %1100 = vmatpush3.bf16.msra.mxu0 %v1224_v37 }
  0x25   :  { %1128 = vmatpush3.bf16.msra.mxu1 %v1226_v39  ;;  %1101 = vmatprep.subr.bf16.mxu0 %v1227_v40 }
  0x26   :  { %1129 = vmatprep.subr.bf16.mxu1 %v1229_v42  ;;  %740 = vmatprep.mubr.bf16.mxu0 %v1244_v57 }
  0x27   :  { %789 = vmatprep.mubr.bf16.mxu1 %v1246_v58 }
  0x28   :  { %1102 = vmatpush3.bf16.msra.mxu0 %v1228_v41 }
  0x29   :  { %1130 = vmatpush3.bf16.msra.mxu1 %v1230_v43  ;;  %1103 = vmatprep.subr.bf16.mxu0 %v1231_v44 }
  0x2a   :  { %1131 = vmatprep.subr.bf16.mxu1 %v1233_v46 }
  0x2b   :  { %741 = vmatmul.mubr.bf16.gmra.mrb[4].mxu0 %v1249_v60 }
  0x2c   :  { %1104 = vmatpush3.bf16.msra.mxu0 %v1232_v45  ;;  %790 = vmatmul.mubr.bf16.gmra.mrb[4].mxu1 %v1250_v61 }
  0x2d   :  { %1132 = vmatpush3.bf16.msra.mxu1 %v1234_v47  ;;  %1105 = vmatprep.subr.bf16.mxu0 %v1235_v48 }
  0x2e   :  { %1133 = vmatprep.subr.bf16.mxu1 %v1237_v50  ;;  %830 = vmatprep.mubr.bf16.mxu0 %v1262_v8 }
  0x2f   :  { %879 = vmatprep.mubr.bf16.mxu1 %v1267_v12 }
  0x30   :  { %1106 = vmatpush3.bf16.msra.mxu0 %v1236_v49 }
  0x31   :  { %1134 = vmatpush3.bf16.msra.mxu1 %v1238_v51  ;;  %1107 = vmatprep.subr.bf16.mxu0 %v1239_v52 }
  0x32   :  { %1135 = vmatprep.subr.bf16.mxu1 %v1241_v54 }
  0x34   :  { %1108 = vmatpush3.bf16.msra.mxu0 %v1240_v53 }
  0x35   :  { %1136 = vmatpush3.bf16.msra.mxu1 %v1242_v55  ;;  %1109 = vmatprep.subr.bf16.mxu0 %v1243_v56 }
  0x36   :  { %1137 = vmatprep.subr.bf16.mxu1 %v1251_v62 }
  0x38   :  { %1110 = vmatpush3.bf16.msra.mxu0 %v1248_v59 }
  0x39   :  { %1138 = vmatpush3.bf16.msra.mxu1 %v1252_v63  ;;  %1111 = vmatprep.subr.bf16.mxu0 %v1253_v0 }
  0x3a   :  { %1139 = vmatprep.subr.bf16.mxu1 %v1255_v2 }
  0x3c   :  { %1112 = vmatpush3.bf16.msra.mxu0 %v1254_v1 }
  0x3d   :  { %1140 = vmatpush3.bf16.msra.mxu1 %v1256_v3  ;;  %1113 = vmatprep.subr.bf16.mxu0 %v1257_v4 }
  0x3e   :  { %1141 = vmatprep.subr.bf16.mxu1 %v1259_v6 }
  0x40   :  { %1114 = vmatpush3.bf16.msra.mxu0 %v1258_v5 }
  0x41   :  { %1142 = vmatpush3.bf16.msra.mxu1 %v1263_v9  ;;  %1165 = vmatprep.subr.bf16.mxu0 %v1264_v10 }
  0x43   :  { %831 = vmatmul.mubr.bf16.vlgmr.msra.gmra.mrb[8].mxu0 %v1260_v7 }
  0x44   :  { %1166 = vmatpush3.bf16.msra.mxu0 %v1264_v10  ;;  %880 = vmatmul.mubr.bf16.vlgmr.msra.gmra.mrb[8].mxu1 %v1265_v11 }
  0x45   :  { %1167 = vmatprep.subr.bf16.mxu0 %v1268_v13  ;;  %838 = vmatprep.mubr.bf16.mxu0 %v1269_v14 }
  0x46   :  { %887 = vmatprep.mubr.bf16.mxu1 %v1273_v17 }
  0x48   :  { %1168 = vmatpush3.bf16.msra.mxu0 %v1268_v13 }
  0x49   :  { %1169 = vmatprep.subr.bf16.mxu0 %v1272_v16 }
  0x4b   :  { %839 = vmatmul.mubr.bf16.gmra.mrb[12].mxu0 %v1271_v15 }
  0x4c   :  { %1170 = vmatpush3.bf16.msra.mxu0 %v1272_v16  ;;  %888 = vmatmul.mubr.bf16.gmra.mrb[12].mxu1 %v1275_v18 }
  0x4d   :  { %1171 = vmatprep.subr.bf16.mxu0 %v1276_v19  ;;  %1181 = vmatprep.mubr.bf16.mxu0 %v1281_v21 }
  0x50   :  { %1172 = vmatpush3.bf16.msra.mxu0 %v1276_v19 }
  0x51   :  { %1173 = vmatprep.subr.bf16.mxu0 %v1277_v20 }
  0x54   :  { %1174 = vmatpush3.bf16.msra.mxu0 %v1277_v20 }
  0x55   :  { %1175 = vmatprep.subr.bf16.mxu0 %v1278_v22 }
  0x58   :  { %1176 = vmatpush3.bf16.msra.mxu0 %v1278_v22 }
  0x59   :  { %1177 = vmatprep.subr.bf16.mxu0 %v1279_v23 }
  0x5c   :  { %1178 = vmatpush3.bf16.msra.mxu0 %v1279_v23 }
  0x5d   :  { %1179 = vmatprep.subr.bf16.mxu0 %v1280_v24 }
  0x60   :  { %1180 = vmatpush3.bf16.msra.mxu0 %v1280_v24 }
  0x63   :  { %1182 = vmatmul.mubr.bf16.vlgmr.msra.gmra.mrb[16].mxu0 %v1282_v25 }
  0xf6   :  { %v1059_v26 = vpop.f32.mrb[0].mxu0 }
  0xf7   :  { %v1087_v27 = vpop.f32.mrb[0].mxu1  ;;  %v1060_v28 = vpop.f32.mrb[1].mxu0 }
  0xf8   :  { %v1061_v29 = vadd.f32 %v1060_v28, %v1059_v26  ;;  %v1088_v30 = vpop.f32.mrb[1].mxu1  ;;  %v1062_v31 = vpop.f32.mrb[2].mxu0 }
  0xf9   :  { %v1089_v32 = vadd.f32 %v1088_v30, %v1087_v27  ;;  %v1090_v33 = vpop.f32.mrb[2].mxu1  ;;  %v1063_v34 = vpop.f32.mrb[3].mxu0 }
  0xfa   :  { %v1064_v35 = vadd.f32 %v1063_v34, %v1062_v31  ;;  %v1091_v36 = vpop.f32.mrb[3].mxu1 }
  0xfb   :  { %v784_v37 = vadd.f32 %v1089_v32, %v1061_v29  ;;  %v1092_v38 = vadd.f32 %v1091_v36, %v1090_v33 }
  0xfd   :  { %v787_v39 = vadd.f32 %v1092_v38, %v1064_v35 }
  0xfe   :  { %v1065_v40 = vpop.f32.mrb[4].mxu0 }
  0xff   :  { %v1093_v41 = vpop.f32.mrb[4].mxu1  ;;  %v1066_v42 = vpop.f32.mrb[5].mxu0 }
 0x100   :  { %v1094_v43 = vpop.f32.mrb[5].mxu1  ;;  %v1067_v44 = vadd.f32 %v1066_v42, %v1065_v40  ;;  %v1068_v46 = vpop.f32.mrb[6].mxu0 }
 0x101   :  { %v1095_v45 = vadd.f32 %v1094_v43, %v1093_v41  ;;  %v1096_v47 = vpop.f32.mrb[6].mxu1  ;;  %v1069_v48 = vpop.f32.mrb[7].mxu0 }
 0x102   :  { %v1097_v49 = vpop.f32.mrb[7].mxu1  ;;  %v1070_v51 = vadd.f32 %v1069_v48, %v1068_v46 }
 0x103   :  { %v792_v50 = vadd.f32 %v1095_v45, %v1067_v44  ;;  %v1098_v52 = vadd.f32 %v1097_v49, %v1096_v47 }
 0x105   :  { %v795_v53 = vadd.f32 %v1098_v52, %v1070_v51 }
 0x116   :  { %v1115_v54 = vpop.f32.mrb[8].mxu0 }
 0x117   :  { %v1116_v55 = vpop.f32.mrb[9].mxu0  ;;  %v1143_v58 = vpop.f32.mrb[8].mxu1 }
 0x118   :  { %v1117_v56 = vadd.f32 %v1116_v55, %v1115_v54  ;;  %v1118_v57 = vpop.f32.mrb[10].mxu0  ;;  %v1144_v62 = vpop.f32.mrb[9].mxu1 }
 0x119   :  { %v1119_v59 = vpop.f32.mrb[11].mxu0  ;;  %v1145_v63 = vadd.f32 %v1144_v62, %v1143_v58  ;;  %v1146_v0 = vpop.f32.mrb[10].mxu1 }
 0x11a   :  { %v833_v60 = vadd.f32 %v1117_v56, %v784_v37  ;;  %v1120_v61 = vadd.f32 %v1119_v59, %v1118_v57  ;;  %v1147_v2 = vpop.f32.mrb[11].mxu1 }
 0x11b   :  { %v1148_v3 = vadd.f32 %v1147_v2, %v1146_v0 }
 0x11c   :  { %v836_v1 = vadd.f32 %v1120_v61, %v787_v39  ;;  %v882_v4 = vadd.f32 %v1145_v63, %v833_v60 }
 0x11e   :  { %v1121_v5 = vpop.f32.mrb[12].mxu0  ;;  %v885_v7 = vadd.f32 %v1148_v3, %v836_v1 }
 0x11f   :  { %v1122_v6 = vpop.f32.mrb[13].mxu0  ;;  %v1149_v10 = vpop.f32.mrb[12].mxu1 }
 0x120   :  { %v1123_v8 = vadd.f32 %v1122_v6, %v1121_v5  ;;  %v1124_v9 = vpop.f32.mrb[14].mxu0  ;;  %v1150_v14 = vpop.f32.mrb[13].mxu1 }
 0x121   :  { %v1125_v11 = vpop.f32.mrb[15].mxu0  ;;  %v1151_v15 = vadd.f32 %v1150_v14, %v1149_v10  ;;  %v1152_v16 = vpop.f32.mrb[14].mxu1 }
 0x122   :  { %v841_v12 = vadd.f32 %v1123_v8, %v792_v50  ;;  %v1126_v13 = vadd.f32 %v1125_v11, %v1124_v9  ;;  %v1153_v18 = vpop.f32.mrb[15].mxu1 }
 0x123   :  { %v1154_v19 = vadd.f32 %v1153_v18, %v1152_v16 }
 0x124   :  { %v844_v17 = vadd.f32 %v1126_v13, %v795_v53  ;;  %v890_v20 = vadd.f32 %v1151_v15, %v841_v12 }
 0x126   :  { %v893_v21 = vadd.f32 %v1154_v19, %v844_v17 }
 0x136   :  { %v1183_v22 = vpop.f32.mrb[16].mxu0 }
 0x137   :  { %v939_v23 = vadd.f32 %v1183_v22, %v890_v20  ;;  %v930_v24 = vpop.f32.mrb[17].mxu0 }
 0x138   :  { %v931_v25 = vadd.f32 %v930_v24, %v882_v4  ;;  %v1184_v26 = vpop.f32.mrb[18].mxu0 }
 0x139   :  { %947 = vst [vmem:[%s1582_s2 + $0x10] sm:$0xff] %v939_v23  ;;  %v942_v27 = vadd.f32 %v1184_v26, %v893_v21  ;;  %v933_v28 = vpop.f32.mrb[19].mxu0 }
 0x13a   :  { %945 = vst [vmem:[%s1582_s2] sm:$0xff] %v931_v25  ;;  %v934_v29 = vadd.f32 %v933_v28, %v885_v7 }
 0x13b   :  { %948 = vst [vmem:[%s1582_s2 + $0x18] sm:$0xff] %v942_v27 }
 0x13c   :  { %946 = vst [vmem:[%s1582_s2 + $0x8] sm:$0xff] %v934_v29 }

// kernel: densenet_forward.162
= control target key start
LH: loop header
LB: loop body
LE: loop exit
PB: predicated region body
PF: predicated region fallthrough
CT: control target
= control target key end

     0   :  { %v42_v19 = vlaneseq  ;;  %s1437_s3 = inlined_call_operand.vmem [shape: bf16[1024,128], index: 3, kind: input, shape index: {}]   ;;  %s1438_s0 = inlined_call_operand.vmem [shape: f32[16,1024], index: 0, kind: input, shape index: {}]   ;;  %s1439_s1 = inlined_call_operand.vmem [shape: f32[1,1024], index: 1, kind: input, shape index: {}]   ;;  %s1440_s2 = inlined_call_operand.vmem [shape: f32[1,1024], index: 2, kind: input, shape index: {}]   ;;  %s1441_s4 = inlined_call_operand.vmem [shape: f32[1,128], index: 4, kind: input, shape index: {}]   ;;  %s1442_s5 = inlined_call_operand.vmem [shape: f32[1,128], index: 5, kind: input, shape index: {}]   ;;  %s1443_s6 = inlined_call_operand.vmem [shape: bf16[16,128], index: 6, kind: output, shape index: {}]  }
   0x1   :  { %v1053_v0 = vld [vmem:[%s1437_s3 + $0x40] sm:$0xff]   ;;  %v1057_v4 = vld [vmem:[%s1437_s3 + $0x48] sm:$0xff]   ;;  %v1061_v8 = vld [vmem:[%s1437_s3 + $0x50] sm:$0xff]  }
   0x2   :  { %v1054_v1 = vld [vmem:[%s1437_s3 + $0xc0] sm:$0xff]   ;;  %965 = vmatprep.subr.bf16.mxu0 %v1053_v0  ;;  %v1058_v5 = vld [vmem:[%s1437_s3 + $0xc8] sm:$0xff]   ;;  %v1062_v9 = vld [vmem:[%s1437_s3 + $0xd0] sm:$0xff]   ;;  %v1221_v24 = vshrl.u32 %v42_v19, 7 }
   0x3   :  { %v1055_v2 = vld [vmem:[%s1437_s3] sm:$0xff]   ;;  %987 = vmatprep.subr.bf16.mxu1 %v1054_v1  ;;  %v1059_v6 = vld [vmem:[%s1437_s3 + $0x8] sm:$0xff]   ;;  %v1063_v10 = vld [vmem:[%s1437_s3 + $0x10] sm:$0xff]  }
   0x4   :  { %v1056_v3 = vld [vmem:[%s1437_s3 + $0x80] sm:$0xff]   ;;  %966 = vmatpush3.bf16.msra.mxu0 %v1055_v2  ;;  %v1060_v7 = vld [vmem:[%s1437_s3 + $0x88] sm:$0xff]   ;;  %v1064_v11 = vld [vmem:[%s1437_s3 + $0x90] sm:$0xff]   ;;  %v48_v29 = vsub.s32 1, %v1221_v24  ;;  %v56_v31 = vsub.s32 3, %v1221_v24  ;;  %v44_v33 = vsub.s32 0, %v1221_v24 }
   0x5   :  { %988 = vmatpush3.bf16.msra.mxu1 %v1056_v3  ;;  %967 = vmatprep.subr.bf16.mxu0 %v1057_v4  ;;  %v1065_v12 = vld [vmem:[%s1437_s3 + $0x58] sm:$0xff]   ;;  %v1069_v16 = vld [vmem:[%s1437_s3 + $0x60] sm:$0xff]   ;;  %v1073_v21 = vld [vmem:[%s1437_s3 + $0x68] sm:$0xff]   ;;  %v52_v35 = vsub.s32 2, %v1221_v24 }
   0x6   :  { %989 = vmatprep.subr.bf16.mxu1 %v1058_v5  ;;  %v1066_v13 = vld [vmem:[%s1437_s3 + $0xd8] sm:$0xff]   ;;  %v1070_v17 = vld [vmem:[%s1437_s3 + $0xe0] sm:$0xff]   ;;  %v1074_v22 = vld [vmem:[%s1437_s3 + $0xe8] sm:$0xff]  }
   0x7   :  { %v1067_v14 = vld [vmem:[%s1437_s3 + $0x18] sm:$0xff]   ;;  %v1071_v18 = vld [vmem:[%s1437_s3 + $0x20] sm:$0xff]   ;;  %v1075_v23 = vld [vmem:[%s1437_s3 + $0x28] sm:$0xff]  }
   0x8   :  { %968 = vmatpush3.bf16.msra.mxu0 %v1059_v6  ;;  %v1068_v15 = vld [vmem:[%s1437_s3 + $0x98] sm:$0xff]   ;;  %v1072_v20 = vld [vmem:[%s1437_s3 + $0xa0] sm:$0xff]   ;;  %v1076_v25 = vld [vmem:[%s1437_s3 + $0xa8] sm:$0xff]  }
   0x9   :  { %990 = vmatpush3.bf16.msra.mxu1 %v1060_v7  ;;  %969 = vmatprep.subr.bf16.mxu0 %v1061_v8  ;;  %v1077_v26 = vld [vmem:[%s1437_s3 + $0x70] sm:$0xff]   ;;  %v1081_v32 = vld [vmem:[%s1437_s3 + $0x78] sm:$0xff]   ;;  %v25_v38 = vld [vmem:[%s1438_s0 + $0x8] sm:$0xff] }
   0xa   :  { %991 = vmatprep.subr.bf16.mxu1 %v1062_v9  ;;  %v1078_v27 = vld [vmem:[%s1437_s3 + $0xf0] sm:$0xff]   ;;  %v1082_v34 = vld [vmem:[%s1437_s3 + $0xf8] sm:$0xff]   ;;  %v33_v39 = vld [vmem:[%s1438_s0 + $0x48] sm:$0xff] }
   0xb   :  { %v1079_v28 = vld [vmem:[%s1437_s3 + $0x30] sm:$0xff]   ;;  %v1083_v36 = vld [vmem:[%s1437_s3 + $0x38] sm:$0xff]   ;;  %v1263_v40 = vld [vmem:[%s1439_s1] sm:$0xff] }
   0xc   :  { %970 = vmatpush3.bf16.msra.mxu0 %v1063_v10  ;;  %v1080_v30 = vld [vmem:[%s1437_s3 + $0xb0] sm:$0xff]   ;;  %v1084_v37 = vld [vmem:[%s1437_s3 + $0xb8] sm:$0xff]   ;;  %v49_v41 = vrot.slane %v1263_v40, %v48_v29  ;;  %v1269_v42 = vld [vmem:[%s1440_s2] sm:$0xff]  ;;  %v57_v45 = vrot.slane %v1263_v40, %v56_v31  ;;  %v45_v46 = vrot.slane %v1263_v40, %v44_v33  ;;  %v53_v47 = vrot.slane %v1263_v40, %v52_v35 }
   0xd   :  { %992 = vmatpush3.bf16.msra.mxu1 %v1064_v11  ;;  %971 = vmatprep.subr.bf16.mxu0 %v1065_v12  ;;  %v27_v43 = vld [vmem:[%s1438_s0 + $0x18] sm:$0xff]  ;;  %v107_v48 = vrot.slane %v1269_v42, %v48_v29  ;;  %v115_v49 = vrot.slane %v1269_v42, %v56_v31  ;;  %v24_v50 = vld [vmem:[%s1438_s0] sm:$0xff]  ;;  %v103_v52 = vrot.slane %v1269_v42, %v44_v33  ;;  %v26_v53 = vld [vmem:[%s1438_s0 + $0x10] sm:$0xff] }
   0xe   :  { %993 = vmatprep.subr.bf16.mxu1 %v1066_v13  ;;  %v35_v44 = vld [vmem:[%s1438_s0 + $0x58] sm:$0xff]  ;;  %v32_v51 = vld [vmem:[%s1438_s0 + $0x40] sm:$0xff]  ;;  %v111_v54 = vrot.slane %v1269_v42, %v52_v35  ;;  %v83_v55 = vmul.f32 %v49_v41, %v25_v38  ;;  %v91_v56 = vmul.f32 %v49_v41, %v33_v39  ;;  %v85_v57 = vmul.f32 %v57_v45, %v27_v43  ;;  %v34_v59 = vld [vmem:[%s1438_s0 + $0x50] sm:$0xff] }
   0xf   :  { %v93_v58 = vmul.f32 %v57_v45, %v35_v44  ;;  %v82_v60 = vmul.f32 %v45_v46, %v24_v50  ;;  %v90_v61 = vmul.f32 %v45_v46, %v32_v51  ;;  %v84_v62 = vmul.f32 %v53_v47, %v26_v53  ;;  %v1085_v0 = vld [vmem:[%s1437_s3 + $0x140] sm:$0xff]   ;;  %v1093_v29 = vld [vmem:[%s1437_s3 + $0x150] sm:$0xff]   ;;  %v1097_v33 = vld [vmem:[%s1437_s3 + $0x158] sm:$0xff]  }
  0x10   :  { %972 = vmatpush3.bf16.msra.mxu0 %v1067_v14  ;;  %v92_v63 = vmul.f32 %v53_v47, %v34_v59  ;;  %v141_v1 = vadd.f32 %v107_v48, %v83_v55  ;;  %v149_v2 = vadd.f32 %v107_v48, %v91_v56  ;;  %v143_v3 = vadd.f32 %v115_v49, %v85_v57  ;;  %v1086_v5 = vld [vmem:[%s1437_s3 + $0x1c0] sm:$0xff]   ;;  %v1095_v31 = vld [vmem:[%s1437_s3 + $0x110] sm:$0xff]   ;;  %v1099_v35 = vld [vmem:[%s1437_s3 + $0x118] sm:$0xff]  }
  0x11   :  { %994 = vmatpush3.bf16.msra.mxu1 %v1068_v15  ;;  %973 = vmatprep.subr.bf16.mxu0 %v1069_v16  ;;  %v151_v4 = vadd.f32 %v115_v49, %v93_v58  ;;  %v140_v6 = vadd.f32 %v103_v52, %v82_v60  ;;  %v148_v7 = vadd.f32 %v103_v52, %v90_v61  ;;  %v1087_v14 = vld [vmem:[%s1437_s3 + $0x100] sm:$0xff]   ;;  %v1105_v43 = vld [vmem:[%s1437_s3 + $0x168] sm:$0xff]   ;;  %v64_v47 = vsub.s32 5, %v1221_v24  ;;  %v1109_v48 = vld [vmem:[%s1437_s3 + $0x170] sm:$0xff]  }
  0x12   :  { %995 = vmatprep.subr.bf16.mxu1 %v1070_v17  ;;  %v142_v8 = vadd.f32 %v111_v54, %v84_v62  ;;  %v150_v9 = vadd.f32 %v111_v54, %v92_v63  ;;  %v157_v10 = vmax.f32 %v141_v1, 0.0  ;;  %v165_v11 = vmax.f32 %v149_v2, 0.0  ;;  %v1088_v15 = vld [vmem:[%s1437_s3 + $0x180] sm:$0xff]   ;;  %v1106_v44 = vld [vmem:[%s1437_s3 + $0x1e8] sm:$0xff]   ;;  %v1110_v50 = vld [vmem:[%s1437_s3 + $0x1f0] sm:$0xff]  }
  0x13   :  { %v159_v12 = vmax.f32 %v143_v3, 0.0  ;;  %v167_v13 = vmax.f32 %v151_v4, 0.0  ;;  %v156_v16 = vmax.f32 %v140_v6, 0.0  ;;  %v164_v17 = vmax.f32 %v148_v7, 0.0  ;;  %v1102_v38 = vld [vmem:[%s1437_s3 + $0x1e0] sm:$0xff]   ;;  %v1107_v45 = vld [vmem:[%s1437_s3 + $0x128] sm:$0xff]  }
  0x14   :  { %974 = vmatpush3.bf16.msra.mxu0 %v1071_v18  ;;  %v158_v18 = vmax.f32 %v142_v8, 0.0  ;;  %v166_v19 = vmax.f32 %v150_v9, 0.0  ;;  %v1103_v39 = vld [vmem:[%s1437_s3 + $0x120] sm:$0xff]   ;;  %v1108_v46 = vld [vmem:[%s1437_s3 + $0x1a8] sm:$0xff]   ;;  %v72_v49 = vsub.s32 7, %v1221_v24  ;;  %v60_v51 = vsub.s32 4, %v1221_v24 }
  0x15   :  { %996 = vmatpush3.bf16.msra.mxu1 %v1072_v20  ;;  %975 = vmatprep.subr.bf16.mxu0 %v1073_v21  ;;  %v1089_v20 = vld [vmem:[%s1437_s3 + $0x148] sm:$0xff]   ;;  %v173_v21 = vpack.c.bf16 %v165_v11, %v157_v10  ;;  %v1104_v41 = vld [vmem:[%s1437_s3 + $0x1a0] sm:$0xff]   ;;  %v1111_v52 = vld [vmem:[%s1437_s3 + $0x130] sm:$0xff]   ;;  %v68_v53 = vsub.s32 6, %v1221_v24  ;;  %v65_v56 = vrot.slane %v1263_v40, %v64_v47  ;;  %v123_v60 = vrot.slane %v1269_v42, %v64_v47 }
  0x16   :  { %997 = vmatprep.subr.bf16.mxu1 %v1074_v22  ;;  %v175_v22 = vpack.c.bf16 %v167_v13, %v159_v12  ;;  %v1112_v54 = vld [vmem:[%s1437_s3 + $0x1b0] sm:$0xff]   ;;  %v1113_v55 = vld [vmem:[%s1437_s3 + $0x178] sm:$0xff]   ;;  %v73_v24 = vrot.slane %v1263_v40, %v72_v49  ;;  %v61_v58 = vrot.slane %v1263_v40, %v60_v51  ;;  %v29_v63 = vld [vmem:[%s1438_s0 + $0x28] sm:$0xff]  ;;  %v131_v1 = vrot.slane %v1269_v42, %v72_v49 }
  0x17   :  { %724 = vmatprep.mubr.bf16.mxu0 %v173_v21  ;;  %v1114_v57 = vld [vmem:[%s1437_s3 + $0x1f8] sm:$0xff]   ;;  %v69_v61 = vrot.slane %v1263_v40, %v68_v53  ;;  %v119_v2 = vrot.slane %v1269_v42, %v60_v51  ;;  %v87_v3 = vmul.f32 %v65_v56, %v29_v63  ;;  %v28_v6 = vld [vmem:[%s1438_s0 + $0x20] sm:$0xff]  ;;  %v127_v7 = vrot.slane %v1269_v42, %v68_v53  ;;  %v30_v12 = vld [vmem:[%s1438_s0 + $0x30] sm:$0xff] }
  0x18   :  { %976 = vmatpush3.bf16.msra.mxu0 %v1075_v23  ;;  %v172_v23 = vpack.c.bf16 %v164_v17, %v156_v16  ;;  %765 = vmatprep.mubr.bf16.mxu1 %v175_v22  ;;  %v1115_v59 = vld [vmem:[%s1437_s3 + $0x138] sm:$0xff]   ;;  %v36_v10 = vld [vmem:[%s1438_s0 + $0x60] sm:$0xff]  ;;  %v86_v11 = vmul.f32 %v61_v58, %v28_v6  ;;  %v38_v13 = vld [vmem:[%s1438_s0 + $0x70] sm:$0xff] }
  0x19   :  { %998 = vmatpush3.bf16.msra.mxu1 %v1076_v25  ;;  %977 = vmatprep.subr.bf16.mxu0 %v1077_v26  ;;  %v174_v25 = vpack.c.bf16 %v166_v19, %v158_v18  ;;  %v1090_v26 = vld [vmem:[%s1437_s3 + $0x1c8] sm:$0xff]   ;;  %v1116_v62 = vld [vmem:[%s1437_s3 + $0x1b8] sm:$0xff]   ;;  %v94_v42 = vmul.f32 %v61_v58, %v36_v10  ;;  %v88_v16 = vmul.f32 %v69_v61, %v30_v12 }
  0x1a   :  { %999 = vmatprep.subr.bf16.mxu1 %v1078_v27  ;;  %v1091_v27 = vld [vmem:[%s1437_s3 + $0x108] sm:$0xff]   ;;  %v31_v4 = vld [vmem:[%s1438_s0 + $0x38] sm:$0xff]  ;;  %v144_v19 = vadd.f32 %v119_v2, %v86_v11 }
  0x1b   :  { %v89_v8 = vmul.f32 %v73_v24, %v31_v4 }
  0x1c   :  { %978 = vmatpush3.bf16.msra.mxu0 %v1079_v28  ;;  %v1092_v28 = vld [vmem:[%s1437_s3 + $0x188] sm:$0xff]  }
  0x1d   :  { %1000 = vmatpush3.bf16.msra.mxu1 %v1080_v30  ;;  %979 = vmatprep.subr.bf16.mxu0 %v1081_v32  ;;  %v1094_v30 = vld [vmem:[%s1437_s3 + $0x1d0] sm:$0xff]   ;;  %v147_v17 = vadd.f32 %v131_v1, %v89_v8 }
  0x1e   :  { %1001 = vmatprep.subr.bf16.mxu1 %v1082_v34  ;;  %v1096_v32 = vld [vmem:[%s1437_s3 + $0x190] sm:$0xff]   ;;  %v1098_v34 = vld [vmem:[%s1437_s3 + $0x1d8] sm:$0xff]  }
  0x20   :  { %980 = vmatpush3.bf16.msra.mxu0 %v1083_v36  ;;  %v1100_v36 = vld [vmem:[%s1437_s3 + $0x198] sm:$0xff]  }
  0x21   :  { %1002 = vmatpush3.bf16.msra.mxu1 %v1084_v37  ;;  %1009 = vmatprep.subr.bf16.mxu0 %v1085_v0  ;;  %v1101_v37 = vld [vmem:[%s1437_s3 + $0x160] sm:$0xff]   ;;  %v37_v0 = vld [vmem:[%s1438_s0 + $0x68] sm:$0xff] }
  0x22   :  { %1031 = vmatprep.subr.bf16.mxu1 %v1086_v5  ;;  %v95_v40 = vmul.f32 %v65_v56, %v37_v0  ;;  %v39_v5 = vld [vmem:[%s1438_s0 + $0x78] sm:$0xff]  ;;  %v954_v0 = vld [vmem:[%s1441_s4] ss:$0 sm:$0xff] }
  0x23   :  { %725 = vmatmul.mubr.bf16.vlgmr.msra.gmra.mrb[0].mxu0 %v172_v23  ;;  %v97_v9 = vmul.f32 %v73_v24, %v39_v5  ;;  %v152_v23 = vadd.f32 %v119_v2, %v94_v42 }
  0x24   :  { %766 = vmatmul.mubr.bf16.vlgmr.msra.gmra.mrb[0].mxu1 %v174_v25  ;;  %1010 = vmatpush3.bf16.msra.mxu0 %v1087_v14  ;;  %v145_v14 = vadd.f32 %v123_v60, %v87_v3  ;;  %v146_v25 = vadd.f32 %v127_v7, %v88_v16 }
  0x25   :  { %1032 = vmatpush3.bf16.msra.mxu1 %v1088_v15  ;;  %1011 = vmatprep.subr.bf16.mxu0 %v1089_v20  ;;  %v153_v15 = vadd.f32 %v123_v60, %v95_v40  ;;  %v155_v18 = vadd.f32 %v131_v1, %v97_v9  ;;  %v96_v20 = vmul.f32 %v69_v61, %v38_v13  ;;  %v955_v40 = vld [vmem:[%s1442_s5] ss:$0 sm:$0xff] }
  0x26   :  { %1033 = vmatprep.subr.bf16.mxu1 %v1090_v26  ;;  %v161_v21 = vmax.f32 %v145_v14, 0.0  ;;  %v163_v26 = vmax.f32 %v147_v17, 0.0 }
  0x27   :  { %v169_v22 = vmax.f32 %v153_v15, 0.0 }
  0x28   :  { %1012 = vmatpush3.bf16.msra.mxu0 %v1091_v27  ;;  %v171_v27 = vmax.f32 %v155_v18, 0.0 }
  0x29   :  { %1034 = vmatpush3.bf16.msra.mxu1 %v1092_v28  ;;  %1013 = vmatprep.subr.bf16.mxu0 %v1093_v29  ;;  %v160_v28 = vmax.f32 %v144_v19, 0.0  ;;  %v154_v29 = vadd.f32 %v127_v7, %v96_v20 }
  0x2a   :  { %1035 = vmatprep.subr.bf16.mxu1 %v1094_v30  ;;  %v177_v30 = vpack.c.bf16 %v169_v22, %v161_v21 }
  0x2c   :  { %1014 = vmatpush3.bf16.msra.mxu0 %v1095_v31  ;;  %v168_v31 = vmax.f32 %v152_v23, 0.0  ;;  %806 = vmatprep.mubr.bf16.mxu0 %v177_v30 }
  0x2d   :  { %1036 = vmatpush3.bf16.msra.mxu1 %v1096_v32  ;;  %1015 = vmatprep.subr.bf16.mxu0 %v1097_v33  ;;  %v162_v32 = vmax.f32 %v146_v25, 0.0  ;;  %v179_v33 = vpack.c.bf16 %v171_v27, %v163_v26 }
  0x2e   :  { %1037 = vmatprep.subr.bf16.mxu1 %v1098_v34  ;;  %v170_v34 = vmax.f32 %v154_v29, 0.0 }
  0x2f   :  { %847 = vmatprep.mubr.bf16.mxu1 %v179_v33 }
  0x30   :  { %1016 = vmatpush3.bf16.msra.mxu0 %v1099_v35  ;;  %v176_v35 = vpack.c.bf16 %v168_v31, %v160_v28 }
  0x31   :  { %1038 = vmatpush3.bf16.msra.mxu1 %v1100_v36  ;;  %1017 = vmatprep.subr.bf16.mxu0 %v1101_v37  ;;  %v178_v36 = vpack.c.bf16 %v170_v34, %v162_v32 }
  0x32   :  { %1039 = vmatprep.subr.bf16.mxu1 %v1102_v38 }
  0x34   :  { %1018 = vmatpush3.bf16.msra.mxu0 %v1103_v39 }
  0x35   :  { %1040 = vmatpush3.bf16.msra.mxu1 %v1104_v41  ;;  %1019 = vmatprep.subr.bf16.mxu0 %v1105_v43 }
  0x36   :  { %1041 = vmatprep.subr.bf16.mxu1 %v1106_v44 }
  0x38   :  { %1020 = vmatpush3.bf16.msra.mxu0 %v1107_v45 }
  0x39   :  { %1042 = vmatpush3.bf16.msra.mxu1 %v1108_v46  ;;  %1021 = vmatprep.subr.bf16.mxu0 %v1109_v48 }
  0x3a   :  { %1043 = vmatprep.subr.bf16.mxu1 %v1110_v50 }
  0x3c   :  { %1022 = vmatpush3.bf16.msra.mxu0 %v1111_v52 }
  0x3d   :  { %1044 = vmatpush3.bf16.msra.mxu1 %v1112_v54  ;;  %1023 = vmatprep.subr.bf16.mxu0 %v1113_v55 }
  0x3e   :  { %1045 = vmatprep.subr.bf16.mxu1 %v1114_v57 }
  0x40   :  { %1024 = vmatpush3.bf16.msra.mxu0 %v1115_v59 }
  0x41   :  { %1046 = vmatpush3.bf16.msra.mxu1 %v1116_v62 }
  0x43   :  { %807 = vmatmul.mubr.bf16.vlgmr.msra.gmra.mrb[4].mxu0 %v176_v35 }
  0x44   :  { %848 = vmatmul.mubr.bf16.vlgmr.msra.gmra.mrb[4].mxu1 %v178_v36 }
  0xf6   :  { %v981_v37 = vpop.f32.mrb[0].mxu0 }
  0xf7   :  { %v1003_v38 = vpop.f32.mrb[0].mxu1  ;;  %v982_v39 = vpop.f32.mrb[1].mxu0 }
  0xf8   :  { %v1004_v41 = vpop.f32.mrb[1].mxu1  ;;  %v983_v43 = vadd.f32 %v982_v39, %v981_v37  ;;  %v984_v45 = vpop.f32.mrb[2].mxu0 }
  0xf9   :  { %v1005_v44 = vadd.f32 %v1004_v41, %v1003_v38  ;;  %v1006_v46 = vpop.f32.mrb[2].mxu1  ;;  %v985_v47 = vpop.f32.mrb[3].mxu0 }
  0xfa   :  { %v1007_v48 = vpop.f32.mrb[3].mxu1  ;;  %v986_v50 = vadd.f32 %v985_v47, %v984_v45 }
  0xfb   :  { %v768_v49 = vadd.f32 %v1005_v44, %v983_v43  ;;  %v1008_v51 = vadd.f32 %v1007_v48, %v1006_v46 }
  0xfd   :  { %v771_v52 = vadd.f32 %v1008_v51, %v986_v50 }
 0x116   :  { %v1025_v53 = vpop.f32.mrb[4].mxu0 }
 0x117   :  { %v1047_v54 = vpop.f32.mrb[4].mxu1  ;;  %v1026_v55 = vpop.f32.mrb[5].mxu0 }
 0x118   :  { %v1027_v56 = vadd.f32 %v1026_v55, %v1025_v53  ;;  %v1048_v57 = vpop.f32.mrb[5].mxu1  ;;  %v1028_v24 = vpop.f32.mrb[6].mxu0 }
 0x119   :  { %v1049_v58 = vadd.f32 %v1048_v57, %v1047_v54  ;;  %v1050_v59 = vpop.f32.mrb[6].mxu1  ;;  %v1029_v60 = vpop.f32.mrb[7].mxu0 }
 0x11a   :  { %v809_v61 = vadd.f32 %v1027_v56, %v768_v49  ;;  %v1030_v62 = vadd.f32 %v1029_v60, %v1028_v24  ;;  %v1051_v63 = vpop.f32.mrb[7].mxu1 }
 0x11b   :  { %v1052_v1 = vadd.f32 %v1051_v63, %v1050_v59 }
 0x11c   :  { %v850_v2 = vadd.f32 %v1049_v58, %v809_v61  ;;  %v812_v3 = vadd.f32 %v1030_v62, %v771_v52 }
 0x11e   :  { %v863_v4 = vmul.f32 %v954_v0, %v850_v2  ;;  %v853_v5 = vadd.f32 %v1052_v1, %v812_v3 }
 0x120   :  { %v872_v6 = vadd.f32 %v955_v40, %v863_v4  ;;  %v864_v7 = vmul.f32 %v954_v0, %v853_v5 }
 0x122   :  { %v873_v8 = vadd.f32 %v955_v40, %v864_v7  ;;  %v874_v9 = vmax.f32 %v872_v6, 0.0 }
 0x124   :  { %v875_v10 = vmax.f32 %v873_v8, 0.0 }
 0x126   :  { %v963_v11 = vpack.c.bf16 %v875_v10, %v874_v9 }
 0x128   :  { %964 = vst [vmem:[%s1443_s6] sm:$0xff] %v963_v11  }

// kernel: densenet_forward.161
= control target key start
LH: loop header
LB: loop body
LE: loop exit
PB: predicated region body
PF: predicated region fallthrough
CT: control target
= control target key end

     0   :  { %v37_v34 = vlaneseq  ;;  %s1288_s6 = inlined_call_operand.vmem [shape: bf16[512,256], index: 6, kind: input, shape index: {}]   ;;  %s1289_s4 = inlined_call_operand.vmem [shape: f32[1,512], index: 4, kind: input, shape index: {}]   ;;  %s1290_s0 = inlined_call_operand.vmem [shape: f32[16,512], index: 0, kind: input, shape index: {}]   ;;  %s1291_s5 = inlined_call_operand.vmem [shape: f32[1,512], index: 5, kind: input, shape index: {}]   ;;  %s1292_s1 = inlined_call_operand.vmem [shape: f32[16,512], index: 1, kind: input, shape index: {}]   ;;  %s1293_s2 = inlined_call_operand.vmem [shape: f32[16,512], index: 2, kind: input, shape index: {}]   ;;  %s1294_s3 = inlined_call_operand.vmem [shape: f32[16,512], index: 3, kind: input, shape index: {}]   ;;  %s1295_s7 = inlined_call_operand.vmem [shape: f32[16,256], index: 7, kind: output, shape index: {}]  }
   0x1   :  { %v780_v0 = vld [vmem:[%s1288_s6 + $0x4] ss:$8 sps:$4 sm:$0xff]   ;;  %v784_v2 = vld [vmem:[%s1288_s6] ss:$8 sps:$4 sm:$0xff]   ;;  %v786_v4 = vld [vmem:[%s1288_s6 + $0x14] ss:$8 sps:$4 sm:$0xff]  }
   0x2   :  { %v782_v1 = vld [vmem:[%s1288_s6 + $0x104] ss:$8 sps:$4 sm:$0xff]   ;;  %618 = vmatprep.subr.bf16.mxu1 %v780_v0  ;;  %v785_v3 = vld [vmem:[%s1288_s6 + $0x100] ss:$8 sps:$4 sm:$0xff]   ;;  %v788_v5 = vld [vmem:[%s1288_s6 + $0x114] ss:$8 sps:$4 sm:$0xff]  }
   0x3   :  { %661 = vmatprep.subr.bf16.mxu0 %v782_v1  ;;  %619 = vmatpush1.bf16.msra.mxu1 %v784_v2  ;;  %v790_v6 = vld [vmem:[%s1288_s6 + $0x10] ss:$8 sps:$4 sm:$0xff]   ;;  %v792_v8 = vld [vmem:[%s1288_s6 + $0x24] ss:$8 sps:$4 sm:$0xff]   ;;  %v796_v10 = vld [vmem:[%s1288_s6 + $0x20] ss:$8 sps:$4 sm:$0xff]  }
   0x4   :  { %662 = vmatpush1.bf16.msra.mxu0 %v785_v3  ;;  %620 = vmatprep.subr.bf16.mxu1 %v786_v4  ;;  %v791_v7 = vld [vmem:[%s1288_s6 + $0x110] ss:$8 sps:$4 sm:$0xff]   ;;  %v794_v9 = vld [vmem:[%s1288_s6 + $0x124] ss:$8 sps:$4 sm:$0xff]   ;;  %v797_v11 = vld [vmem:[%s1288_s6 + $0x120] ss:$8 sps:$4 sm:$0xff]  }
   0x5   :  { %663 = vmatprep.subr.bf16.mxu0 %v788_v5  ;;  %v798_v12 = vld [vmem:[%s1288_s6 + $0x34] ss:$8 sps:$4 sm:$0xff]   ;;  %v802_v14 = vld [vmem:[%s1288_s6 + $0x30] ss:$8 sps:$4 sm:$0xff]   ;;  %v804_v16 = vld [vmem:[%s1288_s6 + $0x44] ss:$8 sps:$4 sm:$0xff]  }
   0x6   :  { %v800_v13 = vld [vmem:[%s1288_s6 + $0x134] ss:$8 sps:$4 sm:$0xff]   ;;  %v803_v15 = vld [vmem:[%s1288_s6 + $0x130] ss:$8 sps:$4 sm:$0xff]   ;;  %v806_v17 = vld [vmem:[%s1288_s6 + $0x144] ss:$8 sps:$4 sm:$0xff]  }
   0x7   :  { %621 = vmatpush1.bf16.msra.mxu1 %v790_v6  ;;  %v808_v18 = vld [vmem:[%s1288_s6 + $0x40] ss:$8 sps:$4 sm:$0xff]   ;;  %v810_v20 = vld [vmem:[%s1288_s6 + $0x54] ss:$8 sps:$4 sm:$0xff]   ;;  %v814_v22 = vld [vmem:[%s1288_s6 + $0x50] ss:$8 sps:$4 sm:$0xff]  }
   0x8   :  { %664 = vmatpush1.bf16.msra.mxu0 %v791_v7  ;;  %622 = vmatprep.subr.bf16.mxu1 %v792_v8  ;;  %v809_v19 = vld [vmem:[%s1288_s6 + $0x140] ss:$8 sps:$4 sm:$0xff]   ;;  %v812_v21 = vld [vmem:[%s1288_s6 + $0x154] ss:$8 sps:$4 sm:$0xff]   ;;  %v815_v23 = vld [vmem:[%s1288_s6 + $0x150] ss:$8 sps:$4 sm:$0xff]  }
   0x9   :  { %665 = vmatprep.subr.bf16.mxu0 %v794_v9  ;;  %v816_v24 = vld [vmem:[%s1288_s6 + $0x64] ss:$8 sps:$4 sm:$0xff]   ;;  %v820_v26 = vld [vmem:[%s1288_s6 + $0x60] ss:$8 sps:$4 sm:$0xff]   ;;  %v822_v28 = vld [vmem:[%s1288_s6 + $0x74] ss:$8 sps:$4 sm:$0xff]  }
   0xa   :  { %v818_v25 = vld [vmem:[%s1288_s6 + $0x164] ss:$8 sps:$4 sm:$0xff]   ;;  %v821_v27 = vld [vmem:[%s1288_s6 + $0x160] ss:$8 sps:$4 sm:$0xff]   ;;  %v824_v29 = vld [vmem:[%s1288_s6 + $0x174] ss:$8 sps:$4 sm:$0xff]  }
   0xb   :  { %623 = vmatpush1.bf16.msra.mxu1 %v796_v10  ;;  %v826_v30 = vld [vmem:[%s1288_s6 + $0x70] ss:$8 sps:$4 sm:$0xff]   ;;  %v828_v32 = vld [vmem:[%s1288_s6 + $0x84] ss:$8 sps:$4 sm:$0xff]   ;;  %v832_v35 = vld [vmem:[%s1288_s6 + $0x80] ss:$8 sps:$4 sm:$0xff]  }
   0xc   :  { %666 = vmatpush1.bf16.msra.mxu0 %v797_v11  ;;  %624 = vmatprep.subr.bf16.mxu1 %v798_v12  ;;  %v827_v31 = vld [vmem:[%s1288_s6 + $0x170] ss:$8 sps:$4 sm:$0xff]   ;;  %v830_v33 = vld [vmem:[%s1288_s6 + $0x184] ss:$8 sps:$4 sm:$0xff]   ;;  %v833_v36 = vld [vmem:[%s1288_s6 + $0x180] ss:$8 sps:$4 sm:$0xff]  }
   0xd   :  { %667 = vmatprep.subr.bf16.mxu0 %v800_v13  ;;  %v834_v37 = vld [vmem:[%s1288_s6 + $0x94] ss:$8 sps:$4 sm:$0xff]   ;;  %v1030_v39 = vshrl.u32 %v37_v34, 7  ;;  %v838_v40 = vld [vmem:[%s1288_s6 + $0x90] ss:$8 sps:$4 sm:$0xff]   ;;  %v29_v58 = vld [vmem:[%s1290_s0 + $0x8] sm:$0xff] }
   0xe   :  { %v836_v38 = vld [vmem:[%s1288_s6 + $0x194] ss:$8 sps:$4 sm:$0xff]   ;;  %v839_v41 = vld [vmem:[%s1288_s6 + $0x190] ss:$8 sps:$4 sm:$0xff]   ;;  %v840_v42 = vld [vmem:[%s1288_s6 + $0xa4] ss:$8 sps:$4 sm:$0xff]  }
   0xf   :  { %625 = vmatpush1.bf16.msra.mxu1 %v802_v14  ;;  %v842_v43 = vld [vmem:[%s1288_s6 + $0x1a4] ss:$8 sps:$4 sm:$0xff]   ;;  %v43_v44 = vsub.s32 1, %v1030_v39  ;;  %v51_v45 = vsub.s32 3, %v1030_v39  ;;  %v844_v46 = vld [vmem:[%s1288_s6 + $0xa0] ss:$8 sps:$4 sm:$0xff]  }
  0x10   :  { %668 = vmatpush1.bf16.msra.mxu0 %v803_v15  ;;  %626 = vmatprep.subr.bf16.mxu1 %v804_v16  ;;  %v845_v47 = vld [vmem:[%s1288_s6 + $0x1a0] ss:$8 sps:$4 sm:$0xff]   ;;  %v39_v48 = vsub.s32 0, %v1030_v39  ;;  %v47_v49 = vsub.s32 2, %v1030_v39  ;;  %v846_v50 = vld [vmem:[%s1288_s6 + $0xb4] ss:$8 sps:$4 sm:$0xff]  }
  0x11   :  { %669 = vmatprep.subr.bf16.mxu0 %v806_v17  ;;  %v848_v51 = vld [vmem:[%s1288_s6 + $0x1b4] ss:$8 sps:$4 sm:$0xff]   ;;  %v850_v52 = vld [vmem:[%s1288_s6 + $0xb0] ss:$8 sps:$4 sm:$0xff]   ;;  %v26_v54 = vld [vmem:[%s1289_s4] sm:$0xf] }
  0x12   :  { %v851_v53 = vld [vmem:[%s1288_s6 + $0x1b0] ss:$8 sps:$4 sm:$0xff]   ;;  %v852_v55 = vld [vmem:[%s1288_s6 + $0xc4] ss:$8 sps:$4 sm:$0xff]   ;;  %v1078_v57 = vld [vmem:[%s1291_s5] sm:$0xf]  ;;  %v44_v60 = vrot.slane %v26_v54, %v43_v44  ;;  %v1086_v61 = vrot.slane %v26_v54, %v51_v45  ;;  %v1088_v62 = vrot.slane %v26_v54, %v39_v48  ;;  %v1092_v63 = vrot.slane %v26_v54, %v47_v49 }
  0x13   :  { %627 = vmatpush1.bf16.msra.mxu1 %v808_v18  ;;  %v854_v56 = vld [vmem:[%s1288_s6 + $0x1c4] ss:$8 sps:$4 sm:$0xff]   ;;  %v73_v0 = vrot.slane %v1078_v57, %v43_v44  ;;  %v1105_v4 = vrot.slane %v1078_v57, %v51_v45  ;;  %v1108_v5 = vrot.slane %v1078_v57, %v39_v48  ;;  %v856_v16 = vld [vmem:[%s1288_s6 + $0xc0] ss:$8 sps:$4 sm:$0xff]   ;;  %v858_v18 = vld [vmem:[%s1288_s6 + $0xd4] ss:$8 sps:$4 sm:$0xff]  }
  0x14   :  { %670 = vmatpush1.bf16.msra.mxu0 %v809_v19  ;;  %628 = vmatprep.subr.bf16.mxu1 %v810_v20  ;;  %v33_v59 = vld [vmem:[%s1290_s0 + $0x28] sm:$0xff]  ;;  %v58_v6 = vmul.f32 %v44_v60, %v29_v58  ;;  %v109_v34 = vld [vmem:[%s1292_s1 + $0x38] sm:$0xff] }
  0x15   :  { %671 = vmatprep.subr.bf16.mxu0 %v812_v21  ;;  %v103_v1 = vld [vmem:[%s1292_s1 + $0x8] sm:$0xff]  ;;  %v62_v7 = vmul.f32 %v44_v60, %v33_v59  ;;  %v145_v44 = vld [vmem:[%s1293_s2 + $0x18] sm:$0xff] }
  0x16   :  { %v107_v2 = vld [vmem:[%s1292_s1 + $0x28] sm:$0xff]  ;;  %v111_v8 = vmul.f32 %v103_v1, %v44_v60  ;;  %v87_v19 = vadd.f32 %v73_v0, %v58_v6  ;;  %v862_v45 = vld [vmem:[%s1288_s6 + $0xd0] ss:$8 sps:$4 sm:$0xff]   ;;  %v153_v1 = vmul.f32 %v145_v44, %v1086_v61 }
  0x17   :  { %629 = vmatpush1.bf16.msra.mxu1 %v814_v22  ;;  %v143_v3 = vld [vmem:[%s1293_s2 + $0x8] sm:$0xff]  ;;  %v115_v12 = vmul.f32 %v107_v2, %v44_v60  ;;  %v91_v20 = vadd.f32 %v73_v0, %v62_v7  ;;  %v185_v2 = vld [vmem:[%s1294_s3 + $0x18] sm:$0xff] }
  0x18   :  { %672 = vmatpush1.bf16.msra.mxu0 %v815_v23  ;;  %630 = vmatprep.subr.bf16.mxu1 %v816_v24  ;;  %v147_v9 = vld [vmem:[%s1293_s2 + $0x28] sm:$0xff]  ;;  %v151_v13 = vmul.f32 %v143_v3, %v44_v60  ;;  %v119_v21 = vadd.f32 %v111_v8, %v73_v0  ;;  %v860_v23 = vld [vmem:[%s1288_s6 + $0x1d4] ss:$8 sps:$4 sm:$0xff]  }
  0x19   :  { %673 = vmatprep.subr.bf16.mxu0 %v818_v25  ;;  %v183_v10 = vld [vmem:[%s1294_s3 + $0x8] sm:$0xff]  ;;  %v155_v14 = vmul.f32 %v147_v9, %v44_v60  ;;  %v123_v24 = vadd.f32 %v115_v12, %v73_v0  ;;  %v189_v3 = vld [vmem:[%s1294_s3 + $0x38] sm:$0xff] }
  0x1a   :  { %v187_v11 = vld [vmem:[%s1294_s3 + $0x28] sm:$0xff]  ;;  %v191_v15 = vmul.f32 %v183_v10, %v44_v60  ;;  %v159_v25 = vadd.f32 %v151_v13, %v73_v0 }
  0x1b   :  { %631 = vmatpush1.bf16.msra.mxu1 %v820_v26  ;;  %v857_v17 = vld [vmem:[%s1288_s6 + $0x1c0] ss:$8 sps:$4 sm:$0xff]   ;;  %v195_v22 = vmul.f32 %v187_v11, %v44_v60  ;;  %v163_v26 = vadd.f32 %v155_v14, %v73_v0  ;;  %v866_v54 = vld [vmem:[%s1288_s6 + $0x1e4] ss:$8 sps:$4 sm:$0xff]  }
  0x1c   :  { %674 = vmatpush1.bf16.msra.mxu0 %v821_v27  ;;  %632 = vmatprep.subr.bf16.mxu1 %v822_v28  ;;  %v31_v27 = vld [vmem:[%s1290_s0 + $0x18] sm:$0xff]  ;;  %v868_v6 = vld [vmem:[%s1288_s6 + $0xe0] ss:$8 sps:$4 sm:$0xff]  }
  0x1d   :  { %675 = vmatprep.subr.bf16.mxu0 %v824_v29  ;;  %v35_v28 = vld [vmem:[%s1290_s0 + $0x38] sm:$0xff]  ;;  %v95_v29 = vmax.f32 %v87_v19, 0.0  ;;  %v869_v11 = vld [vmem:[%s1288_s6 + $0x1e0] ss:$8 sps:$4 sm:$0xff]  }
  0x1f   :  { %633 = vmatpush1.bf16.msra.mxu1 %v826_v30  ;;  %v99_v30 = vmax.f32 %v91_v20, 0.0 }
  0x20   :  { %676 = vmatpush1.bf16.msra.mxu0 %v827_v31  ;;  %634 = vmatprep.subr.bf16.mxu1 %v828_v32  ;;  %v127_v31 = vmax.f32 %v119_v21, 0.0  ;;  %v199_v32 = vadd.f32 %v191_v15, %v73_v0  ;;  %v161_v15 = vadd.f32 %v153_v1, %v1105_v4  ;;  %v193_v21 = vmul.f32 %v185_v2, %v1086_v61 }
  0x21   :  { %677 = vmatprep.subr.bf16.mxu0 %v830_v33  ;;  %v105_v33 = vld [vmem:[%s1292_s1 + $0x18] sm:$0xff] }
  0x23   :  { %635 = vmatpush1.bf16.msra.mxu1 %v832_v35  ;;  %v131_v35 = vmax.f32 %v123_v24, 0.0 }
  0x24   :  { %678 = vmatpush1.bf16.msra.mxu0 %v833_v36  ;;  %636 = vmatprep.subr.bf16.mxu1 %v834_v37  ;;  %v167_v36 = vmax.f32 %v159_v25, 0.0  ;;  %v171_v37 = vmax.f32 %v163_v26, 0.0 }
  0x25   :  { %679 = vmatprep.subr.bf16.mxu0 %v836_v38  ;;  %v203_v38 = vadd.f32 %v195_v22, %v73_v0  ;;  %v197_v22 = vmul.f32 %v189_v3, %v1086_v61 }
  0x27   :  { %637 = vmatpush1.bf16.msra.mxu1 %v838_v40  ;;  %v135_v40 = vadd.f32 %v127_v31, %v95_v29  ;;  %v211_v48 = vmax.f32 %v203_v38, 0.0  ;;  %v201_v29 = vadd.f32 %v193_v21, %v1105_v4  ;;  %v146_v38 = vld [vmem:[%s1293_s2 + $0x20] sm:$0xff] }
  0x28   :  { %680 = vmatpush1.bf16.msra.mxu0 %v839_v41  ;;  %638 = vmatprep.subr.bf16.mxu1 %v840_v42  ;;  %v207_v41 = vmax.f32 %v199_v32, 0.0  ;;  %v60_v42 = vmul.f32 %v1086_v61, %v31_v27  ;;  %v169_v27 = vmax.f32 %v161_v15, 0.0  ;;  %v102_v32 = vld [vmem:[%s1292_s1] sm:$0xff] }
  0x29   :  { %681 = vmatprep.subr.bf16.mxu0 %v842_v43  ;;  %v64_v43 = vmul.f32 %v1086_v61, %v35_v28 }
  0x2b   :  { %639 = vmatpush1.bf16.msra.mxu1 %v844_v46  ;;  %v863_v46 = vld [vmem:[%s1288_s6 + $0x1d0] ss:$8 sps:$4 sm:$0xff]   ;;  %v93_v58 = vadd.f32 %v1105_v4, %v64_v43 }
  0x2c   :  { %682 = vmatpush1.bf16.msra.mxu0 %v845_v47  ;;  %640 = vmatprep.subr.bf16.mxu1 %v846_v50  ;;  %v139_v47 = vadd.f32 %v131_v35, %v99_v30  ;;  %v113_v50 = vmul.f32 %v105_v33, %v1086_v61  ;;  %v205_v30 = vadd.f32 %v197_v22, %v1105_v4  ;;  %v142_v33 = vld [vmem:[%s1293_s2] sm:$0xff] }
  0x2d   :  { %683 = vmatprep.subr.bf16.mxu0 %v848_v51  ;;  %v117_v51 = vmul.f32 %v109_v34, %v1086_v61  ;;  %v101_v9 = vmax.f32 %v93_v58, 0.0  ;;  %v875_v34 = vld [vmem:[%s1288_s6 + $0x1f0] ss:$8 sps:$4 sm:$0xff]   ;;  %v77_v22 = vrot.slane %v1078_v57, %v47_v49 }
  0x2e   :  { %v179_v59 = vadd.f32 %v171_v37, %v139_v47  ;;  %v121_v60 = vadd.f32 %v113_v50, %v1105_v4  ;;  %v150_v47 = vmul.f32 %v142_v33, %v1088_v62  ;;  %v184_v33 = vld [vmem:[%s1294_s3 + $0x10] sm:$0xff] }
  0x2f   :  { %641 = vmatpush1.bf16.msra.mxu1 %v850_v52  ;;  %v149_v52 = vld [vmem:[%s1293_s2 + $0x38] sm:$0xff]  ;;  %v125_v0 = vadd.f32 %v117_v51, %v1105_v4 }
  0x30   :  { %684 = vmatpush1.bf16.msra.mxu0 %v851_v53  ;;  %642 = vmatprep.subr.bf16.mxu1 %v852_v55  ;;  %v864_v53 = vld [vmem:[%s1288_s6 + $0xe4] ss:$8 sps:$4 sm:$0xff]   ;;  %v175_v55 = vadd.f32 %v167_v36, %v135_v40  ;;  %v157_v10 = vmul.f32 %v149_v52, %v1086_v61  ;;  %v219_v12 = vadd.f32 %v211_v48, %v179_v59  ;;  %v129_v13 = vmax.f32 %v121_v60, 0.0  ;;  %v30_v60 = vld [vmem:[%s1290_s0 + $0x10] sm:$0xff] }
  0x31   :  { %685 = vmatprep.subr.bf16.mxu0 %v854_v56  ;;  %v89_v56 = vadd.f32 %v1105_v4, %v60_v42  ;;  %v133_v14 = vmax.f32 %v125_v0, 0.0  ;;  %v106_v61 = vld [vmem:[%s1292_s1 + $0x20] sm:$0xff]  ;;  %v213_v42 = vmax.f32 %v205_v30, 0.0  ;;  %v158_v59 = vadd.f32 %v150_v47, %v1108_v5 }
  0x32   :  { %v215_v7 = vadd.f32 %v207_v41, %v175_v55  ;;  %v165_v20 = vadd.f32 %v157_v10, %v1105_v4  ;;  %v227_v24 = vmul.f32 0.25, %v219_v12  ;;  %v874_v4 = vld [vmem:[%s1288_s6 + $0xf0] ss:$8 sps:$4 sm:$0xff]   ;;  %v209_v41 = vmax.f32 %v201_v29, 0.0  ;;  %v182_v48 = vld [vmem:[%s1294_s3] sm:$0xff] }
  0x33   :  { %643 = vmatpush1.bf16.msra.mxu1 %v856_v16  ;;  %v97_v8 = vmax.f32 %v89_v56, 0.0  ;;  %v28_v16 = vld [vmem:[%s1290_s0] sm:$0xff]  ;;  %v141_v26 = vadd.f32 %v133_v14, %v101_v9  ;;  %v190_v3 = vmul.f32 %v182_v48, %v1088_v62  ;;  %v166_v9 = vmax.f32 %v158_v59, 0.0  ;;  %v108_v12 = vld [vmem:[%s1292_s1 + $0x30] sm:$0xff] }
  0x34   :  { %686 = vmatpush1.bf16.msra.mxu0 %v857_v17  ;;  %644 = vmatprep.subr.bf16.mxu1 %v858_v18  ;;  %v870_v17 = vld [vmem:[%s1288_s6 + $0xf4] ss:$8 sps:$4 sm:$0xff]   ;;  %v223_v19 = vmul.f32 0.25, %v215_v7  ;;  %v173_v28 = vmax.f32 %v165_v20, 0.0  ;;  %v57_v31 = vmul.f32 %v1088_v62, %v28_v16  ;;  %v59_v16 = vmul.f32 %v1092_v63, %v30_v60 }
  0x35   :  { %687 = vmatprep.subr.bf16.mxu0 %v860_v23  ;;  %v872_v18 = vld [vmem:[%s1288_s6 + $0x1f4] ss:$8 sps:$4 sm:$0xff]   ;;  %v32_v23 = vld [vmem:[%s1290_s0 + $0x20] sm:$0xff]  ;;  %v137_v25 = vadd.f32 %v129_v13, %v97_v8  ;;  %v198_v15 = vadd.f32 %v190_v3, %v1108_v5 }
  0x36   :  { %v231_v35 = vpack.c.bf16 %v227_v24, %v223_v19  ;;  %v61_v37 = vmul.f32 %v1088_v62, %v32_v23  ;;  %v181_v40 = vadd.f32 %v173_v28, %v141_v26  ;;  %v86_v43 = vadd.f32 %v1108_v5, %v57_v31 }
  0x37   :  { %645 = vmatpush1.bf16.msra.mxu1 %v862_v45  ;;  %v177_v36 = vadd.f32 %v169_v27, %v137_v25  ;;  %v110_v45 = vmul.f32 %v102_v32, %v1088_v62  ;;  %v206_v21 = vmax.f32 %v198_v15, 0.0  ;;  %v116_v24 = vmul.f32 %v108_v12, %v1092_v63  ;;  %v148_v25 = vld [vmem:[%s1293_s2 + $0x30] sm:$0xff] }
  0x38   :  { %688 = vmatpush1.bf16.msra.mxu0 %v863_v46  ;;  %646 = vmatprep.subr.bf16.mxu1 %v864_v53  ;;  %v90_v44 = vadd.f32 %v1108_v5, %v61_v37  ;;  %v114_v46 = vmul.f32 %v106_v61, %v1088_v62  ;;  %v221_v51 = vadd.f32 %v213_v42, %v181_v40  ;;  %v94_v52 = vmax.f32 %v86_v43, 0.0 }
  0x39   :  { %689 = vmatprep.subr.bf16.mxu0 %v866_v54  ;;  %650 = vmatprep.mubr.bf16.mxu1 %v231_v35  ;;  %v217_v50 = vadd.f32 %v209_v41, %v177_v36  ;;  %v154_v53 = vmul.f32 %v146_v38, %v1088_v62  ;;  %v186_v54 = vld [vmem:[%s1294_s3 + $0x20] sm:$0xff]  ;;  %v118_v56 = vadd.f32 %v110_v45, %v1108_v5 }
  0x3a   :  { %v98_v55 = vmax.f32 %v90_v44, 0.0  ;;  %v122_v58 = vadd.f32 %v114_v46, %v1108_v5  ;;  %v229_v1 = vmul.f32 0.25, %v221_v51  ;;  %v194_v10 = vmul.f32 %v186_v54, %v1088_v62 }
  0x3b   :  { %647 = vmatpush1.bf16.msra.mxu1 %v868_v6  ;;  %v225_v0 = vmul.f32 0.25, %v217_v50  ;;  %v162_v2 = vadd.f32 %v154_v53, %v1108_v5  ;;  %v34_v6 = vld [vmem:[%s1290_s0 + $0x30] sm:$0xff]  ;;  %v126_v7 = vmax.f32 %v118_v56, 0.0  ;;  %v88_v29 = vadd.f32 %v77_v22, %v59_v16 }
  0x3c   :  { %690 = vmatpush1.bf16.msra.mxu0 %v869_v11  ;;  %648 = vmatprep.subr.bf16.mxu1 %v870_v17  ;;  %v130_v8 = vmax.f32 %v122_v58, 0.0  ;;  %v104_v11 = vld [vmem:[%s1292_s1 + $0x10] sm:$0xff]  ;;  %v202_v19 = vadd.f32 %v194_v10, %v1108_v5  ;;  %v63_v20 = vmul.f32 %v1092_v63, %v34_v6  ;;  %v124_v32 = vadd.f32 %v116_v24, %v77_v22 }
  0x3d   :  { %691 = vmatprep.subr.bf16.mxu0 %v872_v18  ;;  %v233_v13 = vpack.c.bf16 %v229_v1, %v225_v0  ;;  %v170_v14 = vmax.f32 %v162_v2, 0.0  ;;  %v144_v17 = vld [vmem:[%s1293_s2 + $0x10] sm:$0xff]  ;;  %v134_v18 = vadd.f32 %v126_v7, %v94_v52  ;;  %v112_v23 = vmul.f32 %v104_v11, %v1092_v63 }
  0x3e   :  { %v138_v62 = vadd.f32 %v130_v8, %v98_v55  ;;  %v210_v28 = vmax.f32 %v202_v19, 0.0  ;;  %v152_v5 = vmul.f32 %v144_v17, %v1092_v63  ;;  %v92_v30 = vadd.f32 %v77_v22, %v63_v20 }
  0x3f   :  { %649 = vmatpush1.bf16.msra.mxu1 %v874_v4  ;;  %693 = vmatprep.mubr.bf16.mxu0 %v233_v13  ;;  %v174_v26 = vadd.f32 %v166_v9, %v134_v18  ;;  %v120_v31 = vadd.f32 %v112_v23, %v77_v22  ;;  %v156_v49 = vmul.f32 %v148_v25, %v1092_v63  ;;  %v188_v4 = vld [vmem:[%s1294_s3 + $0x30] sm:$0xff]  ;;  %v132_v37 = vmax.f32 %v124_v32, 0.0 }
  0x40   :  { %692 = vmatpush1.bf16.msra.mxu0 %v875_v34  ;;  %v178_v27 = vadd.f32 %v170_v14, %v138_v62  ;;  %v160_v57 = vadd.f32 %v152_v5, %v77_v22  ;;  %v96_v34 = vmax.f32 %v88_v29, 0.0  ;;  %v100_v35 = vmax.f32 %v92_v30, 0.0 }
  0x41   :  { %v214_v39 = vadd.f32 %v206_v21, %v174_v26  ;;  %v128_v36 = vmax.f32 %v120_v31, 0.0  ;;  %v164_v41 = vadd.f32 %v156_v49, %v77_v22  ;;  %v192_v45 = vmul.f32 %v184_v33, %v1092_v63 }
  0x42   :  { %v218_v61 = vadd.f32 %v210_v28, %v178_v27  ;;  %v168_v42 = vmax.f32 %v160_v57, 0.0  ;;  %v140_v44 = vadd.f32 %v132_v37, %v100_v35  ;;  %v196_v46 = vmul.f32 %v188_v4, %v1092_v63 }
  0x43   :  { %v222_v38 = vmul.f32 0.25, %v214_v39  ;;  %v136_v43 = vadd.f32 %v128_v36, %v96_v34  ;;  %v172_v48 = vmax.f32 %v164_v41, 0.0  ;;  %v200_v51 = vadd.f32 %v192_v45, %v77_v22 }
  0x44   :  { %v226_v40 = vmul.f32 0.25, %v218_v61  ;;  %v204_v52 = vadd.f32 %v196_v46, %v77_v22 }
  0x45   :  { %v176_v50 = vadd.f32 %v168_v42, %v136_v43  ;;  %v180_v53 = vadd.f32 %v172_v48, %v140_v44  ;;  %v208_v54 = vmax.f32 %v200_v51, 0.0 }
  0x46   :  { %v230_v47 = vpack.c.bf16 %v226_v40, %v222_v38  ;;  %v212_v55 = vmax.f32 %v204_v52, 0.0 }
  0x47   :  { %v216_v56 = vadd.f32 %v208_v54, %v176_v50 }
  0x48   :  { %651 = vmatmul.mubr.bf16.vlgmr.msra.gmra.mrb[0].mxu1 %v230_v47  ;;  %v220_v58 = vadd.f32 %v212_v55, %v180_v53 }
  0x49   :  { %v224_v59 = vmul.f32 0.25, %v216_v56 }
  0x4a   :  { %v228_v60 = vmul.f32 0.25, %v220_v58 }
  0x4c   :  { %v232_v0 = vpack.c.bf16 %v228_v60, %v224_v59 }
  0x4e   :  { %694 = vmatmul.mubr.bf16.vlgmr.msra.gmra.mrb[0].mxu0 %v232_v0 }
 0x11b   :  { %v652_v1 = vpop.f32.mrb[0].mxu1 }
 0x11c   :  { %v654_v2 = vpop.f32.mrb[1].mxu1 }
 0x11d   :  { %v656_v3 = vpop.f32.mrb[2].mxu1 }
 0x11e   :  { %v658_v6 = vpop.f32.mrb[3].mxu1 }
 0x121   :  { %v695_v63 = vpop.f32.mrb[0].mxu0 }
 0x122   :  { %v696_v7 = vadd.f32 %v695_v63, %v652_v1  ;;  %v697_v8 = vpop.f32.mrb[1].mxu0 }
 0x123   :  { %v698_v9 = vadd.f32 %v697_v8, %v654_v2  ;;  %v699_v10 = vpop.f32.mrb[2].mxu0 }
 0x124   :  { %704 = vst [vmem:[%s1295_s7] sm:$0xff] %v696_v7  ;;  %v700_v11 = vadd.f32 %v699_v10, %v656_v3  ;;  %v701_v12 = vpop.f32.mrb[3].mxu0 }
 0x125   :  { %705 = vst [vmem:[%s1295_s7 + $0x8] sm:$0xff] %v698_v9  ;;  %v702_v13 = vadd.f32 %v701_v12, %v658_v6 }
 0x126   :  { %706 = vst [vmem:[%s1295_s7 + $0x10] sm:$0xff] %v700_v11 }
 0x127   :  { %707 = vst [vmem:[%s1295_s7 + $0x18] sm:$0xff] %v702_v13 }

// kernel: densenet_forward.163
= control target key start
LH: loop header
LB: loop body
LE: loop exit
PB: predicated region body
PF: predicated region fallthrough
CT: control target
= control target key end

     0   :  { %vm1141_vm0 = vmmov 0   ;;  %s1406_s1 = inlined_call_operand.vmem [shape: bf16[1152,128], index: 1, kind: input, shape index: {}]   ;;  %s1407_s0 = inlined_call_operand.vmem [shape: bf16[16,1152], index: 0, kind: input, shape index: {}]   ;;  %s1408_s2 = inlined_call_operand.vmem [shape: f32[16,128], index: 2, kind: output, shape index: {}]  }
   0x1   :  { %v1055_v0 = vld [vmem:[%s1406_s1 + $0x40] sm:$0xff]   ;;  %v1059_v4 = vld [vmem:[%s1406_s1 + $0x48] sm:$0xff]   ;;  %v1063_v8 = vld [vmem:[%s1406_s1 + $0x50] sm:$0xff]  }
   0x2   :  { %v1056_v1 = vld [vmem:[%s1406_s1 + $0xc0] sm:$0xff]   ;;  %936 = vmatprep.subr.bf16.mxu0 %v1055_v0  ;;  %v1060_v5 = vld [vmem:[%s1406_s1 + $0xc8] sm:$0xff]   ;;  %v1064_v9 = vld [vmem:[%s1406_s1 + $0xd0] sm:$0xff]  }
   0x3   :  { %v1057_v2 = vld [vmem:[%s1406_s1] sm:$0xff]   ;;  %958 = vmatprep.subr.bf16.mxu1 %v1056_v1  ;;  %v1061_v6 = vld [vmem:[%s1406_s1 + $0x8] sm:$0xff]   ;;  %v1065_v10 = vld [vmem:[%s1406_s1 + $0x10] sm:$0xff]  }
   0x4   :  { %v1058_v3 = vld [vmem:[%s1406_s1 + $0x80] sm:$0xff]   ;;  %937 = vmatpush3.bf16.msra.mxu0 %v1057_v2  ;;  %v1062_v7 = vld [vmem:[%s1406_s1 + $0x88] sm:$0xff]   ;;  %v1066_v11 = vld [vmem:[%s1406_s1 + $0x90] sm:$0xff]  }
   0x5   :  { %959 = vmatpush3.bf16.msra.mxu1 %v1058_v3  ;;  %938 = vmatprep.subr.bf16.mxu0 %v1059_v4  ;;  %v1067_v12 = vld [vmem:[%s1406_s1 + $0x58] sm:$0xff]   ;;  %v1071_v16 = vld [vmem:[%s1406_s1 + $0x60] sm:$0xff]   ;;  %v1075_v20 = vld [vmem:[%s1406_s1 + $0x68] sm:$0xff]  }
   0x6   :  { %960 = vmatprep.subr.bf16.mxu1 %v1060_v5  ;;  %v1068_v13 = vld [vmem:[%s1406_s1 + $0xd8] sm:$0xff]   ;;  %v1072_v17 = vld [vmem:[%s1406_s1 + $0xe0] sm:$0xff]   ;;  %v1076_v21 = vld [vmem:[%s1406_s1 + $0xe8] sm:$0xff]  }
   0x7   :  { %v1069_v14 = vld [vmem:[%s1406_s1 + $0x18] sm:$0xff]   ;;  %v1073_v18 = vld [vmem:[%s1406_s1 + $0x20] sm:$0xff]   ;;  %v1077_v22 = vld [vmem:[%s1406_s1 + $0x28] sm:$0xff]  }
   0x8   :  { %939 = vmatpush3.bf16.msra.mxu0 %v1061_v6  ;;  %v1070_v15 = vld [vmem:[%s1406_s1 + $0x98] sm:$0xff]   ;;  %v1074_v19 = vld [vmem:[%s1406_s1 + $0xa0] sm:$0xff]   ;;  %v1078_v23 = vld [vmem:[%s1406_s1 + $0xa8] sm:$0xff]   ;;  %v1140_v6 = vmov 0.0  }
   0x9   :  { %961 = vmatpush3.bf16.msra.mxu1 %v1062_v7  ;;  %940 = vmatprep.subr.bf16.mxu0 %v1063_v8  ;;  %v1079_v24 = vld [vmem:[%s1406_s1 + $0x70] sm:$0xff]   ;;  %v1083_v28 = vld [vmem:[%s1406_s1 + $0x78] sm:$0xff]   ;;  %v1087_v32 = vld [vmem:[%s1407_s0] ss:$36 sps:$4 sm:$0xff]  }
   0xa   :  { %962 = vmatprep.subr.bf16.mxu1 %v1064_v9  ;;  %v1080_v25 = vld [vmem:[%s1406_s1 + $0xf0] sm:$0xff]   ;;  %v1084_v29 = vld [vmem:[%s1406_s1 + $0xf8] sm:$0xff]   ;;  %v1089_v33 = vld [vmem:[%s1407_s0 + $0x4] ss:$36 sps:$4 sm:$0xff]  }
   0xb   :  { %v1081_v26 = vld [vmem:[%s1406_s1 + $0x30] sm:$0xff]   ;;  %v1085_v30 = vld [vmem:[%s1406_s1 + $0x38] sm:$0xff]   ;;  %v1090_v34 = vld [vmem:[%s1407_s0 + $0x8] ss:$36 sps:$4 sm:$0xff]   ;;  %676 = vmatprep.mubr.bf16.mxu0 %v1089_v33 }
   0xc   :  { %941 = vmatpush3.bf16.msra.mxu0 %v1065_v10  ;;  %v1082_v27 = vld [vmem:[%s1406_s1 + $0xb0] sm:$0xff]   ;;  %v1086_v31 = vld [vmem:[%s1406_s1 + $0xb8] sm:$0xff]   ;;  %v1093_v36 = vld [vmem:[%s1406_s1 + $0x140] sm:$0xff]  }
   0xd   :  { %963 = vmatpush3.bf16.msra.mxu1 %v1066_v11  ;;  %942 = vmatprep.subr.bf16.mxu0 %v1067_v12  ;;  %v1092_v35 = vld [vmem:[%s1407_s0 + $0xc] ss:$36 sps:$4 sm:$0xff]   ;;  %v1094_v37 = vld [vmem:[%s1406_s1 + $0x100] sm:$0xff]   ;;  %v1105_v48 = vld [vmem:[%s1406_s1 + $0x158] sm:$0xff]  }
   0xe   :  { %964 = vmatprep.subr.bf16.mxu1 %v1068_v13  ;;  %717 = vmatprep.mubr.bf16.mxu1 %v1092_v35  ;;  %v1095_v38 = vld [vmem:[%s1406_s1 + $0x1c0] sm:$0xff]   ;;  %v1097_v40 = vld [vmem:[%s1406_s1 + $0x148] sm:$0xff]   ;;  %v1101_v44 = vld [vmem:[%s1406_s1 + $0x150] sm:$0xff]  }
   0xf   :  { %v1096_v39 = vld [vmem:[%s1406_s1 + $0x180] sm:$0xff]   ;;  %v1098_v41 = vld [vmem:[%s1406_s1 + $0x108] sm:$0xff]   ;;  %v1102_v45 = vld [vmem:[%s1406_s1 + $0x110] sm:$0xff]  }
  0x10   :  { %943 = vmatpush3.bf16.msra.mxu0 %v1069_v14  ;;  %v1099_v42 = vld [vmem:[%s1406_s1 + $0x1c8] sm:$0xff]   ;;  %v1103_v46 = vld [vmem:[%s1406_s1 + $0x1d0] sm:$0xff]   ;;  %v1106_v49 = vld [vmem:[%s1406_s1 + $0x118] sm:$0xff]  }
  0x11   :  { %965 = vmatpush3.bf16.msra.mxu1 %v1070_v15  ;;  %944 = vmatprep.subr.bf16.mxu0 %v1071_v16  ;;  %v1100_v43 = vld [vmem:[%s1406_s1 + $0x188] sm:$0xff]   ;;  %v1104_v47 = vld [vmem:[%s1406_s1 + $0x190] sm:$0xff]   ;;  %v1107_v50 = vld [vmem:[%s1406_s1 + $0x1d8] sm:$0xff]  }
  0x12   :  { %966 = vmatprep.subr.bf16.mxu1 %v1072_v17  ;;  %v1108_v51 = vld [vmem:[%s1406_s1 + $0x198] sm:$0xff]   ;;  %v1109_v52 = vld [vmem:[%s1406_s1 + $0x160] sm:$0xff]   ;;  %v1113_v56 = vld [vmem:[%s1406_s1 + $0x168] sm:$0xff]  }
  0x13   :  { %v1110_v53 = vld [vmem:[%s1406_s1 + $0x120] sm:$0xff]   ;;  %v1114_v57 = vld [vmem:[%s1406_s1 + $0x128] sm:$0xff]   ;;  %v1117_v60 = vld [vmem:[%s1406_s1 + $0x170] sm:$0xff]  }
  0x14   :  { %945 = vmatpush3.bf16.msra.mxu0 %v1073_v18  ;;  %v1111_v54 = vld [vmem:[%s1406_s1 + $0x1e0] sm:$0xff]   ;;  %v1115_v58 = vld [vmem:[%s1406_s1 + $0x1e8] sm:$0xff]   ;;  %v1118_v61 = vld [vmem:[%s1406_s1 + $0x130] sm:$0xff]  }
  0x15   :  { %967 = vmatpush3.bf16.msra.mxu1 %v1074_v19  ;;  %946 = vmatprep.subr.bf16.mxu0 %v1075_v20  ;;  %v1112_v55 = vld [vmem:[%s1406_s1 + $0x1a0] sm:$0xff]   ;;  %v1116_v59 = vld [vmem:[%s1406_s1 + $0x1a8] sm:$0xff]   ;;  %v1119_v62 = vld [vmem:[%s1406_s1 + $0x1f0] sm:$0xff]  }
  0x16   :  { %968 = vmatprep.subr.bf16.mxu1 %v1076_v21  ;;  %v1120_v63 = vld [vmem:[%s1406_s1 + $0x1b0] sm:$0xff]   ;;  %v1121_v0 = vld [vmem:[%s1406_s1 + $0x178] sm:$0xff]   ;;  %v1131_v9 = vld [vmem:[%s1406_s1 + $0x200] sm:$0xff]  }
  0x17   :  { %v1122_v1 = vld [vmem:[%s1406_s1 + $0x138] sm:$0xff]   ;;  %v1124_v3 = vld [vmem:[%s1407_s0 + $0x10] ss:$36 sps:$4 sm:$0xff]   ;;  %v1132_v10 = vld [vmem:[%s1406_s1 + $0x208] sm:$0xff]  }
  0x18   :  { %947 = vmatpush3.bf16.msra.mxu0 %v1077_v22  ;;  %v1123_v2 = vld [vmem:[%s1406_s1 + $0x1f8] sm:$0xff]   ;;  %v1133_v11 = vld [vmem:[%s1406_s1 + $0x210] sm:$0xff]   ;;  %v1135_v13 = vld [vmem:[%s1406_s1 + $0x220] sm:$0xff]  }
  0x19   :  { %969 = vmatpush3.bf16.msra.mxu1 %v1078_v23  ;;  %948 = vmatprep.subr.bf16.mxu0 %v1079_v24  ;;  %v1126_v4 = vld [vmem:[%s1407_s0 + $0x14] ss:$36 sps:$4 sm:$0xff]   ;;  %v1130_v8 = vld [vmem:[%s1407_s0 + $0x1c] ss:$36 sps:$4 sm:$0xff]   ;;  %v1136_v14 = vld [vmem:[%s1406_s1 + $0x228] sm:$0xff]  }
  0x1a   :  { %970 = vmatprep.subr.bf16.mxu1 %v1080_v25  ;;  %v1127_v5 = vld [vmem:[%s1406_s1 + $0x1b8] sm:$0xff]   ;;  %v1137_v15 = vld [vmem:[%s1406_s1 + $0x230] sm:$0xff]   ;;  %v1139_v17 = vld [vmem:[%s1407_s0 + $0x20] ss:$36 sps:$4 sm:$0xff]  }
  0x1b   :  { %v1128_v7 = vld [vmem:[%s1407_s0 + $0x18] ss:$36 sps:$4 sm:$0xff]  }
  0x1c   :  { %949 = vmatpush3.bf16.msra.mxu0 %v1081_v26  ;;  %v1134_v12 = vld [vmem:[%s1406_s1 + $0x218] sm:$0xff]  }
  0x1d   :  { %971 = vmatpush3.bf16.msra.mxu1 %v1082_v27  ;;  %950 = vmatprep.subr.bf16.mxu0 %v1083_v28  ;;  %v1138_v16 = vld [vmem:[%s1406_s1 + $0x238] sm:$0xff]  }
  0x1e   :  { %972 = vmatprep.subr.bf16.mxu1 %v1084_v29 }
  0x20   :  { %951 = vmatpush3.bf16.msra.mxu0 %v1085_v30 }
  0x21   :  { %973 = vmatpush3.bf16.msra.mxu1 %v1086_v31  ;;  %980 = vmatprep.subr.bf16.mxu0 %v1093_v36 }
  0x22   :  { %1002 = vmatprep.subr.bf16.mxu1 %v1095_v38 }
  0x23   :  { %677 = vmatmul.mubr.bf16.vlgmr.msra.gmra.mrb[0].mxu0 %v1087_v32 }
  0x24   :  { %718 = vmatmul.mubr.bf16.vlgmr.msra.gmra.mrb[0].mxu1 %v1090_v34  ;;  %981 = vmatpush3.bf16.msra.mxu0 %v1094_v37 }
  0x25   :  { %1003 = vmatpush3.bf16.msra.mxu1 %v1096_v39  ;;  %982 = vmatprep.subr.bf16.mxu0 %v1097_v40 }
  0x26   :  { %1004 = vmatprep.subr.bf16.mxu1 %v1099_v42  ;;  %758 = vmatprep.mubr.bf16.mxu0 %v1126_v4 }
  0x27   :  { %799 = vmatprep.mubr.bf16.mxu1 %v1130_v8 }
  0x28   :  { %983 = vmatpush3.bf16.msra.mxu0 %v1098_v41 }
  0x29   :  { %1005 = vmatpush3.bf16.msra.mxu1 %v1100_v43  ;;  %984 = vmatprep.subr.bf16.mxu0 %v1101_v44 }
  0x2a   :  { %1006 = vmatprep.subr.bf16.mxu1 %v1103_v46 }
  0x2c   :  { %985 = vmatpush3.bf16.msra.mxu0 %v1102_v45 }
  0x2d   :  { %1007 = vmatpush3.bf16.msra.mxu1 %v1104_v47  ;;  %986 = vmatprep.subr.bf16.mxu0 %v1105_v48 }
  0x2e   :  { %1008 = vmatprep.subr.bf16.mxu1 %v1107_v50 }
  0x30   :  { %987 = vmatpush3.bf16.msra.mxu0 %v1106_v49 }
  0x31   :  { %1009 = vmatpush3.bf16.msra.mxu1 %v1108_v51  ;;  %988 = vmatprep.subr.bf16.mxu0 %v1109_v52 }
  0x32   :  { %1010 = vmatprep.subr.bf16.mxu1 %v1111_v54 }
  0x34   :  { %989 = vmatpush3.bf16.msra.mxu0 %v1110_v53 }
  0x35   :  { %1011 = vmatpush3.bf16.msra.mxu1 %v1112_v55  ;;  %990 = vmatprep.subr.bf16.mxu0 %v1113_v56 }
  0x36   :  { %1012 = vmatprep.subr.bf16.mxu1 %v1115_v58 }
  0x38   :  { %991 = vmatpush3.bf16.msra.mxu0 %v1114_v57 }
  0x39   :  { %1013 = vmatpush3.bf16.msra.mxu1 %v1116_v59  ;;  %992 = vmatprep.subr.bf16.mxu0 %v1117_v60 }
  0x3a   :  { %1014 = vmatprep.subr.bf16.mxu1 %v1119_v62 }
  0x3c   :  { %993 = vmatpush3.bf16.msra.mxu0 %v1118_v61 }
  0x3d   :  { %1015 = vmatpush3.bf16.msra.mxu1 %v1120_v63  ;;  %994 = vmatprep.subr.bf16.mxu0 %v1121_v0 }
  0x3e   :  { %1016 = vmatprep.subr.bf16.mxu1 %v1123_v2 }
  0x40   :  { %995 = vmatpush3.bf16.msra.mxu0 %v1122_v1 }
  0x41   :  { %1033 = vmatprep.subr.bf16.mxu0 %v1140_v6  ;;  %1017 = vmatpush3.bf16.msra.mxu1 %v1127_v5 }
  0x43   :  { %759 = vmatmul.mubr.bf16.vlgmr.msra.gmra.mrb[4].mxu0 %v1124_v3 }
  0x44   :  { %1049 = vmatprep.mubr.msk.bf16.mxu0 %vm1141_vm0, %v1140_v6  ;;  %1034 = vmatpush3.bf16.msra.mxu0 %v1131_v9 }
  0x45   :  { %800 = vmatmul.mubr.bf16.vlgmr.msra.gmra.mrb[4].mxu1 %v1128_v7  ;;  %1035 = vmatprep.subr.bf16.mxu0 %v1140_v6 }
  0x48   :  { %1036 = vmatpush3.bf16.msra.mxu0 %v1132_v10 }
  0x49   :  { %1037 = vmatprep.subr.bf16.mxu0 %v1140_v6 }
  0x4c   :  { %1038 = vmatpush3.bf16.msra.mxu0 %v1133_v11 }
  0x4d   :  { %1039 = vmatprep.subr.bf16.mxu0 %v1140_v6 }
  0x50   :  { %1040 = vmatpush3.bf16.msra.mxu0 %v1134_v12 }
  0x51   :  { %1041 = vmatprep.subr.bf16.mxu0 %v1140_v6 }
  0x54   :  { %1042 = vmatpush3.bf16.msra.mxu0 %v1135_v13 }
  0x55   :  { %1043 = vmatprep.subr.bf16.mxu0 %v1140_v6 }
  0x58   :  { %1044 = vmatpush3.bf16.msra.mxu0 %v1136_v14 }
  0x59   :  { %1045 = vmatprep.subr.bf16.mxu0 %v1140_v6 }
  0x5c   :  { %1046 = vmatpush3.bf16.msra.mxu0 %v1137_v15 }
  0x5d   :  { %1047 = vmatprep.subr.bf16.mxu0 %v1140_v6 }
  0x60   :  { %1048 = vmatpush3.bf16.msra.mxu0 %v1138_v16 }
  0x63   :  { %1050 = vmatmul.mubr.bf16.vlgmr.msra.gmra.mrb[8].mxu0 %v1139_v17 }
  0xf6   :  { %v952_v18 = vpop.f32.mrb[0].mxu0 }
  0xf7   :  { %v974_v19 = vpop.f32.mrb[0].mxu1  ;;  %v953_v20 = vpop.f32.mrb[1].mxu0 }
  0xf8   :  { %v954_v21 = vadd.f32 %v953_v20, %v952_v18  ;;  %v975_v22 = vpop.f32.mrb[1].mxu1  ;;  %v955_v23 = vpop.f32.mrb[2].mxu0 }
  0xf9   :  { %v976_v24 = vadd.f32 %v975_v22, %v974_v19  ;;  %v977_v25 = vpop.f32.mrb[2].mxu1  ;;  %v956_v26 = vpop.f32.mrb[3].mxu0 }
  0xfa   :  { %v957_v27 = vadd.f32 %v956_v26, %v955_v23  ;;  %v978_v28 = vpop.f32.mrb[3].mxu1 }
  0xfb   :  { %v720_v29 = vadd.f32 %v976_v24, %v954_v21  ;;  %v979_v30 = vadd.f32 %v978_v28, %v977_v25 }
  0xfd   :  { %v723_v31 = vadd.f32 %v979_v30, %v957_v27 }
 0x116   :  { %v996_v32 = vpop.f32.mrb[4].mxu0 }
 0x117   :  { %v997_v33 = vpop.f32.mrb[5].mxu0 }
 0x118   :  { %v998_v34 = vadd.f32 %v997_v33, %v996_v32  ;;  %v999_v35 = vpop.f32.mrb[6].mxu0  ;;  %v1018_v36 = vpop.f32.mrb[4].mxu1 }
 0x119   :  { %v1000_v37 = vpop.f32.mrb[7].mxu0  ;;  %v1019_v40 = vpop.f32.mrb[5].mxu1 }
 0x11a   :  { %v761_v38 = vadd.f32 %v998_v34, %v720_v29  ;;  %v1001_v39 = vadd.f32 %v1000_v37, %v999_v35  ;;  %v1020_v41 = vadd.f32 %v1019_v40, %v1018_v36  ;;  %v1021_v42 = vpop.f32.mrb[6].mxu1 }
 0x11b   :  { %v1022_v44 = vpop.f32.mrb[7].mxu1 }
 0x11c   :  { %v764_v43 = vadd.f32 %v1001_v39, %v723_v31  ;;  %v1023_v45 = vadd.f32 %v1022_v44, %v1021_v42  ;;  %v802_v46 = vadd.f32 %v1020_v41, %v761_v38 }
 0x11e   :  { %v805_v47 = vadd.f32 %v1023_v45, %v764_v43 }
 0x136   :  { %v842_v48 = vpop.f32.mrb[8].mxu0 }
 0x137   :  { %v843_v49 = vadd.f32 %v842_v48, %v802_v46  ;;  %v1051_v50 = vpop.f32.mrb[9].mxu0 }
 0x138   :  { %v845_v51 = vpop.f32.mrb[10].mxu0 }
 0x139   :  { %849 = vst [vmem:[%s1408_s2] sm:$0xff] %v843_v49  ;;  %v846_v52 = vadd.f32 %v845_v51, %v805_v47  ;;  %v1052_v53 = vpop.f32.mrb[11].mxu0 }
 0x13b   :  { %850 = vst [vmem:[%s1408_s2 + $0x8] sm:$0xff] %v846_v52 }

// kernel: densenet_forward.210
= control target key start
LH: loop header
LB: loop body
LE: loop exit
PB: predicated region body
PF: predicated region fallthrough
CT: control target
= control target key end

     0   :  { %v45_v36 = vlaneseq  ;;  %s4106_s6 = inlined_call_operand.vmem [shape: bf16[1024,512], index: 6, kind: input, shape index: {}]   ;;  %s4107_s4 = inlined_call_operand.vmem [shape: f32[1,1024], index: 4, kind: input, shape index: {}]   ;;  %s4108_s0 = inlined_call_operand.vmem [shape: f32[16,1024], index: 0, kind: input, shape index: {}]   ;;  %s4109_s5 = inlined_call_operand.vmem [shape: f32[1,1024], index: 5, kind: input, shape index: {}]   ;;  %s4110_s1 = inlined_call_operand.vmem [shape: f32[16,1024], index: 1, kind: input, shape index: {}]   ;;  %s4111_s2 = inlined_call_operand.vmem [shape: f32[16,1024], index: 2, kind: input, shape index: {}]   ;;  %s4112_s3 = inlined_call_operand.vmem [shape: f32[16,1024], index: 3, kind: input, shape index: {}]   ;;  %s4113_s7 = inlined_call_operand.vmem [shape: f32[16,512], index: 7, kind: output, shape index: {}]  }
   0x1   :  { %v2610_v0 = vld [vmem:[%s4106_s6 + $0x4] ss:$16 sps:$4 sm:$0xff]   ;;  %v2612_v1 = vld [vmem:[%s4106_s6 + $0xc] ss:$16 sps:$4 sm:$0xff]   ;;  %v2614_v2 = vld [vmem:[%s4106_s6] ss:$16 sps:$4 sm:$0xff]  }
   0x2   :  { %1974 = vmatprep.subr.bf16.mxu0 %v2610_v0  ;;  %v2615_v3 = vld [vmem:[%s4106_s6 + $0x8] ss:$16 sps:$4 sm:$0xff]   ;;  %2146 = vmatprep.subr.bf16.mxu1 %v2612_v1  ;;  %v2616_v4 = vld [vmem:[%s4106_s6 + $0x24] ss:$16 sps:$4 sm:$0xff]   ;;  %v2618_v5 = vld [vmem:[%s4106_s6 + $0x2c] ss:$16 sps:$4 sm:$0xff]  }
   0x3   :  { %1975 = vmatpush1.bf16.msra.mxu0 %v2614_v2  ;;  %2147 = vmatpush1.bf16.msra.mxu1 %v2615_v3  ;;  %v2620_v6 = vld [vmem:[%s4106_s6 + $0x20] ss:$16 sps:$4 sm:$0xff]   ;;  %v2621_v7 = vld [vmem:[%s4106_s6 + $0x28] ss:$16 sps:$4 sm:$0xff]   ;;  %v2622_v8 = vld [vmem:[%s4106_s6 + $0x44] ss:$16 sps:$4 sm:$0xff]  }
   0x4   :  { %1976 = vmatprep.subr.bf16.mxu0 %v2616_v4  ;;  %2148 = vmatprep.subr.bf16.mxu1 %v2618_v5  ;;  %v2624_v9 = vld [vmem:[%s4106_s6 + $0x4c] ss:$16 sps:$4 sm:$0xff]   ;;  %v2626_v10 = vld [vmem:[%s4106_s6 + $0x40] ss:$16 sps:$4 sm:$0xff]   ;;  %v2627_v11 = vld [vmem:[%s4106_s6 + $0x48] ss:$16 sps:$4 sm:$0xff]  }
   0x5   :  { %v2628_v12 = vld [vmem:[%s4106_s6 + $0x64] ss:$16 sps:$4 sm:$0xff]   ;;  %v2630_v13 = vld [vmem:[%s4106_s6 + $0x6c] ss:$16 sps:$4 sm:$0xff]   ;;  %v2632_v14 = vld [vmem:[%s4106_s6 + $0x60] ss:$16 sps:$4 sm:$0xff]  }
   0x6   :  { %v2633_v15 = vld [vmem:[%s4106_s6 + $0x68] ss:$16 sps:$4 sm:$0xff]   ;;  %v2634_v16 = vld [vmem:[%s4106_s6 + $0x84] ss:$16 sps:$4 sm:$0xff]   ;;  %v2636_v17 = vld [vmem:[%s4106_s6 + $0x8c] ss:$16 sps:$4 sm:$0xff]  }
   0x7   :  { %1977 = vmatpush1.bf16.msra.mxu0 %v2620_v6  ;;  %2149 = vmatpush1.bf16.msra.mxu1 %v2621_v7  ;;  %v2638_v18 = vld [vmem:[%s4106_s6 + $0x80] ss:$16 sps:$4 sm:$0xff]   ;;  %v2639_v19 = vld [vmem:[%s4106_s6 + $0x88] ss:$16 sps:$4 sm:$0xff]   ;;  %v2640_v20 = vld [vmem:[%s4106_s6 + $0xa4] ss:$16 sps:$4 sm:$0xff]  }
   0x8   :  { %1978 = vmatprep.subr.bf16.mxu0 %v2622_v8  ;;  %2150 = vmatprep.subr.bf16.mxu1 %v2624_v9  ;;  %v2642_v21 = vld [vmem:[%s4106_s6 + $0xac] ss:$16 sps:$4 sm:$0xff]   ;;  %v2644_v22 = vld [vmem:[%s4106_s6 + $0xa0] ss:$16 sps:$4 sm:$0xff]   ;;  %v2645_v23 = vld [vmem:[%s4106_s6 + $0xa8] ss:$16 sps:$4 sm:$0xff]  }
   0x9   :  { %v2646_v24 = vld [vmem:[%s4106_s6 + $0xc4] ss:$16 sps:$4 sm:$0xff]   ;;  %v2648_v25 = vld [vmem:[%s4106_s6 + $0xcc] ss:$16 sps:$4 sm:$0xff]   ;;  %v2650_v26 = vld [vmem:[%s4106_s6 + $0xc0] ss:$16 sps:$4 sm:$0xff]  }
   0xa   :  { %v2651_v27 = vld [vmem:[%s4106_s6 + $0xc8] ss:$16 sps:$4 sm:$0xff]   ;;  %v2652_v28 = vld [vmem:[%s4106_s6 + $0xe4] ss:$16 sps:$4 sm:$0xff]   ;;  %v2654_v29 = vld [vmem:[%s4106_s6 + $0xec] ss:$16 sps:$4 sm:$0xff]  }
   0xb   :  { %1979 = vmatpush1.bf16.msra.mxu0 %v2626_v10  ;;  %2151 = vmatpush1.bf16.msra.mxu1 %v2627_v11  ;;  %v2656_v30 = vld [vmem:[%s4106_s6 + $0xe0] ss:$16 sps:$4 sm:$0xff]   ;;  %v2657_v31 = vld [vmem:[%s4106_s6 + $0xe8] ss:$16 sps:$4 sm:$0xff]   ;;  %v2658_v32 = vld [vmem:[%s4106_s6 + $0x104] ss:$16 sps:$4 sm:$0xff]  }
   0xc   :  { %1980 = vmatprep.subr.bf16.mxu0 %v2628_v12  ;;  %2152 = vmatprep.subr.bf16.mxu1 %v2630_v13  ;;  %v2660_v33 = vld [vmem:[%s4106_s6 + $0x10c] ss:$16 sps:$4 sm:$0xff]   ;;  %v2662_v34 = vld [vmem:[%s4106_s6 + $0x100] ss:$16 sps:$4 sm:$0xff]   ;;  %v2663_v35 = vld [vmem:[%s4106_s6 + $0x108] ss:$16 sps:$4 sm:$0xff]  }
   0xd   :  { %v2664_v37 = vld [vmem:[%s4106_s6 + $0x124] ss:$16 sps:$4 sm:$0xff]   ;;  %v2666_v38 = vld [vmem:[%s4106_s6 + $0x12c] ss:$16 sps:$4 sm:$0xff]   ;;  %v2668_v39 = vld [vmem:[%s4106_s6 + $0x120] ss:$16 sps:$4 sm:$0xff]  }
   0xe   :  { %v3153_v40 = vshrl.u32 %v45_v36, 7  ;;  %v2669_v41 = vld [vmem:[%s4106_s6 + $0x128] ss:$16 sps:$4 sm:$0xff]   ;;  %v2670_v42 = vld [vmem:[%s4106_s6 + $0x144] ss:$16 sps:$4 sm:$0xff]  }
   0xf   :  { %1981 = vmatpush1.bf16.msra.mxu0 %v2632_v14  ;;  %2153 = vmatpush1.bf16.msra.mxu1 %v2633_v15  ;;  %v2672_v43 = vld [vmem:[%s4106_s6 + $0x14c] ss:$16 sps:$4 sm:$0xff]   ;;  %v2674_v44 = vld [vmem:[%s4106_s6 + $0x140] ss:$16 sps:$4 sm:$0xff]   ;;  %v2675_v45 = vld [vmem:[%s4106_s6 + $0x148] ss:$16 sps:$4 sm:$0xff]  }
  0x10   :  { %1982 = vmatprep.subr.bf16.mxu0 %v2634_v16  ;;  %2154 = vmatprep.subr.bf16.mxu1 %v2636_v17  ;;  %v51_v46 = vsub.s32 1, %v3153_v40  ;;  %v2676_v47 = vld [vmem:[%s4106_s6 + $0x164] ss:$16 sps:$4 sm:$0xff]   ;;  %v47_v48 = vsub.s32 0, %v3153_v40  ;;  %v2678_v49 = vld [vmem:[%s4106_s6 + $0x16c] ss:$16 sps:$4 sm:$0xff]  }
  0x11   :  { %v2680_v50 = vld [vmem:[%s4106_s6 + $0x160] ss:$16 sps:$4 sm:$0xff]   ;;  %v2681_v51 = vld [vmem:[%s4106_s6 + $0x168] ss:$16 sps:$4 sm:$0xff]   ;;  %v2682_v53 = vld [vmem:[%s4106_s6 + $0x184] ss:$16 sps:$4 sm:$0xff]  }
  0x12   :  { %v3187_v52 = vld [vmem:[%s4107_s4] sm:$0xff]  ;;  %v2684_v54 = vld [vmem:[%s4106_s6 + $0x18c] ss:$16 sps:$4 sm:$0xff]   ;;  %v2687_v12 = vld [vmem:[%s4106_s6 + $0x188] ss:$16 sps:$4 sm:$0xff]  }
  0x13   :  { %1983 = vmatpush1.bf16.msra.mxu0 %v2638_v18  ;;  %2155 = vmatpush1.bf16.msra.mxu1 %v2639_v19  ;;  %v3198_v55 = vld [vmem:[%s4109_s5] sm:$0xff]  ;;  %v29_v56 = vld [vmem:[%s4108_s0 + $0x8] sm:$0xff]  ;;  %v52_v58 = vrot.slane %v3187_v52, %v51_v46  ;;  %v3218_v63 = vrot.slane %v3187_v52, %v47_v48 }
  0x14   :  { %1984 = vmatprep.subr.bf16.mxu0 %v2640_v20  ;;  %2156 = vmatprep.subr.bf16.mxu1 %v2642_v21  ;;  %v37_v57 = vld [vmem:[%s4108_s0 + $0x48] sm:$0xff]  ;;  %v109_v59 = vrot.slane %v3198_v55, %v51_v46  ;;  %v3221_v0 = vrot.slane %v3198_v55, %v47_v48  ;;  %v2686_v7 = vld [vmem:[%s4106_s6 + $0x180] ss:$16 sps:$4 sm:$0xff]   ;;  %v2688_v17 = vld [vmem:[%s4106_s6 + $0x1a4] ss:$16 sps:$4 sm:$0xff]  }
  0x15   :  { %v175_v60 = vld [vmem:[%s4110_s1 + $0x8] sm:$0xff]  ;;  %v86_v1 = vmul.f32 %v52_v58, %v29_v56  ;;  %v94_v2 = vmul.f32 %v52_v58, %v37_v57 }
  0x16   :  { %v183_v61 = vld [vmem:[%s4110_s1 + $0x48] sm:$0xff]  ;;  %v191_v3 = vmul.f32 %v175_v60, %v52_v58  ;;  %v2698_v60 = vld [vmem:[%s4106_s6 + $0x1c0] ss:$16 sps:$4 sm:$0xff]  }
  0x17   :  { %1985 = vmatpush1.bf16.msra.mxu0 %v2644_v22  ;;  %2157 = vmatpush1.bf16.msra.mxu1 %v2645_v23  ;;  %v255_v62 = vld [vmem:[%s4111_s2 + $0x8] sm:$0xff]  ;;  %v199_v8 = vmul.f32 %v183_v61, %v52_v58  ;;  %v143_v13 = vadd.f32 %v109_v59, %v86_v1  ;;  %v151_v14 = vadd.f32 %v109_v59, %v94_v2  ;;  %v28_v22 = vld [vmem:[%s4108_s0] sm:$0xff] }
  0x18   :  { %1986 = vmatprep.subr.bf16.mxu0 %v2646_v24  ;;  %2158 = vmatprep.subr.bf16.mxu1 %v2648_v25  ;;  %v263_v4 = vld [vmem:[%s4111_s2 + $0x48] sm:$0xff]  ;;  %v271_v9 = vmul.f32 %v255_v62, %v52_v58  ;;  %v207_v15 = vadd.f32 %v191_v3, %v109_v59 }
  0x19   :  { %v335_v5 = vld [vmem:[%s4112_s3 + $0x8] sm:$0xff]  ;;  %v279_v10 = vmul.f32 %v263_v4, %v52_v58  ;;  %v215_v19 = vadd.f32 %v199_v8, %v109_v59  ;;  %v159_v23 = vmax.f32 %v143_v13, 0.0  ;;  %v167_v24 = vmax.f32 %v151_v14, 0.0  ;;  %v2700_v4 = vld [vmem:[%s4106_s6 + $0x1e4] ss:$16 sps:$4 sm:$0xff]  }
  0x1a   :  { %v343_v6 = vld [vmem:[%s4112_s3 + $0x48] sm:$0xff]  ;;  %v351_v11 = vmul.f32 %v335_v5, %v52_v58  ;;  %v287_v20 = vadd.f32 %v271_v9, %v109_v59  ;;  %v223_v25 = vmax.f32 %v207_v15, 0.0 }
  0x1b   :  { %1987 = vmatpush1.bf16.msra.mxu0 %v2650_v26  ;;  %2159 = vmatpush1.bf16.msra.mxu1 %v2651_v27  ;;  %v359_v16 = vmul.f32 %v343_v6, %v52_v58  ;;  %v2690_v18 = vld [vmem:[%s4106_s6 + $0x1ac] ss:$16 sps:$4 sm:$0xff]   ;;  %v295_v21 = vadd.f32 %v279_v10, %v109_v59  ;;  %v36_v27 = vld [vmem:[%s4108_s0 + $0x40] sm:$0xff]  ;;  %v2699_v3 = vld [vmem:[%s4106_s6 + $0x1c8] ss:$16 sps:$4 sm:$0xff]  }
  0x1c   :  { %1988 = vmatprep.subr.bf16.mxu0 %v2652_v28  ;;  %2160 = vmatprep.subr.bf16.mxu1 %v2654_v29  ;;  %v367_v26 = vadd.f32 %v351_v11, %v109_v59  ;;  %v174_v28 = vld [vmem:[%s4110_s1] sm:$0xff]  ;;  %v239_v36 = vadd.f32 %v223_v25, %v159_v23  ;;  %v2696_v48 = vld [vmem:[%s4106_s6 + $0x1cc] ss:$16 sps:$4 sm:$0xff]  }
  0x1d   :  { %v182_v29 = vld [vmem:[%s4110_s1 + $0x40] sm:$0xff]  ;;  %v2702_v9 = vld [vmem:[%s4106_s6 + $0x1ec] ss:$16 sps:$4 sm:$0xff]  }
  0x1e   :  { %v198_v46 = vmul.f32 %v182_v29, %v3218_v63  ;;  %v2708_v23 = vld [vmem:[%s4106_s6 + $0x204] ss:$16 sps:$4 sm:$0xff]   ;;  %v2711_v25 = vld [vmem:[%s4106_s6 + $0x20c] ss:$16 sps:$4 sm:$0xff]  }
  0x1f   :  { %1989 = vmatpush1.bf16.msra.mxu0 %v2656_v30  ;;  %2161 = vmatpush1.bf16.msra.mxu1 %v2657_v31  ;;  %v2692_v30 = vld [vmem:[%s4106_s6 + $0x1a0] ss:$16 sps:$4 sm:$0xff]   ;;  %v2693_v31 = vld [vmem:[%s4106_s6 + $0x1a8] ss:$16 sps:$4 sm:$0xff]  }
  0x20   :  { %1990 = vmatprep.subr.bf16.mxu0 %v2658_v32  ;;  %2162 = vmatprep.subr.bf16.mxu1 %v2660_v33  ;;  %v231_v32 = vmax.f32 %v215_v19, 0.0  ;;  %v303_v33 = vmax.f32 %v287_v20, 0.0  ;;  %v214_v57 = vadd.f32 %v198_v46, %v3221_v0  ;;  %v2724_v46 = vld [vmem:[%s4106_s6 + $0x260] ss:$16 sps:$4 sm:$0xff]  }
  0x23   :  { %1991 = vmatpush1.bf16.msra.mxu0 %v2662_v34  ;;  %2163 = vmatpush1.bf16.msra.mxu1 %v2663_v35  ;;  %v311_v34 = vmax.f32 %v295_v21, 0.0  ;;  %v375_v35 = vadd.f32 %v359_v16, %v109_v59  ;;  %v342_v59 = vld [vmem:[%s4112_s3 + $0x40] sm:$0xff] }
  0x24   :  { %1992 = vmatprep.subr.bf16.mxu0 %v2664_v37  ;;  %2164 = vmatprep.subr.bf16.mxu1 %v2666_v38  ;;  %v383_v37 = vmax.f32 %v367_v26, 0.0  ;;  %v85_v38 = vmul.f32 %v3218_v63, %v28_v22  ;;  %v358_v13 = vmul.f32 %v342_v59, %v3218_v63  ;;  %v2705_v22 = vld [vmem:[%s4106_s6 + $0x1e8] ss:$16 sps:$4 sm:$0xff]   ;;  %v2744_v59 = vld [vmem:[%s4106_s6 + $0x2c4] ss:$16 sps:$4 sm:$0xff]  }
  0x26   :  { %v374_v21 = vadd.f32 %v358_v13, %v3221_v0 }
  0x27   :  { %1993 = vmatpush1.bf16.msra.mxu0 %v2668_v39  ;;  %2165 = vmatpush1.bf16.msra.mxu1 %v2669_v41  ;;  %v93_v39 = vmul.f32 %v3218_v63, %v36_v27  ;;  %v254_v41 = vld [vmem:[%s4111_s2] sm:$0xff] }
  0x28   :  { %1994 = vmatprep.subr.bf16.mxu0 %v2670_v42  ;;  %2166 = vmatprep.subr.bf16.mxu1 %v2672_v43  ;;  %v2694_v42 = vld [vmem:[%s4106_s6 + $0x1c4] ss:$16 sps:$4 sm:$0xff]   ;;  %v247_v43 = vadd.f32 %v231_v32, %v167_v24  ;;  %v270_v58 = vmul.f32 %v254_v41, %v3218_v63  ;;  %v390_v27 = vmax.f32 %v374_v21, 0.0  ;;  %v2723_v41 = vld [vmem:[%s4106_s6 + $0x24c] ss:$16 sps:$4 sm:$0xff]  }
  0x2a   :  { %v286_v8 = vadd.f32 %v270_v58, %v3221_v0  ;;  %v2739_v58 = vld [vmem:[%s4106_s6 + $0x2a8] ss:$16 sps:$4 sm:$0xff]  }
  0x2b   :  { %1995 = vmatpush1.bf16.msra.mxu0 %v2674_v44  ;;  %2167 = vmatpush1.bf16.msra.mxu1 %v2675_v45  ;;  %v391_v44 = vmax.f32 %v375_v35, 0.0  ;;  %v190_v45 = vmul.f32 %v174_v28, %v3218_v63  ;;  %v2714_v35 = vld [vmem:[%s4106_s6 + $0x224] ss:$16 sps:$4 sm:$0xff]  }
  0x2c   :  { %1996 = vmatprep.subr.bf16.mxu0 %v2676_v47  ;;  %2168 = vmatprep.subr.bf16.mxu1 %v2678_v49  ;;  %v262_v47 = vld [vmem:[%s4111_s2 + $0x40] sm:$0xff]  ;;  %v319_v49 = vadd.f32 %v303_v33, %v239_v36  ;;  %v2709_v33 = vld [vmem:[%s4106_s6 + $0x208] ss:$16 sps:$4 sm:$0xff]   ;;  %v2717_v36 = vld [vmem:[%s4106_s6 + $0x22c] ss:$16 sps:$4 sm:$0xff]  }
  0x2d   :  { %v206_v56 = vadd.f32 %v190_v45, %v3221_v0  ;;  %v278_v2 = vmul.f32 %v262_v47, %v3218_v63  ;;  %v2729_v45 = vld [vmem:[%s4106_s6 + $0x26c] ss:$16 sps:$4 sm:$0xff]   ;;  %v2727_v47 = vld [vmem:[%s4106_s6 + $0x268] ss:$16 sps:$4 sm:$0xff]  }
  0x2e   :  { %v399_v61 = vadd.f32 %v383_v37, %v319_v49  ;;  %v2712_v37 = vld [vmem:[%s4106_s6 + $0x220] ss:$16 sps:$4 sm:$0xff]   ;;  %v2735_v49 = vld [vmem:[%s4106_s6 + $0x28c] ss:$16 sps:$4 sm:$0xff]  }
  0x2f   :  { %1997 = vmatpush1.bf16.msra.mxu0 %v2680_v50  ;;  %2169 = vmatpush1.bf16.msra.mxu1 %v2681_v51  ;;  %v142_v50 = vadd.f32 %v3221_v0, %v85_v38  ;;  %v150_v51 = vadd.f32 %v3221_v0, %v93_v39  ;;  %v222_v6 = vmax.f32 %v206_v56, 0.0  ;;  %v294_v11 = vadd.f32 %v278_v2, %v3221_v0  ;;  %v2715_v38 = vld [vmem:[%s4106_s6 + $0x228] ss:$16 sps:$4 sm:$0xff]   ;;  %v2720_v39 = vld [vmem:[%s4106_s6 + $0x244] ss:$16 sps:$4 sm:$0xff]  }
  0x30   :  { %1998 = vmatprep.subr.bf16.mxu0 %v2682_v53  ;;  %2170 = vmatprep.subr.bf16.mxu1 %v2684_v54  ;;  %v334_v53 = vld [vmem:[%s4112_s3] sm:$0xff]  ;;  %v327_v54 = vadd.f32 %v311_v34, %v247_v43  ;;  %v415_v10 = vmul.f32 0.25, %v399_v61  ;;  %v2721_v43 = vld [vmem:[%s4106_s6 + $0x248] ss:$16 sps:$4 sm:$0xff]   ;;  %v59_v56 = vsub.s32 3, %v3153_v40 }
  0x31   :  { %v158_v62 = vmax.f32 %v142_v50, 0.0  ;;  %v166_v1 = vmax.f32 %v150_v51, 0.0  ;;  %v310_v19 = vmax.f32 %v294_v11, 0.0  ;;  %v2730_v50 = vld [vmem:[%s4106_s6 + $0x280] ss:$16 sps:$4 sm:$0xff]   ;;  %v177_v11 = vld [vmem:[%s4110_s1 + $0x18] sm:$0xff] }
  0x32   :  { %v407_v5 = vadd.f32 %v391_v44, %v327_v54  ;;  %v2726_v44 = vld [vmem:[%s4106_s6 + $0x264] ss:$16 sps:$4 sm:$0xff]   ;;  %v2733_v51 = vld [vmem:[%s4106_s6 + $0x288] ss:$16 sps:$4 sm:$0xff]   ;;  %v2741_v54 = vld [vmem:[%s4106_s6 + $0x2ac] ss:$16 sps:$4 sm:$0xff]   ;;  %v60_v61 = vrot.slane %v3187_v52, %v59_v56 }
  0x33   :  { %1999 = vmatpush1.bf16.msra.mxu0 %v2686_v7  ;;  %2171 = vmatpush1.bf16.msra.mxu1 %v2687_v12  ;;  %v230_v7 = vmax.f32 %v214_v57, 0.0  ;;  %v350_v12 = vmul.f32 %v334_v53, %v3218_v63  ;;  %v238_v15 = vadd.f32 %v222_v6, %v158_v62  ;;  %v2738_v53 = vld [vmem:[%s4106_s6 + $0x2a4] ss:$16 sps:$4 sm:$0xff]   ;;  %v2736_v57 = vld [vmem:[%s4106_s6 + $0x2a0] ss:$16 sps:$4 sm:$0xff]   ;;  %v31_v6 = vld [vmem:[%s4108_s0 + $0x18] sm:$0xff] }
  0x34   :  { %2000 = vmatprep.subr.bf16.mxu0 %v2688_v17  ;;  %2172 = vmatprep.subr.bf16.mxu1 %v2690_v18  ;;  %v423_v14 = vmul.f32 0.25, %v407_v5  ;;  %v302_v17 = vmax.f32 %v286_v8, 0.0  ;;  %v2704_v18 = vld [vmem:[%s4106_s6 + $0x1e0] ss:$16 sps:$4 sm:$0xff]   ;;  %v2745_v2 = vld [vmem:[%s4106_s6 + $0x2c8] ss:$16 sps:$4 sm:$0xff]  }
  0x35   :  { %v246_v16 = vadd.f32 %v230_v7, %v166_v1  ;;  %v366_v20 = vadd.f32 %v350_v12, %v3221_v0  ;;  %v2742_v62 = vld [vmem:[%s4106_s6 + $0x2c0] ss:$16 sps:$4 sm:$0xff]   ;;  %v55_v1 = vsub.s32 2, %v3153_v40  ;;  %v2753_v5 = vld [vmem:[%s4106_s6 + $0x2ec] ss:$16 sps:$4 sm:$0xff]  }
  0x36   :  { %v431_v63 = vpack.c.bf16 %v423_v14, %v415_v10  ;;  %v318_v24 = vadd.f32 %v302_v17, %v238_v15  ;;  %v2748_v7 = vld [vmem:[%s4106_s6 + $0x2e0] ss:$16 sps:$4 sm:$0xff]   ;;  %v2751_v8 = vld [vmem:[%s4106_s6 + $0x2e8] ss:$16 sps:$4 sm:$0xff]   ;;  %v88_v10 = vmul.f32 %v60_v61, %v31_v6  ;;  %v193_v14 = vmul.f32 %v177_v11, %v60_v61 }
  0x37   :  { %2001 = vmatpush1.bf16.msra.mxu0 %v2692_v30  ;;  %2173 = vmatpush1.bf16.msra.mxu1 %v2693_v31  ;;  %v326_v26 = vadd.f32 %v310_v19, %v246_v16  ;;  %v382_v0 = vmax.f32 %v366_v20, 0.0  ;;  %v2706_v30 = vld [vmem:[%s4106_s6 + $0x200] ss:$16 sps:$4 sm:$0xff]   ;;  %v185_v12 = vld [vmem:[%s4110_s1 + $0x58] sm:$0xff]  ;;  %v3436_v19 = vrot.slane %v3187_v52, %v55_v1 }
  0x38   :  { %2002 = vmatprep.subr.bf16.mxu0 %v2694_v42  ;;  %2174 = vmatprep.subr.bf16.mxu1 %v2696_v48  ;;  %v2718_v42 = vld [vmem:[%s4106_s6 + $0x240] ss:$16 sps:$4 sm:$0xff]   ;;  %v2732_v48 = vld [vmem:[%s4106_s6 + $0x284] ss:$16 sps:$4 sm:$0xff]   ;;  %v201_v15 = vmul.f32 %v185_v12, %v60_v61  ;;  %v257_v16 = vld [vmem:[%s4111_s2 + $0x18] sm:$0xff] }
  0x39   :  { %2006 = vmatprep.mubr.bf16.mxu0 %v431_v63  ;;  %2178 = vmatprep.mubr.bf16.mxu1 %v431_v63  ;;  %v398_v28 = vadd.f32 %v382_v0, %v318_v24  ;;  %v406_v29 = vadd.f32 %v390_v27, %v326_v26  ;;  %v265_v17 = vld [vmem:[%s4111_s2 + $0x58] sm:$0xff]  ;;  %v273_v21 = vmul.f32 %v257_v16, %v60_v61  ;;  %v2754_v27 = vld [vmem:[%s4106_s6 + $0x300] ss:$16 sps:$4 sm:$0xff]  }
  0x3a   :  { %v345_v63 = vld [vmem:[%s4112_s3 + $0x58] sm:$0xff] }
  0x3b   :  { %2003 = vmatpush1.bf16.msra.mxu0 %v2698_v60  ;;  %2175 = vmatpush1.bf16.msra.mxu1 %v2699_v3  ;;  %v414_v31 = vmul.f32 0.25, %v398_v28  ;;  %v422_v32 = vmul.f32 0.25, %v406_v29  ;;  %v2747_v60 = vld [vmem:[%s4106_s6 + $0x2cc] ss:$16 sps:$4 sm:$0xff]   ;;  %v117_v3 = vrot.slane %v3198_v55, %v59_v56  ;;  %v2769_v12 = vld [vmem:[%s4106_s6 + $0x348] ss:$16 sps:$4 sm:$0xff]  }
  0x3c   :  { %2004 = vmatprep.subr.bf16.mxu0 %v2700_v4  ;;  %2176 = vmatprep.subr.bf16.mxu1 %v2702_v9  ;;  %v2750_v4 = vld [vmem:[%s4106_s6 + $0x2e4] ss:$16 sps:$4 sm:$0xff]   ;;  %v39_v9 = vld [vmem:[%s4108_s0 + $0x58] sm:$0xff] }
  0x3d   :  { %v430_v34 = vpack.c.bf16 %v422_v32, %v414_v31  ;;  %v96_v13 = vmul.f32 %v60_v61, %v39_v9  ;;  %v145_v20 = vadd.f32 %v117_v3, %v88_v10  ;;  %v2759_v24 = vld [vmem:[%s4106_s6 + $0x30c] ss:$16 sps:$4 sm:$0xff]   ;;  %v209_v26 = vadd.f32 %v193_v14, %v117_v3 }
  0x3e   :  { %v217_v0 = vadd.f32 %v201_v15, %v117_v3  ;;  %v289_v29 = vadd.f32 %v273_v21, %v117_v3  ;;  %v2777_v21 = vld [vmem:[%s4106_s6 + $0x36c] ss:$16 sps:$4 sm:$0xff]  }
  0x3f   :  { %2005 = vmatpush1.bf16.msra.mxu0 %v2704_v18  ;;  %2177 = vmatpush1.bf16.msra.mxu1 %v2705_v22  ;;  %v337_v18 = vld [vmem:[%s4112_s3 + $0x18] sm:$0xff]  ;;  %v281_v22 = vmul.f32 %v265_v17, %v60_v61  ;;  %v161_v28 = vmax.f32 %v145_v20, 0.0  ;;  %v336_v17 = vld [vmem:[%s4112_s3 + $0x10] sm:$0xff] }
  0x40   :  { %2017 = vmatprep.subr.bf16.mxu0 %v2708_v23  ;;  %2189 = vmatprep.subr.bf16.mxu1 %v2711_v25  ;;  %v2756_v23 = vld [vmem:[%s4106_s6 + $0x304] ss:$16 sps:$4 sm:$0xff]   ;;  %v153_v25 = vadd.f32 %v117_v3, %v96_v13  ;;  %v353_v31 = vmul.f32 %v337_v18, %v60_v61 }
  0x41   :  { %v344_v18 = vld [vmem:[%s4112_s3 + $0x50] sm:$0xff] }
  0x42   :  { %2007 = vmatmul.mubr.bf16.vlgmr.msra.gmra.mrb[0].mxu0 %v430_v34  ;;  %2179 = vmatmul.mubr.bf16.vlgmr.msra.gmra.mrb[0].mxu1 %v430_v34  ;;  %v169_v32 = vmax.f32 %v153_v25, 0.0  ;;  %v233_v34 = vmax.f32 %v217_v0, 0.0  ;;  %v2774_v20 = vld [vmem:[%s4106_s6 + $0x364] ss:$16 sps:$4 sm:$0xff]  }
  0x43   :  { %2018 = vmatpush1.bf16.msra.mxu0 %v2706_v30  ;;  %2190 = vmatpush1.bf16.msra.mxu1 %v2709_v33  ;;  %v297_v30 = vadd.f32 %v281_v22, %v117_v3  ;;  %v225_v33 = vmax.f32 %v209_v26, 0.0 }
  0x44   :  { %2019 = vmatprep.subr.bf16.mxu0 %v2714_v35  ;;  %2191 = vmatprep.subr.bf16.mxu1 %v2717_v36  ;;  %v361_v35 = vmul.f32 %v345_v63, %v60_v61  ;;  %v30_v36 = vld [vmem:[%s4108_s0 + $0x10] sm:$0xff] }
  0x45   :  { %v87_v56 = vmul.f32 %v3436_v19, %v30_v36 }
  0x47   :  { %2020 = vmatpush1.bf16.msra.mxu0 %v2712_v37  ;;  %2192 = vmatpush1.bf16.msra.mxu1 %v2715_v38  ;;  %v38_v37 = vld [vmem:[%s4108_s0 + $0x50] sm:$0xff] }
  0x48   :  { %2021 = vmatprep.subr.bf16.mxu0 %v2720_v39  ;;  %2193 = vmatprep.subr.bf16.mxu1 %v2723_v41  ;;  %v176_v38 = vld [vmem:[%s4110_s1 + $0x10] sm:$0xff]  ;;  %v2757_v39 = vld [vmem:[%s4106_s6 + $0x308] ss:$16 sps:$4 sm:$0xff]   ;;  %v305_v41 = vmax.f32 %v289_v29, 0.0 }
  0x49   :  { %v2772_v29 = vld [vmem:[%s4106_s6 + $0x360] ss:$16 sps:$4 sm:$0xff]  }
  0x4b   :  { %2022 = vmatpush1.bf16.msra.mxu0 %v2718_v42  ;;  %2194 = vmatpush1.bf16.msra.mxu1 %v2721_v43  ;;  %v313_v42 = vmax.f32 %v297_v30, 0.0  ;;  %v369_v43 = vadd.f32 %v353_v31, %v117_v3  ;;  %v2775_v30 = vld [vmem:[%s4106_s6 + $0x368] ss:$16 sps:$4 sm:$0xff]   ;;  %v2780_v31 = vld [vmem:[%s4106_s6 + $0x384] ss:$16 sps:$4 sm:$0xff]  }
  0x4c   :  { %2023 = vmatprep.subr.bf16.mxu0 %v2726_v44  ;;  %2195 = vmatprep.subr.bf16.mxu1 %v2729_v45  ;;  %v3463_v44 = vrot.slane %v3198_v55, %v55_v1  ;;  %v184_v45 = vld [vmem:[%s4110_s1 + $0x50] sm:$0xff] }
  0x4d   :  { %v256_v1 = vld [vmem:[%s4111_s2 + $0x10] sm:$0xff] }
  0x4e   :  { %v272_v11 = vmul.f32 %v256_v1, %v3436_v19  ;;  %v2804_v1 = vld [vmem:[%s4106_s6 + $0x404] ss:$16 sps:$4 sm:$0xff]  }
  0x4f   :  { %2024 = vmatpush1.bf16.msra.mxu0 %v2724_v46  ;;  %2196 = vmatpush1.bf16.msra.mxu1 %v2727_v47  ;;  %v2762_v46 = vld [vmem:[%s4106_s6 + $0x324] ss:$16 sps:$4 sm:$0xff]   ;;  %v2765_v47 = vld [vmem:[%s4106_s6 + $0x32c] ss:$16 sps:$4 sm:$0xff]  }
  0x50   :  { %2025 = vmatprep.subr.bf16.mxu0 %v2732_v48  ;;  %2197 = vmatprep.subr.bf16.mxu1 %v2735_v49  ;;  %v241_v48 = vadd.f32 %v225_v33, %v161_v28  ;;  %v249_v49 = vadd.f32 %v233_v34, %v169_v32  ;;  %v288_v25 = vadd.f32 %v272_v11, %v3463_v44  ;;  %v2816_v11 = vld [vmem:[%s4106_s6 + $0x444] ss:$16 sps:$4 sm:$0xff]  }
  0x51   :  { %v360_v28 = vmul.f32 %v344_v18, %v3436_v19  ;;  %v2820_v18 = vld [vmem:[%s4106_s6 + $0x460] ss:$16 sps:$4 sm:$0xff]  }
  0x52   :  { %v304_v33 = vmax.f32 %v288_v25, 0.0 }
  0x53   :  { %2026 = vmatpush1.bf16.msra.mxu0 %v2730_v50  ;;  %2198 = vmatpush1.bf16.msra.mxu1 %v2733_v51  ;;  %v377_v50 = vadd.f32 %v361_v35, %v117_v3  ;;  %v2760_v51 = vld [vmem:[%s4106_s6 + $0x320] ss:$16 sps:$4 sm:$0xff]   ;;  %v2768_v3 = vld [vmem:[%s4106_s6 + $0x344] ss:$16 sps:$4 sm:$0xff]  }
  0x54   :  { %2027 = vmatprep.subr.bf16.mxu0 %v2738_v53  ;;  %2199 = vmatprep.subr.bf16.mxu1 %v2741_v54  ;;  %v2763_v53 = vld [vmem:[%s4106_s6 + $0x328] ss:$16 sps:$4 sm:$0xff]   ;;  %v385_v54 = vmax.f32 %v369_v43, 0.0 }
  0x55   :  { %v393_v61 = vmax.f32 %v377_v50, 0.0  ;;  %v2795_v50 = vld [vmem:[%s4106_s6 + $0x3cc] ss:$16 sps:$4 sm:$0xff]  }
  0x57   :  { %2028 = vmatpush1.bf16.msra.mxu0 %v2736_v57  ;;  %2200 = vmatpush1.bf16.msra.mxu1 %v2739_v58  ;;  %v95_v57 = vmul.f32 %v3436_v19, %v38_v37  ;;  %v192_v58 = vmul.f32 %v176_v38, %v3436_v19  ;;  %v376_v37 = vadd.f32 %v360_v28, %v3463_v44  ;;  %v2778_v38 = vld [vmem:[%s4106_s6 + $0x380] ss:$16 sps:$4 sm:$0xff]  }
  0x58   :  { %2029 = vmatprep.subr.bf16.mxu0 %v2744_v59  ;;  %2201 = vmatprep.subr.bf16.mxu1 %v2747_v60  ;;  %v321_v59 = vadd.f32 %v305_v41, %v241_v48  ;;  %v329_v60 = vadd.f32 %v313_v42, %v249_v49  ;;  %v2786_v41 = vld [vmem:[%s4106_s6 + $0x3a4] ss:$16 sps:$4 sm:$0xff]   ;;  %v2789_v42 = vld [vmem:[%s4106_s6 + $0x3ac] ss:$16 sps:$4 sm:$0xff]   ;;  %v2787_v48 = vld [vmem:[%s4106_s6 + $0x3a8] ss:$16 sps:$4 sm:$0xff]  }
  0x59   :  { %v152_v9 = vadd.f32 %v3463_v44, %v95_v57  ;;  %v208_v10 = vadd.f32 %v192_v58, %v3463_v44  ;;  %v2792_v49 = vld [vmem:[%s4106_s6 + $0x3c4] ss:$16 sps:$4 sm:$0xff]   ;;  %v2801_v58 = vld [vmem:[%s4106_s6 + $0x3ec] ss:$16 sps:$4 sm:$0xff]  }
  0x5a   :  { %v409_v6 = vadd.f32 %v393_v61, %v329_v60  ;;  %v2798_v57 = vld [vmem:[%s4106_s6 + $0x3e4] ss:$16 sps:$4 sm:$0xff]   ;;  %v2796_v61 = vld [vmem:[%s4106_s6 + $0x3e0] ss:$16 sps:$4 sm:$0xff]  }
  0x5b   :  { %2030 = vmatpush1.bf16.msra.mxu0 %v2742_v62  ;;  %2202 = vmatpush1.bf16.msra.mxu1 %v2745_v2  ;;  %v200_v62 = vmul.f32 %v184_v45, %v3436_v19  ;;  %v264_v2 = vld [vmem:[%s4111_s2 + $0x50] sm:$0xff] }
  0x5c   :  { %2031 = vmatprep.subr.bf16.mxu0 %v2750_v4  ;;  %2203 = vmatprep.subr.bf16.mxu1 %v2753_v5  ;;  %v2771_v4 = vld [vmem:[%s4106_s6 + $0x34c] ss:$16 sps:$4 sm:$0xff]   ;;  %v401_v5 = vadd.f32 %v385_v54, %v321_v59  ;;  %v425_v14 = vmul.f32 0.25, %v409_v6  ;;  %v280_v16 = vmul.f32 %v264_v2, %v3436_v19  ;;  %v2790_v54 = vld [vmem:[%s4106_s6 + $0x3c0] ss:$16 sps:$4 sm:$0xff]  }
  0x5d   :  { %v216_v15 = vadd.f32 %v200_v62, %v3463_v44  ;;  %v2799_v62 = vld [vmem:[%s4106_s6 + $0x3e8] ss:$16 sps:$4 sm:$0xff]   ;;  %v2807_v2 = vld [vmem:[%s4106_s6 + $0x40c] ss:$16 sps:$4 sm:$0xff]   ;;  %v2810_v6 = vld [vmem:[%s4106_s6 + $0x424] ss:$16 sps:$4 sm:$0xff]  }
  0x5e   :  { %v417_v13 = vmul.f32 0.25, %v401_v5  ;;  %v296_v0 = vadd.f32 %v280_v16, %v3463_v44  ;;  %v2805_v5 = vld [vmem:[%s4106_s6 + $0x408] ss:$16 sps:$4 sm:$0xff]   ;;  %v2822_v16 = vld [vmem:[%s4106_s6 + $0x464] ss:$16 sps:$4 sm:$0xff]  }
  0x5f   :  { %2032 = vmatpush1.bf16.msra.mxu0 %v2748_v7  ;;  %2204 = vmatpush1.bf16.msra.mxu1 %v2751_v8  ;;  %v2766_v7 = vld [vmem:[%s4106_s6 + $0x340] ss:$16 sps:$4 sm:$0xff]   ;;  %v144_v8 = vadd.f32 %v3463_v44, %v87_v56  ;;  %v232_v26 = vmax.f32 %v216_v15, 0.0  ;;  %v2793_v56 = vld [vmem:[%s4106_s6 + $0x3c8] ss:$16 sps:$4 sm:$0xff]  }
  0x60   :  { %2033 = vmatprep.subr.bf16.mxu0 %v2756_v23  ;;  %2205 = vmatprep.subr.bf16.mxu1 %v2759_v24  ;;  %v433_v22 = vpack.c.bf16 %v425_v14, %v417_v13  ;;  %v168_v23 = vmax.f32 %v152_v9, 0.0  ;;  %v224_v24 = vmax.f32 %v208_v10, 0.0  ;;  %v312_v35 = vmax.f32 %v296_v0, 0.0  ;;  %v2808_v9 = vld [vmem:[%s4106_s6 + $0x420] ss:$16 sps:$4 sm:$0xff]   ;;  %v267_v0 = vld [vmem:[%s4111_s2 + $0x68] sm:$0xff] }
  0x61   :  { %v160_v63 = vmax.f32 %v144_v8, 0.0  ;;  %v67_v8 = vsub.s32 5, %v3153_v40  ;;  %v2811_v10 = vld [vmem:[%s4106_s6 + $0x428] ss:$16 sps:$4 sm:$0xff]   ;;  %v2814_v14 = vld [vmem:[%s4106_s6 + $0x440] ss:$16 sps:$4 sm:$0xff]  }
  0x62   :  { %2049 = vmatprep.mubr.bf16.mxu0 %v433_v22  ;;  %2221 = vmatprep.mubr.bf16.mxu1 %v433_v22  ;;  %v248_v34 = vadd.f32 %v232_v26, %v168_v23  ;;  %v2817_v15 = vld [vmem:[%s4106_s6 + $0x448] ss:$16 sps:$4 sm:$0xff]  }
  0x63   :  { %2034 = vmatpush1.bf16.msra.mxu0 %v2754_v27  ;;  %2206 = vmatpush1.bf16.msra.mxu1 %v2757_v39  ;;  %v352_v27 = vmul.f32 %v336_v17, %v3436_v19  ;;  %v2783_v19 = vld [vmem:[%s4106_s6 + $0x38c] ss:$16 sps:$4 sm:$0xff]   ;;  %v240_v32 = vadd.f32 %v224_v24, %v160_v63  ;;  %v2781_v39 = vld [vmem:[%s4106_s6 + $0x388] ss:$16 sps:$4 sm:$0xff]   ;;  %v68_v13 = vrot.slane %v3187_v52, %v67_v8 }
  0x64   :  { %2035 = vmatprep.subr.bf16.mxu0 %v2762_v46  ;;  %2207 = vmatprep.subr.bf16.mxu1 %v2765_v47  ;;  %v392_v46 = vmax.f32 %v376_v37, 0.0  ;;  %v2784_v47 = vld [vmem:[%s4106_s6 + $0x3a0] ss:$16 sps:$4 sm:$0xff]   ;;  %v2825_v52 = vld [vmem:[%s4106_s6 + $0x46c] ss:$16 sps:$4 sm:$0xff]   ;;  %v125_v17 = vrot.slane %v3198_v55, %v67_v8 }
  0x65   :  { %v368_v36 = vadd.f32 %v352_v27, %v3463_v44  ;;  %v320_v43 = vadd.f32 %v304_v33, %v240_v32  ;;  %v328_v44 = vadd.f32 %v312_v35, %v248_v34  ;;  %v41_v22 = vld [vmem:[%s4108_s0 + $0x68] sm:$0xff] }
  0x66   :  { %v179_v55 = vld [vmem:[%s4110_s1 + $0x28] sm:$0xff]  ;;  %v98_v23 = vmul.f32 %v68_v13, %v41_v22  ;;  %v2852_v22 = vld [vmem:[%s4106_s6 + $0x504] ss:$16 sps:$4 sm:$0xff]  }
  0x67   :  { %2036 = vmatpush1.bf16.msra.mxu0 %v2760_v51  ;;  %2208 = vmatpush1.bf16.msra.mxu1 %v2763_v53  ;;  %v384_v45 = vmax.f32 %v368_v36, 0.0  ;;  %v408_v53 = vadd.f32 %v392_v46, %v328_v44  ;;  %v187_v24 = vld [vmem:[%s4110_s1 + $0x68] sm:$0xff]  ;;  %v195_v25 = vmul.f32 %v179_v55, %v68_v13 }
  0x68   :  { %2037 = vmatprep.subr.bf16.mxu0 %v2768_v3  ;;  %2209 = vmatprep.subr.bf16.mxu1 %v2771_v4  ;;  %v2802_v4 = vld [vmem:[%s4106_s6 + $0x400] ss:$16 sps:$4 sm:$0xff]   ;;  %v259_v26 = vld [vmem:[%s4111_s2 + $0x28] sm:$0xff]  ;;  %v203_v27 = vmul.f32 %v187_v24, %v68_v13  ;;  %v155_v34 = vadd.f32 %v125_v17, %v98_v23 }
  0x69   :  { %v400_v51 = vadd.f32 %v384_v45, %v320_v43  ;;  %v424_v60 = vmul.f32 0.25, %v408_v53  ;;  %v275_v28 = vmul.f32 %v259_v26, %v68_v13  ;;  %v2831_v32 = vld [vmem:[%s4106_s6 + $0x48c] ss:$16 sps:$4 sm:$0xff]   ;;  %v211_v35 = vadd.f32 %v195_v25, %v125_v17  ;;  %v2829_v46 = vld [vmem:[%s4106_s6 + $0x488] ss:$16 sps:$4 sm:$0xff]   ;;  %v3731_v23 = vld [vmem:[%s4109_s5] sm:$0xff] }
  0x6a   :  { %v219_v36 = vadd.f32 %v203_v27, %v125_v17  ;;  %v171_v43 = vmax.f32 %v155_v34, 0.0  ;;  %v2837_v53 = vld [vmem:[%s4106_s6 + $0x4ac] ss:$16 sps:$4 sm:$0xff]   ;;  %v2841_v8 = vld [vmem:[%s4106_s6 + $0x4c8] ss:$16 sps:$4 sm:$0xff]  }
  0x6b   :  { %2038 = vmatpush1.bf16.msra.mxu0 %v2766_v7  ;;  %2210 = vmatpush1.bf16.msra.mxu1 %v2769_v12  ;;  %v416_v59 = vmul.f32 0.25, %v400_v51  ;;  %v2813_v7 = vld [vmem:[%s4106_s6 + $0x42c] ss:$16 sps:$4 sm:$0xff]   ;;  %v291_v37 = vadd.f32 %v275_v28, %v125_v17  ;;  %v227_v44 = vmax.f32 %v211_v35, 0.0  ;;  %v2834_v51 = vld [vmem:[%s4106_s6 + $0x4a4] ss:$16 sps:$4 sm:$0xff]  }
  0x6c   :  { %2039 = vmatprep.subr.bf16.mxu0 %v2774_v20  ;;  %2211 = vmatprep.subr.bf16.mxu1 %v2777_v21  ;;  %v2819_v12 = vld [vmem:[%s4106_s6 + $0x44c] ss:$16 sps:$4 sm:$0xff]   ;;  %v2823_v20 = vld [vmem:[%s4106_s6 + $0x468] ss:$16 sps:$4 sm:$0xff]   ;;  %v2850_v25 = vld [vmem:[%s4106_s6 + $0x500] ss:$16 sps:$4 sm:$0xff]  }
  0x6d   :  { %v432_v3 = vpack.c.bf16 %v424_v60, %v416_v59  ;;  %v33_v21 = vld [vmem:[%s4108_s0 + $0x28] sm:$0xff]  ;;  %v2832_v59 = vld [vmem:[%s4106_s6 + $0x4a0] ss:$16 sps:$4 sm:$0xff]  }
  0x6e   :  { %v90_v63 = vmul.f32 %v68_v13, %v33_v21  ;;  %v186_v21 = vld [vmem:[%s4110_s1 + $0x60] sm:$0xff]  ;;  %v2855_v55 = vld [vmem:[%s4106_s6 + $0x50c] ss:$16 sps:$4 sm:$0xff]   ;;  %v2853_v26 = vld [vmem:[%s4106_s6 + $0x508] ss:$16 sps:$4 sm:$0xff]  }
  0x6f   :  { %2040 = vmatpush1.bf16.msra.mxu0 %v2772_v29  ;;  %2212 = vmatpush1.bf16.msra.mxu1 %v2775_v30  ;;  %v283_v29 = vmul.f32 %v267_v0, %v68_v13  ;;  %v339_v30 = vld [vmem:[%s4112_s3 + $0x28] sm:$0xff] }
  0x70   :  { %2041 = vmatprep.subr.bf16.mxu0 %v2780_v31  ;;  %2213 = vmatprep.subr.bf16.mxu1 %v2783_v19  ;;  %v347_v31 = vld [vmem:[%s4112_s3 + $0x68] sm:$0xff]  ;;  %v2828_v19 = vld [vmem:[%s4106_s6 + $0x484] ss:$16 sps:$4 sm:$0xff]   ;;  %v147_v33 = vadd.f32 %v125_v17, %v90_v63 }
  0x71   :  { %v363_v45 = vmul.f32 %v347_v31, %v68_v13  ;;  %v266_v31 = vld [vmem:[%s4111_s2 + $0x60] sm:$0xff] }
  0x73   :  { %2042 = vmatpush1.bf16.msra.mxu0 %v2778_v38  ;;  %2214 = vmatpush1.bf16.msra.mxu1 %v2781_v39  ;;  %v299_v38 = vadd.f32 %v283_v29, %v125_v17  ;;  %v355_v39 = vmul.f32 %v339_v30, %v68_v13  ;;  %v3701_v13 = vld [vmem:[%s4107_s4] sm:$0xff] }
  0x74   :  { %2043 = vmatprep.subr.bf16.mxu0 %v2786_v41  ;;  %2215 = vmatprep.subr.bf16.mxu1 %v2789_v42  ;;  %v2826_v41 = vld [vmem:[%s4106_s6 + $0x480] ss:$16 sps:$4 sm:$0xff]   ;;  %v163_v42 = vmax.f32 %v147_v33, 0.0  ;;  %v2858_v29 = vld [vmem:[%s4106_s6 + $0x524] ss:$16 sps:$4 sm:$0xff]  }
  0x75   :  { %v258_v30 = vld [vmem:[%s4111_s2 + $0x20] sm:$0xff]  ;;  %v2859_v33 = vld [vmem:[%s4106_s6 + $0x528] ss:$16 sps:$4 sm:$0xff]  }
  0x77   :  { %2044 = vmatpush1.bf16.msra.mxu0 %v2784_v47  ;;  %2216 = vmatpush1.bf16.msra.mxu1 %v2787_v48  ;;  %v235_v47 = vmax.f32 %v219_v36, 0.0  ;;  %v307_v48 = vmax.f32 %v291_v37, 0.0 }
  0x78   :  { %2045 = vmatprep.subr.bf16.mxu0 %v2792_v49  ;;  %2217 = vmatprep.subr.bf16.mxu1 %v2795_v50  ;;  %v315_v49 = vmax.f32 %v299_v38, 0.0  ;;  %v371_v50 = vadd.f32 %v355_v39, %v125_v17  ;;  %v2864_v38 = vld [vmem:[%s4106_s6 + $0x544] ss:$16 sps:$4 sm:$0xff]  }
  0x7b   :  { %2046 = vmatpush1.bf16.msra.mxu0 %v2790_v54  ;;  %2218 = vmatpush1.bf16.msra.mxu1 %v2793_v56  ;;  %v243_v54 = vadd.f32 %v227_v44, %v163_v42  ;;  %v379_v56 = vadd.f32 %v363_v45, %v125_v17  ;;  %v32_v17 = vld [vmem:[%s4108_s0 + $0x20] sm:$0xff]  ;;  %v2867_v44 = vld [vmem:[%s4106_s6 + $0x54c] ss:$16 sps:$4 sm:$0xff]  }
  0x7c   :  { %2047 = vmatprep.subr.bf16.mxu0 %v2798_v57  ;;  %2219 = vmatprep.subr.bf16.mxu1 %v2801_v58  ;;  %v251_v57 = vadd.f32 %v235_v47, %v171_v43  ;;  %v387_v58 = vmax.f32 %v371_v50, 0.0  ;;  %v338_v42 = vld [vmem:[%s4112_s3 + $0x20] sm:$0xff]  ;;  %v2865_v50 = vld [vmem:[%s4106_s6 + $0x548] ss:$16 sps:$4 sm:$0xff]  }
  0x7d   :  { %v323_v60 = vadd.f32 %v307_v48, %v243_v54  ;;  %v346_v43 = vld [vmem:[%s4112_s3 + $0x60] sm:$0xff] }
  0x7f   :  { %2048 = vmatpush1.bf16.msra.mxu0 %v2796_v61  ;;  %2220 = vmatpush1.bf16.msra.mxu1 %v2799_v62  ;;  %v395_v61 = vmax.f32 %v379_v56, 0.0  ;;  %v2835_v62 = vld [vmem:[%s4106_s6 + $0x4a8] ss:$16 sps:$4 sm:$0xff]  }
  0x80   :  { %2060 = vmatprep.subr.bf16.mxu0 %v2804_v1  ;;  %2232 = vmatprep.subr.bf16.mxu1 %v2807_v2  ;;  %v2840_v1 = vld [vmem:[%s4106_s6 + $0x4c4] ss:$16 sps:$4 sm:$0xff]   ;;  %v331_v2 = vadd.f32 %v315_v49, %v251_v57  ;;  %v2862_v49 = vld [vmem:[%s4106_s6 + $0x540] ss:$16 sps:$4 sm:$0xff]  }
  0x81   :  { %v2870_v57 = vld [vmem:[%s4106_s6 + $0x564] ss:$16 sps:$4 sm:$0xff]  }
  0x82   :  { %2050 = vmatmul.mubr.bf16.vlgmr.msra.gmra.mrb[0].mxu0 %v432_v3  ;;  %2222 = vmatmul.mubr.bf16.vlgmr.msra.gmra.mrb[0].mxu1 %v432_v3  ;;  %v2843_v3 = vld [vmem:[%s4106_s6 + $0x4cc] ss:$16 sps:$4 sm:$0xff]  }
  0x83   :  { %2061 = vmatpush1.bf16.msra.mxu0 %v2802_v4  ;;  %2233 = vmatpush1.bf16.msra.mxu1 %v2805_v5  ;;  %v403_v4 = vadd.f32 %v387_v58, %v323_v60  ;;  %v63_v5 = vsub.s32 4, %v3153_v40  ;;  %v2873_v58 = vld [vmem:[%s4106_s6 + $0x56c] ss:$16 sps:$4 sm:$0xff]  }
  0x84   :  { %2062 = vmatprep.subr.bf16.mxu0 %v2810_v6  ;;  %2234 = vmatprep.subr.bf16.mxu1 %v2813_v7  ;;  %v411_v6 = vadd.f32 %v395_v61, %v331_v2  ;;  %v2838_v7 = vld [vmem:[%s4106_s6 + $0x4c0] ss:$16 sps:$4 sm:$0xff]  }
  0x85   :  { %v121_v24 = vrot.slane %v3731_v23, %v63_v5 }
  0x87   :  { %2063 = vmatpush1.bf16.msra.mxu0 %v2808_v9  ;;  %2235 = vmatpush1.bf16.msra.mxu1 %v2811_v10  ;;  %v419_v9 = vmul.f32 0.25, %v403_v4  ;;  %v2846_v10 = vld [vmem:[%s4106_s6 + $0x4e4] ss:$16 sps:$4 sm:$0xff]  }
  0x88   :  { %2064 = vmatprep.subr.bf16.mxu0 %v2816_v11  ;;  %2236 = vmatprep.subr.bf16.mxu1 %v2819_v12  ;;  %v427_v11 = vmul.f32 0.25, %v411_v6  ;;  %v2849_v12 = vld [vmem:[%s4106_s6 + $0x4ec] ss:$16 sps:$4 sm:$0xff]  }
  0x89   :  { %v2879_v6 = vld [vmem:[%s4106_s6 + $0x58c] ss:$16 sps:$4 sm:$0xff]  }
  0x8b   :  { %2065 = vmatpush1.bf16.msra.mxu0 %v2814_v14  ;;  %2237 = vmatpush1.bf16.msra.mxu1 %v2817_v15  ;;  %v64_v14 = vrot.slane %v3701_v13, %v63_v5  ;;  %v2844_v15 = vld [vmem:[%s4106_s6 + $0x4e0] ss:$16 sps:$4 sm:$0xff]   ;;  %v2876_v5 = vld [vmem:[%s4106_s6 + $0x584] ss:$16 sps:$4 sm:$0xff]  }
  0x8c   :  { %2066 = vmatprep.subr.bf16.mxu0 %v2822_v16  ;;  %2238 = vmatprep.subr.bf16.mxu1 %v2825_v52  ;;  %v2847_v16 = vld [vmem:[%s4106_s6 + $0x4e8] ss:$16 sps:$4 sm:$0xff]   ;;  %v435_v52 = vpack.c.bf16 %v427_v11, %v419_v9 }
  0x8d   :  { %v89_v63 = vmul.f32 %v64_v14, %v32_v17  ;;  %v202_v28 = vmul.f32 %v186_v21, %v64_v14  ;;  %v274_v39 = vmul.f32 %v258_v30, %v64_v14  ;;  %v354_v54 = vmul.f32 %v338_v42, %v64_v14  ;;  %v2888_v21 = vld [vmem:[%s4106_s6 + $0x5c4] ss:$16 sps:$4 sm:$0xff]   ;;  %v2895_v30 = vld [vmem:[%s4106_s6 + $0x5e8] ss:$16 sps:$4 sm:$0xff]  }
  0x8e   :  { %2092 = vmatprep.mubr.bf16.mxu0 %v435_v52  ;;  %2264 = vmatprep.mubr.bf16.mxu1 %v435_v52  ;;  %v362_v56 = vmul.f32 %v346_v43, %v64_v14  ;;  %v2883_v52 = vld [vmem:[%s4106_s6 + $0x5a8] ss:$16 sps:$4 sm:$0xff]   ;;  %v2900_v43 = vld [vmem:[%s4106_s6 + $0x604] ss:$16 sps:$4 sm:$0xff]  }
  0x8f   :  { %2067 = vmatpush1.bf16.msra.mxu0 %v2820_v18  ;;  %2239 = vmatpush1.bf16.msra.mxu1 %v2823_v20  ;;  %v40_v18 = vld [vmem:[%s4108_s0 + $0x60] sm:$0xff]  ;;  %v146_v34 = vadd.f32 %v121_v24, %v89_v63  ;;  %v218_v37 = vadd.f32 %v202_v28, %v121_v24  ;;  %v2889_v63 = vld [vmem:[%s4106_s6 + $0x5c8] ss:$16 sps:$4 sm:$0xff]  }
  0x90   :  { %2068 = vmatprep.subr.bf16.mxu0 %v2828_v19  ;;  %2240 = vmatprep.subr.bf16.mxu1 %v2831_v32  ;;  %v178_v20 = vld [vmem:[%s4110_s1 + $0x20] sm:$0xff]  ;;  %v97_v0 = vmul.f32 %v64_v14, %v40_v18  ;;  %v2861_v19 = vld [vmem:[%s4106_s6 + $0x52c] ss:$16 sps:$4 sm:$0xff]   ;;  %v378_v4 = vadd.f32 %v362_v56, %v121_v24 }
  0x91   :  { %v194_v27 = vmul.f32 %v178_v20, %v64_v14  ;;  %v2856_v32 = vld [vmem:[%s4106_s6 + $0x520] ss:$16 sps:$4 sm:$0xff]   ;;  %v162_v45 = vmax.f32 %v146_v34, 0.0  ;;  %v234_v48 = vmax.f32 %v218_v37, 0.0  ;;  %v75_v20 = vsub.s32 7, %v3153_v40  ;;  %v181_v34 = vld [vmem:[%s4110_s1 + $0x38] sm:$0xff] }
  0x92   :  { %v154_v35 = vadd.f32 %v121_v24, %v97_v0  ;;  %v2894_v0 = vld [vmem:[%s4106_s6 + $0x5e4] ss:$16 sps:$4 sm:$0xff]   ;;  %v341_v42 = vld [vmem:[%s4112_s3 + $0x38] sm:$0xff] }
  0x93   :  { %2069 = vmatpush1.bf16.msra.mxu0 %v2826_v41  ;;  %2241 = vmatpush1.bf16.msra.mxu1 %v2829_v46  ;;  %v210_v36 = vadd.f32 %v194_v27, %v121_v24  ;;  %v282_v41 = vmul.f32 %v266_v31, %v64_v14  ;;  %v2882_v14 = vld [vmem:[%s4106_s6 + $0x5a4] ss:$16 sps:$4 sm:$0xff]   ;;  %v2897_v27 = vld [vmem:[%s4106_s6 + $0x5ec] ss:$16 sps:$4 sm:$0xff]   ;;  %v133_v28 = vrot.slane %v3731_v23, %v75_v20 }
  0x94   :  { %2070 = vmatprep.subr.bf16.mxu0 %v2834_v51  ;;  %2242 = vmatprep.subr.bf16.mxu1 %v2837_v53  ;;  %v170_v46 = vmax.f32 %v154_v35, 0.0  ;;  %v290_v51 = vadd.f32 %v274_v39, %v121_v24  ;;  %v35_v31 = vld [vmem:[%s4108_s0 + $0x38] sm:$0xff] }
  0x95   :  { %v226_v47 = vmax.f32 %v210_v36, 0.0  ;;  %v298_v53 = vadd.f32 %v282_v41, %v121_v24  ;;  %v189_v35 = vld [vmem:[%s4110_s1 + $0x78] sm:$0xff] }
  0x96   :  { %v250_v61 = vadd.f32 %v234_v48, %v170_v46  ;;  %v261_v39 = vld [vmem:[%s4111_s2 + $0x38] sm:$0xff] }
  0x97   :  { %2071 = vmatpush1.bf16.msra.mxu0 %v2832_v59  ;;  %2243 = vmatpush1.bf16.msra.mxu1 %v2835_v62  ;;  %v2868_v59 = vld [vmem:[%s4106_s6 + $0x560] ss:$16 sps:$4 sm:$0xff]   ;;  %v242_v60 = vadd.f32 %v226_v47, %v162_v45  ;;  %v2871_v62 = vld [vmem:[%s4106_s6 + $0x568] ss:$16 sps:$4 sm:$0xff]   ;;  %v314_v2 = vmax.f32 %v298_v53, 0.0 }
  0x98   :  { %2072 = vmatprep.subr.bf16.mxu0 %v2840_v1  ;;  %2244 = vmatprep.subr.bf16.mxu1 %v2843_v3  ;;  %v306_v1 = vmax.f32 %v290_v51, 0.0  ;;  %v370_v3 = vadd.f32 %v354_v54, %v121_v24  ;;  %v269_v41 = vld [vmem:[%s4111_s2 + $0x78] sm:$0xff]  ;;  %v2898_v54 = vld [vmem:[%s4106_s6 + $0x600] ss:$16 sps:$4 sm:$0xff]  }
  0x99   :  { %v349_v48 = vld [vmem:[%s4112_s3 + $0x78] sm:$0xff] }
  0x9a   :  { %v322_v9 = vadd.f32 %v306_v1, %v242_v60  ;;  %v386_v11 = vmax.f32 %v370_v3, 0.0  ;;  %v2901_v60 = vld [vmem:[%s4106_s6 + $0x608] ss:$16 sps:$4 sm:$0xff]   ;;  %v2906_v3 = vld [vmem:[%s4106_s6 + $0x624] ss:$16 sps:$4 sm:$0xff]  }
  0x9b   :  { %2073 = vmatpush1.bf16.msra.mxu0 %v2838_v7  ;;  %2245 = vmatpush1.bf16.msra.mxu1 %v2841_v8  ;;  %v2874_v7 = vld [vmem:[%s4106_s6 + $0x580] ss:$16 sps:$4 sm:$0xff]   ;;  %v2877_v8 = vld [vmem:[%s4106_s6 + $0x588] ss:$16 sps:$4 sm:$0xff]  }
  0x9c   :  { %2074 = vmatprep.subr.bf16.mxu0 %v2846_v10  ;;  %2246 = vmatprep.subr.bf16.mxu1 %v2849_v12  ;;  %v330_v10 = vadd.f32 %v314_v2, %v250_v61  ;;  %v394_v12 = vmax.f32 %v378_v4, 0.0  ;;  %v402_v17 = vadd.f32 %v386_v11, %v322_v9  ;;  %v2909_v4 = vld [vmem:[%s4106_s6 + $0x62c] ss:$16 sps:$4 sm:$0xff]  }
  0x9e   :  { %v410_v18 = vadd.f32 %v394_v12, %v330_v10  ;;  %v418_v24 = vmul.f32 0.25, %v402_v17  ;;  %v2904_v12 = vld [vmem:[%s4106_s6 + $0x620] ss:$16 sps:$4 sm:$0xff]   ;;  %v2915_v17 = vld [vmem:[%s4106_s6 + $0x64c] ss:$16 sps:$4 sm:$0xff]  }
  0x9f   :  { %2075 = vmatpush1.bf16.msra.mxu0 %v2844_v15  ;;  %2247 = vmatpush1.bf16.msra.mxu1 %v2847_v16  ;;  %v2885_v15 = vld [vmem:[%s4106_s6 + $0x5ac] ss:$16 sps:$4 sm:$0xff]   ;;  %v2880_v16 = vld [vmem:[%s4106_s6 + $0x5a0] ss:$16 sps:$4 sm:$0xff]  }
  0xa0   :  { %2076 = vmatprep.subr.bf16.mxu0 %v2852_v22  ;;  %2248 = vmatprep.subr.bf16.mxu1 %v2855_v55  ;;  %v2891_v22 = vld [vmem:[%s4106_s6 + $0x5cc] ss:$16 sps:$4 sm:$0xff]   ;;  %v2886_v55 = vld [vmem:[%s4106_s6 + $0x5c0] ss:$16 sps:$4 sm:$0xff]  }
  0xa3   :  { %2077 = vmatpush1.bf16.msra.mxu0 %v2850_v25  ;;  %2249 = vmatpush1.bf16.msra.mxu1 %v2853_v26  ;;  %v426_v25 = vmul.f32 0.25, %v410_v18  ;;  %v76_v26 = vrot.slane %v3701_v13, %v75_v20 }
  0xa4   :  { %2078 = vmatprep.subr.bf16.mxu0 %v2858_v29  ;;  %2250 = vmatprep.subr.bf16.mxu1 %v2861_v19  ;;  %v2892_v29 = vld [vmem:[%s4106_s6 + $0x5e0] ss:$16 sps:$4 sm:$0xff]  }
  0xa5   :  { %v434_v19 = vpack.c.bf16 %v426_v25, %v418_v24  ;;  %v197_v37 = vmul.f32 %v181_v34, %v76_v26  ;;  %v277_v46 = vmul.f32 %v261_v39, %v76_v26  ;;  %v285_v47 = vmul.f32 %v269_v41, %v76_v26  ;;  %v2918_v24 = vld [vmem:[%s4106_s6 + $0x664] ss:$16 sps:$4 sm:$0xff]   ;;  %v2921_v25 = vld [vmem:[%s4106_s6 + $0x66c] ss:$16 sps:$4 sm:$0xff]   ;;  %v2931_v34 = vld [vmem:[%s4106_s6 + $0x6a8] ss:$16 sps:$4 sm:$0xff]  }
  0xa6   :  { %v357_v53 = vmul.f32 %v341_v42, %v76_v26  ;;  %v2942_v39 = vld [vmem:[%s4106_s6 + $0x6e4] ss:$16 sps:$4 sm:$0xff]   ;;  %v2945_v41 = vld [vmem:[%s4106_s6 + $0x6ec] ss:$16 sps:$4 sm:$0xff]   ;;  %v71_v42 = vsub.s32 6, %v3153_v40 }
  0xa7   :  { %2079 = vmatpush1.bf16.msra.mxu0 %v2856_v32  ;;  %2251 = vmatpush1.bf16.msra.mxu1 %v2859_v33  ;;  %v43_v32 = vld [vmem:[%s4108_s0 + $0x78] sm:$0xff]  ;;  %v92_v33 = vmul.f32 %v76_v26, %v35_v31 }
  0xa8   :  { %2080 = vmatprep.subr.bf16.mxu0 %v2864_v38  ;;  %2252 = vmatprep.subr.bf16.mxu1 %v2867_v44  ;;  %v100_v36 = vmul.f32 %v76_v26, %v43_v32  ;;  %v205_v38 = vmul.f32 %v189_v35, %v76_v26  ;;  %v2903_v44 = vld [vmem:[%s4106_s6 + $0x60c] ss:$16 sps:$4 sm:$0xff]   ;;  %v373_v2 = vadd.f32 %v357_v53, %v133_v28  ;;  %v2925_v31 = vld [vmem:[%s4106_s6 + $0x688] ss:$16 sps:$4 sm:$0xff]   ;;  %v2936_v35 = vld [vmem:[%s4106_s6 + $0x6c4] ss:$16 sps:$4 sm:$0xff]  }
  0xa9   :  { %v149_v45 = vadd.f32 %v133_v28, %v92_v33  ;;  %v2933_v32 = vld [vmem:[%s4106_s6 + $0x6ac] ss:$16 sps:$4 sm:$0xff]   ;;  %v2928_v33 = vld [vmem:[%s4106_s6 + $0x6a0] ss:$16 sps:$4 sm:$0xff]   ;;  %v2954_v53 = vld [vmem:[%s4106_s6 + $0x724] ss:$16 sps:$4 sm:$0xff]  }
  0xaa   :  { %v221_v51 = vadd.f32 %v205_v38, %v133_v28  ;;  %v389_v10 = vmax.f32 %v373_v2, 0.0  ;;  %v2937_v38 = vld [vmem:[%s4106_s6 + $0x6c8] ss:$16 sps:$4 sm:$0xff]   ;;  %v2951_v40 = vld [vmem:[%s4106_s6 + $0x70c] ss:$16 sps:$4 sm:$0xff]  }
  0xab   :  { %2081 = vmatpush1.bf16.msra.mxu0 %v2862_v49  ;;  %2253 = vmatpush1.bf16.msra.mxu1 %v2865_v50  ;;  %v157_v49 = vadd.f32 %v133_v28, %v100_v36  ;;  %v213_v50 = vadd.f32 %v197_v37, %v133_v28  ;;  %v165_v56 = vmax.f32 %v149_v45, 0.0  ;;  %v2939_v36 = vld [vmem:[%s4106_s6 + $0x6cc] ss:$16 sps:$4 sm:$0xff]   ;;  %v2934_v37 = vld [vmem:[%s4106_s6 + $0x6c0] ss:$16 sps:$4 sm:$0xff]  }
  0xac   :  { %2082 = vmatprep.subr.bf16.mxu0 %v2870_v57  ;;  %2254 = vmatprep.subr.bf16.mxu1 %v2873_v58  ;;  %v293_v57 = vadd.f32 %v277_v46, %v133_v28  ;;  %v301_v58 = vadd.f32 %v285_v47, %v133_v28  ;;  %v237_v1 = vmax.f32 %v221_v51, 0.0  ;;  %v2948_v45 = vld [vmem:[%s4106_s6 + $0x704] ss:$16 sps:$4 sm:$0xff]   ;;  %v72_v47 = vrot.slane %v3701_v13, %v71_v42  ;;  %v2946_v51 = vld [vmem:[%s4106_s6 + $0x700] ss:$16 sps:$4 sm:$0xff]  }
  0xad   :  { %v173_v61 = vmax.f32 %v157_v49, 0.0  ;;  %v34_v46 = vld [vmem:[%s4108_s0 + $0x30] sm:$0xff]  ;;  %v2949_v13 = vld [vmem:[%s4106_s6 + $0x708] ss:$16 sps:$4 sm:$0xff]  }
  0xae   :  { %v180_v49 = vld [vmem:[%s4110_s1 + $0x30] sm:$0xff] }
  0xaf   :  { %2083 = vmatpush1.bf16.msra.mxu0 %v2868_v59  ;;  %2255 = vmatpush1.bf16.msra.mxu1 %v2871_v62  ;;  %v365_v59 = vmul.f32 %v349_v48, %v76_v26  ;;  %v229_v62 = vmax.f32 %v213_v50, 0.0  ;;  %v253_v9 = vadd.f32 %v237_v1, %v173_v61  ;;  %v42_v48 = vld [vmem:[%s4108_s0 + $0x70] sm:$0xff] }
  0xb0   :  { %2084 = vmatprep.subr.bf16.mxu0 %v2876_v5  ;;  %2256 = vmatprep.subr.bf16.mxu1 %v2879_v6  ;;  %v309_v5 = vmax.f32 %v293_v57, 0.0  ;;  %v317_v6 = vmax.f32 %v301_v58, 0.0  ;;  %v188_v50 = vld [vmem:[%s4110_s1 + $0x70] sm:$0xff]  ;;  %v91_v57 = vmul.f32 %v72_v47, %v34_v46  ;;  %v99_v58 = vmul.f32 %v72_v47, %v42_v48 }
  0xb1   :  { %v2952_v61 = vld [vmem:[%s4106_s6 + $0x720] ss:$16 sps:$4 sm:$0xff]   ;;  %v2960_v2 = vld [vmem:[%s4106_s6 + $0x744] ss:$16 sps:$4 sm:$0xff]  }
  0xb2   :  { %v260_v1 = vld [vmem:[%s4111_s2 + $0x30] sm:$0xff] }
  0xb3   :  { %2085 = vmatpush1.bf16.msra.mxu0 %v2874_v7  ;;  %2257 = vmatpush1.bf16.msra.mxu1 %v2877_v8  ;;  %v381_v7 = vadd.f32 %v365_v59, %v133_v28  ;;  %v245_v8 = vadd.f32 %v229_v62, %v165_v56  ;;  %v2924_v28 = vld [vmem:[%s4106_s6 + $0x684] ss:$16 sps:$4 sm:$0xff]   ;;  %v129_v56 = vrot.slane %v3731_v23, %v71_v42  ;;  %v2955_v62 = vld [vmem:[%s4106_s6 + $0x728] ss:$16 sps:$4 sm:$0xff]   ;;  %v2982_v46 = vld [vmem:[%s4106_s6 + $0x7c0] ss:$16 sps:$4 sm:$0xff]  }
  0xb4   :  { %2086 = vmatprep.subr.bf16.mxu0 %v2882_v14  ;;  %2258 = vmatprep.subr.bf16.mxu1 %v2885_v15  ;;  %v2907_v14 = vld [vmem:[%s4106_s6 + $0x628] ss:$16 sps:$4 sm:$0xff]   ;;  %v196_v59 = vmul.f32 %v180_v49, %v72_v47  ;;  %v268_v23 = vld [vmem:[%s4111_s2 + $0x70] sm:$0xff]  ;;  %v2993_v49 = vld [vmem:[%s4106_s6 + $0x7ec] ss:$16 sps:$4 sm:$0xff]  }
  0xb5   :  { %v397_v11 = vmax.f32 %v381_v7, 0.0  ;;  %v325_v15 = vadd.f32 %v309_v5, %v245_v8  ;;  %v156_v5 = vadd.f32 %v129_v56, %v99_v58  ;;  %v2958_v8 = vld [vmem:[%s4106_s6 + $0x740] ss:$16 sps:$4 sm:$0xff]   ;;  %v2979_v42 = vld [vmem:[%s4106_s6 + $0x7a8] ss:$16 sps:$4 sm:$0xff]  }
  0xb6   :  { %v2990_v48 = vld [vmem:[%s4106_s6 + $0x7e4] ss:$16 sps:$4 sm:$0xff]  }
  0xb7   :  { %2087 = vmatpush1.bf16.msra.mxu0 %v2880_v16  ;;  %2259 = vmatpush1.bf16.msra.mxu1 %v2883_v52  ;;  %v333_v16 = vadd.f32 %v317_v6, %v253_v9  ;;  %v2912_v52 = vld [vmem:[%s4106_s6 + $0x644] ss:$16 sps:$4 sm:$0xff]   ;;  %v405_v18 = vadd.f32 %v389_v10, %v325_v15  ;;  %v212_v6 = vadd.f32 %v196_v59, %v129_v56 }
  0xb8   :  { %2088 = vmatprep.subr.bf16.mxu0 %v2888_v21  ;;  %2260 = vmatprep.subr.bf16.mxu1 %v2891_v22  ;;  %v2910_v21 = vld [vmem:[%s4106_s6 + $0x640] ss:$16 sps:$4 sm:$0xff]   ;;  %v2913_v22 = vld [vmem:[%s4106_s6 + $0x648] ss:$16 sps:$4 sm:$0xff]   ;;  %v276_v9 = vmul.f32 %v260_v1, %v72_v47  ;;  %v284_v10 = vmul.f32 %v268_v23, %v72_v47  ;;  %v2966_v15 = vld [vmem:[%s4106_s6 + $0x764] ss:$16 sps:$4 sm:$0xff]  }
  0xb9   :  { %v413_v20 = vadd.f32 %v397_v11, %v333_v16  ;;  %v2961_v11 = vld [vmem:[%s4106_s6 + $0x748] ss:$16 sps:$4 sm:$0xff]   ;;  %v2969_v16 = vld [vmem:[%s4106_s6 + $0x76c] ss:$16 sps:$4 sm:$0xff]  }
  0xbb   :  { %2089 = vmatpush1.bf16.msra.mxu0 %v2886_v55  ;;  %2261 = vmatpush1.bf16.msra.mxu1 %v2889_v63  ;;  %v421_v55 = vmul.f32 0.25, %v405_v18  ;;  %v429_v63 = vmul.f32 0.25, %v413_v20  ;;  %v228_v18 = vmax.f32 %v212_v6, 0.0 }
  0xbc   :  { %2090 = vmatprep.subr.bf16.mxu0 %v2894_v0  ;;  %2262 = vmatprep.subr.bf16.mxu1 %v2897_v27  ;;  %v2916_v0 = vld [vmem:[%s4106_s6 + $0x660] ss:$16 sps:$4 sm:$0xff]   ;;  %v2919_v27 = vld [vmem:[%s4106_s6 + $0x668] ss:$16 sps:$4 sm:$0xff]  }
  0xbd   :  { %v437_v26 = vpack.c.bf16 %v429_v63, %v421_v55 }
  0xbf   :  { %2091 = vmatpush1.bf16.msra.mxu0 %v2892_v29  ;;  %2263 = vmatpush1.bf16.msra.mxu1 %v2895_v30  ;;  %v2927_v29 = vld [vmem:[%s4106_s6 + $0x68c] ss:$16 sps:$4 sm:$0xff]   ;;  %v2922_v30 = vld [vmem:[%s4106_s6 + $0x680] ss:$16 sps:$4 sm:$0xff]  }
  0xc0   :  { %2103 = vmatprep.subr.bf16.mxu0 %v2900_v43  ;;  %2275 = vmatprep.subr.bf16.mxu1 %v2903_v44  ;;  %v2940_v43 = vld [vmem:[%s4106_s6 + $0x6e0] ss:$16 sps:$4 sm:$0xff]   ;;  %v2943_v44 = vld [vmem:[%s4106_s6 + $0x6e8] ss:$16 sps:$4 sm:$0xff]  }
  0xc2   :  { %2093 = vmatmul.mubr.bf16.vlgmr.msra.gmra.mrb[0].mxu0 %v434_v19  ;;  %2265 = vmatmul.mubr.bf16.vlgmr.msra.gmra.mrb[0].mxu1 %v434_v19  ;;  %v2930_v19 = vld [vmem:[%s4106_s6 + $0x6a4] ss:$16 sps:$4 sm:$0xff]  }
  0xc3   :  { %2104 = vmatpush1.bf16.msra.mxu0 %v2898_v54  ;;  %2276 = vmatpush1.bf16.msra.mxu1 %v2901_v60  ;;  %v2957_v54 = vld [vmem:[%s4106_s6 + $0x72c] ss:$16 sps:$4 sm:$0xff]   ;;  %v204_v60 = vmul.f32 %v188_v50, %v72_v47 }
  0xc4   :  { %2105 = vmatprep.subr.bf16.mxu0 %v2906_v3  ;;  %2277 = vmatprep.subr.bf16.mxu1 %v2909_v4  ;;  %v2963_v3 = vld [vmem:[%s4106_s6 + $0x74c] ss:$16 sps:$4 sm:$0xff]   ;;  %v148_v4 = vadd.f32 %v129_v56, %v91_v57 }
  0xc5   :  { %2135 = vmatprep.mubr.bf16.mxu0 %v437_v26  ;;  %2307 = vmatprep.mubr.bf16.mxu1 %v437_v26  ;;  %v220_v7 = vadd.f32 %v204_v60, %v129_v56  ;;  %v2972_v26 = vld [vmem:[%s4106_s6 + $0x784] ss:$16 sps:$4 sm:$0xff]  }
  0xc7   :  { %2106 = vmatpush1.bf16.msra.mxu0 %v2904_v12  ;;  %2278 = vmatpush1.bf16.msra.mxu1 %v2907_v14  ;;  %v340_v12 = vld [vmem:[%s4112_s3 + $0x30] sm:$0xff]  ;;  %v236_v20 = vmax.f32 %v220_v7, 0.0 }
  0xc8   :  { %2107 = vmatprep.subr.bf16.mxu0 %v2912_v52  ;;  %2279 = vmatprep.subr.bf16.mxu1 %v2915_v17  ;;  %v348_v14 = vld [vmem:[%s4112_s3 + $0x70] sm:$0xff]  ;;  %v164_v52 = vmax.f32 %v148_v4, 0.0  ;;  %v172_v17 = vmax.f32 %v156_v5, 0.0  ;;  %v356_v55 = vmul.f32 %v340_v12, %v72_v47 }
  0xc9   :  { %v364_v63 = vmul.f32 %v348_v14, %v72_v47  ;;  %v2985_v47 = vld [vmem:[%s4106_s6 + $0x7c8] ss:$16 sps:$4 sm:$0xff]  }
  0xcb   :  { %2108 = vmatpush1.bf16.msra.mxu0 %v2910_v21  ;;  %2280 = vmatpush1.bf16.msra.mxu1 %v2913_v22  ;;  %v292_v21 = vadd.f32 %v276_v9, %v129_v56  ;;  %v300_v22 = vadd.f32 %v284_v10, %v129_v56 }
  0xcc   :  { %2109 = vmatprep.subr.bf16.mxu0 %v2918_v24  ;;  %2281 = vmatprep.subr.bf16.mxu1 %v2921_v25  ;;  %v2964_v24 = vld [vmem:[%s4106_s6 + $0x760] ss:$16 sps:$4 sm:$0xff]   ;;  %v2967_v25 = vld [vmem:[%s4106_s6 + $0x768] ss:$16 sps:$4 sm:$0xff]  }
  0xcf   :  { %2110 = vmatpush1.bf16.msra.mxu0 %v2916_v0  ;;  %2282 = vmatpush1.bf16.msra.mxu1 %v2919_v27  ;;  %v2975_v0 = vld [vmem:[%s4106_s6 + $0x78c] ss:$16 sps:$4 sm:$0xff]   ;;  %v244_v27 = vadd.f32 %v228_v18, %v164_v52 }
  0xd0   :  { %2111 = vmatprep.subr.bf16.mxu0 %v2924_v28  ;;  %2283 = vmatprep.subr.bf16.mxu1 %v2927_v29  ;;  %v252_v28 = vadd.f32 %v236_v20, %v172_v17  ;;  %v308_v29 = vmax.f32 %v292_v21, 0.0 }
  0xd3   :  { %2112 = vmatpush1.bf16.msra.mxu0 %v2922_v30  ;;  %2284 = vmatpush1.bf16.msra.mxu1 %v2925_v31  ;;  %v316_v30 = vmax.f32 %v300_v22, 0.0  ;;  %v372_v31 = vadd.f32 %v356_v55, %v129_v56 }
  0xd4   :  { %2113 = vmatprep.subr.bf16.mxu0 %v2930_v19  ;;  %2285 = vmatprep.subr.bf16.mxu1 %v2933_v32  ;;  %v380_v19 = vadd.f32 %v364_v63, %v129_v56  ;;  %v2970_v32 = vld [vmem:[%s4106_s6 + $0x780] ss:$16 sps:$4 sm:$0xff]  }
  0xd7   :  { %2114 = vmatpush1.bf16.msra.mxu0 %v2928_v33  ;;  %2286 = vmatpush1.bf16.msra.mxu1 %v2931_v34  ;;  %v2973_v33 = vld [vmem:[%s4106_s6 + $0x788] ss:$16 sps:$4 sm:$0xff]   ;;  %v2978_v34 = vld [vmem:[%s4106_s6 + $0x7a4] ss:$16 sps:$4 sm:$0xff]  }
  0xd8   :  { %2115 = vmatprep.subr.bf16.mxu0 %v2936_v35  ;;  %2287 = vmatprep.subr.bf16.mxu1 %v2939_v36  ;;  %v2981_v35 = vld [vmem:[%s4106_s6 + $0x7ac] ss:$16 sps:$4 sm:$0xff]   ;;  %v324_v36 = vadd.f32 %v308_v29, %v244_v27 }
  0xdb   :  { %2116 = vmatpush1.bf16.msra.mxu0 %v2934_v37  ;;  %2288 = vmatpush1.bf16.msra.mxu1 %v2937_v38  ;;  %v332_v37 = vadd.f32 %v316_v30, %v252_v28  ;;  %v388_v38 = vmax.f32 %v372_v31, 0.0 }
  0xdc   :  { %2117 = vmatprep.subr.bf16.mxu0 %v2942_v39  ;;  %2289 = vmatprep.subr.bf16.mxu1 %v2945_v41  ;;  %v396_v39 = vmax.f32 %v380_v19, 0.0  ;;  %v2976_v41 = vld [vmem:[%s4106_s6 + $0x7a0] ss:$16 sps:$4 sm:$0xff]  }
  0xdf   :  { %2118 = vmatpush1.bf16.msra.mxu0 %v2940_v43  ;;  %2290 = vmatpush1.bf16.msra.mxu1 %v2943_v44  ;;  %v2984_v43 = vld [vmem:[%s4106_s6 + $0x7c4] ss:$16 sps:$4 sm:$0xff]   ;;  %v2987_v44 = vld [vmem:[%s4106_s6 + $0x7cc] ss:$16 sps:$4 sm:$0xff]  }
  0xe0   :  { %2119 = vmatprep.subr.bf16.mxu0 %v2948_v45  ;;  %2291 = vmatprep.subr.bf16.mxu1 %v2951_v40  ;;  %v404_v45 = vadd.f32 %v388_v38, %v324_v36  ;;  %v412_v40 = vadd.f32 %v396_v39, %v332_v37 }
  0xe2   :  { %v420_v50 = vmul.f32 0.25, %v404_v45 }
  0xe3   :  { %2120 = vmatpush1.bf16.msra.mxu0 %v2946_v51  ;;  %2292 = vmatpush1.bf16.msra.mxu1 %v2949_v13  ;;  %v428_v51 = vmul.f32 0.25, %v412_v40  ;;  %v2988_v13 = vld [vmem:[%s4106_s6 + $0x7e0] ss:$16 sps:$4 sm:$0xff]  }
  0xe4   :  { %2121 = vmatprep.subr.bf16.mxu0 %v2954_v53  ;;  %2293 = vmatprep.subr.bf16.mxu1 %v2957_v54  ;;  %v2991_v53 = vld [vmem:[%s4106_s6 + $0x7e8] ss:$16 sps:$4 sm:$0xff]  }
  0xe5   :  { %v436_v54 = vpack.c.bf16 %v428_v51, %v420_v50 }
  0xe7   :  { %2122 = vmatpush1.bf16.msra.mxu0 %v2952_v61  ;;  %2294 = vmatpush1.bf16.msra.mxu1 %v2955_v62 }
  0xe8   :  { %2123 = vmatprep.subr.bf16.mxu0 %v2960_v2  ;;  %2295 = vmatprep.subr.bf16.mxu1 %v2963_v3 }
  0xeb   :  { %2124 = vmatpush1.bf16.msra.mxu0 %v2958_v8  ;;  %2296 = vmatpush1.bf16.msra.mxu1 %v2961_v11 }
  0xec   :  { %2125 = vmatprep.subr.bf16.mxu0 %v2966_v15  ;;  %2297 = vmatprep.subr.bf16.mxu1 %v2969_v16 }
  0xef   :  { %2126 = vmatpush1.bf16.msra.mxu0 %v2964_v24  ;;  %2298 = vmatpush1.bf16.msra.mxu1 %v2967_v25 }
  0xf0   :  { %2127 = vmatprep.subr.bf16.mxu0 %v2972_v26  ;;  %2299 = vmatprep.subr.bf16.mxu1 %v2975_v0 }
  0xf3   :  { %2128 = vmatpush1.bf16.msra.mxu0 %v2970_v32  ;;  %2300 = vmatpush1.bf16.msra.mxu1 %v2973_v33 }
  0xf4   :  { %2129 = vmatprep.subr.bf16.mxu0 %v2978_v34  ;;  %2301 = vmatprep.subr.bf16.mxu1 %v2981_v35 }
  0xf7   :  { %2130 = vmatpush1.bf16.msra.mxu0 %v2976_v41  ;;  %2302 = vmatpush1.bf16.msra.mxu1 %v2979_v42 }
  0xf8   :  { %2131 = vmatprep.subr.bf16.mxu0 %v2984_v43  ;;  %2303 = vmatprep.subr.bf16.mxu1 %v2987_v44 }
  0xfb   :  { %2132 = vmatpush1.bf16.msra.mxu0 %v2982_v46  ;;  %2304 = vmatpush1.bf16.msra.mxu1 %v2985_v47 }
  0xfc   :  { %2133 = vmatprep.subr.bf16.mxu0 %v2990_v48  ;;  %2305 = vmatprep.subr.bf16.mxu1 %v2993_v49 }
  0xff   :  { %2134 = vmatpush1.bf16.msra.mxu0 %v2988_v13  ;;  %2306 = vmatpush1.bf16.msra.mxu1 %v2991_v53 }
 0x102   :  { %2136 = vmatmul.mubr.bf16.vlgmr.msra.gmra.mrb[0].mxu0 %v436_v54  ;;  %2308 = vmatmul.mubr.bf16.vlgmr.msra.gmra.mrb[0].mxu1 %v436_v54 }
 0x1d5   :  { %v2137_v56 = vpop.f32.mrb[0].mxu0  ;;  %v2309_v57 = vpop.f32.mrb[0].mxu1 }
 0x1d6   :  { %2318 = vst [vmem:[%s4113_s7] sm:$0xff] %v2137_v56  ;;  %2320 = vst [vmem:[%s4113_s7 + $0x10] sm:$0xff] %v2309_v57  ;;  %v2139_v58 = vpop.f32.mrb[1].mxu0  ;;  %v2311_v59 = vpop.f32.mrb[1].mxu1 }
 0x1d7   :  { %2319 = vst [vmem:[%s4113_s7 + $0x8] sm:$0xff] %v2139_v58  ;;  %2321 = vst [vmem:[%s4113_s7 + $0x18] sm:$0xff] %v2311_v59  ;;  %v2141_v60 = vpop.f32.mrb[2].mxu0  ;;  %v2313_v61 = vpop.f32.mrb[2].mxu1 }
 0x1d8   :  { %2322 = vst [vmem:[%s4113_s7 + $0x20] sm:$0xff] %v2141_v60  ;;  %2324 = vst [vmem:[%s4113_s7 + $0x30] sm:$0xff] %v2313_v61  ;;  %v2143_v62 = vpop.f32.mrb[3].mxu0  ;;  %v2315_v1 = vpop.f32.mrb[3].mxu1 }
 0x1d9   :  { %2323 = vst [vmem:[%s4113_s7 + $0x28] sm:$0xff] %v2143_v62  ;;  %2325 = vst [vmem:[%s4113_s7 + $0x38] sm:$0xff] %v2315_v1 }

// kernel: densenet_forward.243
= control target key start
LH: loop header
LB: loop body
LE: loop exit
PB: predicated region body
PF: predicated region fallthrough
CT: control target
= control target key end

     0   :  { %v34_v27 = vlaneseq  ;;  %vm298_vm0 = vcmask 1041409   ;;  %s1419_s0 = inlined_call_operand.vmem [shape: f32[2,1,1024], index: 0, kind: input, shape index: {}]   ;;  %s1420_s1 = inlined_call_operand.vmem [shape: f32[1,1,1024], index: 1, kind: input, shape index: {}]   ;;  %s1421_s2 = inlined_call_operand.vmem [shape: f32[1,1,1024], index: 2, kind: input, shape index: {}]   ;;  %s1422_s3 = inlined_call_operand.vmem [shape: bf16[1024,128], index: 3, kind: input, shape index: {}]   ;;  %s1423_s4 = inlined_call_operand.vmem [shape: f32[1,128], index: 4, kind: input, shape index: {}]   ;;  %s1424_s5 = inlined_call_operand.hbm [shape: f32[2,128], index: 5, kind: output, shape index: {}]  }
   0x1   :  { %v1043_v0 = vld [vmem:[%s1422_s3 + $0x40] sm:$0xff]   ;;  %v1047_v4 = vld [vmem:[%s1422_s3 + $0x48] sm:$0xff]   ;;  %v1051_v8 = vld [vmem:[%s1422_s3 + $0x50] sm:$0xff]  }
   0x2   :  { %v1044_v1 = vld [vmem:[%s1422_s3 + $0xc0] sm:$0xff]   ;;  %954 = vmatprep.subr.bf16.mxu0 %v1043_v0  ;;  %v1048_v5 = vld [vmem:[%s1422_s3 + $0xc8] sm:$0xff]   ;;  %v1052_v9 = vld [vmem:[%s1422_s3 + $0xd0] sm:$0xff]   ;;  %v1255_v32 = vshrl.u32 %v34_v27, 7 }
   0x3   :  { %v1045_v2 = vld [vmem:[%s1422_s3] sm:$0xff]   ;;  %976 = vmatprep.subr.bf16.mxu1 %v1044_v1  ;;  %v1049_v6 = vld [vmem:[%s1422_s3 + $0x8] sm:$0xff]   ;;  %v1053_v10 = vld [vmem:[%s1422_s3 + $0x10] sm:$0xff]  }
   0x4   :  { %v1046_v3 = vld [vmem:[%s1422_s3 + $0x80] sm:$0xff]   ;;  %955 = vmatpush3.bf16.msra.mxu0 %v1045_v2  ;;  %v1050_v7 = vld [vmem:[%s1422_s3 + $0x88] sm:$0xff]   ;;  %v1054_v11 = vld [vmem:[%s1422_s3 + $0x90] sm:$0xff]   ;;  %v40_v40 = vsub.s32 1, %v1255_v32  ;;  %v48_v44 = vsub.s32 3, %v1255_v32  ;;  %v36_v46 = vsub.s32 0, %v1255_v32 }
   0x5   :  { %977 = vmatpush3.bf16.msra.mxu1 %v1046_v3  ;;  %956 = vmatprep.subr.bf16.mxu0 %v1047_v4  ;;  %v1055_v12 = vld [vmem:[%s1422_s3 + $0x58] sm:$0xff]   ;;  %v1059_v16 = vld [vmem:[%s1422_s3 + $0x60] sm:$0xff]   ;;  %v1063_v20 = vld [vmem:[%s1422_s3 + $0x68] sm:$0xff]   ;;  %v44_v47 = vsub.s32 2, %v1255_v32  ;;  %v56_v50 = vsub.s32 5, %v1255_v32  ;;  %v64_v51 = vsub.s32 7, %v1255_v32 }
   0x6   :  { %978 = vmatprep.subr.bf16.mxu1 %v1048_v5  ;;  %v1056_v13 = vld [vmem:[%s1422_s3 + $0xd8] sm:$0xff]   ;;  %v1060_v17 = vld [vmem:[%s1422_s3 + $0xe0] sm:$0xff]   ;;  %v1064_v21 = vld [vmem:[%s1422_s3 + $0xe8] sm:$0xff]  }
   0x7   :  { %v1057_v14 = vld [vmem:[%s1422_s3 + $0x18] sm:$0xff]   ;;  %v1061_v18 = vld [vmem:[%s1422_s3 + $0x20] sm:$0xff]   ;;  %v1065_v22 = vld [vmem:[%s1422_s3 + $0x28] sm:$0xff]  }
   0x8   :  { %957 = vmatpush3.bf16.msra.mxu0 %v1049_v6  ;;  %v1058_v15 = vld [vmem:[%s1422_s3 + $0x98] sm:$0xff]   ;;  %v1062_v19 = vld [vmem:[%s1422_s3 + $0xa0] sm:$0xff]   ;;  %v1066_v23 = vld [vmem:[%s1422_s3 + $0xa8] sm:$0xff]  }
   0x9   :  { %979 = vmatpush3.bf16.msra.mxu1 %v1050_v7  ;;  %958 = vmatprep.subr.bf16.mxu0 %v1051_v8  ;;  %v1067_v24 = vld [vmem:[%s1422_s3 + $0x70] sm:$0xff]   ;;  %v1071_v29 = vld [vmem:[%s1422_s3 + $0x78] sm:$0xff]   ;;  %v22_v34 = vld [vmem:[%s1419_s0] sm:$0xff] }
   0xa   :  { %980 = vmatprep.subr.bf16.mxu1 %v1052_v9  ;;  %v1068_v25 = vld [vmem:[%s1422_s3 + $0xf0] sm:$0xff]   ;;  %v1072_v30 = vld [vmem:[%s1422_s3 + $0xf8] sm:$0xff]   ;;  %v23_v35 = vld [vmem:[%s1419_s0 + $0x8] sm:$0xff] }
   0xb   :  { %v1069_v26 = vld [vmem:[%s1422_s3 + $0x30] sm:$0xff]   ;;  %v1073_v31 = vld [vmem:[%s1422_s3 + $0x38] sm:$0xff]   ;;  %v24_v36 = vld [vmem:[%s1420_s1] sm:$0xff] }
   0xc   :  { %959 = vmatpush3.bf16.msra.mxu0 %v1053_v10  ;;  %v1070_v28 = vld [vmem:[%s1422_s3 + $0xb0] sm:$0xff]   ;;  %v1074_v33 = vld [vmem:[%s1422_s3 + $0xb8] sm:$0xff]   ;;  %v25_v37 = vmul.f32 %v24_v36, %v22_v34  ;;  %v26_v38 = vmul.f32 %v24_v36, %v23_v35  ;;  %v27_v39 = vld [vmem:[%s1421_s2] sm:$0xff] }
   0xd   :  { %981 = vmatpush3.bf16.msra.mxu1 %v1054_v11  ;;  %960 = vmatprep.subr.bf16.mxu0 %v1055_v12  ;;  %v1075_v41 = vld [vmem:[%s1422_s3 + $0x140] sm:$0xff]   ;;  %v1080_v34 = vld [vmem:[%s1422_s3 + $0x1c8] sm:$0xff]  }
   0xe   :  { %982 = vmatprep.subr.bf16.mxu1 %v1056_v13  ;;  %v28_v42 = vadd.f32 %v27_v39, %v25_v37  ;;  %v29_v43 = vadd.f32 %v27_v39, %v26_v38  ;;  %v1076_v45 = vld [vmem:[%s1422_s3 + $0x1c0] sm:$0xff]   ;;  %v1081_v37 = vld [vmem:[%s1422_s3 + $0x108] sm:$0xff]  }
  0x10   :  { %961 = vmatpush3.bf16.msra.mxu0 %v1057_v14  ;;  %v1282_v48 = vmax.f32 %v28_v42, 0.0  ;;  %v1284_v49 = vmax.f32 %v29_v43, 0.0  ;;  %v1083_v42 = vld [vmem:[%s1422_s3 + $0x150] sm:$0xff]  }
  0x11   :  { %983 = vmatpush3.bf16.msra.mxu1 %v1058_v15  ;;  %962 = vmatprep.subr.bf16.mxu0 %v1059_v16 }
  0x12   :  { %984 = vmatprep.subr.bf16.mxu1 %v1060_v17  ;;  %v41_v52 = vrot.slane %v1282_v48, %v40_v40  ;;  %v73_v53 = vrot.slane %v1284_v49, %v40_v40  ;;  %v49_v54 = vrot.slane %v1282_v48, %v48_v44  ;;  %v81_v55 = vrot.slane %v1284_v49, %v48_v44  ;;  %v1082_v40 = vld [vmem:[%s1422_s3 + $0x188] sm:$0xff]  }
  0x13   :  { %v37_v56 = vrot.slane %v1282_v48, %v36_v46  ;;  %v69_v57 = vrot.slane %v1284_v49, %v36_v46  ;;  %v45_v58 = vrot.slane %v1282_v48, %v44_v47  ;;  %v77_v59 = vrot.slane %v1284_v49, %v44_v47  ;;  %v1085_v47 = vld [vmem:[%s1422_s3 + $0x110] sm:$0xff]  }
  0x14   :  { %963 = vmatpush3.bf16.msra.mxu0 %v1061_v18  ;;  %v115_v60 = vpack.c.bf16 %v41_v52, %v41_v52  ;;  %v123_v61 = vpack.c.bf16 %v73_v53, %v73_v53  ;;  %v117_v62 = vpack.c.bf16 %v49_v54, %v49_v54  ;;  %v125_v63 = vpack.c.bf16 %v81_v55, %v81_v55  ;;  %v1077_v18 = vld [vmem:[%s1422_s3 + $0x100] sm:$0xff]   ;;  %v1086_v52 = vld [vmem:[%s1422_s3 + $0x190] sm:$0xff]   ;;  %v1087_v54 = vld [vmem:[%s1422_s3 + $0x158] sm:$0xff]  }
  0x15   :  { %985 = vmatpush3.bf16.msra.mxu1 %v1062_v19  ;;  %964 = vmatprep.subr.bf16.mxu0 %v1063_v20  ;;  %v114_v0 = vpack.c.bf16 %v37_v56, %v37_v56  ;;  %v122_v1 = vpack.c.bf16 %v69_v57, %v69_v57  ;;  %v116_v2 = vpack.c.bf16 %v45_v58, %v45_v58  ;;  %v52_v53 = vsub.s32 4, %v1255_v32  ;;  %v1088_v57 = vld [vmem:[%s1422_s3 + $0x1d8] sm:$0xff]  }
  0x16   :  { %986 = vmatprep.subr.bf16.mxu1 %v1064_v21  ;;  %v124_v3 = vpack.c.bf16 %v77_v59, %v77_v59  ;;  %v282_v4 = vunpack.c.l.b16 %v115_v60  ;;  %v290_v5 = vunpack.c.l.b16 %v123_v61  ;;  %v284_v6 = vunpack.c.l.b16 %v117_v62  ;;  %v1089_v59 = vld [vmem:[%s1422_s3 + $0x118] sm:$0xff]  }
  0x17   :  { %v292_v7 = vunpack.c.l.b16 %v125_v63  ;;  %v281_v8 = vunpack.c.l.b16 %v114_v0  ;;  %v289_v9 = vunpack.c.l.b16 %v122_v1  ;;  %v283_v10 = vunpack.c.l.b16 %v116_v2  ;;  %v1090_v60 = vld [vmem:[%s1422_s3 + $0x198] sm:$0xff]   ;;  %v1092_v63 = vld [vmem:[%s1422_s3 + $0x1e0] sm:$0xff]  }
  0x18   :  { %965 = vmatpush3.bf16.msra.mxu0 %v1065_v22  ;;  %v291_v11 = vunpack.c.l.b16 %v124_v3  ;;  %v300_v12 = vrot.slane %v290_v5, 7  ;;  %v57_v14 = vrot.slane %v1282_v48, %v56_v50  ;;  %v89_v15 = vrot.slane %v1284_v49, %v56_v50  ;;  %v1093_v0 = vld [vmem:[%s1422_s3 + $0x120] sm:$0xff]  }
  0x19   :  { %987 = vmatpush3.bf16.msra.mxu1 %v1066_v23  ;;  %966 = vmatprep.subr.bf16.mxu0 %v1067_v24  ;;  %v304_v13 = vrot.slane %v292_v7, 7  ;;  %v297_v16 = vrot.slane %v289_v9, 7  ;;  %v65_v19 = vrot.slane %v1282_v48, %v64_v51  ;;  %v97_v20 = vrot.slane %v1284_v49, %v64_v51  ;;  %v1078_v23 = vld [vmem:[%s1422_s3 + $0x180] sm:$0xff]  }
  0x1a   :  { %988 = vmatprep.subr.bf16.mxu1 %v1068_v25  ;;  %v302_v17 = vrot.slane %v291_v11, 7  ;;  %v301_v21 = vsel %vm298_vm0, %v300_v12, %v282_v4  ;;  %v119_v24 = vpack.c.bf16 %v57_v14, %v57_v14  ;;  %v127_v25 = vpack.c.bf16 %v89_v15, %v89_v15  ;;  %v1094_v1 = vld [vmem:[%s1422_s3 + $0x1a0] sm:$0xff]  }
  0x1b   :  { %v305_v22 = vsel %vm298_vm0, %v304_v13, %v284_v6  ;;  %v121_v38 = vpack.c.bf16 %v65_v19, %v65_v19  ;;  %v129_v39 = vpack.c.bf16 %v97_v20, %v97_v20  ;;  %v60_v56 = vsub.s32 6, %v1255_v32  ;;  %v1091_v32 = vld [vmem:[%s1422_s3 + $0x160] sm:$0xff]   ;;  %v1096_v6 = vld [vmem:[%s1422_s3 + $0x1e8] sm:$0xff]  }
  0x1c   :  { %967 = vmatpush3.bf16.msra.mxu0 %v1069_v26  ;;  %v315_v26 = vpack.c.b16 %v301_v21, %v301_v21  ;;  %v317_v27 = vpack.c.b16 %v305_v22, %v305_v22  ;;  %v286_v35 = vunpack.c.l.b16 %v119_v24  ;;  %v294_v36 = vunpack.c.l.b16 %v127_v25 }
  0x1d   :  { %989 = vmatpush3.bf16.msra.mxu1 %v1070_v28  ;;  %968 = vmatprep.subr.bf16.mxu0 %v1071_v29  ;;  %v299_v28 = vsel %vm298_vm0, %v297_v16, %v281_v8  ;;  %v303_v29 = vsel %vm298_vm0, %v302_v17, %v283_v10  ;;  %v288_v43 = vunpack.c.l.b16 %v121_v38  ;;  %v296_v44 = vunpack.c.l.b16 %v129_v39 }
  0x1e   :  { %990 = vmatprep.subr.bf16.mxu1 %v1072_v30  ;;  %v1079_v30 = vld [vmem:[%s1422_s3 + $0x148] sm:$0xff]   ;;  %746 = vmatprep.mubr.bf16.mxu0 %v315_v26  ;;  %v85_v61 = vrot.slane %v1284_v49, %v52_v53  ;;  %v93_v62 = vrot.slane %v1284_v49, %v60_v56  ;;  %v53_v2 = vrot.slane %v1282_v48, %v52_v53 }
  0x1f   :  { %786 = vmatprep.mubr.bf16.mxu1 %v317_v27  ;;  %v312_v51 = vrot.slane %v296_v44, 7  ;;  %v1095_v49 = vld [vmem:[%s1422_s3 + $0x168] sm:$0xff]   ;;  %v61_v4 = vrot.slane %v1282_v48, %v60_v56 }
  0x20   :  { %969 = vmatpush3.bf16.msra.mxu0 %v1073_v31  ;;  %v314_v31 = vpack.c.b16 %v299_v28, %v299_v28  ;;  %v126_v3 = vpack.c.bf16 %v85_v61, %v85_v61  ;;  %v128_v5 = vpack.c.bf16 %v93_v62, %v93_v62 }
  0x21   :  { %991 = vmatpush3.bf16.msra.mxu1 %v1074_v33  ;;  %998 = vmatprep.subr.bf16.mxu0 %v1075_v41  ;;  %v316_v33 = vpack.c.b16 %v303_v29, %v303_v29  ;;  %v308_v41 = vrot.slane %v294_v36, 7  ;;  %v313_v55 = vsel %vm298_vm0, %v312_v51, %v288_v43 }
  0x22   :  { %1020 = vmatprep.subr.bf16.mxu1 %v1076_v45  ;;  %v1084_v45 = vld [vmem:[%s1422_s3 + $0x1d0] sm:$0xff]   ;;  %v321_v58 = vpack.c.b16 %v313_v55, %v313_v55 }
  0x23   :  { %747 = vmatmul.mubr.bf16.vlgmr.msra.gmra.mrb[0].mxu0 %v314_v31  ;;  %v309_v46 = vsel %vm298_vm0, %v308_v41, %v286_v35 }
  0x24   :  { %787 = vmatmul.mubr.bf16.vlgmr.msra.gmra.mrb[0].mxu1 %v316_v33  ;;  %999 = vmatpush3.bf16.msra.mxu0 %v1077_v18  ;;  %v319_v50 = vpack.c.b16 %v309_v46, %v309_v46 }
  0x25   :  { %1021 = vmatpush3.bf16.msra.mxu1 %v1078_v23  ;;  %1000 = vmatprep.subr.bf16.mxu0 %v1079_v30 }
  0x26   :  { %1022 = vmatprep.subr.bf16.mxu1 %v1080_v34  ;;  %826 = vmatprep.mubr.bf16.mxu0 %v319_v50 }
  0x27   :  { %866 = vmatprep.mubr.bf16.mxu1 %v321_v58 }
  0x28   :  { %1001 = vmatpush3.bf16.msra.mxu0 %v1081_v37 }
  0x29   :  { %1023 = vmatpush3.bf16.msra.mxu1 %v1082_v40  ;;  %1002 = vmatprep.subr.bf16.mxu0 %v1083_v42 }
  0x2a   :  { %1024 = vmatprep.subr.bf16.mxu1 %v1084_v45 }
  0x2c   :  { %1003 = vmatpush3.bf16.msra.mxu0 %v1085_v47 }
  0x2d   :  { %1025 = vmatpush3.bf16.msra.mxu1 %v1086_v52  ;;  %1004 = vmatprep.subr.bf16.mxu0 %v1087_v54 }
  0x2e   :  { %1026 = vmatprep.subr.bf16.mxu1 %v1088_v57 }
  0x30   :  { %1005 = vmatpush3.bf16.msra.mxu0 %v1089_v59 }
  0x31   :  { %1027 = vmatpush3.bf16.msra.mxu1 %v1090_v60  ;;  %1006 = vmatprep.subr.bf16.mxu0 %v1091_v32 }
  0x32   :  { %1028 = vmatprep.subr.bf16.mxu1 %v1092_v63 }
  0x33   :  { %10 = vsyncpa [#allocation3], 0  ;;  %v1097_v7 = vld [vmem:[%s1422_s3 + $0x128] sm:$0xff]   ;;  %v118_v9 = vpack.c.bf16 %v53_v2, %v53_v2  ;;  %v293_v48 = vunpack.c.l.b16 %v126_v3  ;;  %v120_v10 = vpack.c.bf16 %v61_v4, %v61_v4  ;;  %v295_v11 = vunpack.c.l.b16 %v128_v5  ;;  %v1099_v12 = vld [vmem:[%s1422_s3 + $0x170] sm:$0xff]  }
  0x34   :  { %1007 = vmatpush3.bf16.msra.mxu0 %v1093_v0  ;;  %v1098_v8 = vld [vmem:[%s1422_s3 + $0x1a8] sm:$0xff]   ;;  %v1100_v13 = vld [vmem:[%s1422_s3 + $0x1f0] sm:$0xff]   ;;  %v1103_v20 = vld [vmem:[%s1422_s3 + $0x178] sm:$0xff]  }
  0x35   :  { %1029 = vmatpush3.bf16.msra.mxu1 %v1094_v1  ;;  %1008 = vmatprep.subr.bf16.mxu0 %v1095_v49  ;;  %v1101_v14 = vld [vmem:[%s1422_s3 + $0x130] sm:$0xff]   ;;  %v285_v16 = vunpack.c.l.b16 %v118_v9  ;;  %v306_v17 = vrot.slane %v293_v48, 7  ;;  %v287_v18 = vunpack.c.l.b16 %v120_v10  ;;  %v310_v19 = vrot.slane %v295_v11, 7  ;;  %v1104_v21 = vld [vmem:[%s1422_s3 + $0x1f8] sm:$0xff]   ;;  %v889_v30 = vld [vmem:[%s1423_s4] ss:$0 sm:$0xff] }
  0x36   :  { %1030 = vmatprep.subr.bf16.mxu1 %v1096_v6  ;;  %v1102_v15 = vld [vmem:[%s1422_s3 + $0x1b0] sm:$0xff]   ;;  %v1105_v22 = vld [vmem:[%s1422_s3 + $0x138] sm:$0xff]  }
  0x37   :  { %v1106_v23 = vld [vmem:[%s1422_s3 + $0x1b8] sm:$0xff]   ;;  %v307_v24 = vsel %vm298_vm0, %v306_v17, %v285_v16  ;;  %v311_v25 = vsel %vm298_vm0, %v310_v19, %v287_v18  ;;  %s1131_s3 = smov [#allocation2]  }
  0x38   :  { %1009 = vmatpush3.bf16.msra.mxu0 %v1097_v7  ;;  %v318_v26 = vpack.c.b16 %v307_v24, %v307_v24  ;;  %v320_v27 = vpack.c.b16 %v311_v25, %v311_v25  ;;  %s881_s4 = sshll.u32 %s1131_s3, 4  ;;  %s882_s4 = int_to_ptr.vmem [resolvable:$true] %s881_s4 }
  0x39   :  { %1031 = vmatpush3.bf16.msra.mxu1 %v1098_v8  ;;  %1010 = vmatprep.subr.bf16.mxu0 %v1099_v12  ;;  %s1107_s22 = scalar_lea.vmem %s882_s4, 32  ;;  %p1112_p1 = scmp.lt.s32.totalorder %s882_s4, %s882_s4 }
  0x3a   :  { %1032 = vmatprep.subr.bf16.mxu1 %v1100_v13  ;;  %p1108_p0 = scmp.ne.s32.totalorder %s882_s4, %s1107_s22  ;;  %p1113_p2 = scmp.lt.s32.totalorder %s1107_s22, %s1107_s22 }
  0x3c   :  { %1011 = vmatpush3.bf16.msra.mxu0 %v1101_v14  ;;  %p1114_p3 = por %p1113_p2, %p1112_p1 }
  0x3d   :  { %1033 = vmatpush3.bf16.msra.mxu1 %v1102_v15  ;;  %1012 = vmatprep.subr.bf16.mxu0 %v1103_v20 }
  0x3e   :  { %1034 = vmatprep.subr.bf16.mxu1 %v1104_v21  ;;  %p1115_p4 = pnand %p1114_p3, %p1108_p0 }
  0x40   :  { %1013 = vmatpush3.bf16.msra.mxu0 %v1105_v22 }
  0x41   :  { %1035 = vmatpush3.bf16.msra.mxu1 %v1106_v23 }
  0x43   :  { %827 = vmatmul.mubr.bf16.vlgmr.msra.gmra.mrb[4].mxu0 %v318_v26 }
  0x44   :  { %867 = vmatmul.mubr.bf16.vlgmr.msra.gmra.mrb[4].mxu1 %v320_v27 }
  0xf6   :  { %v970_v28 = vpop.f32.mrb[0].mxu0 }
  0xf7   :  { %v992_v29 = vpop.f32.mrb[0].mxu1  ;;  %v971_v31 = vpop.f32.mrb[1].mxu0 }
  0xf8   :  { %v993_v33 = vpop.f32.mrb[1].mxu1  ;;  %v972_v34 = vadd.f32 %v971_v31, %v970_v28  ;;  %v973_v36 = vpop.f32.mrb[2].mxu0 }
  0xf9   :  { %v994_v35 = vadd.f32 %v993_v33, %v992_v29  ;;  %v995_v37 = vpop.f32.mrb[2].mxu1  ;;  %v974_v38 = vpop.f32.mrb[3].mxu0 }
  0xfa   :  { %v996_v39 = vpop.f32.mrb[3].mxu1  ;;  %v749_v40 = vadd.f32 %v972_v34, %v889_v30 }
  0xfc   :  { %v789_v41 = vadd.f32 %v994_v35, %v749_v40 }
 0x116   :  { %v1014_v42 = vpop.f32.mrb[4].mxu0 }
 0x117   :  { %v1036_v43 = vpop.f32.mrb[4].mxu1  ;;  %v1015_v44 = vpop.f32.mrb[5].mxu0 }
 0x118   :  { %v1037_v45 = vpop.f32.mrb[5].mxu1  ;;  %v1016_v46 = vadd.f32 %v1015_v44, %v1014_v42  ;;  %v1017_v50 = vpop.f32.mrb[6].mxu0 }
 0x119   :  { %v1038_v47 = vadd.f32 %v1037_v45, %v1036_v43  ;;  %v1039_v51 = vpop.f32.mrb[6].mxu1  ;;  %v1018_v52 = vpop.f32.mrb[7].mxu0 }
 0x11a   :  { %v1040_v53 = vpop.f32.mrb[7].mxu1  ;;  %v829_v54 = vadd.f32 %v1016_v46, %v789_v41 }
 0x11c   :  { %v869_v55 = vadd.f32 %v1038_v47, %v829_v54 }
 0x11e   :  { %874 = vst [vmem:[#allocation2] sm:$0x3] %v869_v55 }
 0x11f   :  { %1118 = shalt.err (!%p1115_p4)
}
 0x120   :  { %s1119_s25 = scalar_lea.hbm %s1424_s5, 32 }
 0x121   :  { %p1120_p5 = scmp.ne.s32.totalorder %s1424_s5, %s1119_s25  ;;  %p1123_p6 = scmp.lt.u32.totalorder %s1119_s25, %s1424_s5 }
 0x123   :  { %p1125_p7 = pnand %p1123_p6, %p1120_p5 }
 0x125   :  { %1128 = shalt.err (!%p1125_p7)
}
 0x126   :  { %884 = dma.vmem_to_hbm [thread:$0]  %s882_s4, 32, %s1424_s5, [#allocation3]  }
 0x127   :  { %1129 = dma.done.wait [#allocation3], 32  }
 0x128   :  { %1130 = vsyncadd [#allocation3], 4294967264 }
 0x129   :  { %888 = vsyncpa [#allocation3], 1 }

</bundles_post_ra>
